<compile_context>
chip_gen: v6e
topology: v6e:2x2x1
jax: 0.10.0
libtpu: 0.0.40
codegen_flags: <defaults>
</compile_context>

<pallas_src>
import functools

import jax
import jax.numpy as jnp
from jax import lax
from jax.experimental import pallas as pl
from jax.experimental.pallas import tpu as pltpu

INPUT_SIZE = 10
HIDDEN_SIZE = 64
HP = 128                 # lane-padded hidden size (one full vreg lane width)
NUM_LAYERS = 2           # hard-wired: layer0 + layer1
FC1_SIZE = 32
BN_EPS = 1e-5
LEAKY_SLOPE = 0.01       # torch F.leaky_relu default


def _lstm_predictor_kernel(
    x_ref,        # (T*B, F)     time-major input, flattened
    wih0_ref,     # (F, 4*HP)    layer-0 input weights (gate-col padded)
    whh0_ref,     # (HP, 4*HP)   layer-0 recurrent weights (row+col padded)
    b0_ref,       # (1, 4*HP)    layer-0 combined bias
    w1f_ref,      # (2*HP, 4*HP) layer-1 fused [wih1; whh1]
    b1_ref,       # (1, 4*HP)    layer-1 combined bias
    wfc1_ref,     # (HP, 32)     fc1 weights with BatchNorm folded in
    bfc1_ref,     # (1, 32)
    wfc2_ref,     # (32, 1)
    bfc2_ref,     # (1, 1)
    out_ref,      # (B, 1)
    *, T, B,
):
    # Hoisted layer-0 input projection: one well-shaped matmul for all steps.
    xp = (
        jnp.dot(x_ref[...], wih0_ref[...], preferred_element_type=jnp.float32)
        + b0_ref[...]
    )                                                      # (T*B, 4*HP)

    whh0 = whh0_ref[...]
    w1f = w1f_ref[...]
    b1b = jnp.broadcast_to(b1_ref[...], (B, 4 * HP))       # hoisted broadcast

    def gates_to_state(gates, c):
        # Lane-aligned gate slices (each block is exactly one 128-lane group).
        i = jax.nn.sigmoid(gates[:, 0 * HP:1 * HP])
        f = jax.nn.sigmoid(gates[:, 1 * HP:2 * HP])
        g = jnp.tanh(gates[:, 2 * HP:3 * HP])
        o = jax.nn.sigmoid(gates[:, 3 * HP:4 * HP])
        c_new = f * c + i * g
        h_new = o * jnp.tanh(c_new)
        return h_new, c_new

    zeros = jnp.zeros((B, HP), jnp.float32)
    h0, c0, h1, c1 = zeros, zeros, zeros, zeros

    # Fully unrolled recurrence (T is small and static).
    for t in range(T):
        g0 = xp[t * B:(t + 1) * B, :] + jnp.dot(
            h0, whh0, preferred_element_type=jnp.float32)
        h0, c0 = gates_to_state(g0, c0)
        # TODO(synk): inter-layer dropout (p=0.2) is identity in eval mode.
        hcat = jnp.concatenate([h0, h1], axis=1)            # (B, 2*HP)
        g1 = jnp.dot(hcat, w1f, preferred_element_type=jnp.float32) + b1b
        h1, c1 = gates_to_state(g1, c1)

    # out = lstm_out[:, -1, :] == h1 (padded lanes are exactly zero).
    # BatchNorm (eval, B>1) is folded into wfc1/bfc1; dropout is identity.
    z = jnp.dot(h1, wfc1_ref[...], preferred_element_type=jnp.float32) + bfc1_ref[...]
    z = jnp.where(z > 0, z, LEAKY_SLOPE * z)                # leaky_relu
    y = jnp.dot(z, wfc2_ref[...], preferred_element_type=jnp.float32) + bfc2_ref[...]
    out_ref[...] = y.astype(out_ref.dtype)


def _pad_gate_cols(w, h=HIDDEN_SIZE, hp=HP):
    """(rows, 4*h) -> (rows, 4*hp): zero-pad each gate's column block to hp."""
    rows = w.shape[0]
    w4 = w.reshape(rows, 4, h)
    w4 = jnp.pad(w4, ((0, 0), (0, 0), (0, hp - h)))
    return w4.reshape(rows, 4 * hp)


def _pad_rows(w, rows_to):
    return jnp.pad(w, ((0, rows_to - w.shape[0]), (0, 0)))


def init_params(key, input_size=INPUT_SIZE, hidden_size=HIDDEN_SIZE):
    """Deterministic synthetic parameters with the nn.Module's shapes."""
    ks = jax.random.split(key, 12)
    H, F = hidden_size, input_size
    s = 0.1
    return {
        # LSTM layer 0
        "w_ih0": jax.random.normal(ks[0], (4 * H, F), jnp.float32) * s,
        "w_hh0": jax.random.normal(ks[1], (4 * H, H), jnp.float32) * s,
        "b_ih0": jax.random.normal(ks[2], (4 * H,), jnp.float32) * s,
        "b_hh0": jax.random.normal(ks[3], (4 * H,), jnp.float32) * s,
        # LSTM layer 1
        "w_ih1": jax.random.normal(ks[4], (4 * H, H), jnp.float32) * s,
        "w_hh1": jax.random.normal(ks[5], (4 * H, H), jnp.float32) * s,
        "b_ih1": jax.random.normal(ks[6], (4 * H,), jnp.float32) * s,
        "b_hh1": jax.random.normal(ks[7], (4 * H,), jnp.float32) * s,
        # BatchNorm1d(hidden): PyTorch-default running stats, random affine
        "bn_gamma": jax.random.normal(ks[8], (H,), jnp.float32) * s + 1.0,
        "bn_beta": jax.random.normal(ks[9], (H,), jnp.float32) * s,
        "bn_mean": jnp.zeros((H,), jnp.float32),
        "bn_var": jnp.ones((H,), jnp.float32),
        # fc1, fc2
        "fc1_w": jax.random.normal(ks[10], (FC1_SIZE, H), jnp.float32) * s,
        "fc1_b": jnp.zeros((FC1_SIZE,), jnp.float32),
        "fc2_w": jax.random.normal(ks[11], (1, FC1_SIZE), jnp.float32) * s,
        "fc2_b": jnp.zeros((1,), jnp.float32),
    }


@jax.jit
def lstm_price_predictor(x, params):
    """x: (B, T, F) float32 -> (B, 1) float32 (eval-mode forward)."""
    B, T, F = x.shape
    H = HIDDEN_SIZE

    # ---- constant folding / re-layout (traced once under jit) ----
    # layer 0
    wih0 = _pad_gate_cols(params["w_ih0"].T)                        # (F, 4HP)
    whh0 = _pad_rows(_pad_gate_cols(params["w_hh0"].T), HP)         # (HP, 4HP)
    b0 = _pad_gate_cols((params["b_ih0"] + params["b_hh0"]).reshape(1, 4 * H))
    # layer 1: fuse input/recurrent weights along K for the [h0, h1] concat
    wih1 = _pad_rows(_pad_gate_cols(params["w_ih1"].T), HP)         # (HP, 4HP)
    whh1 = _pad_rows(_pad_gate_cols(params["w_hh1"].T), HP)         # (HP, 4HP)
    w1f = jnp.concatenate([wih1, whh1], axis=0)                     # (2HP, 4HP)
    b1 = _pad_gate_cols((params["b_ih1"] + params["b_hh1"]).reshape(1, 4 * H))

    # Fold eval-mode BatchNorm1d into fc1.  PyTorch only applies BN when the
    # batch is > 1; B is a static shape here so mirror that branch exactly.
    if B > 1:
        scale = params["bn_gamma"] * lax.rsqrt(params["bn_var"] + BN_EPS)
        shift = params["bn_beta"] - params["bn_mean"] * scale
    else:
        scale = jnp.ones((H,), jnp.float32)
        shift = jnp.zeros((H,), jnp.float32)
    wfc1 = _pad_rows((params["fc1_w"] * scale[None, :]).T, HP)      # (HP, 32)
    bfc1 = (shift @ params["fc1_w"].T + params["fc1_b"]).reshape(1, FC1_SIZE)
    wfc2 = params["fc2_w"].T                                        # (32, 1)
    bfc2 = params["fc2_b"].reshape(1, 1)

    # time-major + flatten so the hoisted input projection is one matmul with
    # contiguous per-timestep row blocks.
    x2d = jnp.transpose(x, (1, 0, 2)).reshape(T * B, F)

    operands = [x2d, wih0, whh0, b0, w1f, b1, wfc1, bfc1, wfc2, bfc2]
    vmem = pl.BlockSpec(memory_space=pltpu.MemorySpace.VMEM)
    kernel = functools.partial(_lstm_predictor_kernel, T=T, B=B)
    return pl.pallas_call(
        kernel,
        out_shape=jax.ShapeDtypeStruct((B, 1), jnp.float32),
        in_specs=[vmem] * len(operands),
        out_specs=vmem,
    )(*operands)


def _reference(x, p):
    """Pure-JAX reference of the same eval-mode forward (unpadded H=64)."""
    B, T, F = x.shape
    H = p["w_hh0"].shape[1]

    def cell(x_t, h, c, wih, whh, b):
        g = x_t @ wih.T + h @ whh.T + b
        i = jax.nn.sigmoid(g[:, :H])
        f = jax.nn.sigmoid(g[:, H:2 * H])
        gg = jnp.tanh(g[:, 2 * H:3 * H])
        o = jax.nn.sigmoid(g[:, 3 * H:])
        c = f * c + i * gg
        return o * jnp.tanh(c), c

    h0 = c0 = h1 = c1 = jnp.zeros((B, H), jnp.float32)
    for t in range(T):
        h0, c0 = cell(x[:, t, :], h0, c0, p["w_ih0"], p["w_hh0"],
                      p["b_ih0"] + p["b_hh0"])
        h1, c1 = cell(h0, h1, c1, p["w_ih1"], p["w_hh1"],
                      p["b_ih1"] + p["b_hh1"])
    out = h1
    if B > 1:
        out = (out - p["bn_mean"]) / jnp.sqrt(p["bn_var"] + BN_EPS)
        out = out * p["bn_gamma"] + p["bn_beta"]
    z = out @ p["fc1_w"].T + p["fc1_b"]
    z = jnp.where(z > 0, z, LEAKY_SLOPE * z)
    return z @ p["fc2_w"].T + p["fc2_b"]


if __name__ == "__main__":
    key = jax.random.PRNGKey(0)
    k_x, k_p = jax.random.split(key)

    B, T = 2, 8
    x = jax.random.normal(k_x, (B, T, INPUT_SIZE), jnp.float32)
    params = init_params(k_p)

    y = lstm_price_predictor(x, params)
    y = jax.block_until_ready(y)

    y_ref = _reference(x, params)
    assert y.shape == (B, 1), y.shape
    assert jnp.allclose(y, y_ref, rtol=1e-4, atol=1e-4), (y, y_ref)

    print("KERNEL_OK")
</pallas_src>

<mosaic_0001>
module attributes {stable_mosaic.version = 11 : i64} {
  func.func @_lstm_predictor_kernel(%arg0: memref<16x10xf32, #tpu.memory_space<vmem>>, %arg1: memref<10x512xf32, #tpu.memory_space<vmem>>, %arg2: memref<128x512xf32, #tpu.memory_space<vmem>>, %arg3: memref<1x512xf32, #tpu.memory_space<vmem>>, %arg4: memref<256x512xf32, #tpu.memory_space<vmem>>, %arg5: memref<1x512xf32, #tpu.memory_space<vmem>>, %arg6: memref<128x32xf32, #tpu.memory_space<vmem>>, %arg7: memref<1x32xf32, #tpu.memory_space<vmem>>, %arg8: memref<32x1xf32, #tpu.memory_space<vmem>>, %arg9: memref<1x1xf32, #tpu.memory_space<vmem>>, %arg10: memref<2x1xf32, #tpu.memory_space<vmem>>) attributes {dimension_semantics = [], scalar_prefetch = 0 : i64, scratch_operands = 0 : i64, tpu.core_type = #tpu.core_type<tc>} {
    %c0 = arith.constant 0 : index
    %c0_0 = arith.constant 0 : index
    %0 = vector.load %arg0[%c0, %c0_0] : memref<16x10xf32, #tpu.memory_space<vmem>>, vector<16x10xf32>
    %c0_1 = arith.constant 0 : index
    %c0_2 = arith.constant 0 : index
    %1 = vector.load %arg1[%c0_1, %c0_2] : memref<10x512xf32, #tpu.memory_space<vmem>>, vector<10x512xf32>
    %cst = arith.constant dense<0.000000e+00> : vector<16x512xf32>
    %2 = tpu.matmul %0, %1, %cst {dimension_numbers = #tpu.dot_dimension_numbers<[1], [0], [0], [1], [0, 0, 1, 1], [], []>} : vector<16x10xf32>, vector<10x512xf32>, vector<16x512xf32> -> vector<16x512xf32>
    %c0_3 = arith.constant 0 : index
    %c0_4 = arith.constant 0 : index
    %3 = vector.load %arg3[%c0_3, %c0_4] : memref<1x512xf32, #tpu.memory_space<vmem>>, vector<1x512xf32>
    %4 = vector.broadcast %3 : vector<1x512xf32> to vector<16x512xf32>
    %5 = arith.addf %2, %4 : vector<16x512xf32>
    %c0_5 = arith.constant 0 : index
    %c0_6 = arith.constant 0 : index
    %6 = vector.load %arg2[%c0_5, %c0_6] : memref<128x512xf32, #tpu.memory_space<vmem>>, vector<128x512xf32>
    %c0_7 = arith.constant 0 : index
    %c0_8 = arith.constant 0 : index
    %7 = vector.load %arg4[%c0_7, %c0_8] : memref<256x512xf32, #tpu.memory_space<vmem>>, vector<256x512xf32>
    %c0_9 = arith.constant 0 : index
    %c0_10 = arith.constant 0 : index
    %8 = vector.load %arg5[%c0_9, %c0_10] : memref<1x512xf32, #tpu.memory_space<vmem>>, vector<1x512xf32>
    %9 = vector.shape_cast %8 : vector<1x512xf32> to vector<1x512xf32>
    %10 = vector.broadcast %9 : vector<1x512xf32> to vector<2x512xf32>
    %cst_11 = arith.constant 0.000000e+00 : f32
    %11 = vector.broadcast %cst_11 : f32 to vector<2x128xf32>
    %12 = vector.extract_strided_slice %5 {offsets = [0, 0], sizes = [2, 512], strides = [1, 1]} : vector<16x512xf32> to vector<2x512xf32>
    %cst_12 = arith.constant dense<0.000000e+00> : vector<2x512xf32>
    %13 = tpu.matmul %11, %6, %cst_12 {dimension_numbers = #tpu.dot_dimension_numbers<[1], [0], [0], [1], [0, 0, 1, 1], [], []>} : vector<2x128xf32>, vector<128x512xf32>, vector<2x512xf32> -> vector<2x512xf32>
    %14 = arith.addf %12, %13 : vector<2x512xf32>
    %15 = vector.extract_strided_slice %14 {offsets = [0, 0], sizes = [2, 128], strides = [1, 1]} : vector<2x512xf32> to vector<2x128xf32>
    %16 = arith.negf %15 : vector<2x128xf32>
    %17 = math.exp %16 : vector<2x128xf32>
    %cst_13 = arith.constant 1.000000e+00 : f32
    %18 = vector.broadcast %cst_13 : f32 to vector<2x128xf32>
    %19 = arith.addf %18, %17 : vector<2x128xf32>
    %20 = arith.divf %18, %19 : vector<2x128xf32>
    %21 = vector.extract_strided_slice %14 {offsets = [0, 128], sizes = [2, 128], strides = [1, 1]} : vector<2x512xf32> to vector<2x128xf32>
    %22 = arith.negf %21 : vector<2x128xf32>
    %23 = math.exp %22 : vector<2x128xf32>
    %cst_14 = arith.constant 1.000000e+00 : f32
    %24 = vector.broadcast %cst_14 : f32 to vector<2x128xf32>
    %25 = arith.addf %24, %23 : vector<2x128xf32>
    %26 = arith.divf %24, %25 : vector<2x128xf32>
    %27 = vector.extract_strided_slice %14 {offsets = [0, 256], sizes = [2, 128], strides = [1, 1]} : vector<2x512xf32> to vector<2x128xf32>
    %28 = math.tanh %27 : vector<2x128xf32>
    %29 = vector.extract_strided_slice %14 {offsets = [0, 384], sizes = [2, 128], strides = [1, 1]} : vector<2x512xf32> to vector<2x128xf32>
    %30 = arith.negf %29 : vector<2x128xf32>
    %31 = math.exp %30 : vector<2x128xf32>
    %cst_15 = arith.constant 1.000000e+00 : f32
    %32 = vector.broadcast %cst_15 : f32 to vector<2x128xf32>
    %33 = arith.addf %32, %31 : vector<2x128xf32>
    %34 = arith.divf %32, %33 : vector<2x128xf32>
    %35 = arith.mulf %26, %11 : vector<2x128xf32>
    %36 = arith.mulf %20, %28 : vector<2x128xf32>
    %37 = arith.addf %35, %36 : vector<2x128xf32>
    %38 = math.tanh %37 : vector<2x128xf32>
    %39 = arith.mulf %34, %38 : vector<2x128xf32>
    %40 = tpu.concatenate %39, %11 in 1 : vector<2x128xf32>, vector<2x128xf32> -> vector<2x256xf32>
    %cst_16 = arith.constant dense<0.000000e+00> : vector<2x512xf32>
    %41 = tpu.matmul %40, %7, %cst_16 {dimension_numbers = #tpu.dot_dimension_numbers<[1], [0], [0], [1], [0, 0, 1, 1], [], []>} : vector<2x256xf32>, vector<256x512xf32>, vector<2x512xf32> -> vector<2x512xf32>
    %42 = arith.addf %41, %10 : vector<2x512xf32>
    %43 = vector.extract_strided_slice %42 {offsets = [0, 0], sizes = [2, 128], strides = [1, 1]} : vector<2x512xf32> to vector<2x128xf32>
    %44 = arith.negf %43 : vector<2x128xf32>
    %45 = math.exp %44 : vector<2x128xf32>
    %cst_17 = arith.constant 1.000000e+00 : f32
    %46 = vector.broadcast %cst_17 : f32 to vector<2x128xf32>
    %47 = arith.addf %46, %45 : vector<2x128xf32>
    %48 = arith.divf %46, %47 : vector<2x128xf32>
    %49 = vector.extract_strided_slice %42 {offsets = [0, 128], sizes = [2, 128], strides = [1, 1]} : vector<2x512xf32> to vector<2x128xf32>
    %50 = arith.negf %49 : vector<2x128xf32>
    %51 = math.exp %50 : vector<2x128xf32>
    %cst_18 = arith.constant 1.000000e+00 : f32
    %52 = vector.broadcast %cst_18 : f32 to vector<2x128xf32>
    %53 = arith.addf %52, %51 : vector<2x128xf32>
    %54 = arith.divf %52, %53 : vector<2x128xf32>
    %55 = vector.extract_strided_slice %42 {offsets = [0, 256], sizes = [2, 128], strides = [1, 1]} : vector<2x512xf32> to vector<2x128xf32>
    %56 = math.tanh %55 : vector<2x128xf32>
    %57 = vector.extract_strided_slice %42 {offsets = [0, 384], sizes = [2, 128], strides = [1, 1]} : vector<2x512xf32> to vector<2x128xf32>
    %58 = arith.negf %57 : vector<2x128xf32>
    %59 = math.exp %58 : vector<2x128xf32>
    %cst_19 = arith.constant 1.000000e+00 : f32
    %60 = vector.broadcast %cst_19 : f32 to vector<2x128xf32>
    %61 = arith.addf %60, %59 : vector<2x128xf32>
    %62 = arith.divf %60, %61 : vector<2x128xf32>
    %63 = arith.mulf %54, %11 : vector<2x128xf32>
    %64 = arith.mulf %48, %56 : vector<2x128xf32>
    %65 = arith.addf %63, %64 : vector<2x128xf32>
    %66 = math.tanh %65 : vector<2x128xf32>
    %67 = arith.mulf %62, %66 : vector<2x128xf32>
    %68 = vector.extract_strided_slice %5 {offsets = [2, 0], sizes = [2, 512], strides = [1, 1]} : vector<16x512xf32> to vector<2x512xf32>
    %cst_20 = arith.constant dense<0.000000e+00> : vector<2x512xf32>
    %69 = tpu.matmul %39, %6, %cst_20 {dimension_numbers = #tpu.dot_dimension_numbers<[1], [0], [0], [1], [0, 0, 1, 1], [], []>} : vector<2x128xf32>, vector<128x512xf32>, vector<2x512xf32> -> vector<2x512xf32>
    %70 = arith.addf %68, %69 : vector<2x512xf32>
    %71 = vector.extract_strided_slice %70 {offsets = [0, 0], sizes = [2, 128], strides = [1, 1]} : vector<2x512xf32> to vector<2x128xf32>
    %72 = arith.negf %71 : vector<2x128xf32>
    %73 = math.exp %72 : vector<2x128xf32>
    %cst_21 = arith.constant 1.000000e+00 : f32
    %74 = vector.broadcast %cst_21 : f32 to vector<2x128xf32>
    %75 = arith.addf %74, %73 : vector<2x128xf32>
    %76 = arith.divf %74, %75 : vector<2x128xf32>
    %77 = vector.extract_strided_slice %70 {offsets = [0, 128], sizes = [2, 128], strides = [1, 1]} : vector<2x512xf32> to vector<2x128xf32>
    %78 = arith.negf %77 : vector<2x128xf32>
    %79 = math.exp %78 : vector<2x128xf32>
    %cst_22 = arith.constant 1.000000e+00 : f32
    %80 = vector.broadcast %cst_22 : f32 to vector<2x128xf32>
    %81 = arith.addf %80, %79 : vector<2x128xf32>
    %82 = arith.divf %80, %81 : vector<2x128xf32>
    %83 = vector.extract_strided_slice %70 {offsets = [0, 256], sizes = [2, 128], strides = [1, 1]} : vector<2x512xf32> to vector<2x128xf32>
    %84 = math.tanh %83 : vector<2x128xf32>
    %85 = vector.extract_strided_slice %70 {offsets = [0, 384], sizes = [2, 128], strides = [1, 1]} : vector<2x512xf32> to vector<2x128xf32>
    %86 = arith.negf %85 : vector<2x128xf32>
    %87 = math.exp %86 : vector<2x128xf32>
    %cst_23 = arith.constant 1.000000e+00 : f32
    %88 = vector.broadcast %cst_23 : f32 to vector<2x128xf32>
    %89 = arith.addf %88, %87 : vector<2x128xf32>
    %90 = arith.divf %88, %89 : vector<2x128xf32>
    %91 = arith.mulf %82, %37 : vector<2x128xf32>
    %92 = arith.mulf %76, %84 : vector<2x128xf32>
    %93 = arith.addf %91, %92 : vector<2x128xf32>
    %94 = math.tanh %93 : vector<2x128xf32>
    %95 = arith.mulf %90, %94 : vector<2x128xf32>
    %96 = tpu.concatenate %95, %67 in 1 : vector<2x128xf32>, vector<2x128xf32> -> vector<2x256xf32>
    %cst_24 = arith.constant dense<0.000000e+00> : vector<2x512xf32>
    %97 = tpu.matmul %96, %7, %cst_24 {dimension_numbers = #tpu.dot_dimension_numbers<[1], [0], [0], [1], [0, 0, 1, 1], [], []>} : vector<2x256xf32>, vector<256x512xf32>, vector<2x512xf32> -> vector<2x512xf32>
    %98 = arith.addf %97, %10 : vector<2x512xf32>
    %99 = vector.extract_strided_slice %98 {offsets = [0, 0], sizes = [2, 128], strides = [1, 1]} : vector<2x512xf32> to vector<2x128xf32>
    %100 = arith.negf %99 : vector<2x128xf32>
    %101 = math.exp %100 : vector<2x128xf32>
    %cst_25 = arith.constant 1.000000e+00 : f32
    %102 = vector.broadcast %cst_25 : f32 to vector<2x128xf32>
    %103 = arith.addf %102, %101 : vector<2x128xf32>
    %104 = arith.divf %102, %103 : vector<2x128xf32>
    %105 = vector.extract_strided_slice %98 {offsets = [0, 128], sizes = [2, 128], strides = [1, 1]} : vector<2x512xf32> to vector<2x128xf32>
    %106 = arith.negf %105 : vector<2x128xf32>
    %107 = math.exp %106 : vector<2x128xf32>
    %cst_26 = arith.constant 1.000000e+00 : f32
    %108 = vector.broadcast %cst_26 : f32 to vector<2x128xf32>
    %109 = arith.addf %108, %107 : vector<2x128xf32>
    %110 = arith.divf %108, %109 : vector<2x128xf32>
    %111 = vector.extract_strided_slice %98 {offsets = [0, 256], sizes = [2, 128], strides = [1, 1]} : vector<2x512xf32> to vector<2x128xf32>
    %112 = math.tanh %111 : vector<2x128xf32>
    %113 = vector.extract_strided_slice %98 {offsets = [0, 384], sizes = [2, 128], strides = [1, 1]} : vector<2x512xf32> to vector<2x128xf32>
    %114 = arith.negf %113 : vector<2x128xf32>
    %115 = math.exp %114 : vector<2x128xf32>
    %cst_27 = arith.constant 1.000000e+00 : f32
    %116 = vector.broadcast %cst_27 : f32 to vector<2x128xf32>
    %117 = arith.addf %116, %115 : vector<2x128xf32>
    %118 = arith.divf %116, %117 : vector<2x128xf32>
    %119 = arith.mulf %110, %65 : vector<2x128xf32>
    %120 = arith.mulf %104, %112 : vector<2x128xf32>
    %121 = arith.addf %119, %120 : vector<2x128xf32>
    %122 = math.tanh %121 : vector<2x128xf32>
    %123 = arith.mulf %118, %122 : vector<2x128xf32>
    %124 = vector.extract_strided_slice %5 {offsets = [4, 0], sizes = [2, 512], strides = [1, 1]} : vector<16x512xf32> to vector<2x512xf32>
    %cst_28 = arith.constant dense<0.000000e+00> : vector<2x512xf32>
    %125 = tpu.matmul %95, %6, %cst_28 {dimension_numbers = #tpu.dot_dimension_numbers<[1], [0], [0], [1], [0, 0, 1, 1], [], []>} : vector<2x128xf32>, vector<128x512xf32>, vector<2x512xf32> -> vector<2x512xf32>
    %126 = arith.addf %124, %125 : vector<2x512xf32>
    %127 = vector.extract_strided_slice %126 {offsets = [0, 0], sizes = [2, 128], strides = [1, 1]} : vector<2x512xf32> to vector<2x128xf32>
    %128 = arith.negf %127 : vector<2x128xf32>
    %129 = math.exp %128 : vector<2x128xf32>
    %cst_29 = arith.constant 1.000000e+00 : f32
    %130 = vector.broadcast %cst_29 : f32 to vector<2x128xf32>
    %131 = arith.addf %130, %129 : vector<2x128xf32>
    %132 = arith.divf %130, %131 : vector<2x128xf32>
    %133 = vector.extract_strided_slice %126 {offsets = [0, 128], sizes = [2, 128], strides = [1, 1]} : vector<2x512xf32> to vector<2x128xf32>
    %134 = arith.negf %133 : vector<2x128xf32>
    %135 = math.exp %134 : vector<2x128xf32>
    %cst_30 = arith.constant 1.000000e+00 : f32
    %136 = vector.broadcast %cst_30 : f32 to vector<2x128xf32>
    %137 = arith.addf %136, %135 : vector<2x128xf32>
    %138 = arith.divf %136, %137 : vector<2x128xf32>
    %139 = vector.extract_strided_slice %126 {offsets = [0, 256], sizes = [2, 128], strides = [1, 1]} : vector<2x512xf32> to vector<2x128xf32>
    %140 = math.tanh %139 : vector<2x128xf32>
    %141 = vector.extract_strided_slice %126 {offsets = [0, 384], sizes = [2, 128], strides = [1, 1]} : vector<2x512xf32> to vector<2x128xf32>
    %142 = arith.negf %141 : vector<2x128xf32>
    %143 = math.exp %142 : vector<2x128xf32>
    %cst_31 = arith.constant 1.000000e+00 : f32
    %144 = vector.broadcast %cst_31 : f32 to vector<2x128xf32>
    %145 = arith.addf %144, %143 : vector<2x128xf32>
    %146 = arith.divf %144, %145 : vector<2x128xf32>
    %147 = arith.mulf %138, %93 : vector<2x128xf32>
    %148 = arith.mulf %132, %140 : vector<2x128xf32>
    %149 = arith.addf %147, %148 : vector<2x128xf32>
    %150 = math.tanh %149 : vector<2x128xf32>
    %151 = arith.mulf %146, %150 : vector<2x128xf32>
    %152 = tpu.concatenate %151, %123 in 1 : vector<2x128xf32>, vector<2x128xf32> -> vector<2x256xf32>
    %cst_32 = arith.constant dense<0.000000e+00> : vector<2x512xf32>
    %153 = tpu.matmul %152, %7, %cst_32 {dimension_numbers = #tpu.dot_dimension_numbers<[1], [0], [0], [1], [0, 0, 1, 1], [], []>} : vector<2x256xf32>, vector<256x512xf32>, vector<2x512xf32> -> vector<2x512xf32>
    %154 = arith.addf %153, %10 : vector<2x512xf32>
    %155 = vector.extract_strided_slice %154 {offsets = [0, 0], sizes = [2, 128], strides = [1, 1]} : vector<2x512xf32> to vector<2x128xf32>
    %156 = arith.negf %155 : vector<2x128xf32>
    %157 = math.exp %156 : vector<2x128xf32>
    %cst_33 = arith.constant 1.000000e+00 : f32
    %158 = vector.broadcast %cst_33 : f32 to vector<2x128xf32>
    %159 = arith.addf %158, %157 : vector<2x128xf32>
    %160 = arith.divf %158, %159 : vector<2x128xf32>
    %161 = vector.extract_strided_slice %154 {offsets = [0, 128], sizes = [2, 128], strides = [1, 1]} : vector<2x512xf32> to vector<2x128xf32>
    %162 = arith.negf %161 : vector<2x128xf32>
    %163 = math.exp %162 : vector<2x128xf32>
    %cst_34 = arith.constant 1.000000e+00 : f32
    %164 = vector.broadcast %cst_34 : f32 to vector<2x128xf32>
    %165 = arith.addf %164, %163 : vector<2x128xf32>
    %166 = arith.divf %164, %165 : vector<2x128xf32>
    %167 = vector.extract_strided_slice %154 {offsets = [0, 256], sizes = [2, 128], strides = [1, 1]} : vector<2x512xf32> to vector<2x128xf32>
    %168 = math.tanh %167 : vector<2x128xf32>
    %169 = vector.extract_strided_slice %154 {offsets = [0, 384], sizes = [2, 128], strides = [1, 1]} : vector<2x512xf32> to vector<2x128xf32>
    %170 = arith.negf %169 : vector<2x128xf32>
    %171 = math.exp %170 : vector<2x128xf32>
    %cst_35 = arith.constant 1.000000e+00 : f32
    %172 = vector.broadcast %cst_35 : f32 to vector<2x128xf32>
    %173 = arith.addf %172, %171 : vector<2x128xf32>
    %174 = arith.divf %172, %173 : vector<2x128xf32>
    %175 = arith.mulf %166, %121 : vector<2x128xf32>
    %176 = arith.mulf %160, %168 : vector<2x128xf32>
    %177 = arith.addf %175, %176 : vector<2x128xf32>
    %178 = math.tanh %177 : vector<2x128xf32>
    %179 = arith.mulf %174, %178 : vector<2x128xf32>
    %180 = vector.extract_strided_slice %5 {offsets = [6, 0], sizes = [2, 512], strides = [1, 1]} : vector<16x512xf32> to vector<2x512xf32>
    %cst_36 = arith.constant dense<0.000000e+00> : vector<2x512xf32>
    %181 = tpu.matmul %151, %6, %cst_36 {dimension_numbers = #tpu.dot_dimension_numbers<[1], [0], [0], [1], [0, 0, 1, 1], [], []>} : vector<2x128xf32>, vector<128x512xf32>, vector<2x512xf32> -> vector<2x512xf32>
    %182 = arith.addf %180, %181 : vector<2x512xf32>
    %183 = vector.extract_strided_slice %182 {offsets = [0, 0], sizes = [2, 128], strides = [1, 1]} : vector<2x512xf32> to vector<2x128xf32>
    %184 = arith.negf %183 : vector<2x128xf32>
    %185 = math.exp %184 : vector<2x128xf32>
    %cst_37 = arith.constant 1.000000e+00 : f32
    %186 = vector.broadcast %cst_37 : f32 to vector<2x128xf32>
    %187 = arith.addf %186, %185 : vector<2x128xf32>
    %188 = arith.divf %186, %187 : vector<2x128xf32>
    %189 = vector.extract_strided_slice %182 {offsets = [0, 128], sizes = [2, 128], strides = [1, 1]} : vector<2x512xf32> to vector<2x128xf32>
    %190 = arith.negf %189 : vector<2x128xf32>
    %191 = math.exp %190 : vector<2x128xf32>
    %cst_38 = arith.constant 1.000000e+00 : f32
    %192 = vector.broadcast %cst_38 : f32 to vector<2x128xf32>
    %193 = arith.addf %192, %191 : vector<2x128xf32>
    %194 = arith.divf %192, %193 : vector<2x128xf32>
    %195 = vector.extract_strided_slice %182 {offsets = [0, 256], sizes = [2, 128], strides = [1, 1]} : vector<2x512xf32> to vector<2x128xf32>
    %196 = math.tanh %195 : vector<2x128xf32>
    %197 = vector.extract_strided_slice %182 {offsets = [0, 384], sizes = [2, 128], strides = [1, 1]} : vector<2x512xf32> to vector<2x128xf32>
    %198 = arith.negf %197 : vector<2x128xf32>
    %199 = math.exp %198 : vector<2x128xf32>
    %cst_39 = arith.constant 1.000000e+00 : f32
    %200 = vector.broadcast %cst_39 : f32 to vector<2x128xf32>
    %201 = arith.addf %200, %199 : vector<2x128xf32>
    %202 = arith.divf %200, %201 : vector<2x128xf32>
    %203 = arith.mulf %194, %149 : vector<2x128xf32>
    %204 = arith.mulf %188, %196 : vector<2x128xf32>
    %205 = arith.addf %203, %204 : vector<2x128xf32>
    %206 = math.tanh %205 : vector<2x128xf32>
    %207 = arith.mulf %202, %206 : vector<2x128xf32>
    %208 = tpu.concatenate %207, %179 in 1 : vector<2x128xf32>, vector<2x128xf32> -> vector<2x256xf32>
    %cst_40 = arith.constant dense<0.000000e+00> : vector<2x512xf32>
    %209 = tpu.matmul %208, %7, %cst_40 {dimension_numbers = #tpu.dot_dimension_numbers<[1], [0], [0], [1], [0, 0, 1, 1], [], []>} : vector<2x256xf32>, vector<256x512xf32>, vector<2x512xf32> -> vector<2x512xf32>
    %210 = arith.addf %209, %10 : vector<2x512xf32>
    %211 = vector.extract_strided_slice %210 {offsets = [0, 0], sizes = [2, 128], strides = [1, 1]} : vector<2x512xf32> to vector<2x128xf32>
    %212 = arith.negf %211 : vector<2x128xf32>
    %213 = math.exp %212 : vector<2x128xf32>
    %cst_41 = arith.constant 1.000000e+00 : f32
    %214 = vector.broadcast %cst_41 : f32 to vector<2x128xf32>
    %215 = arith.addf %214, %213 : vector<2x128xf32>
    %216 = arith.divf %214, %215 : vector<2x128xf32>
    %217 = vector.extract_strided_slice %210 {offsets = [0, 128], sizes = [2, 128], strides = [1, 1]} : vector<2x512xf32> to vector<2x128xf32>
    %218 = arith.negf %217 : vector<2x128xf32>
    %219 = math.exp %218 : vector<2x128xf32>
    %cst_42 = arith.constant 1.000000e+00 : f32
    %220 = vector.broadcast %cst_42 : f32 to vector<2x128xf32>
    %221 = arith.addf %220, %219 : vector<2x128xf32>
    %222 = arith.divf %220, %221 : vector<2x128xf32>
    %223 = vector.extract_strided_slice %210 {offsets = [0, 256], sizes = [2, 128], strides = [1, 1]} : vector<2x512xf32> to vector<2x128xf32>
    %224 = math.tanh %223 : vector<2x128xf32>
    %225 = vector.extract_strided_slice %210 {offsets = [0, 384], sizes = [2, 128], strides = [1, 1]} : vector<2x512xf32> to vector<2x128xf32>
    %226 = arith.negf %225 : vector<2x128xf32>
    %227 = math.exp %226 : vector<2x128xf32>
    %cst_43 = arith.constant 1.000000e+00 : f32
    %228 = vector.broadcast %cst_43 : f32 to vector<2x128xf32>
    %229 = arith.addf %228, %227 : vector<2x128xf32>
    %230 = arith.divf %228, %229 : vector<2x128xf32>
    %231 = arith.mulf %222, %177 : vector<2x128xf32>
    %232 = arith.mulf %216, %224 : vector<2x128xf32>
    %233 = arith.addf %231, %232 : vector<2x128xf32>
    %234 = math.tanh %233 : vector<2x128xf32>
    %235 = arith.mulf %230, %234 : vector<2x128xf32>
    %236 = vector.extract_strided_slice %5 {offsets = [8, 0], sizes = [2, 512], strides = [1, 1]} : vector<16x512xf32> to vector<2x512xf32>
    %cst_44 = arith.constant dense<0.000000e+00> : vector<2x512xf32>
    %237 = tpu.matmul %207, %6, %cst_44 {dimension_numbers = #tpu.dot_dimension_numbers<[1], [0], [0], [1], [0, 0, 1, 1], [], []>} : vector<2x128xf32>, vector<128x512xf32>, vector<2x512xf32> -> vector<2x512xf32>
    %238 = arith.addf %236, %237 : vector<2x512xf32>
    %239 = vector.extract_strided_slice %238 {offsets = [0, 0], sizes = [2, 128], strides = [1, 1]} : vector<2x512xf32> to vector<2x128xf32>
    %240 = arith.negf %239 : vector<2x128xf32>
    %241 = math.exp %240 : vector<2x128xf32>
    %cst_45 = arith.constant 1.000000e+00 : f32
    %242 = vector.broadcast %cst_45 : f32 to vector<2x128xf32>
    %243 = arith.addf %242, %241 : vector<2x128xf32>
    %244 = arith.divf %242, %243 : vector<2x128xf32>
    %245 = vector.extract_strided_slice %238 {offsets = [0, 128], sizes = [2, 128], strides = [1, 1]} : vector<2x512xf32> to vector<2x128xf32>
    %246 = arith.negf %245 : vector<2x128xf32>
    %247 = math.exp %246 : vector<2x128xf32>
    %cst_46 = arith.constant 1.000000e+00 : f32
    %248 = vector.broadcast %cst_46 : f32 to vector<2x128xf32>
    %249 = arith.addf %248, %247 : vector<2x128xf32>
    %250 = arith.divf %248, %249 : vector<2x128xf32>
    %251 = vector.extract_strided_slice %238 {offsets = [0, 256], sizes = [2, 128], strides = [1, 1]} : vector<2x512xf32> to vector<2x128xf32>
    %252 = math.tanh %251 : vector<2x128xf32>
    %253 = vector.extract_strided_slice %238 {offsets = [0, 384], sizes = [2, 128], strides = [1, 1]} : vector<2x512xf32> to vector<2x128xf32>
    %254 = arith.negf %253 : vector<2x128xf32>
    %255 = math.exp %254 : vector<2x128xf32>
    %cst_47 = arith.constant 1.000000e+00 : f32
    %256 = vector.broadcast %cst_47 : f32 to vector<2x128xf32>
    %257 = arith.addf %256, %255 : vector<2x128xf32>
    %258 = arith.divf %256, %257 : vector<2x128xf32>
    %259 = arith.mulf %250, %205 : vector<2x128xf32>
    %260 = arith.mulf %244, %252 : vector<2x128xf32>
    %261 = arith.addf %259, %260 : vector<2x128xf32>
    %262 = math.tanh %261 : vector<2x128xf32>
    %263 = arith.mulf %258, %262 : vector<2x128xf32>
    %264 = tpu.concatenate %263, %235 in 1 : vector<2x128xf32>, vector<2x128xf32> -> vector<2x256xf32>
    %cst_48 = arith.constant dense<0.000000e+00> : vector<2x512xf32>
    %265 = tpu.matmul %264, %7, %cst_48 {dimension_numbers = #tpu.dot_dimension_numbers<[1], [0], [0], [1], [0, 0, 1, 1], [], []>} : vector<2x256xf32>, vector<256x512xf32>, vector<2x512xf32> -> vector<2x512xf32>
    %266 = arith.addf %265, %10 : vector<2x512xf32>
    %267 = vector.extract_strided_slice %266 {offsets = [0, 0], sizes = [2, 128], strides = [1, 1]} : vector<2x512xf32> to vector<2x128xf32>
    %268 = arith.negf %267 : vector<2x128xf32>
    %269 = math.exp %268 : vector<2x128xf32>
    %cst_49 = arith.constant 1.000000e+00 : f32
    %270 = vector.broadcast %cst_49 : f32 to vector<2x128xf32>
    %271 = arith.addf %270, %269 : vector<2x128xf32>
    %272 = arith.divf %270, %271 : vector<2x128xf32>
    %273 = vector.extract_strided_slice %266 {offsets = [0, 128], sizes = [2, 128], strides = [1, 1]} : vector<2x512xf32> to vector<2x128xf32>
    %274 = arith.negf %273 : vector<2x128xf32>
    %275 = math.exp %274 : vector<2x128xf32>
    %cst_50 = arith.constant 1.000000e+00 : f32
    %276 = vector.broadcast %cst_50 : f32 to vector<2x128xf32>
    %277 = arith.addf %276, %275 : vector<2x128xf32>
    %278 = arith.divf %276, %277 : vector<2x128xf32>
    %279 = vector.extract_strided_slice %266 {offsets = [0, 256], sizes = [2, 128], strides = [1, 1]} : vector<2x512xf32> to vector<2x128xf32>
    %280 = math.tanh %279 : vector<2x128xf32>
    %281 = vector.extract_strided_slice %266 {offsets = [0, 384], sizes = [2, 128], strides = [1, 1]} : vector<2x512xf32> to vector<2x128xf32>
    %282 = arith.negf %281 : vector<2x128xf32>
    %283 = math.exp %282 : vector<2x128xf32>
    %cst_51 = arith.constant 1.000000e+00 : f32
    %284 = vector.broadcast %cst_51 : f32 to vector<2x128xf32>
    %285 = arith.addf %284, %283 : vector<2x128xf32>
    %286 = arith.divf %284, %285 : vector<2x128xf32>
    %287 = arith.mulf %278, %233 : vector<2x128xf32>
    %288 = arith.mulf %272, %280 : vector<2x128xf32>
    %289 = arith.addf %287, %288 : vector<2x128xf32>
    %290 = math.tanh %289 : vector<2x128xf32>
    %291 = arith.mulf %286, %290 : vector<2x128xf32>
    %292 = vector.extract_strided_slice %5 {offsets = [10, 0], sizes = [2, 512], strides = [1, 1]} : vector<16x512xf32> to vector<2x512xf32>
    %cst_52 = arith.constant dense<0.000000e+00> : vector<2x512xf32>
    %293 = tpu.matmul %263, %6, %cst_52 {dimension_numbers = #tpu.dot_dimension_numbers<[1], [0], [0], [1], [0, 0, 1, 1], [], []>} : vector<2x128xf32>, vector<128x512xf32>, vector<2x512xf32> -> vector<2x512xf32>
    %294 = arith.addf %292, %293 : vector<2x512xf32>
    %295 = vector.extract_strided_slice %294 {offsets = [0, 0], sizes = [2, 128], strides = [1, 1]} : vector<2x512xf32> to vector<2x128xf32>
    %296 = arith.negf %295 : vector<2x128xf32>
    %297 = math.exp %296 : vector<2x128xf32>
    %cst_53 = arith.constant 1.000000e+00 : f32
    %298 = vector.broadcast %cst_53 : f32 to vector<2x128xf32>
    %299 = arith.addf %298, %297 : vector<2x128xf32>
    %300 = arith.divf %298, %299 : vector<2x128xf32>
    %301 = vector.extract_strided_slice %294 {offsets = [0, 128], sizes = [2, 128], strides = [1, 1]} : vector<2x512xf32> to vector<2x128xf32>
    %302 = arith.negf %301 : vector<2x128xf32>
    %303 = math.exp %302 : vector<2x128xf32>
    %cst_54 = arith.constant 1.000000e+00 : f32
    %304 = vector.broadcast %cst_54 : f32 to vector<2x128xf32>
    %305 = arith.addf %304, %303 : vector<2x128xf32>
    %306 = arith.divf %304, %305 : vector<2x128xf32>
    %307 = vector.extract_strided_slice %294 {offsets = [0, 256], sizes = [2, 128], strides = [1, 1]} : vector<2x512xf32> to vector<2x128xf32>
    %308 = math.tanh %307 : vector<2x128xf32>
    %309 = vector.extract_strided_slice %294 {offsets = [0, 384], sizes = [2, 128], strides = [1, 1]} : vector<2x512xf32> to vector<2x128xf32>
    %310 = arith.negf %309 : vector<2x128xf32>
    %311 = math.exp %310 : vector<2x128xf32>
    %cst_55 = arith.constant 1.000000e+00 : f32
    %312 = vector.broadcast %cst_55 : f32 to vector<2x128xf32>
    %313 = arith.addf %312, %311 : vector<2x128xf32>
    %314 = arith.divf %312, %313 : vector<2x128xf32>
    %315 = arith.mulf %306, %261 : vector<2x128xf32>
    %316 = arith.mulf %300, %308 : vector<2x128xf32>
    %317 = arith.addf %315, %316 : vector<2x128xf32>
    %318 = math.tanh %317 : vector<2x128xf32>
    %319 = arith.mulf %314, %318 : vector<2x128xf32>
    %320 = tpu.concatenate %319, %291 in 1 : vector<2x128xf32>, vector<2x128xf32> -> vector<2x256xf32>
    %cst_56 = arith.constant dense<0.000000e+00> : vector<2x512xf32>
    %321 = tpu.matmul %320, %7, %cst_56 {dimension_numbers = #tpu.dot_dimension_numbers<[1], [0], [0], [1], [0, 0, 1, 1], [], []>} : vector<2x256xf32>, vector<256x512xf32>, vector<2x512xf32> -> vector<2x512xf32>
    %322 = arith.addf %321, %10 : vector<2x512xf32>
    %323 = vector.extract_strided_slice %322 {offsets = [0, 0], sizes = [2, 128], strides = [1, 1]} : vector<2x512xf32> to vector<2x128xf32>
    %324 = arith.negf %323 : vector<2x128xf32>
    %325 = math.exp %324 : vector<2x128xf32>
    %cst_57 = arith.constant 1.000000e+00 : f32
    %326 = vector.broadcast %cst_57 : f32 to vector<2x128xf32>
    %327 = arith.addf %326, %325 : vector<2x128xf32>
    %328 = arith.divf %326, %327 : vector<2x128xf32>
    %329 = vector.extract_strided_slice %322 {offsets = [0, 128], sizes = [2, 128], strides = [1, 1]} : vector<2x512xf32> to vector<2x128xf32>
    %330 = arith.negf %329 : vector<2x128xf32>
    %331 = math.exp %330 : vector<2x128xf32>
    %cst_58 = arith.constant 1.000000e+00 : f32
    %332 = vector.broadcast %cst_58 : f32 to vector<2x128xf32>
    %333 = arith.addf %332, %331 : vector<2x128xf32>
    %334 = arith.divf %332, %333 : vector<2x128xf32>
    %335 = vector.extract_strided_slice %322 {offsets = [0, 256], sizes = [2, 128], strides = [1, 1]} : vector<2x512xf32> to vector<2x128xf32>
    %336 = math.tanh %335 : vector<2x128xf32>
    %337 = vector.extract_strided_slice %322 {offsets = [0, 384], sizes = [2, 128], strides = [1, 1]} : vector<2x512xf32> to vector<2x128xf32>
    %338 = arith.negf %337 : vector<2x128xf32>
    %339 = math.exp %338 : vector<2x128xf32>
    %cst_59 = arith.constant 1.000000e+00 : f32
    %340 = vector.broadcast %cst_59 : f32 to vector<2x128xf32>
    %341 = arith.addf %340, %339 : vector<2x128xf32>
    %342 = arith.divf %340, %341 : vector<2x128xf32>
    %343 = arith.mulf %334, %289 : vector<2x128xf32>
    %344 = arith.mulf %328, %336 : vector<2x128xf32>
    %345 = arith.addf %343, %344 : vector<2x128xf32>
    %346 = math.tanh %345 : vector<2x128xf32>
    %347 = arith.mulf %342, %346 : vector<2x128xf32>
    %348 = vector.extract_strided_slice %5 {offsets = [12, 0], sizes = [2, 512], strides = [1, 1]} : vector<16x512xf32> to vector<2x512xf32>
    %cst_60 = arith.constant dense<0.000000e+00> : vector<2x512xf32>
    %349 = tpu.matmul %319, %6, %cst_60 {dimension_numbers = #tpu.dot_dimension_numbers<[1], [0], [0], [1], [0, 0, 1, 1], [], []>} : vector<2x128xf32>, vector<128x512xf32>, vector<2x512xf32> -> vector<2x512xf32>
    %350 = arith.addf %348, %349 : vector<2x512xf32>
    %351 = vector.extract_strided_slice %350 {offsets = [0, 0], sizes = [2, 128], strides = [1, 1]} : vector<2x512xf32> to vector<2x128xf32>
    %352 = arith.negf %351 : vector<2x128xf32>
    %353 = math.exp %352 : vector<2x128xf32>
    %cst_61 = arith.constant 1.000000e+00 : f32
    %354 = vector.broadcast %cst_61 : f32 to vector<2x128xf32>
    %355 = arith.addf %354, %353 : vector<2x128xf32>
    %356 = arith.divf %354, %355 : vector<2x128xf32>
    %357 = vector.extract_strided_slice %350 {offsets = [0, 128], sizes = [2, 128], strides = [1, 1]} : vector<2x512xf32> to vector<2x128xf32>
    %358 = arith.negf %357 : vector<2x128xf32>
    %359 = math.exp %358 : vector<2x128xf32>
    %cst_62 = arith.constant 1.000000e+00 : f32
    %360 = vector.broadcast %cst_62 : f32 to vector<2x128xf32>
    %361 = arith.addf %360, %359 : vector<2x128xf32>
    %362 = arith.divf %360, %361 : vector<2x128xf32>
    %363 = vector.extract_strided_slice %350 {offsets = [0, 256], sizes = [2, 128], strides = [1, 1]} : vector<2x512xf32> to vector<2x128xf32>
    %364 = math.tanh %363 : vector<2x128xf32>
    %365 = vector.extract_strided_slice %350 {offsets = [0, 384], sizes = [2, 128], strides = [1, 1]} : vector<2x512xf32> to vector<2x128xf32>
    %366 = arith.negf %365 : vector<2x128xf32>
    %367 = math.exp %366 : vector<2x128xf32>
    %cst_63 = arith.constant 1.000000e+00 : f32
    %368 = vector.broadcast %cst_63 : f32 to vector<2x128xf32>
    %369 = arith.addf %368, %367 : vector<2x128xf32>
    %370 = arith.divf %368, %369 : vector<2x128xf32>
    %371 = arith.mulf %362, %317 : vector<2x128xf32>
    %372 = arith.mulf %356, %364 : vector<2x128xf32>
    %373 = arith.addf %371, %372 : vector<2x128xf32>
    %374 = math.tanh %373 : vector<2x128xf32>
    %375 = arith.mulf %370, %374 : vector<2x128xf32>
    %376 = tpu.concatenate %375, %347 in 1 : vector<2x128xf32>, vector<2x128xf32> -> vector<2x256xf32>
    %cst_64 = arith.constant dense<0.000000e+00> : vector<2x512xf32>
    %377 = tpu.matmul %376, %7, %cst_64 {dimension_numbers = #tpu.dot_dimension_numbers<[1], [0], [0], [1], [0, 0, 1, 1], [], []>} : vector<2x256xf32>, vector<256x512xf32>, vector<2x512xf32> -> vector<2x512xf32>
    %378 = arith.addf %377, %10 : vector<2x512xf32>
    %379 = vector.extract_strided_slice %378 {offsets = [0, 0], sizes = [2, 128], strides = [1, 1]} : vector<2x512xf32> to vector<2x128xf32>
    %380 = arith.negf %379 : vector<2x128xf32>
    %381 = math.exp %380 : vector<2x128xf32>
    %cst_65 = arith.constant 1.000000e+00 : f32
    %382 = vector.broadcast %cst_65 : f32 to vector<2x128xf32>
    %383 = arith.addf %382, %381 : vector<2x128xf32>
    %384 = arith.divf %382, %383 : vector<2x128xf32>
    %385 = vector.extract_strided_slice %378 {offsets = [0, 128], sizes = [2, 128], strides = [1, 1]} : vector<2x512xf32> to vector<2x128xf32>
    %386 = arith.negf %385 : vector<2x128xf32>
    %387 = math.exp %386 : vector<2x128xf32>
    %cst_66 = arith.constant 1.000000e+00 : f32
    %388 = vector.broadcast %cst_66 : f32 to vector<2x128xf32>
    %389 = arith.addf %388, %387 : vector<2x128xf32>
    %390 = arith.divf %388, %389 : vector<2x128xf32>
    %391 = vector.extract_strided_slice %378 {offsets = [0, 256], sizes = [2, 128], strides = [1, 1]} : vector<2x512xf32> to vector<2x128xf32>
    %392 = math.tanh %391 : vector<2x128xf32>
    %393 = vector.extract_strided_slice %378 {offsets = [0, 384], sizes = [2, 128], strides = [1, 1]} : vector<2x512xf32> to vector<2x128xf32>
    %394 = arith.negf %393 : vector<2x128xf32>
    %395 = math.exp %394 : vector<2x128xf32>
    %cst_67 = arith.constant 1.000000e+00 : f32
    %396 = vector.broadcast %cst_67 : f32 to vector<2x128xf32>
    %397 = arith.addf %396, %395 : vector<2x128xf32>
    %398 = arith.divf %396, %397 : vector<2x128xf32>
    %399 = arith.mulf %390, %345 : vector<2x128xf32>
    %400 = arith.mulf %384, %392 : vector<2x128xf32>
    %401 = arith.addf %399, %400 : vector<2x128xf32>
    %402 = math.tanh %401 : vector<2x128xf32>
    %403 = arith.mulf %398, %402 : vector<2x128xf32>
    %404 = vector.extract_strided_slice %5 {offsets = [14, 0], sizes = [2, 512], strides = [1, 1]} : vector<16x512xf32> to vector<2x512xf32>
    %cst_68 = arith.constant dense<0.000000e+00> : vector<2x512xf32>
    %405 = tpu.matmul %375, %6, %cst_68 {dimension_numbers = #tpu.dot_dimension_numbers<[1], [0], [0], [1], [0, 0, 1, 1], [], []>} : vector<2x128xf32>, vector<128x512xf32>, vector<2x512xf32> -> vector<2x512xf32>
    %406 = arith.addf %404, %405 : vector<2x512xf32>
    %407 = vector.extract_strided_slice %406 {offsets = [0, 0], sizes = [2, 128], strides = [1, 1]} : vector<2x512xf32> to vector<2x128xf32>
    %408 = arith.negf %407 : vector<2x128xf32>
    %409 = math.exp %408 : vector<2x128xf32>
    %cst_69 = arith.constant 1.000000e+00 : f32
    %410 = vector.broadcast %cst_69 : f32 to vector<2x128xf32>
    %411 = arith.addf %410, %409 : vector<2x128xf32>
    %412 = arith.divf %410, %411 : vector<2x128xf32>
    %413 = vector.extract_strided_slice %406 {offsets = [0, 128], sizes = [2, 128], strides = [1, 1]} : vector<2x512xf32> to vector<2x128xf32>
    %414 = arith.negf %413 : vector<2x128xf32>
    %415 = math.exp %414 : vector<2x128xf32>
    %cst_70 = arith.constant 1.000000e+00 : f32
    %416 = vector.broadcast %cst_70 : f32 to vector<2x128xf32>
    %417 = arith.addf %416, %415 : vector<2x128xf32>
    %418 = arith.divf %416, %417 : vector<2x128xf32>
    %419 = vector.extract_strided_slice %406 {offsets = [0, 256], sizes = [2, 128], strides = [1, 1]} : vector<2x512xf32> to vector<2x128xf32>
    %420 = math.tanh %419 : vector<2x128xf32>
    %421 = vector.extract_strided_slice %406 {offsets = [0, 384], sizes = [2, 128], strides = [1, 1]} : vector<2x512xf32> to vector<2x128xf32>
    %422 = arith.negf %421 : vector<2x128xf32>
    %423 = math.exp %422 : vector<2x128xf32>
    %cst_71 = arith.constant 1.000000e+00 : f32
    %424 = vector.broadcast %cst_71 : f32 to vector<2x128xf32>
    %425 = arith.addf %424, %423 : vector<2x128xf32>
    %426 = arith.divf %424, %425 : vector<2x128xf32>
    %427 = arith.mulf %418, %373 : vector<2x128xf32>
    %428 = arith.mulf %412, %420 : vector<2x128xf32>
    %429 = arith.addf %427, %428 : vector<2x128xf32>
    %430 = math.tanh %429 : vector<2x128xf32>
    %431 = arith.mulf %426, %430 : vector<2x128xf32>
    %432 = tpu.concatenate %431, %403 in 1 : vector<2x128xf32>, vector<2x128xf32> -> vector<2x256xf32>
    %cst_72 = arith.constant dense<0.000000e+00> : vector<2x512xf32>
    %433 = tpu.matmul %432, %7, %cst_72 {dimension_numbers = #tpu.dot_dimension_numbers<[1], [0], [0], [1], [0, 0, 1, 1], [], []>} : vector<2x256xf32>, vector<256x512xf32>, vector<2x512xf32> -> vector<2x512xf32>
    %434 = arith.addf %433, %10 : vector<2x512xf32>
    %435 = vector.extract_strided_slice %434 {offsets = [0, 0], sizes = [2, 128], strides = [1, 1]} : vector<2x512xf32> to vector<2x128xf32>
    %436 = arith.negf %435 : vector<2x128xf32>
    %437 = math.exp %436 : vector<2x128xf32>
    %cst_73 = arith.constant 1.000000e+00 : f32
    %438 = vector.broadcast %cst_73 : f32 to vector<2x128xf32>
    %439 = arith.addf %438, %437 : vector<2x128xf32>
    %440 = arith.divf %438, %439 : vector<2x128xf32>
    %441 = vector.extract_strided_slice %434 {offsets = [0, 128], sizes = [2, 128], strides = [1, 1]} : vector<2x512xf32> to vector<2x128xf32>
    %442 = arith.negf %441 : vector<2x128xf32>
    %443 = math.exp %442 : vector<2x128xf32>
    %cst_74 = arith.constant 1.000000e+00 : f32
    %444 = vector.broadcast %cst_74 : f32 to vector<2x128xf32>
    %445 = arith.addf %444, %443 : vector<2x128xf32>
    %446 = arith.divf %444, %445 : vector<2x128xf32>
    %447 = vector.extract_strided_slice %434 {offsets = [0, 256], sizes = [2, 128], strides = [1, 1]} : vector<2x512xf32> to vector<2x128xf32>
    %448 = math.tanh %447 : vector<2x128xf32>
    %449 = vector.extract_strided_slice %434 {offsets = [0, 384], sizes = [2, 128], strides = [1, 1]} : vector<2x512xf32> to vector<2x128xf32>
    %450 = arith.negf %449 : vector<2x128xf32>
    %451 = math.exp %450 : vector<2x128xf32>
    %cst_75 = arith.constant 1.000000e+00 : f32
    %452 = vector.broadcast %cst_75 : f32 to vector<2x128xf32>
    %453 = arith.addf %452, %451 : vector<2x128xf32>
    %454 = arith.divf %452, %453 : vector<2x128xf32>
    %455 = arith.mulf %446, %401 : vector<2x128xf32>
    %456 = arith.mulf %440, %448 : vector<2x128xf32>
    %457 = arith.addf %455, %456 : vector<2x128xf32>
    %458 = math.tanh %457 : vector<2x128xf32>
    %459 = arith.mulf %454, %458 : vector<2x128xf32>
    %c0_76 = arith.constant 0 : index
    %c0_77 = arith.constant 0 : index
    %460 = vector.load %arg6[%c0_76, %c0_77] : memref<128x32xf32, #tpu.memory_space<vmem>>, vector<128x32xf32>
    %cst_78 = arith.constant dense<0.000000e+00> : vector<2x32xf32>
    %461 = tpu.matmul %459, %460, %cst_78 {dimension_numbers = #tpu.dot_dimension_numbers<[1], [0], [0], [1], [0, 0, 1, 1], [], []>} : vector<2x128xf32>, vector<128x32xf32>, vector<2x32xf32> -> vector<2x32xf32>
    %c0_79 = arith.constant 0 : index
    %c0_80 = arith.constant 0 : index
    %462 = vector.load %arg7[%c0_79, %c0_80] : memref<1x32xf32, #tpu.memory_space<vmem>>, vector<1x32xf32>
    %463 = vector.broadcast %462 : vector<1x32xf32> to vector<2x32xf32>
    %464 = arith.addf %461, %463 : vector<2x32xf32>
    %cst_81 = arith.constant 0.000000e+00 : f32
    %465 = vector.broadcast %cst_81 : f32 to vector<2x32xf32>
    %466 = arith.cmpf ogt, %464, %465 : vector<2x32xf32>
    %cst_82 = arith.constant 0.00999999977 : f32
    %467 = vector.broadcast %cst_82 : f32 to vector<2x32xf32>
    %468 = arith.mulf %467, %464 : vector<2x32xf32>
    %469 = arith.select %466, %464, %468 : vector<2x32xi1>, vector<2x32xf32>
    %c0_83 = arith.constant 0 : index
    %c0_84 = arith.constant 0 : index
    %470 = vector.load %arg8[%c0_83, %c0_84] : memref<32x1xf32, #tpu.memory_space<vmem>>, vector<32x1xf32>
    %cst_85 = arith.constant dense<0.000000e+00> : vector<2x1xf32>
    %471 = tpu.matmul %469, %470, %cst_85 {dimension_numbers = #tpu.dot_dimension_numbers<[1], [0], [0], [1], [0, 0, 1, 1], [], []>} : vector<2x32xf32>, vector<32x1xf32>, vector<2x1xf32> -> vector<2x1xf32>
    %c0_86 = arith.constant 0 : index
    %c0_87 = arith.constant 0 : index
    %472 = vector.load %arg9[%c0_86, %c0_87] : memref<1x1xf32, #tpu.memory_space<vmem>>, vector<1x1xf32>
    %473 = vector.broadcast %472 : vector<1x1xf32> to vector<2x1xf32>
    %474 = arith.addf %471, %473 : vector<2x1xf32>
    %c0_88 = arith.constant 0 : index
    %c0_89 = arith.constant 0 : index
    %475 = vector.load %arg10[%c0_88, %c0_89] : memref<2x1xf32, #tpu.memory_space<vmem>>, vector<2x1xf32>
    tpu.vector_store %arg10[%c0_88, %c0_89], %474 {strides = array<i32>} : memref<2x1xf32, #tpu.memory_space<vmem>>, vector<2x1xf32>,
    return
  }
}

</mosaic_0001>

<bundles_post_ra>
// kernel: lstm_price_predictor.1
= control target key start
LH: loop header
LB: loop body
LE: loop exit
PB: predicated region body
PF: predicated region fallthrough
CT: control target
= control target key end

     0   :  { %vm76_vm0 = vcmask 1041408   ;;  %v10243_v3 = vmov 0.0   ;;  %vm69_vm1 = vcmask 80896   ;;  %vm4429_vm2 = vmmov 0   ;;  %s10232_s1 = inlined_call_operand.vmem [shape: f32[10,512], index: 1, kind: input, shape index: {}]   ;;  %s10233_s2 = inlined_call_operand.vmem [shape: f32[128,512], index: 2, kind: input, shape index: {}]   ;;  %s10234_s0 = inlined_call_operand.vmem [shape: f32[16,10], index: 0, kind: input, shape index: {}]   ;;  %s10235_s4 = inlined_call_operand.vmem [shape: f32[256,512], index: 4, kind: input, shape index: {}]   ;;  %s10236_s3 = inlined_call_operand.vmem [shape: f32[1,512], index: 3, kind: input, shape index: {}]   ;;  %s10237_s5 = inlined_call_operand.vmem [shape: f32[1,512], index: 5, kind: input, shape index: {}]   ;;  %s10238_s6 = inlined_call_operand.vmem [shape: f32[128,32], index: 6, kind: input, shape index: {}]   ;;  %s10239_s8 = inlined_call_operand.vmem [shape: f32[32,1], index: 8, kind: input, shape index: {}]   ;;  %s10240_s9 = inlined_call_operand.<no memory space> [shape: f32[1,1], index: 9, kind: input, shape index: {}]   ;;  %s10241_s7 = inlined_call_operand.vmem [shape: f32[1,32], index: 7, kind: input, shape index: {}]   ;;  %s10242_s10 = inlined_call_operand.vmem [shape: f32[2,1], index: 10, kind: output, shape index: {}]  }
   0x1   :  { %v44_v0 = vld [vmem:[%s10232_s1 + $0x28] sm:$0x3]  ;;  %v43_v2 = vld [vmem:[%s10232_s1 + $0x20] sm:$0x3]  ;;  %153 = vmatprep.mubr.f32.mxu1 %v10243_v3  ;;  %521 = vmatprep.mubr.f32.mxu0 %v10243_v3  ;;  %v46_v13 = vld [vmem:[%s10232_s1 + $0x38] sm:$0x3] }
   0x2   :  { %v4491_v1 = vld [vmem:[%s10233_s2 + $0x1e8] sm:$0xff]  ;;  %3467 = vmatprep.subr.msk.mxu1 %vm76_vm0, %v44_v0  ;;  %v4503_v4 = vld [vmem:[%s10233_s2 + $0x1e0] sm:$0xff]  ;;  %v45_v15 = vld [vmem:[%s10232_s1 + $0x30] sm:$0x3]  ;;  %vm3387_vm4 = vcmask 261120   ;;  %vm3461_vm5 = vcmask 1024  }
   0x3   :  { %457 = vmatprep.subr.mxu0 %v4491_v1  ;;  %v40_v5 = vld [vmem:[%s10232_s1 + $0x8] sm:$0xff]  ;;  %3468 = vmatpush1.msk.msra.mxu1 %vm76_vm0, %v43_v2  ;;  %v39_v7 = vld [vmem:[%s10232_s1] sm:$0xff]  ;;  %v42_v18 = vld [vmem:[%s10232_s1 + $0x18] sm:$0xff] }
   0x4   :  { %v4511_v6 = vld [vmem:[%s10233_s2 + $0x1c8] sm:$0xff]  ;;  %458 = vmatpush1.msra.mxu0 %v4503_v4  ;;  %v4521_v8 = vld [vmem:[%s10233_s2 + $0x1c0] sm:$0xff]  ;;  %119 = vmatprep.subr.mxu1 %v40_v5  ;;  %v41_v20 = vld [vmem:[%s10232_s1 + $0x10] sm:$0xff] }
   0x5   :  { %v37_v9 = vld [vmem:[%s10234_s0] sm:$0xff]  ;;  %459 = vmatprep.subr.mxu0 %v4511_v6  ;;  %v4530_v10 = vld [vmem:[%s10233_s2 + $0x1a8] sm:$0xff]  ;;  %120 = vmatpush1.msra.mxu1 %v39_v7  ;;  %v4600_v23 = vld [vmem:[%s10233_s2 + $0x1f8] sm:$0xff] }
   0x6   :  { %v4535_v11 = vld [vmem:[%s10233_s2 + $0x1a0] sm:$0xff]  ;;  %460 = vmatpush1.msra.mxu0 %v4521_v8  ;;  %v4541_v12 = vld [vmem:[%s10233_s2 + $0x188] sm:$0xff]  ;;  %3469 = vmatmul.mubr.msk.f32.vlgmr.msra.gmra.mxu1 %vm69_vm1, %v37_v9  ;;  %v4611_v25 = vld [vmem:[%s10233_s2 + $0x1f0] sm:$0xff] }
   0x7   :  { %461 = vmatprep.subr.mxu0 %v4530_v10  ;;  %v4551_v14 = vld [vmem:[%s10233_s2 + $0x180] sm:$0xff]  ;;  %159 = vmatprep.mubr.f32.mxu1 %v10243_v3  ;;  %v4561_v16 = vld [vmem:[%s10234_s0 + $0x8] sm:$0xff]  ;;  %v4623_v27 = vld [vmem:[%s10233_s2 + $0x1d8] sm:$0xff] }
   0x8   :  { %462 = vmatpush1.msra.mxu0 %v4535_v11  ;;  %v4566_v17 = vld [vmem:[%s10233_s2 + $0x168] sm:$0xff]  ;;  %3471 = vmatprep.subr.msk.mxu1 %vm76_vm0, %v46_v13  ;;  %v4576_v19 = vld [vmem:[%s10233_s2 + $0x160] sm:$0xff]  ;;  %v4635_v29 = vld [vmem:[%s10233_s2 + $0x1d0] sm:$0xff] }
   0x9   :  { %463 = vmatprep.subr.mxu0 %v4541_v12  ;;  %3472 = vmatpush1.msk.msra.mxu1 %vm76_vm0, %v45_v15  ;;  %v4586_v21 = vld [vmem:[%s10233_s2 + $0x148] sm:$0xff]  ;;  %v4594_v22 = vld [vmem:[%s10233_s2 + $0x140] sm:$0xff]  ;;  %v4647_v31 = vld [vmem:[%s10233_s2 + $0x1b8] sm:$0xff] }
   0xa   :  { %464 = vmatpush1.msra.mxu0 %v4551_v14  ;;  %3470 = vmatmul.mubr.msk.f32.gmra.mxu1 %vm69_vm1, %v4561_v16  ;;  %v4606_v24 = vld [vmem:[%s10233_s2 + $0x128] sm:$0xff]  ;;  %v4618_v26 = vld [vmem:[%s10233_s2 + $0x120] sm:$0xff]  ;;  %v4659_v33 = vld [vmem:[%s10233_s2 + $0x1b0] sm:$0xff] }
   0xb   :  { %465 = vmatprep.subr.mxu0 %v4566_v17  ;;  %196 = vmatprep.subr.mxu1 %v42_v18  ;;  %v4630_v28 = vld [vmem:[%s10233_s2 + $0x108] sm:$0xff]  ;;  %v4642_v30 = vld [vmem:[%s10233_s2 + $0x100] sm:$0xff]  ;;  %v4671_v35 = vld [vmem:[%s10233_s2 + $0x198] sm:$0xff] }
   0xc   :  { %466 = vmatpush1.msra.mxu0 %v4576_v19  ;;  %197 = vmatpush1.msra.mxu1 %v41_v20  ;;  %v4654_v32 = vld [vmem:[%s10233_s2 + $0xe8] sm:$0xff]  ;;  %v4666_v34 = vld [vmem:[%s10233_s2 + $0xe0] sm:$0xff]  ;;  %v4683_v37 = vld [vmem:[%s10233_s2 + $0x190] sm:$0xff] }
   0xd   :  { %467 = vmatprep.subr.mxu0 %v4586_v21  ;;  %230 = vmatprep.mubr.f32.mxu1 %v10243_v3  ;;  %v4678_v36 = vld [vmem:[%s10233_s2 + $0xc8] sm:$0xff]  ;;  %v4690_v38 = vld [vmem:[%s10233_s2 + $0xc0] sm:$0xff]  ;;  %v4695_v39 = vld [vmem:[%s10233_s2 + $0x178] sm:$0xff] }
   0xe   :  { %468 = vmatpush1.msra.mxu0 %v4594_v22  ;;  %528 = vmatprep.subr.mxu1 %v4600_v23  ;;  %v4702_v40 = vld [vmem:[%s10233_s2 + $0xa8] sm:$0xff]  ;;  %v4707_v41 = vld [vmem:[%s10233_s2 + $0x170] sm:$0xff]  ;;  %v4714_v42 = vld [vmem:[%s10233_s2 + $0xa0] sm:$0xff] }
   0xf   :  { %3473 = vmatmul.mubr.msk.f32.vlgmr.msra.gmra.mxu1 %vm69_vm1, %v37_v9  ;;  %469 = vmatprep.subr.mxu0 %v4606_v24  ;;  %v4719_v43 = vld [vmem:[%s10233_s2 + $0x158] sm:$0xff]  ;;  %v4726_v44 = vld [vmem:[%s10233_s2 + $0x88] sm:$0xff]  ;;  %v4731_v45 = vld [vmem:[%s10233_s2 + $0x150] sm:$0xff] }
  0x10   :  { %529 = vmatpush1.msra.mxu1 %v4611_v25  ;;  %470 = vmatpush1.msra.mxu0 %v4618_v26  ;;  %v4738_v46 = vld [vmem:[%s10233_s2 + $0x80] sm:$0xff]  ;;  %v4743_v47 = vld [vmem:[%s10233_s2 + $0x138] sm:$0xff]  ;;  %v4750_v48 = vld [vmem:[%s10233_s2 + $0x68] sm:$0xff] }
  0x11   :  { %530 = vmatprep.subr.mxu1 %v4623_v27  ;;  %471 = vmatprep.subr.mxu0 %v4630_v28  ;;  %10874 = vst [vmem:[#allocation3_spill] sm:$0xff] %v4738_v46  ;;  %10875 = vst [vmem:[#allocation4_spill] sm:$0xff] %v4750_v48  ;;  %v4755_v49 = vld [vmem:[%s10233_s2 + $0x130] sm:$0xff]  ;;  %v4762_v50 = vld [vmem:[%s10233_s2 + $0x60] sm:$0xff] }
  0x12   :  { %531 = vmatpush1.msra.mxu1 %v4635_v29  ;;  %472 = vmatpush1.msra.mxu0 %v4642_v30  ;;  %10876 = vst [vmem:[#allocation5_spill] sm:$0xff] %v4762_v50  ;;  %v4767_v51 = vld [vmem:[%s10233_s2 + $0x118] sm:$0xff]  ;;  %v4774_v52 = vld [vmem:[%s10233_s2 + $0x48] sm:$0xff]  ;;  %v4779_v53 = vld [vmem:[%s10233_s2 + $0x110] sm:$0xff] }
  0x13   :  { %532 = vmatprep.subr.mxu1 %v4647_v31  ;;  %473 = vmatprep.subr.mxu0 %v4654_v32  ;;  %10877 = vst [vmem:[#allocation6_spill] sm:$0xff] %v4774_v52  ;;  %v4786_v54 = vld [vmem:[%s10233_s2 + $0x40] sm:$0xff]  ;;  %v4791_v55 = vld [vmem:[%s10233_s2 + $0xf8] sm:$0xff]  ;;  %v4798_v56 = vld [vmem:[%s10233_s2 + $0x28] sm:$0xff] }
  0x14   :  { %533 = vmatpush1.msra.mxu1 %v4659_v33  ;;  %474 = vmatpush1.msra.mxu0 %v4666_v34  ;;  %10878 = vst [vmem:[#allocation7_spill] sm:$0xff] %v4786_v54  ;;  %10879 = vst [vmem:[#allocation8_spill] sm:$0xff] %v4798_v56  ;;  %v4803_v57 = vld [vmem:[%s10233_s2 + $0xf0] sm:$0xff]  ;;  %v4810_v58 = vld [vmem:[%s10233_s2 + $0x20] sm:$0xff] }
  0x15   :  { %534 = vmatprep.subr.mxu1 %v4671_v35  ;;  %475 = vmatprep.subr.mxu0 %v4678_v36  ;;  %10880 = vst [vmem:[#allocation9_spill] sm:$0xff] %v4810_v58  ;;  %v4815_v59 = vld [vmem:[%s10233_s2 + $0xd8] sm:$0xff]  ;;  %v4822_v60 = vld [vmem:[%s10233_s2 + $0x8] sm:$0xff]  ;;  %v4827_v61 = vld [vmem:[%s10233_s2 + $0xd0] sm:$0xff] }
  0x16   :  { %535 = vmatpush1.msra.mxu1 %v4683_v37  ;;  %476 = vmatpush1.msra.mxu0 %v4690_v38  ;;  %10881 = vst [vmem:[#allocation10_spill] sm:$0xff] %v4822_v60  ;;  %v4834_v62 = vld [vmem:[%s10233_s2] sm:$0xff]  ;;  %v4839_v63 = vld [vmem:[%s10233_s2 + $0xb8] sm:$0xff]  ;;  %v4846_v0 = vld [vmem:[%s10233_s2 + $0xb0] sm:$0xff] }
  0x17   :  { %536 = vmatprep.subr.mxu1 %v4695_v39  ;;  %477 = vmatprep.subr.mxu0 %v4702_v40  ;;  %10882 = vst [vmem:[#allocation11_spill] sm:$0xff] %v4834_v62  ;;  %v4853_v2 = vld [vmem:[%s10233_s2 + $0x98] sm:$0xff]  ;;  %v4860_v5 = vld [vmem:[%s10233_s2 + $0x90] sm:$0xff] }
  0x18   :  { %537 = vmatpush1.msra.mxu1 %v4707_v41  ;;  %478 = vmatpush1.msra.mxu0 %v4714_v42  ;;  %10883 = vst [vmem:[#allocation12_spill] sm:$0xff] %v4853_v2  ;;  %10884 = vst [vmem:[#allocation13_spill] sm:$0xff] %v4860_v5  ;;  %v4867_v7 = vld [vmem:[%s10233_s2 + $0x78] sm:$0xff]  ;;  %v4873_v9 = vld [vmem:[%s10233_s2 + $0x70] sm:$0xff] }
  0x19   :  { %538 = vmatprep.subr.mxu1 %v4719_v43  ;;  %479 = vmatprep.subr.mxu0 %v4726_v44  ;;  %10885 = vst [vmem:[#allocation14_spill] sm:$0xff] %v4867_v7  ;;  %10886 = vst [vmem:[#allocation15_spill] sm:$0xff] %v4873_v9  ;;  %v4880_v13 = vld [vmem:[%s10233_s2 + $0x58] sm:$0xff]  ;;  %v4887_v15 = vld [vmem:[%s10233_s2 + $0x50] sm:$0xff] }
  0x1a   :  { %539 = vmatpush1.msra.mxu1 %v4731_v45  ;;  %480 = vmatpush1.msra.mxu0 %v4738_v46  ;;  %10887 = vst [vmem:[#allocation16_spill] sm:$0xff] %v4880_v13  ;;  %10888 = vst [vmem:[#allocation17_spill] sm:$0xff] %v4887_v15  ;;  %v4895_v18 = vld [vmem:[%s10233_s2 + $0x38] sm:$0xff]  ;;  %v4902_v20 = vld [vmem:[%s10233_s2 + $0x30] sm:$0xff] }
  0x1b   :  { %540 = vmatprep.subr.mxu1 %v4743_v47  ;;  %481 = vmatprep.subr.mxu0 %v4750_v48  ;;  %10889 = vst [vmem:[#allocation18_spill] sm:$0xff] %v4895_v18  ;;  %10890 = vst [vmem:[#allocation19_spill] sm:$0xff] %v4902_v20 }
  0x1c   :  { %541 = vmatpush1.msra.mxu1 %v4755_v49  ;;  %482 = vmatpush1.msra.mxu0 %v4762_v50 }
  0x1d   :  { %542 = vmatprep.subr.mxu1 %v4767_v51  ;;  %483 = vmatprep.subr.mxu0 %v4774_v52 }
  0x1e   :  { %543 = vmatpush1.msra.mxu1 %v4779_v53  ;;  %484 = vmatpush1.msra.mxu0 %v4786_v54 }
  0x1f   :  { %544 = vmatprep.subr.mxu1 %v4791_v55  ;;  %485 = vmatprep.subr.mxu0 %v4798_v56  ;;  %v4985_v56 = vld [vmem:[%s10235_s4 + $0x1b0] sm:$0xff] }
  0x20   :  { %545 = vmatpush1.msra.mxu1 %v4803_v57  ;;  %486 = vmatpush1.msra.mxu0 %v4810_v58  ;;  %v4929_v58 = vld [vmem:[%s10235_s4 + $0x1f8] sm:$0xff]  ;;  %10905 = vst [vmem:[#allocation33_spill] sm:$0xff] %v4985_v56 }
  0x21   :  { %546 = vmatprep.subr.mxu1 %v4815_v59  ;;  %487 = vmatprep.subr.mxu0 %v4822_v60  ;;  %v4924_v60 = vld [vmem:[%s10235_s4 + $0x1e8] sm:$0xff]  ;;  %10895 = vst [vmem:[#allocation23_spill] sm:$0xff] %v4929_v58 }
  0x22   :  { %547 = vmatpush1.msra.mxu1 %v4827_v61  ;;  %488 = vmatpush1.msra.mxu0 %v4834_v62  ;;  %v10893_v62 = vmov 0.0   ;;  %10894 = vst [vmem:[#allocation22_spill] sm:$0xff] %v4924_v60 }
  0x23   :  { %548 = vmatprep.subr.mxu1 %v4839_v63  ;;  %522 = vmatmul.mubr.f32.vlgmr.msra.gmra.mxu0 %v10243_v3 }
  0x24   :  { %549 = vmatpush1.msra.mxu1 %v4846_v0  ;;  %236 = vmatprep.mubr.f32.mxu1 %v10243_v3 }
  0x25   :  { %550 = vmatprep.subr.mxu1 %v4853_v2  ;;  %691 = vmatprep.mubr.f32.mxu0 %v10243_v3 }
  0x26   :  { %551 = vmatpush1.msra.mxu1 %v4860_v5  ;;  %627 = vmatprep.subr.mxu0 %v4924_v60  ;;  %v4963_v60 = vld [vmem:[%s10235_s4 + $0x1d0] sm:$0xff] }
  0x27   :  { %552 = vmatprep.subr.mxu1 %v4867_v7  ;;  %3474 = vmatmul.mubr.msk.f32.gmra.mxu1 %vm69_vm1, %v4561_v16  ;;  %v4908_v16 = vld [vmem:[%s10233_s2 + $0x18] sm:$0xff]  ;;  %10901 = vst [vmem:[#allocation29_spill] sm:$0xff] %v4963_v60 }
  0x28   :  { %553 = vmatpush1.msra.mxu1 %v4873_v9  ;;  %592 = vmatprep.mubr.f32.mxu1 %v10243_v3  ;;  %10891 = vst [vmem:[#allocation20_spill] sm:$0xff] %v4908_v16  ;;  %v4914_v3 = vld [vmem:[%s10233_s2 + $0x10] sm:$0xff] }
  0x29   :  { %554 = vmatprep.subr.mxu1 %v4880_v13  ;;  %10892 = vst [vmem:[#allocation21_spill] sm:$0xff] %v4914_v3 }
  0x2a   :  { %555 = vmatpush1.msra.mxu1 %v4887_v15 }
  0x2b   :  { %556 = vmatprep.subr.mxu1 %v4895_v18  ;;  %v4968_v18 = vld [vmem:[%s10235_s4 + $0x1a8] sm:$0xff] }
  0x2c   :  { %557 = vmatpush1.msra.mxu1 %v4902_v20  ;;  %v4951_v20 = vld [vmem:[%s10235_s4 + $0x1d8] sm:$0xff]  ;;  %10902 = vst [vmem:[#allocation30_spill] sm:$0xff] %v4968_v18 }
  0x2d   :  { %558 = vmatprep.subr.mxu1 %v4908_v16  ;;  %v4934_v16 = vld [vmem:[%s10235_s4 + $0x1e0] sm:$0xff]  ;;  %10899 = vst [vmem:[#allocation27_spill] sm:$0xff] %v4951_v20 }
  0x2e   :  { %559 = vmatpush1.msra.mxu1 %v4914_v3  ;;  %10896 = vst [vmem:[#allocation24_spill] sm:$0xff] %v4934_v16  ;;  %v4941_v3 = vld [vmem:[%s10235_s4 + $0x1f0] sm:$0xff]  ;;  %628 = vmatpush1.msra.mxu0 %v4934_v16  ;;  %v4980_v16 = vld [vmem:[%s10235_s4 + $0x1a0] sm:$0xff] }
  0x2f   :  { %593 = vmatmul.mubr.f32.vlgmr.msra.gmra.mxu1 %v10893_v62  ;;  %698 = vmatprep.subr.mxu1 %v4929_v58  ;;  %10897 = vst [vmem:[#allocation25_spill] sm:$0xff] %v4941_v3  ;;  %v4958_v58 = vld [vmem:[%s10235_s4 + $0x1c0] sm:$0xff]  ;;  %10904 = vst [vmem:[#allocation32_spill] sm:$0xff] %v4980_v16 }
  0x30   :  { %762 = vmatprep.mubr.f32.mxu1 %v10893_v62  ;;  %v4946_v62 = vld [vmem:[%s10235_s4 + $0x1c8] sm:$0xff]  ;;  %699 = vmatpush1.msra.mxu1 %v4941_v3  ;;  %10900 = vst [vmem:[#allocation28_spill] sm:$0xff] %v4958_v58  ;;  %v4975_v3 = vld [vmem:[%s10235_s4 + $0x1b8] sm:$0xff] }
  0x31   :  { %10898 = vst [vmem:[#allocation26_spill] sm:$0xff] %v4946_v62  ;;  %629 = vmatprep.subr.mxu0 %v4946_v62  ;;  %700 = vmatprep.subr.mxu1 %v4951_v20  ;;  %10903 = vst [vmem:[#allocation31_spill] sm:$0xff] %v4975_v3  ;;  %v4992_v20 = vld [vmem:[%s10235_s4 + $0x188] sm:$0xff]  ;;  %v4997_v62 = vld [vmem:[%s10235_s4 + $0x198] sm:$0xff] }
  0x32   :  { %630 = vmatpush1.msra.mxu0 %v4958_v58  ;;  %701 = vmatpush1.msra.mxu1 %v4963_v60  ;;  %10906 = vst [vmem:[#allocation34_spill] sm:$0xff] %v4992_v20  ;;  %10907 = vst [vmem:[#allocation35_spill] sm:$0xff] %v4997_v62  ;;  %v5004_v58 = vld [vmem:[%s10235_s4 + $0x180] sm:$0xff]  ;;  %v5009_v60 = vld [vmem:[%s10235_s4 + $0x190] sm:$0xff] }
  0x33   :  { %631 = vmatprep.subr.mxu0 %v4968_v18  ;;  %702 = vmatprep.subr.mxu1 %v4975_v3  ;;  %10908 = vst [vmem:[#allocation36_spill] sm:$0xff] %v5004_v58  ;;  %10909 = vst [vmem:[#allocation37_spill] sm:$0xff] %v5009_v60  ;;  %v5020_v3 = vld [vmem:[%s10235_s4 + $0x168] sm:$0xff]  ;;  %v5025_v18 = vld [vmem:[%s10235_s4 + $0x178] sm:$0xff] }
  0x34   :  { %632 = vmatpush1.msra.mxu0 %v4980_v16  ;;  %703 = vmatpush1.msra.mxu1 %v4985_v56  ;;  %10910 = vst [vmem:[#allocation38_spill] sm:$0xff] %v5020_v3  ;;  %10911 = vst [vmem:[#allocation39_spill] sm:$0xff] %v5025_v18  ;;  %v5568_v56 = vld [vmem:[%s10235_s4 + $0x288] sm:$0xff]  ;;  %v5585_v16 = vld [vmem:[%s10235_s4 + $0x290] sm:$0xff] }
  0x35   :  { %633 = vmatprep.subr.mxu0 %v4992_v20  ;;  %704 = vmatprep.subr.mxu1 %v4997_v62  ;;  %v5534_v62 = vld [vmem:[%s10235_s4 + $0x2c0] sm:$0xff]  ;;  %v5551_v20 = vld [vmem:[%s10235_s4 + $0x2b8] sm:$0xff]  ;;  %11002 = vst [vmem:[#allocation130_spill] sm:$0xff] %v5568_v56  ;;  %11005 = vst [vmem:[#allocation133_spill] sm:$0xff] %v5585_v16 }
  0x36   :  { %634 = vmatpush1.msra.mxu0 %v5004_v58  ;;  %705 = vmatpush1.msra.mxu1 %v5009_v60  ;;  %v5032_v58 = vld [vmem:[%s10235_s4 + $0x160] sm:$0xff]  ;;  %v5037_v60 = vld [vmem:[%s10235_s4 + $0x170] sm:$0xff]  ;;  %10996 = vst [vmem:[#allocation124_spill] sm:$0xff] %v5534_v62  ;;  %10999 = vst [vmem:[#allocation127_spill] sm:$0xff] %v5551_v20 }
  0x37   :  { %635 = vmatprep.subr.mxu0 %v5020_v3  ;;  %706 = vmatprep.subr.mxu1 %v5025_v18  ;;  %10912 = vst [vmem:[#allocation40_spill] sm:$0xff] %v5032_v58  ;;  %10913 = vst [vmem:[#allocation41_spill] sm:$0xff] %v5037_v60  ;;  %v5044_v3 = vld [vmem:[%s10235_s4 + $0x148] sm:$0xff]  ;;  %v5049_v18 = vld [vmem:[%s10235_s4 + $0x158] sm:$0xff] }
  0x38   :  { %636 = vmatpush1.msra.mxu0 %v5032_v58  ;;  %707 = vmatpush1.msra.mxu1 %v5037_v60  ;;  %10914 = vst [vmem:[#allocation42_spill] sm:$0xff] %v5044_v3  ;;  %10915 = vst [vmem:[#allocation43_spill] sm:$0xff] %v5049_v18  ;;  %v5056_v58 = vld [vmem:[%s10235_s4 + $0x140] sm:$0xff]  ;;  %v5061_v60 = vld [vmem:[%s10235_s4 + $0x150] sm:$0xff] }
  0x39   :  { %637 = vmatprep.subr.mxu0 %v5044_v3  ;;  %708 = vmatprep.subr.mxu1 %v5049_v18  ;;  %10916 = vst [vmem:[#allocation44_spill] sm:$0xff] %v5056_v58  ;;  %10917 = vst [vmem:[#allocation45_spill] sm:$0xff] %v5061_v60  ;;  %v5068_v3 = vld [vmem:[%s10235_s4 + $0x128] sm:$0xff]  ;;  %v5073_v18 = vld [vmem:[%s10235_s4 + $0x138] sm:$0xff] }
  0x3a   :  { %638 = vmatpush1.msra.mxu0 %v5056_v58  ;;  %709 = vmatpush1.msra.mxu1 %v5061_v60  ;;  %10918 = vst [vmem:[#allocation46_spill] sm:$0xff] %v5068_v3  ;;  %10919 = vst [vmem:[#allocation47_spill] sm:$0xff] %v5073_v18  ;;  %v5080_v58 = vld [vmem:[%s10235_s4 + $0x120] sm:$0xff]  ;;  %v5085_v60 = vld [vmem:[%s10235_s4 + $0x130] sm:$0xff] }
  0x3b   :  { %639 = vmatprep.subr.mxu0 %v5068_v3  ;;  %710 = vmatprep.subr.mxu1 %v5073_v18  ;;  %10920 = vst [vmem:[#allocation48_spill] sm:$0xff] %v5080_v58  ;;  %10921 = vst [vmem:[#allocation49_spill] sm:$0xff] %v5085_v60  ;;  %v5092_v3 = vld [vmem:[%s10235_s4 + $0x108] sm:$0xff]  ;;  %v5097_v18 = vld [vmem:[%s10235_s4 + $0x118] sm:$0xff] }
  0x3c   :  { %640 = vmatpush1.msra.mxu0 %v5080_v58  ;;  %711 = vmatpush1.msra.mxu1 %v5085_v60  ;;  %10922 = vst [vmem:[#allocation50_spill] sm:$0xff] %v5092_v3  ;;  %10923 = vst [vmem:[#allocation51_spill] sm:$0xff] %v5097_v18  ;;  %v5104_v58 = vld [vmem:[%s10235_s4 + $0x100] sm:$0xff]  ;;  %v5109_v60 = vld [vmem:[%s10235_s4 + $0x110] sm:$0xff] }
  0x3d   :  { %641 = vmatprep.subr.mxu0 %v5092_v3  ;;  %712 = vmatprep.subr.mxu1 %v5097_v18  ;;  %10924 = vst [vmem:[#allocation52_spill] sm:$0xff] %v5104_v58  ;;  %10925 = vst [vmem:[#allocation53_spill] sm:$0xff] %v5109_v60  ;;  %v5116_v3 = vld [vmem:[%s10235_s4 + $0xe8] sm:$0xff]  ;;  %v5121_v18 = vld [vmem:[%s10235_s4 + $0xf8] sm:$0xff] }
  0x3e   :  { %642 = vmatpush1.msra.mxu0 %v5104_v58  ;;  %713 = vmatpush1.msra.mxu1 %v5109_v60  ;;  %10926 = vst [vmem:[#allocation54_spill] sm:$0xff] %v5116_v3  ;;  %10927 = vst [vmem:[#allocation55_spill] sm:$0xff] %v5121_v18  ;;  %v5128_v58 = vld [vmem:[%s10235_s4 + $0xe0] sm:$0xff]  ;;  %v5133_v60 = vld [vmem:[%s10235_s4 + $0xf0] sm:$0xff] }
  0x3f   :  { %643 = vmatprep.subr.mxu0 %v5116_v3  ;;  %714 = vmatprep.subr.mxu1 %v5121_v18  ;;  %10928 = vst [vmem:[#allocation56_spill] sm:$0xff] %v5128_v58  ;;  %10929 = vst [vmem:[#allocation57_spill] sm:$0xff] %v5133_v60  ;;  %v5140_v3 = vld [vmem:[%s10235_s4 + $0xc8] sm:$0xff]  ;;  %v5145_v18 = vld [vmem:[%s10235_s4 + $0xd8] sm:$0xff] }
  0x40   :  { %644 = vmatpush1.msra.mxu0 %v5128_v58  ;;  %715 = vmatpush1.msra.mxu1 %v5133_v60  ;;  %10930 = vst [vmem:[#allocation58_spill] sm:$0xff] %v5140_v3  ;;  %10931 = vst [vmem:[#allocation59_spill] sm:$0xff] %v5145_v18  ;;  %v5152_v58 = vld [vmem:[%s10235_s4 + $0xc0] sm:$0xff]  ;;  %v5157_v60 = vld [vmem:[%s10235_s4 + $0xd0] sm:$0xff] }
  0x41   :  { %645 = vmatprep.subr.mxu0 %v5140_v3  ;;  %716 = vmatprep.subr.mxu1 %v5145_v18  ;;  %10932 = vst [vmem:[#allocation60_spill] sm:$0xff] %v5152_v58  ;;  %10933 = vst [vmem:[#allocation61_spill] sm:$0xff] %v5157_v60  ;;  %v5164_v3 = vld [vmem:[%s10235_s4 + $0xa8] sm:$0xff]  ;;  %v5169_v18 = vld [vmem:[%s10235_s4 + $0xb8] sm:$0xff] }
  0x42   :  { %646 = vmatpush1.msra.mxu0 %v5152_v58  ;;  %717 = vmatpush1.msra.mxu1 %v5157_v60  ;;  %10934 = vst [vmem:[#allocation62_spill] sm:$0xff] %v5164_v3  ;;  %10935 = vst [vmem:[#allocation63_spill] sm:$0xff] %v5169_v18  ;;  %v5176_v58 = vld [vmem:[%s10235_s4 + $0xa0] sm:$0xff]  ;;  %v5181_v60 = vld [vmem:[%s10235_s4 + $0xb0] sm:$0xff] }
  0x43   :  { %647 = vmatprep.subr.mxu0 %v5164_v3  ;;  %718 = vmatprep.subr.mxu1 %v5169_v18  ;;  %10936 = vst [vmem:[#allocation64_spill] sm:$0xff] %v5176_v58  ;;  %10937 = vst [vmem:[#allocation65_spill] sm:$0xff] %v5181_v60  ;;  %v5188_v3 = vld [vmem:[%s10235_s4 + $0x88] sm:$0xff]  ;;  %v5193_v18 = vld [vmem:[%s10235_s4 + $0x98] sm:$0xff] }
  0x44   :  { %648 = vmatpush1.msra.mxu0 %v5176_v58  ;;  %719 = vmatpush1.msra.mxu1 %v5181_v60  ;;  %10938 = vst [vmem:[#allocation66_spill] sm:$0xff] %v5188_v3  ;;  %10939 = vst [vmem:[#allocation67_spill] sm:$0xff] %v5193_v18  ;;  %v5200_v58 = vld [vmem:[%s10235_s4 + $0x80] sm:$0xff]  ;;  %v5205_v60 = vld [vmem:[%s10235_s4 + $0x90] sm:$0xff] }
  0x45   :  { %649 = vmatprep.subr.mxu0 %v5188_v3  ;;  %720 = vmatprep.subr.mxu1 %v5193_v18  ;;  %10940 = vst [vmem:[#allocation68_spill] sm:$0xff] %v5200_v58  ;;  %10941 = vst [vmem:[#allocation69_spill] sm:$0xff] %v5205_v60  ;;  %v5212_v3 = vld [vmem:[%s10235_s4 + $0x68] sm:$0xff]  ;;  %v5217_v18 = vld [vmem:[%s10235_s4 + $0x78] sm:$0xff] }
  0x46   :  { %650 = vmatpush1.msra.mxu0 %v5200_v58  ;;  %721 = vmatpush1.msra.mxu1 %v5205_v60  ;;  %10942 = vst [vmem:[#allocation70_spill] sm:$0xff] %v5212_v3  ;;  %10943 = vst [vmem:[#allocation71_spill] sm:$0xff] %v5217_v18  ;;  %v5224_v58 = vld [vmem:[%s10235_s4 + $0x60] sm:$0xff]  ;;  %v5229_v60 = vld [vmem:[%s10235_s4 + $0x70] sm:$0xff] }
  0x47   :  { %651 = vmatprep.subr.mxu0 %v5212_v3  ;;  %722 = vmatprep.subr.mxu1 %v5217_v18  ;;  %10944 = vst [vmem:[#allocation72_spill] sm:$0xff] %v5224_v58  ;;  %10945 = vst [vmem:[#allocation73_spill] sm:$0xff] %v5229_v60  ;;  %v5236_v3 = vld [vmem:[%s10235_s4 + $0x48] sm:$0xff]  ;;  %v5241_v18 = vld [vmem:[%s10235_s4 + $0x58] sm:$0xff] }
  0x48   :  { %652 = vmatpush1.msra.mxu0 %v5224_v58  ;;  %723 = vmatpush1.msra.mxu1 %v5229_v60  ;;  %10946 = vst [vmem:[#allocation74_spill] sm:$0xff] %v5236_v3  ;;  %10947 = vst [vmem:[#allocation75_spill] sm:$0xff] %v5241_v18  ;;  %v5248_v58 = vld [vmem:[%s10235_s4 + $0x40] sm:$0xff]  ;;  %v5253_v60 = vld [vmem:[%s10235_s4 + $0x50] sm:$0xff] }
  0x49   :  { %653 = vmatprep.subr.mxu0 %v5236_v3  ;;  %724 = vmatprep.subr.mxu1 %v5241_v18  ;;  %10948 = vst [vmem:[#allocation76_spill] sm:$0xff] %v5248_v58  ;;  %10949 = vst [vmem:[#allocation77_spill] sm:$0xff] %v5253_v60  ;;  %v5260_v3 = vld [vmem:[%s10235_s4 + $0x28] sm:$0xff]  ;;  %v5265_v18 = vld [vmem:[%s10235_s4 + $0x38] sm:$0xff] }
  0x4a   :  { %654 = vmatpush1.msra.mxu0 %v5248_v58  ;;  %725 = vmatpush1.msra.mxu1 %v5253_v60  ;;  %10950 = vst [vmem:[#allocation78_spill] sm:$0xff] %v5260_v3  ;;  %10951 = vst [vmem:[#allocation79_spill] sm:$0xff] %v5265_v18  ;;  %v5272_v58 = vld [vmem:[%s10235_s4 + $0x20] sm:$0xff]  ;;  %v5277_v60 = vld [vmem:[%s10235_s4 + $0x30] sm:$0xff] }
  0x4b   :  { %655 = vmatprep.subr.mxu0 %v5260_v3  ;;  %726 = vmatprep.subr.mxu1 %v5265_v18  ;;  %10952 = vst [vmem:[#allocation80_spill] sm:$0xff] %v5272_v58  ;;  %10953 = vst [vmem:[#allocation81_spill] sm:$0xff] %v5277_v60  ;;  %v5284_v3 = vld [vmem:[%s10235_s4 + $0x8] sm:$0xff]  ;;  %v5289_v18 = vld [vmem:[%s10235_s4 + $0x18] sm:$0xff] }
  0x4c   :  { %656 = vmatpush1.msra.mxu0 %v5272_v58  ;;  %727 = vmatpush1.msra.mxu1 %v5277_v60  ;;  %10954 = vst [vmem:[#allocation82_spill] sm:$0xff] %v5284_v3  ;;  %10955 = vst [vmem:[#allocation83_spill] sm:$0xff] %v5289_v18  ;;  %v5296_v58 = vld [vmem:[%s10235_s4] sm:$0xff]  ;;  %v5301_v60 = vld [vmem:[%s10235_s4 + $0x10] sm:$0xff] }
  0x4d   :  { %657 = vmatprep.subr.mxu0 %v5284_v3  ;;  %728 = vmatprep.subr.mxu1 %v5289_v18  ;;  %10956 = vst [vmem:[#allocation84_spill] sm:$0xff] %v5296_v58  ;;  %10957 = vst [vmem:[#allocation85_spill] sm:$0xff] %v5301_v60  ;;  %v5308_v3 = vld [vmem:[%s10235_s4 + $0x3e8] sm:$0xff]  ;;  %v5313_v18 = vld [vmem:[%s10235_s4 + $0x3f8] sm:$0xff] }
  0x4e   :  { %658 = vmatpush1.msra.mxu0 %v5296_v58  ;;  %729 = vmatpush1.msra.mxu1 %v5301_v60  ;;  %10958 = vst [vmem:[#allocation86_spill] sm:$0xff] %v5308_v3  ;;  %10959 = vst [vmem:[#allocation87_spill] sm:$0xff] %v5313_v18  ;;  %v5320_v58 = vld [vmem:[%s10235_s4 + $0x3e0] sm:$0xff]  ;;  %v5325_v60 = vld [vmem:[%s10235_s4 + $0x3f0] sm:$0xff] }
  0x4f   :  { %659 = vmatprep.subr.mxu0 %v5308_v3  ;;  %730 = vmatprep.subr.mxu1 %v5313_v18  ;;  %10960 = vst [vmem:[#allocation88_spill] sm:$0xff] %v5320_v58  ;;  %10961 = vst [vmem:[#allocation89_spill] sm:$0xff] %v5325_v60  ;;  %v5332_v3 = vld [vmem:[%s10235_s4 + $0x3c8] sm:$0xff]  ;;  %v5337_v18 = vld [vmem:[%s10235_s4 + $0x3d8] sm:$0xff] }
  0x50   :  { %660 = vmatpush2.msra.mxu0 %v5320_v58  ;;  %731 = vmatpush2.msra.mxu1 %v5325_v60  ;;  %10962 = vst [vmem:[#allocation90_spill] sm:$0xff] %v5332_v3  ;;  %10963 = vst [vmem:[#allocation91_spill] sm:$0xff] %v5337_v18  ;;  %v5344_v58 = vld [vmem:[%s10235_s4 + $0x3c0] sm:$0xff]  ;;  %v5349_v60 = vld [vmem:[%s10235_s4 + $0x3d0] sm:$0xff] }
  0x51   :  { %661 = vmatprep.subr.mxu0 %v5332_v3  ;;  %732 = vmatprep.subr.mxu1 %v5337_v18  ;;  %10964 = vst [vmem:[#allocation92_spill] sm:$0xff] %v5344_v58  ;;  %10965 = vst [vmem:[#allocation93_spill] sm:$0xff] %v5349_v60  ;;  %v5356_v3 = vld [vmem:[%s10235_s4 + $0x3a8] sm:$0xff]  ;;  %v5361_v18 = vld [vmem:[%s10235_s4 + $0x3b8] sm:$0xff] }
  0x52   :  { %662 = vmatpush2.msra.mxu0 %v5344_v58  ;;  %733 = vmatpush2.msra.mxu1 %v5349_v60  ;;  %10966 = vst [vmem:[#allocation94_spill] sm:$0xff] %v5356_v3  ;;  %10967 = vst [vmem:[#allocation95_spill] sm:$0xff] %v5361_v18  ;;  %v5368_v58 = vld [vmem:[%s10235_s4 + $0x3a0] sm:$0xff]  ;;  %v5373_v60 = vld [vmem:[%s10235_s4 + $0x3b0] sm:$0xff] }
  0x53   :  { %663 = vmatprep.subr.mxu0 %v5356_v3  ;;  %734 = vmatprep.subr.mxu1 %v5361_v18  ;;  %10968 = vst [vmem:[#allocation96_spill] sm:$0xff] %v5368_v58  ;;  %10969 = vst [vmem:[#allocation97_spill] sm:$0xff] %v5373_v60  ;;  %v5380_v3 = vld [vmem:[%s10235_s4 + $0x388] sm:$0xff]  ;;  %v5385_v18 = vld [vmem:[%s10235_s4 + $0x398] sm:$0xff] }
  0x54   :  { %664 = vmatpush2.msra.mxu0 %v5368_v58  ;;  %735 = vmatpush2.msra.mxu1 %v5373_v60  ;;  %10970 = vst [vmem:[#allocation98_spill] sm:$0xff] %v5380_v3  ;;  %10971 = vst [vmem:[#allocation99_spill] sm:$0xff] %v5385_v18  ;;  %v5392_v58 = vld [vmem:[%s10235_s4 + $0x380] sm:$0xff]  ;;  %v5397_v60 = vld [vmem:[%s10235_s4 + $0x390] sm:$0xff] }
  0x55   :  { %665 = vmatprep.subr.mxu0 %v5380_v3  ;;  %736 = vmatprep.subr.mxu1 %v5385_v18  ;;  %10972 = vst [vmem:[#allocation100_spill] sm:$0xff] %v5392_v58  ;;  %10973 = vst [vmem:[#allocation101_spill] sm:$0xff] %v5397_v60  ;;  %v5404_v3 = vld [vmem:[%s10235_s4 + $0x368] sm:$0xff]  ;;  %v5409_v18 = vld [vmem:[%s10235_s4 + $0x378] sm:$0xff] }
  0x56   :  { %666 = vmatpush2.msra.mxu0 %v5392_v58  ;;  %737 = vmatpush2.msra.mxu1 %v5397_v60  ;;  %10974 = vst [vmem:[#allocation102_spill] sm:$0xff] %v5404_v3  ;;  %10975 = vst [vmem:[#allocation103_spill] sm:$0xff] %v5409_v18  ;;  %v5416_v58 = vld [vmem:[%s10235_s4 + $0x360] sm:$0xff]  ;;  %v5421_v60 = vld [vmem:[%s10235_s4 + $0x370] sm:$0xff] }
  0x57   :  { %667 = vmatprep.subr.mxu0 %v5404_v3  ;;  %738 = vmatprep.subr.mxu1 %v5409_v18  ;;  %10976 = vst [vmem:[#allocation104_spill] sm:$0xff] %v5416_v58  ;;  %10977 = vst [vmem:[#allocation105_spill] sm:$0xff] %v5421_v60  ;;  %v5428_v3 = vld [vmem:[%s10235_s4 + $0x348] sm:$0xff]  ;;  %v5433_v18 = vld [vmem:[%s10235_s4 + $0x358] sm:$0xff] }
  0x58   :  { %668 = vmatpush2.msra.mxu0 %v5416_v58  ;;  %739 = vmatpush2.msra.mxu1 %v5421_v60  ;;  %10978 = vst [vmem:[#allocation106_spill] sm:$0xff] %v5428_v3  ;;  %10979 = vst [vmem:[#allocation107_spill] sm:$0xff] %v5433_v18  ;;  %v5440_v58 = vld [vmem:[%s10235_s4 + $0x340] sm:$0xff]  ;;  %v5445_v60 = vld [vmem:[%s10235_s4 + $0x350] sm:$0xff] }
  0x59   :  { %669 = vmatprep.subr.mxu0 %v5428_v3  ;;  %740 = vmatprep.subr.mxu1 %v5433_v18  ;;  %10980 = vst [vmem:[#allocation108_spill] sm:$0xff] %v5440_v58  ;;  %10981 = vst [vmem:[#allocation109_spill] sm:$0xff] %v5445_v60  ;;  %v5452_v3 = vld [vmem:[%s10235_s4 + $0x328] sm:$0xff]  ;;  %v5457_v18 = vld [vmem:[%s10235_s4 + $0x338] sm:$0xff] }
  0x5a   :  { %670 = vmatpush2.msra.mxu0 %v5440_v58  ;;  %741 = vmatpush2.msra.mxu1 %v5445_v60  ;;  %10982 = vst [vmem:[#allocation110_spill] sm:$0xff] %v5452_v3  ;;  %10983 = vst [vmem:[#allocation111_spill] sm:$0xff] %v5457_v18  ;;  %v5464_v58 = vld [vmem:[%s10235_s4 + $0x320] sm:$0xff]  ;;  %v5469_v60 = vld [vmem:[%s10235_s4 + $0x330] sm:$0xff] }
  0x5b   :  { %671 = vmatprep.subr.mxu0 %v5452_v3  ;;  %742 = vmatprep.subr.mxu1 %v5457_v18  ;;  %10984 = vst [vmem:[#allocation112_spill] sm:$0xff] %v5464_v58  ;;  %10985 = vst [vmem:[#allocation113_spill] sm:$0xff] %v5469_v60  ;;  %v5476_v3 = vld [vmem:[%s10235_s4 + $0x308] sm:$0xff]  ;;  %v5481_v18 = vld [vmem:[%s10235_s4 + $0x318] sm:$0xff] }
  0x5c   :  { %672 = vmatpush2.msra.mxu0 %v5464_v58  ;;  %743 = vmatpush2.msra.mxu1 %v5469_v60  ;;  %10986 = vst [vmem:[#allocation114_spill] sm:$0xff] %v5476_v3  ;;  %10987 = vst [vmem:[#allocation115_spill] sm:$0xff] %v5481_v18  ;;  %v5488_v58 = vld [vmem:[%s10235_s4 + $0x300] sm:$0xff]  ;;  %v5493_v60 = vld [vmem:[%s10235_s4 + $0x310] sm:$0xff] }
  0x5d   :  { %673 = vmatprep.subr.mxu0 %v5476_v3  ;;  %744 = vmatprep.subr.mxu1 %v5481_v18  ;;  %10988 = vst [vmem:[#allocation116_spill] sm:$0xff] %v5488_v58  ;;  %10989 = vst [vmem:[#allocation117_spill] sm:$0xff] %v5493_v60  ;;  %v5500_v3 = vld [vmem:[%s10235_s4 + $0x2e8] sm:$0xff]  ;;  %v5505_v18 = vld [vmem:[%s10235_s4 + $0x2f8] sm:$0xff] }
  0x5e   :  { %674 = vmatpush2.msra.mxu0 %v5488_v58  ;;  %745 = vmatpush2.msra.mxu1 %v5493_v60  ;;  %10990 = vst [vmem:[#allocation118_spill] sm:$0xff] %v5500_v3  ;;  %10991 = vst [vmem:[#allocation119_spill] sm:$0xff] %v5505_v18  ;;  %v5512_v58 = vld [vmem:[%s10235_s4 + $0x2e0] sm:$0xff]  ;;  %v5517_v60 = vld [vmem:[%s10235_s4 + $0x2f0] sm:$0xff] }
  0x5f   :  { %675 = vmatprep.subr.mxu0 %v5500_v3  ;;  %746 = vmatprep.subr.mxu1 %v5505_v18  ;;  %10992 = vst [vmem:[#allocation120_spill] sm:$0xff] %v5512_v58  ;;  %10993 = vst [vmem:[#allocation121_spill] sm:$0xff] %v5517_v60  ;;  %v5524_v3 = vld [vmem:[%s10235_s4 + $0x2c8] sm:$0xff]  ;;  %v5529_v18 = vld [vmem:[%s10235_s4 + $0x2d8] sm:$0xff] }
  0x60   :  { %676 = vmatpush2.msra.mxu0 %v5512_v58  ;;  %747 = vmatpush2.msra.mxu1 %v5517_v60  ;;  %10994 = vst [vmem:[#allocation122_spill] sm:$0xff] %v5524_v3  ;;  %10995 = vst [vmem:[#allocation123_spill] sm:$0xff] %v5529_v18  ;;  %v5541_v60 = vld [vmem:[%s10235_s4 + $0x2d0] sm:$0xff]  ;;  %v5546_v58 = vld [vmem:[%s10235_s4 + $0x2a8] sm:$0xff] }
  0x61   :  { %677 = vmatprep.subr.mxu0 %v5524_v3  ;;  %748 = vmatprep.subr.mxu1 %v5529_v18  ;;  %10997 = vst [vmem:[#allocation125_spill] sm:$0xff] %v5541_v60  ;;  %10998 = vst [vmem:[#allocation126_spill] sm:$0xff] %v5546_v58  ;;  %v5558_v18 = vld [vmem:[%s10235_s4 + $0x2a0] sm:$0xff]  ;;  %v5563_v3 = vld [vmem:[%s10235_s4 + $0x2b0] sm:$0xff] }
  0x62   :  { %678 = vmatpush2.msra.mxu0 %v5534_v62  ;;  %749 = vmatpush2.msra.mxu1 %v5541_v60  ;;  %11000 = vst [vmem:[#allocation128_spill] sm:$0xff] %v5558_v18  ;;  %11001 = vst [vmem:[#allocation129_spill] sm:$0xff] %v5563_v3  ;;  %v5575_v60 = vld [vmem:[%s10235_s4 + $0x298] sm:$0xff]  ;;  %v5580_v62 = vld [vmem:[%s10235_s4 + $0x280] sm:$0xff] }
  0x63   :  { %679 = vmatprep.subr.mxu0 %v5546_v58  ;;  %750 = vmatprep.subr.mxu1 %v5551_v20  ;;  %11003 = vst [vmem:[#allocation131_spill] sm:$0xff] %v5575_v60  ;;  %11004 = vst [vmem:[#allocation132_spill] sm:$0xff] %v5580_v62  ;;  %v5592_v20 = vld [vmem:[%s10235_s4 + $0x268] sm:$0xff]  ;;  %v5597_v58 = vld [vmem:[%s10235_s4 + $0x278] sm:$0xff] }
  0x64   :  { %680 = vmatpush2.msra.mxu0 %v5558_v18  ;;  %751 = vmatpush2.msra.mxu1 %v5563_v3  ;;  %11006 = vst [vmem:[#allocation134_spill] sm:$0xff] %v5592_v20  ;;  %11007 = vst [vmem:[#allocation135_spill] sm:$0xff] %v5597_v58  ;;  %v5604_v18 = vld [vmem:[%s10235_s4 + $0x260] sm:$0xff]  ;;  %v5609_v3 = vld [vmem:[%s10235_s4 + $0x270] sm:$0xff] }
  0x65   :  { %681 = vmatprep.subr.mxu0 %v5568_v56  ;;  %752 = vmatprep.subr.mxu1 %v5575_v60  ;;  %11008 = vst [vmem:[#allocation136_spill] sm:$0xff] %v5604_v18  ;;  %11009 = vst [vmem:[#allocation137_spill] sm:$0xff] %v5609_v3  ;;  %v5616_v56 = vld [vmem:[%s10235_s4 + $0x248] sm:$0xff]  ;;  %v5621_v60 = vld [vmem:[%s10235_s4 + $0x258] sm:$0xff] }
  0x66   :  { %682 = vmatpush2.msra.mxu0 %v5580_v62  ;;  %753 = vmatpush2.msra.mxu1 %v5585_v16  ;;  %11010 = vst [vmem:[#allocation138_spill] sm:$0xff] %v5616_v56  ;;  %11011 = vst [vmem:[#allocation139_spill] sm:$0xff] %v5621_v60  ;;  %v5628_v62 = vld [vmem:[%s10235_s4 + $0x240] sm:$0xff]  ;;  %v5633_v16 = vld [vmem:[%s10235_s4 + $0x250] sm:$0xff] }
  0x67   :  { %683 = vmatprep.subr.mxu0 %v5592_v20  ;;  %754 = vmatprep.subr.mxu1 %v5597_v58  ;;  %11012 = vst [vmem:[#allocation140_spill] sm:$0xff] %v5628_v62  ;;  %11013 = vst [vmem:[#allocation141_spill] sm:$0xff] %v5633_v16  ;;  %v5640_v20 = vld [vmem:[%s10235_s4 + $0x228] sm:$0xff]  ;;  %v5645_v58 = vld [vmem:[%s10235_s4 + $0x238] sm:$0xff] }
  0x68   :  { %684 = vmatpush2.msra.mxu0 %v5604_v18  ;;  %755 = vmatpush2.msra.mxu1 %v5609_v3  ;;  %11014 = vst [vmem:[#allocation142_spill] sm:$0xff] %v5640_v20  ;;  %11015 = vst [vmem:[#allocation143_spill] sm:$0xff] %v5645_v58  ;;  %v5652_v18 = vld [vmem:[%s10235_s4 + $0x220] sm:$0xff]  ;;  %v5657_v3 = vld [vmem:[%s10235_s4 + $0x230] sm:$0xff] }
  0x69   :  { %685 = vmatprep.subr.mxu0 %v5616_v56  ;;  %756 = vmatprep.subr.mxu1 %v5621_v60  ;;  %11016 = vst [vmem:[#allocation144_spill] sm:$0xff] %v5652_v18  ;;  %11017 = vst [vmem:[#allocation145_spill] sm:$0xff] %v5657_v3  ;;  %v5664_v56 = vld [vmem:[%s10235_s4 + $0x208] sm:$0xff]  ;;  %v5669_v60 = vld [vmem:[%s10235_s4 + $0x218] sm:$0xff] }
  0x6a   :  { %686 = vmatpush2.msra.mxu0 %v5628_v62  ;;  %757 = vmatpush2.msra.mxu1 %v5633_v16  ;;  %11018 = vst [vmem:[#allocation146_spill] sm:$0xff] %v5664_v56  ;;  %11019 = vst [vmem:[#allocation147_spill] sm:$0xff] %v5669_v60  ;;  %v5676_v62 = vld [vmem:[%s10235_s4 + $0x200] sm:$0xff]  ;;  %v5681_v16 = vld [vmem:[%s10235_s4 + $0x210] sm:$0xff] }
  0x6b   :  { %687 = vmatprep.subr.mxu0 %v5640_v20  ;;  %758 = vmatprep.subr.mxu1 %v5645_v58  ;;  %11020 = vst [vmem:[#allocation148_spill] sm:$0xff] %v5676_v62  ;;  %11021 = vst [vmem:[#allocation149_spill] sm:$0xff] %v5681_v16  ;;  %v49_v58 = vlaneseq }
  0x6c   :  { %688 = vmatpush2.msra.mxu0 %v5652_v18  ;;  %759 = vmatpush2.msra.mxu1 %v5657_v3  ;;  %v47_v3 = vld [vmem:[%s10236_s3] sm:$0xf] }
  0x6d   :  { %689 = vmatprep.subr.mxu0 %v5664_v56  ;;  %760 = vmatprep.subr.mxu1 %v5669_v60  ;;  %v5691_v20 = vshrl.u32 %v49_v58, 7 }
  0x6e   :  { %690 = vmatpush2.msra.mxu0 %v5676_v62  ;;  %761 = vmatpush2.msra.mxu1 %v5681_v16 }
  0x6f   :  { %793 = vmatprep.subr.mxu0 %v4491_v1  ;;  %864 = vmatprep.subr.mxu1 %v4600_v23  ;;  %v10390_v15 = vsub.s32 0, %v5691_v20  ;;  %v10392_v60 = vsub.s32 1, %v5691_v20  ;;  %v10398_v52 = vsub.s32 2, %v5691_v20  ;;  %v10402_v50 = vsub.s32 3, %v5691_v20 }
  0x71   :  { %v52_v16 = vrot.slane %v47_v3, %v10390_v15  ;;  %v56_v1 = vrot.slane %v47_v3, %v10392_v60 }
  0xc6   :  { %v155_v56 = vpop.f32.mrf.mxu1 }
  0xc7   :  { %v5707_v9 = vadd.f32 %v155_v56, %v52_v16  ;;  %v64_v56 = vrot.slane %v47_v3, %v10402_v50 }
  0xc8   :  { %v157_v18 = vpop.f32.mrf.mxu1 }
  0xc9   :  { %11024 = vst [vmem:[#allocation152_spill] sm:$0xff] %v5707_v9  ;;  %v5710_v48 = vadd.f32 %v157_v18, %v56_v1 }
  0xca   :  { %v161_v62 = vpop.f32.mrf.mxu1 }
  0xcb   :  { %v5702_v23 = vadd.f32 %v161_v62, %v52_v16  ;;  %11025 = vst [vmem:[#allocation153_spill] sm:$0xff] %v5710_v48  ;;  %v60_v62 = vrot.slane %v47_v3, %v10398_v52 }
  0xcc   :  { %v163_v58 = vpop.f32.mrf.mxu1 }
  0xcd   :  { %11022 = vst [vmem:[#allocation150_spill] sm:$0xff] %v5702_v23  ;;  %v5704_v54 = vadd.f32 %v163_v58, %v56_v1 }
  0xcf   :  { %11023 = vst [vmem:[#allocation151_spill] sm:$0xff] %v5704_v54  ;;  %v232_v13 = vpop.f32.mrf.mxu1 }
  0xd0   :  { %v5725_v2 = vadd.f32 %v232_v13, %v60_v62 }
  0xd1   :  { %v234_v15 = vpop.f32.mrf.mxu1 }
  0xd2   :  { %11028 = vst [vmem:[#allocation156_spill] sm:$0xff] %v5725_v2 }
  0xe3   :  { %v523_v7 = vpop.f32.mrf.mxu0 }
  0xe4   :  { %v599_v5 = vadd.f32 %v523_v7, %v5707_v9  ;;  %v5722_v9 = vadd.f32 %v234_v15, %v64_v56 }
  0xe5   :  { %v525_v60 = vpop.f32.mrf.mxu0 }
  0xe6   :  { %v3475_v23 = vmul.f32 -1.442695, %v599_v5  ;;  %v600_v58 = vadd.f32 %v525_v60, %v5710_v48 }
  0xe7   :  { %v238_v54 = vpop.f32.mrf.mxu1 }
  0xe8   :  { %v5718_v16 = vadd.f32 %v238_v54, %v60_v62  ;;  %3596 = vpow2.f32 %v3475_v23  ;;  %v3476_v46 = vmul.f32 -1.442695, %v600_v58 }
  0xe9   :  { %v240_v18 = vpop.f32.mrf.mxu1 }
  0xea   :  { %11026 = vst [vmem:[#allocation154_spill] sm:$0xff] %v5718_v16  ;;  %v5720_v1 = vadd.f32 %v240_v18, %v64_v56  ;;  %3598 = vpow2.f32 %v3476_v46 }
  0xec   :  { %11027 = vst [vmem:[#allocation155_spill] sm:$0xff] %v5720_v1  ;;  %v6276_v1 = vld [vmem:[%s10233_s2 + $0x70] sm:$0xff] }
  0xef   :  { %v594_v7 = vpop.f32.mrf.mxu1 }
  0xf0   :  { %v601_v3 = vadd.f32 %v594_v7, %v5725_v2 }
  0xf1   :  { %v596_v52 = vpop.f32.mrf.mxu1 }
  0xf2   :  { %v602_v5 = vadd.f32 %v596_v52, %v5722_v9 }
  0xf4   :  { %v3477_v60 = vmul.f32 -1.442695, %v602_v5  ;;  %v11074_v5 = vld [vmem:[#allocation47_spill] sm:$0xff] }
  0xf5   :  { %v3597_v48 = vpop.eup %3596 }
  0xf6   :  { %v606_v54 = vadd.f32 1.0, %v3597_v48  ;;  %3600 = vpow2.f32 %v3477_v60  ;;  %v11075_v60 = vld [vmem:[#allocation48_spill] sm:$0xff] }
  0xf7   :  { %v3599_v50 = vpop.eup %3598 }
  0xf8   :  { %3602 = vrcp.f32 %v606_v54  ;;  %v612_v23 = vadd.f32 1.0, %v3599_v50  ;;  %v11064_v50 = vld [vmem:[#allocation37_spill] sm:$0xff]  ;;  %v11077_v54 = vld [vmem:[#allocation50_spill] sm:$0xff] }
  0xf9   :  { %3604 = vtanh.f32 %v601_v3  ;;  %v11076_v3 = vld [vmem:[#allocation49_spill] sm:$0xff] }
  0xfa   :  { %3606 = vrcp.f32 %v612_v23  ;;  %v11078_v23 = vld [vmem:[#allocation51_spill] sm:$0xff] }
 0x103   :  { %v3601_v46 = vpop.eup %3600 }
 0x104   :  { %v619_v18 = vadd.f32 1.0, %v3601_v46  ;;  %v11079_v46 = vld [vmem:[#allocation52_spill] sm:$0xff] }
 0x105   :  { %v3603_v58 = vpop.eup %3602 }
 0x106   :  { %v3605_v15 = vpop.eup %3604  ;;  %3608 = vrcp.f32 %v619_v18  ;;  %v11083_v18 = vld [vmem:[#allocation56_spill] sm:$0xff] }
 0x107   :  { %v3607_v56 = vpop.eup %3606  ;;  %v623_v52 = vmul.f32 %v3605_v15, %v3603_v58  ;;  %v11080_v58 = vld [vmem:[#allocation53_spill] sm:$0xff]  ;;  %v11081_v15 = vld [vmem:[#allocation54_spill] sm:$0xff] }
 0x108   :  { %v622_v16 = vmul.f32 0.0, %v3607_v56  ;;  %v11082_v56 = vld [vmem:[#allocation55_spill] sm:$0xff] }
 0x10a   :  { %v5728_v13 = vadd.f32 %v623_v52, %v622_v16  ;;  %v11073_v16 = vld [vmem:[#allocation46_spill] sm:$0xff]  ;;  %v11084_v52 = vld [vmem:[#allocation57_spill] sm:$0xff] }
 0x10c   :  { %3610 = vtanh.f32 %v5728_v13 }
 0x113   :  { %v3609_v62 = vpop.eup %3608 }
 0x119   :  { %v3611_v48 = vpop.eup %3610 }
 0x11a   :  { %v5731_v7 = vmul.f32 %v3611_v48, %v3609_v62  ;;  %v11085_v62 = vld [vmem:[#allocation58_spill] sm:$0xff]  ;;  %v11086_v48 = vld [vmem:[#allocation59_spill] sm:$0xff] }
 0x11c   :  { %692 = vmatmul.mubr.f32.vlgmr.msra.gmra.mxu0 %v5731_v7  ;;  %763 = vmatmul.mubr.f32.vlgmr.msra.gmra.mxu1 %v5731_v7 }
 0x11d   :  { %794 = vmatpush1.msra.mxu0 %v4503_v4  ;;  %865 = vmatpush1.msra.mxu1 %v4611_v25  ;;  %v11029_v4 = vld [vmem:[#allocation12_spill] sm:$0xff]  ;;  %v11041_v25 = vld [vmem:[#allocation18_spill] sm:$0xff] }
 0x11e   :  { %795 = vmatprep.subr.mxu0 %v4511_v6  ;;  %866 = vmatprep.subr.mxu1 %v4623_v27  ;;  %v11030_v6 = vld [vmem:[#allocation3_spill] sm:$0xff] }
 0x11f   :  { %796 = vmatpush1.msra.mxu0 %v4521_v8  ;;  %867 = vmatpush1.msra.mxu1 %v4635_v29  ;;  %v11031_v8 = vld [vmem:[#allocation13_spill] sm:$0xff]  ;;  %v11043_v27 = vld [vmem:[#allocation19_spill] sm:$0xff]  ;;  %v11045_v29 = vld [vmem:[#allocation20_spill] sm:$0xff] }
 0x120   :  { %797 = vmatprep.subr.mxu0 %v4530_v10  ;;  %868 = vmatprep.subr.mxu1 %v4647_v31  ;;  %v11032_v10 = vld [vmem:[#allocation4_spill] sm:$0xff]  ;;  %v11047_v31 = vmov 0.0   ;;  %11197 = vst [vmem:[#allocation19_spill] sm:$0xff] %v6276_v1 }
 0x121   :  { %798 = vmatpush1.msra.mxu0 %v4535_v11  ;;  %869 = vmatpush1.msra.mxu1 %v4659_v33  ;;  %v11033_v11 = vld [vmem:[#allocation14_spill] sm:$0xff] }
 0x122   :  { %799 = vmatprep.subr.mxu0 %v4541_v12  ;;  %870 = vmatprep.subr.mxu1 %v4671_v35  ;;  %v11034_v12 = vld [vmem:[#allocation5_spill] sm:$0xff]  ;;  %v11049_v33 = vld [vmem:[#allocation22_spill] sm:$0xff]  ;;  %v11051_v35 = vld [vmem:[#allocation24_spill] sm:$0xff] }
 0x123   :  { %800 = vmatpush1.msra.mxu0 %v4551_v14  ;;  %871 = vmatpush1.msra.mxu1 %v4683_v37  ;;  %v11035_v14 = vld [vmem:[#allocation15_spill] sm:$0xff]  ;;  %v11053_v37 = vld [vmem:[#allocation26_spill] sm:$0xff] }
 0x124   :  { %801 = vmatprep.subr.mxu0 %v4566_v17  ;;  %872 = vmatprep.subr.mxu1 %v4695_v39  ;;  %v11036_v17 = vld [vmem:[#allocation6_spill] sm:$0xff]  ;;  %v11055_v39 = vld [vmem:[#allocation28_spill] sm:$0xff] }
 0x125   :  { %802 = vmatpush1.msra.mxu0 %v4576_v19  ;;  %873 = vmatpush1.msra.mxu1 %v4707_v41  ;;  %v11037_v19 = vld [vmem:[#allocation16_spill] sm:$0xff]  ;;  %v11057_v41 = vld [vmem:[#allocation30_spill] sm:$0xff] }
 0x126   :  { %803 = vmatprep.subr.mxu0 %v4586_v21  ;;  %874 = vmatprep.subr.mxu1 %v4719_v43  ;;  %v11038_v21 = vld [vmem:[#allocation7_spill] sm:$0xff]  ;;  %v11059_v43 = vld [vmem:[#allocation32_spill] sm:$0xff] }
 0x127   :  { %804 = vmatpush1.msra.mxu0 %v4594_v22  ;;  %875 = vmatpush1.msra.mxu1 %v4731_v45  ;;  %v11039_v22 = vld [vmem:[#allocation17_spill] sm:$0xff]  ;;  %v11061_v45 = vld [vmem:[#allocation34_spill] sm:$0xff] }
 0x128   :  { %805 = vmatprep.subr.mxu0 %v4606_v24  ;;  %876 = vmatprep.subr.mxu1 %v4743_v47  ;;  %v11040_v24 = vld [vmem:[#allocation8_spill] sm:$0xff]  ;;  %v11062_v47 = vld [vmem:[#allocation35_spill] sm:$0xff] }
 0x129   :  { %806 = vmatpush1.msra.mxu0 %v4618_v26  ;;  %877 = vmatpush1.msra.mxu1 %v4755_v49  ;;  %v11042_v26 = vld [vmem:[#allocation9_spill] sm:$0xff]  ;;  %v11063_v49 = vld [vmem:[#allocation36_spill] sm:$0xff] }
 0x12a   :  { %807 = vmatprep.subr.mxu0 %v4630_v28  ;;  %878 = vmatprep.subr.mxu1 %v4767_v51  ;;  %v11044_v28 = vld [vmem:[#allocation10_spill] sm:$0xff] }
 0x12b   :  { %808 = vmatpush1.msra.mxu0 %v4642_v30  ;;  %879 = vmatpush1.msra.mxu1 %v4779_v53  ;;  %v11046_v30 = vld [vmem:[#allocation11_spill] sm:$0xff]  ;;  %v11065_v51 = vld [vmem:[#allocation38_spill] sm:$0xff] }
 0x12c   :  { %809 = vmatprep.subr.mxu0 %v4654_v32  ;;  %880 = vmatprep.subr.mxu1 %v4791_v55  ;;  %v11048_v32 = vld [vmem:[#allocation21_spill] sm:$0xff]  ;;  %v11066_v53 = vld [vmem:[#allocation39_spill] sm:$0xff]  ;;  %v11067_v55 = vld [vmem:[#allocation40_spill] sm:$0xff] }
 0x12d   :  { %810 = vmatpush1.msra.mxu0 %v4666_v34  ;;  %881 = vmatpush1.msra.mxu1 %v4803_v57  ;;  %v11050_v34 = vld [vmem:[#allocation23_spill] sm:$0xff]  ;;  %v11068_v57 = vld [vmem:[#allocation41_spill] sm:$0xff] }
 0x12e   :  { %811 = vmatprep.subr.mxu0 %v4678_v36  ;;  %882 = vmatprep.subr.mxu1 %v4815_v59  ;;  %v11052_v36 = vld [vmem:[#allocation25_spill] sm:$0xff]  ;;  %v11069_v59 = vld [vmem:[#allocation42_spill] sm:$0xff] }
 0x12f   :  { %812 = vmatpush1.msra.mxu0 %v4690_v38  ;;  %883 = vmatpush1.msra.mxu1 %v4827_v61  ;;  %v11054_v38 = vld [vmem:[#allocation27_spill] sm:$0xff] }
 0x130   :  { %813 = vmatprep.subr.mxu0 %v4702_v40  ;;  %884 = vmatprep.subr.mxu1 %v4839_v63  ;;  %v11056_v40 = vld [vmem:[#allocation29_spill] sm:$0xff]  ;;  %v11070_v61 = vld [vmem:[#allocation43_spill] sm:$0xff]  ;;  %v11071_v63 = vld [vmem:[#allocation44_spill] sm:$0xff] }
 0x131   :  { %814 = vmatpush1.msra.mxu0 %v4714_v42  ;;  %885 = vmatpush1.msra.mxu1 %v4846_v0  ;;  %v11058_v42 = vld [vmem:[#allocation31_spill] sm:$0xff]  ;;  %v11072_v0 = vld [vmem:[#allocation45_spill] sm:$0xff] }
 0x132   :  { %815 = vmatprep.subr.mxu0 %v4726_v44  ;;  %886 = vmatprep.subr.mxu1 %v11029_v4  ;;  %v11060_v44 = vld [vmem:[#allocation33_spill] sm:$0xff] }
 0x133   :  { %816 = vmatpush1.msra.mxu0 %v11030_v6  ;;  %887 = vmatpush1.msra.mxu1 %v11031_v8  ;;  %v11088_v4 = vld [vmem:[#allocation61_spill] sm:$0xff]  ;;  %v11089_v6 = vld [vmem:[#allocation62_spill] sm:$0xff]  ;;  %v11090_v8 = vld [vmem:[#allocation63_spill] sm:$0xff] }
 0x134   :  { %817 = vmatprep.subr.mxu0 %v11032_v10  ;;  %888 = vmatprep.subr.mxu1 %v11033_v11  ;;  %v11091_v10 = vld [vmem:[#allocation64_spill] sm:$0xff]  ;;  %v11092_v11 = vld [vmem:[#allocation65_spill] sm:$0xff] }
 0x135   :  { %818 = vmatpush1.msra.mxu0 %v11034_v12  ;;  %889 = vmatpush1.msra.mxu1 %v11035_v14  ;;  %v11093_v12 = vld [vmem:[#allocation66_spill] sm:$0xff]  ;;  %v11094_v14 = vld [vmem:[#allocation67_spill] sm:$0xff] }
 0x136   :  { %819 = vmatprep.subr.mxu0 %v11036_v17  ;;  %890 = vmatprep.subr.mxu1 %v11037_v19  ;;  %v11095_v17 = vld [vmem:[#allocation68_spill] sm:$0xff]  ;;  %v11096_v19 = vld [vmem:[#allocation69_spill] sm:$0xff] }
 0x137   :  { %820 = vmatpush1.msra.mxu0 %v11038_v21  ;;  %891 = vmatpush1.msra.mxu1 %v11039_v22  ;;  %v11097_v21 = vld [vmem:[#allocation70_spill] sm:$0xff]  ;;  %v11098_v22 = vld [vmem:[#allocation71_spill] sm:$0xff] }
 0x138   :  { %821 = vmatprep.subr.mxu0 %v11040_v24  ;;  %892 = vmatprep.subr.mxu1 %v11041_v25  ;;  %v11099_v24 = vld [vmem:[#allocation72_spill] sm:$0xff]  ;;  %v11100_v25 = vld [vmem:[#allocation73_spill] sm:$0xff] }
 0x139   :  { %822 = vmatpush1.msra.mxu0 %v11042_v26  ;;  %893 = vmatpush1.msra.mxu1 %v11043_v27  ;;  %v11101_v26 = vld [vmem:[#allocation74_spill] sm:$0xff]  ;;  %v11102_v27 = vld [vmem:[#allocation75_spill] sm:$0xff] }
 0x13a   :  { %823 = vmatprep.subr.mxu0 %v11044_v28  ;;  %894 = vmatprep.subr.mxu1 %v11045_v29  ;;  %v11103_v28 = vld [vmem:[#allocation76_spill] sm:$0xff]  ;;  %v11104_v29 = vld [vmem:[#allocation77_spill] sm:$0xff] }
 0x13b   :  { %824 = vmatpush1.msra.mxu0 %v11046_v30  ;;  %857 = vmatprep.mubr.f32.mxu0 %v11047_v31  ;;  %v11105_v30 = vld [vmem:[#allocation78_spill] sm:$0xff] }
 0x13c   :  { %895 = vmatpush1.msra.mxu1 %v11048_v32  ;;  %928 = vmatprep.mubr.f32.mxu1 %v11047_v31  ;;  %v11106_v32 = vld [vmem:[#allocation79_spill] sm:$0xff] }
 0x13d   :  { %858 = vmatmul.mubr.f32.vlgmr.msra.gmra.mxu0 %v5731_v7  ;;  %929 = vmatmul.mubr.f32.vlgmr.msra.gmra.mxu1 %v5731_v7  ;;  %v11087_v7 = vld [vmem:[#allocation60_spill] sm:$0xff] }
 0x13e   :  { %985 = vmatprep.subr.mxu0 %v11049_v33  ;;  %1056 = vmatprep.subr.mxu1 %v11050_v34  ;;  %v11107_v33 = vld [vmem:[#allocation80_spill] sm:$0xff]  ;;  %v11108_v34 = vld [vmem:[#allocation81_spill] sm:$0xff] }
 0x13f   :  { %986 = vmatpush1.msra.mxu0 %v11051_v35  ;;  %1057 = vmatpush1.msra.mxu1 %v11052_v36  ;;  %v11109_v35 = vld [vmem:[#allocation82_spill] sm:$0xff]  ;;  %v11110_v36 = vld [vmem:[#allocation83_spill] sm:$0xff] }
 0x140   :  { %987 = vmatprep.subr.mxu0 %v11053_v37  ;;  %1058 = vmatprep.subr.mxu1 %v11054_v38  ;;  %v11111_v37 = vld [vmem:[#allocation84_spill] sm:$0xff]  ;;  %v11112_v38 = vld [vmem:[#allocation85_spill] sm:$0xff] }
 0x141   :  { %988 = vmatpush1.msra.mxu0 %v11055_v39  ;;  %1059 = vmatpush1.msra.mxu1 %v11056_v40  ;;  %v11113_v39 = vld [vmem:[#allocation86_spill] sm:$0xff]  ;;  %v11114_v40 = vld [vmem:[#allocation87_spill] sm:$0xff] }
 0x142   :  { %989 = vmatprep.subr.mxu0 %v11057_v41  ;;  %1060 = vmatprep.subr.mxu1 %v11058_v42  ;;  %v11115_v41 = vld [vmem:[#allocation88_spill] sm:$0xff]  ;;  %v11116_v42 = vld [vmem:[#allocation89_spill] sm:$0xff] }
 0x143   :  { %990 = vmatpush1.msra.mxu0 %v11059_v43  ;;  %1061 = vmatpush1.msra.mxu1 %v11060_v44  ;;  %v11117_v43 = vld [vmem:[#allocation90_spill] sm:$0xff]  ;;  %v11118_v44 = vld [vmem:[#allocation91_spill] sm:$0xff] }
 0x144   :  { %991 = vmatprep.subr.mxu0 %v11061_v45  ;;  %1062 = vmatprep.subr.mxu1 %v11062_v47  ;;  %v11119_v45 = vld [vmem:[#allocation92_spill] sm:$0xff]  ;;  %v11120_v47 = vld [vmem:[#allocation93_spill] sm:$0xff] }
 0x145   :  { %992 = vmatpush1.msra.mxu0 %v11063_v49  ;;  %1063 = vmatpush1.msra.mxu1 %v11064_v50  ;;  %v11121_v49 = vld [vmem:[#allocation94_spill] sm:$0xff]  ;;  %v11122_v50 = vld [vmem:[#allocation95_spill] sm:$0xff] }
 0x146   :  { %993 = vmatprep.subr.mxu0 %v11065_v51  ;;  %1064 = vmatprep.subr.mxu1 %v11066_v53  ;;  %v11123_v51 = vld [vmem:[#allocation96_spill] sm:$0xff]  ;;  %v11124_v53 = vld [vmem:[#allocation97_spill] sm:$0xff] }
 0x147   :  { %994 = vmatpush1.msra.mxu0 %v11067_v55  ;;  %1065 = vmatpush1.msra.mxu1 %v11068_v57  ;;  %v11125_v55 = vld [vmem:[#allocation98_spill] sm:$0xff]  ;;  %v11126_v57 = vld [vmem:[#allocation99_spill] sm:$0xff] }
 0x148   :  { %995 = vmatprep.subr.mxu0 %v11069_v59  ;;  %1066 = vmatprep.subr.mxu1 %v11070_v61  ;;  %v11127_v59 = vld [vmem:[#allocation100_spill] sm:$0xff]  ;;  %v11128_v61 = vld [vmem:[#allocation101_spill] sm:$0xff] }
 0x149   :  { %996 = vmatpush1.msra.mxu0 %v11071_v63  ;;  %1067 = vmatpush1.msra.mxu1 %v11072_v0  ;;  %v11129_v63 = vld [vmem:[#allocation102_spill] sm:$0xff]  ;;  %v11130_v0 = vld [vmem:[#allocation103_spill] sm:$0xff] }
 0x14a   :  { %997 = vmatprep.subr.mxu0 %v11073_v16  ;;  %1068 = vmatprep.subr.mxu1 %v11074_v5  ;;  %v11131_v16 = vld [vmem:[#allocation104_spill] sm:$0xff]  ;;  %v11132_v5 = vld [vmem:[#allocation105_spill] sm:$0xff] }
 0x14b   :  { %998 = vmatpush1.msra.mxu0 %v11075_v60  ;;  %1069 = vmatpush1.msra.mxu1 %v11076_v3  ;;  %v11133_v60 = vld [vmem:[#allocation106_spill] sm:$0xff]  ;;  %v11134_v3 = vld [vmem:[#allocation107_spill] sm:$0xff] }
 0x14c   :  { %999 = vmatprep.subr.mxu0 %v11077_v54  ;;  %1070 = vmatprep.subr.mxu1 %v11078_v23  ;;  %v11135_v54 = vld [vmem:[#allocation108_spill] sm:$0xff]  ;;  %v11136_v23 = vld [vmem:[#allocation109_spill] sm:$0xff] }
 0x14d   :  { %1000 = vmatpush1.msra.mxu0 %v11079_v46  ;;  %1071 = vmatpush1.msra.mxu1 %v11080_v58  ;;  %v11137_v46 = vld [vmem:[#allocation110_spill] sm:$0xff]  ;;  %v11138_v58 = vld [vmem:[#allocation111_spill] sm:$0xff] }
 0x14e   :  { %1001 = vmatprep.subr.mxu0 %v11081_v15  ;;  %1072 = vmatprep.subr.mxu1 %v11082_v56  ;;  %v11139_v15 = vld [vmem:[#allocation112_spill] sm:$0xff]  ;;  %v11140_v56 = vld [vmem:[#allocation113_spill] sm:$0xff] }
 0x14f   :  { %1002 = vmatpush1.msra.mxu0 %v11083_v18  ;;  %1073 = vmatpush1.msra.mxu1 %v11084_v52  ;;  %v11141_v18 = vld [vmem:[#allocation114_spill] sm:$0xff]  ;;  %v11142_v52 = vld [vmem:[#allocation115_spill] sm:$0xff] }
 0x150   :  { %1003 = vmatprep.subr.mxu0 %v11085_v62  ;;  %1074 = vmatprep.subr.mxu1 %v11086_v48  ;;  %v11143_v62 = vld [vmem:[#allocation116_spill] sm:$0xff]  ;;  %v11144_v48 = vld [vmem:[#allocation117_spill] sm:$0xff] }
 0x151   :  { %1004 = vmatpush1.msra.mxu0 %v11087_v7  ;;  %1075 = vmatpush1.msra.mxu1 %v11088_v4  ;;  %v11145_v7 = vld [vmem:[#allocation118_spill] sm:$0xff]  ;;  %v11146_v4 = vld [vmem:[#allocation119_spill] sm:$0xff] }
 0x152   :  { %1005 = vmatprep.subr.mxu0 %v11089_v6  ;;  %1076 = vmatprep.subr.mxu1 %v11090_v8  ;;  %v11147_v6 = vld [vmem:[#allocation120_spill] sm:$0xff]  ;;  %v11148_v8 = vld [vmem:[#allocation121_spill] sm:$0xff] }
 0x153   :  { %1006 = vmatpush1.msra.mxu0 %v11091_v10  ;;  %1077 = vmatpush1.msra.mxu1 %v11092_v11  ;;  %v11149_v10 = vld [vmem:[#allocation122_spill] sm:$0xff]  ;;  %v11150_v11 = vld [vmem:[#allocation123_spill] sm:$0xff] }
 0x154   :  { %1007 = vmatprep.subr.mxu0 %v11093_v12  ;;  %1078 = vmatprep.subr.mxu1 %v11094_v14  ;;  %v11151_v12 = vld [vmem:[#allocation124_spill] sm:$0xff]  ;;  %v11152_v14 = vld [vmem:[#allocation125_spill] sm:$0xff] }
 0x155   :  { %1008 = vmatpush1.msra.mxu0 %v11095_v17  ;;  %1079 = vmatpush1.msra.mxu1 %v11096_v19  ;;  %v11153_v17 = vld [vmem:[#allocation126_spill] sm:$0xff]  ;;  %v11154_v19 = vld [vmem:[#allocation127_spill] sm:$0xff] }
 0x156   :  { %1009 = vmatprep.subr.mxu0 %v11097_v21  ;;  %1080 = vmatprep.subr.mxu1 %v11098_v22  ;;  %v11155_v21 = vld [vmem:[#allocation128_spill] sm:$0xff]  ;;  %v11156_v22 = vld [vmem:[#allocation129_spill] sm:$0xff] }
 0x157   :  { %1010 = vmatpush1.msra.mxu0 %v11099_v24  ;;  %1081 = vmatpush1.msra.mxu1 %v11100_v25  ;;  %v11157_v24 = vld [vmem:[#allocation130_spill] sm:$0xff]  ;;  %v11158_v25 = vld [vmem:[#allocation131_spill] sm:$0xff] }
 0x158   :  { %1011 = vmatprep.subr.mxu0 %v11101_v26  ;;  %1082 = vmatprep.subr.mxu1 %v11102_v27  ;;  %v11159_v26 = vld [vmem:[#allocation132_spill] sm:$0xff]  ;;  %v11160_v27 = vld [vmem:[#allocation133_spill] sm:$0xff] }
 0x159   :  { %1012 = vmatpush1.msra.mxu0 %v11103_v28  ;;  %1083 = vmatpush1.msra.mxu1 %v11104_v29  ;;  %v11161_v28 = vld [vmem:[#allocation134_spill] sm:$0xff]  ;;  %v11162_v29 = vld [vmem:[#allocation135_spill] sm:$0xff] }
 0x15a   :  { %1013 = vmatprep.subr.mxu0 %v11105_v30  ;;  %1084 = vmatprep.subr.mxu1 %v11106_v32  ;;  %v11163_v30 = vld [vmem:[#allocation136_spill] sm:$0xff]  ;;  %v11164_v32 = vld [vmem:[#allocation137_spill] sm:$0xff] }
 0x15b   :  { %1014 = vmatpush1.msra.mxu0 %v11107_v33  ;;  %1085 = vmatpush1.msra.mxu1 %v11108_v34  ;;  %v11165_v33 = vld [vmem:[#allocation138_spill] sm:$0xff]  ;;  %v11166_v34 = vld [vmem:[#allocation139_spill] sm:$0xff] }
 0x15c   :  { %1015 = vmatprep.subr.mxu0 %v11109_v35  ;;  %1086 = vmatprep.subr.mxu1 %v11110_v36  ;;  %v11167_v35 = vld [vmem:[#allocation140_spill] sm:$0xff]  ;;  %v11168_v36 = vld [vmem:[#allocation141_spill] sm:$0xff] }
 0x15d   :  { %1016 = vmatpush1.msra.mxu0 %v11111_v37  ;;  %1087 = vmatpush1.msra.mxu1 %v11112_v38  ;;  %v11169_v37 = vld [vmem:[#allocation142_spill] sm:$0xff]  ;;  %v11170_v38 = vld [vmem:[#allocation143_spill] sm:$0xff] }
 0x15e   :  { %1017 = vmatprep.subr.mxu0 %v11113_v39  ;;  %1088 = vmatprep.subr.mxu1 %v11114_v40  ;;  %v11171_v39 = vld [vmem:[#allocation144_spill] sm:$0xff]  ;;  %v11172_v40 = vld [vmem:[#allocation145_spill] sm:$0xff] }
 0x15f   :  { %1018 = vmatpush2.msra.mxu0 %v11115_v41  ;;  %1089 = vmatpush2.msra.mxu1 %v11116_v42  ;;  %v11173_v41 = vld [vmem:[#allocation146_spill] sm:$0xff]  ;;  %v11174_v42 = vld [vmem:[#allocation147_spill] sm:$0xff] }
 0x160   :  { %1019 = vmatprep.subr.mxu0 %v11117_v43  ;;  %1090 = vmatprep.subr.mxu1 %v11118_v44  ;;  %v11175_v43 = vld [vmem:[#allocation148_spill] sm:$0xff]  ;;  %v11176_v44 = vld [vmem:[#allocation149_spill] sm:$0xff] }
 0x161   :  { %1020 = vmatpush2.msra.mxu0 %v11119_v45  ;;  %1091 = vmatpush2.msra.mxu1 %v11120_v47  ;;  %v5932_v45 = vld [vmem:[%s10233_s2 + $0x1e8] sm:$0xff]  ;;  %v5938_v47 = vld [vmem:[%s10233_s2 + $0x1f8] sm:$0xff] }
 0x162   :  { %1021 = vmatprep.subr.mxu0 %v11121_v49  ;;  %1092 = vmatprep.subr.mxu1 %v11122_v50  ;;  %v435_v49 = vld [vmem:[%s10237_s5] sm:$0xf]  ;;  %v11177_v50 = vsub.s32 0, %v5691_v20 }
 0x163   :  { %1022 = vmatpush2.msra.mxu0 %v11123_v51  ;;  %1093 = vmatpush2.msra.mxu1 %v11124_v53  ;;  %v11179_v53 = vsub.s32 1, %v5691_v20 }
 0x164   :  { %1023 = vmatprep.subr.mxu0 %v11125_v55  ;;  %1094 = vmatprep.subr.mxu1 %v11126_v57  ;;  %v5946_v51 = vrot.slane %v435_v49, %v11177_v50 }
 0x165   :  { %1024 = vmatpush2.msra.mxu0 %v11127_v59  ;;  %1095 = vmatpush2.msra.mxu1 %v11128_v61  ;;  %v5950_v55 = vrot.slane %v435_v49, %v11179_v53 }
 0x166   :  { %1025 = vmatprep.subr.mxu0 %v11129_v63  ;;  %1096 = vmatprep.subr.mxu1 %v11130_v0  ;;  %11178 = vst [vmem:[#allocation12_spill] sm:$0xff] %v5946_v51 }
 0x167   :  { %1026 = vmatpush2.msra.mxu0 %v11131_v16  ;;  %1097 = vmatpush2.msra.mxu1 %v11132_v5  ;;  %11180 = vst [vmem:[#allocation3_spill] sm:$0xff] %v5950_v55 }
 0x168   :  { %1027 = vmatprep.subr.mxu0 %v11133_v60  ;;  %1098 = vmatprep.subr.mxu1 %v11134_v3  ;;  %v11181_v60 = vsub.s32 3, %v5691_v20 }
 0x169   :  { %1028 = vmatpush2.msra.mxu0 %v11135_v54  ;;  %1099 = vmatpush2.msra.mxu1 %v11136_v23 }
 0x16a   :  { %1029 = vmatprep.subr.mxu0 %v11137_v46  ;;  %1100 = vmatprep.subr.mxu1 %v11138_v58  ;;  %v5956_v3 = vrot.slane %v435_v49, %v11181_v60  ;;  %v11183_v46 = vsub.s32 2, %v5691_v20 }
 0x16b   :  { %1030 = vmatpush2.msra.mxu0 %v11139_v15  ;;  %1101 = vmatpush2.msra.mxu1 %v11140_v56 }
 0x16c   :  { %1031 = vmatprep.subr.mxu0 %v11141_v18  ;;  %1102 = vmatprep.subr.mxu1 %v11142_v52  ;;  %11182 = vst [vmem:[#allocation13_spill] sm:$0xff] %v5956_v3  ;;  %v5961_v58 = vrot.slane %v435_v49, %v11183_v46 }
 0x16d   :  { %1032 = vmatpush2.msra.mxu0 %v11143_v62  ;;  %1103 = vmatpush2.msra.mxu1 %v11144_v48 }
 0x16e   :  { %1033 = vmatprep.subr.mxu0 %v11145_v7  ;;  %1104 = vmatprep.subr.mxu1 %v11146_v4  ;;  %11184 = vst [vmem:[#allocation4_spill] sm:$0xff] %v5961_v58 }
 0x16f   :  { %1034 = vmatpush2.msra.mxu0 %v11147_v6  ;;  %1105 = vmatpush2.msra.mxu1 %v11148_v8 }
 0x170   :  { %1035 = vmatprep.subr.mxu0 %v11149_v10  ;;  %1106 = vmatprep.subr.mxu1 %v11150_v11 }
 0x171   :  { %1036 = vmatpush2.msra.mxu0 %v11151_v12  ;;  %1107 = vmatpush2.msra.mxu1 %v11152_v14  ;;  %v11185_v14 = vld [vmem:[#allocation152_spill] sm:$0xff] }
 0x172   :  { %1037 = vmatprep.subr.mxu0 %v11153_v17  ;;  %1108 = vmatprep.subr.mxu1 %v11154_v19 }
 0x173   :  { %1038 = vmatpush2.msra.mxu0 %v11155_v21  ;;  %1109 = vmatpush2.msra.mxu1 %v11156_v22 }
 0x174   :  { %1039 = vmatprep.subr.mxu0 %v11157_v24  ;;  %1110 = vmatprep.subr.mxu1 %v11158_v25 }
 0x175   :  { %1040 = vmatpush2.msra.mxu0 %v11159_v26  ;;  %1111 = vmatpush2.msra.mxu1 %v11160_v27  ;;  %v11186_v26 = vld [vmem:[#allocation153_spill] sm:$0xff] }
 0x176   :  { %1041 = vmatprep.subr.mxu0 %v11161_v28  ;;  %1112 = vmatprep.subr.mxu1 %v11162_v29 }
 0x177   :  { %1042 = vmatpush2.msra.mxu0 %v11163_v30  ;;  %1113 = vmatpush2.msra.mxu1 %v11164_v32 }
 0x178   :  { %1043 = vmatprep.subr.mxu0 %v11165_v33  ;;  %1114 = vmatprep.subr.mxu1 %v11166_v34 }
 0x179   :  { %1044 = vmatpush2.msra.mxu0 %v11167_v35  ;;  %1115 = vmatpush2.msra.mxu1 %v11168_v36 }
 0x17a   :  { %1045 = vmatprep.subr.mxu0 %v11169_v37  ;;  %1116 = vmatprep.subr.mxu1 %v11170_v38 }
 0x17b   :  { %1046 = vmatpush2.msra.mxu0 %v11171_v39  ;;  %1117 = vmatpush2.msra.mxu1 %v11172_v40 }
 0x17c   :  { %1047 = vmatprep.subr.mxu0 %v11173_v41  ;;  %1118 = vmatprep.subr.mxu1 %v11174_v42 }
 0x17d   :  { %1048 = vmatpush2.msra.mxu0 %v11175_v43  ;;  %1119 = vmatpush2.msra.mxu1 %v11176_v44 }
 0x17e   :  { %1151 = vmatprep.subr.mxu0 %v5932_v45  ;;  %1222 = vmatprep.subr.mxu1 %v5938_v47 }
 0x1dc   :  { %v693_v57 = vpop.f32.mrf.mxu0  ;;  %v764_v16 = vpop.f32.mrf.mxu1 }
 0x1dd   :  { %v694_v59 = vadd.f32 %v693_v57, %v5946_v51  ;;  %v765_v18 = vadd.f32 %v764_v16, %v5961_v58 }
 0x1de   :  { %v695_v61 = vpop.f32.mrf.mxu0  ;;  %v766_v54 = vpop.f32.mrf.mxu1 }
 0x1df   :  { %v3478_v63 = vmul.f32 -1.442695, %v694_v59  ;;  %v696_v0 = vadd.f32 %v695_v61, %v5950_v55  ;;  %v767_v23 = vadd.f32 %v766_v54, %v5956_v3  ;;  %v971_v59 = vrot.slane %v5728_v13, 6  ;;  %v5982_v13 = vld [vmem:[%s10233_s2 + $0x1e0] sm:$0xff] }
 0x1e1   :  { %3612 = vpow2.f32 %v3478_v63  ;;  %v3479_v5 = vmul.f32 -1.442695, %v696_v0  ;;  %v3480_v15 = vmul.f32 -1.442695, %v767_v23 }
 0x1e3   :  { %3614 = vpow2.f32 %v3479_v5 }
 0x1e4   :  { %3616 = vpow2.f32 %v3480_v15  ;;  %v5988_v15 = vld [vmem:[%s10233_s2 + $0x1f0] sm:$0xff] }
 0x1ee   :  { %v3613_v56 = vpop.eup %3612 }
 0x1ef   :  { %v772_v52 = vadd.f32 1.0, %v3613_v56  ;;  %v5994_v56 = vld [vmem:[%s10233_s2 + $0x1c8] sm:$0xff] }
 0x1f0   :  { %v3615_v62 = vpop.eup %3614 }
 0x1f1   :  { %3618 = vrcp.f32 %v772_v52  ;;  %v778_v48 = vadd.f32 1.0, %v3615_v62  ;;  %v3617_v7 = vpop.eup %3616  ;;  %v6006_v52 = vld [vmem:[%s10233_s2 + $0x1c0] sm:$0xff]  ;;  %v6012_v62 = vld [vmem:[%s10233_s2 + $0x1d0] sm:$0xff] }
 0x1f2   :  { %3620 = vtanh.f32 %v765_v18  ;;  %v785_v11 = vadd.f32 1.0, %v3617_v7  ;;  %v6000_v18 = vld [vmem:[%s10233_s2 + $0x1d8] sm:$0xff] }
 0x1f3   :  { %3622 = vrcp.f32 %v778_v48  ;;  %v6018_v48 = vld [vmem:[%s10233_s2 + $0x1a8] sm:$0xff]  ;;  %v6024_v7 = vld [vmem:[%s10233_s2 + $0x1b8] sm:$0xff] }
 0x1f4   :  { %3624 = vrcp.f32 %v785_v11  ;;  %v6054_v11 = vld [vmem:[%s10233_s2 + $0x180] sm:$0xff] }
 0x1fd   :  { %v859_v4 = vpop.f32.mrf.mxu0  ;;  %v930_v19 = vpop.f32.mrf.mxu1 }
 0x1fe   :  { %v3619_v6 = vpop.eup %3618  ;;  %v939_v8 = vrot.slane %v859_v4, 6  ;;  %v941_v34 = vrot.slane %v930_v19, 6  ;;  %v6030_v4 = vld [vmem:[%s10233_s2 + $0x1a0] sm:$0xff] }
 0x1ff   :  { %v3621_v10 = vpop.eup %3620  ;;  %v861_v20 = vpop.f32.mrf.mxu0  ;;  %v6078_v19 = vld [vmem:[%s10233_s2 + $0x160] sm:$0xff] }
 0x200   :  { %v3623_v12 = vpop.eup %3622  ;;  %v947_v17 = vadd.f32 %v939_v8, %v11185_v14  ;;  %v940_v21 = vrot.slane %v861_v20, 6  ;;  %v789_v24 = vmul.f32 %v3621_v10, %v3619_v6  ;;  %v932_v30 = vpop.f32.mrf.mxu1  ;;  %v949_v38 = vadd.f32 %v941_v34, %v5725_v2  ;;  %v6036_v6 = vld [vmem:[%s10233_s2 + $0x1b0] sm:$0xff]  ;;  %v6042_v8 = vld [vmem:[%s10233_s2 + $0x188] sm:$0xff]  ;;  %v6048_v10 = vld [vmem:[%s10233_s2 + $0x198] sm:$0xff] }
 0x201   :  { %v788_v22 = vmul.f32 0.0, %v3623_v12  ;;  %v942_v32 = vrot.slane %v932_v30, 6  ;;  %v3625_v36 = vpop.eup %3624  ;;  %v6060_v20 = vld [vmem:[%s10233_s2 + $0x190] sm:$0xff]  ;;  %v6066_v12 = vld [vmem:[%s10233_s2 + $0x168] sm:$0xff]  ;;  %v6120_v30 = vld [vmem:[%s10233_s2 + $0x138] sm:$0xff] }
 0x202   :  { %v3481_v25 = vmul.f32 -1.442695, %v947_v17  ;;  %v948_v27 = vadd.f32 %v940_v21, %v11186_v26  ;;  %v6072_v17 = vld [vmem:[%s10233_s2 + $0x178] sm:$0xff]  ;;  %v6084_v21 = vld [vmem:[%s10233_s2 + $0x170] sm:$0xff]  ;;  %v6138_v34 = vld [vmem:[%s10233_s2 + $0x108] sm:$0xff] }
 0x203   :  { %v5966_v28 = vadd.f32 %v789_v24, %v788_v22  ;;  %v950_v33 = vadd.f32 %v942_v32, %v5722_v9  ;;  %v6090_v22 = vld [vmem:[%s10233_s2 + $0x148] sm:$0xff]  ;;  %v6096_v24 = vld [vmem:[%s10233_s2 + $0x158] sm:$0xff]  ;;  %v6126_v32 = vld [vmem:[%s10233_s2 + $0x120] sm:$0xff] }
 0x204   :  { %3626 = vpow2.f32 %v3481_v25  ;;  %v3482_v29 = vmul.f32 -1.442695, %v948_v27  ;;  %v6102_v25 = vld [vmem:[%s10233_s2 + $0x140] sm:$0xff]  ;;  %v6108_v27 = vld [vmem:[%s10233_s2 + $0x150] sm:$0xff] }
 0x205   :  { %3628 = vtanh.f32 %v5966_v28  ;;  %v3483_v35 = vmul.f32 -1.442695, %v950_v33  ;;  %v6132_v33 = vld [vmem:[%s10233_s2 + $0x130] sm:$0xff] }
 0x206   :  { %3630 = vpow2.f32 %v3482_v29  ;;  %v6114_v29 = vld [vmem:[%s10233_s2 + $0x128] sm:$0xff] }
 0x207   :  { %3632 = vpow2.f32 %v3483_v35  ;;  %v6144_v35 = vld [vmem:[%s10233_s2 + $0x118] sm:$0xff] }
 0x211   :  { %v3627_v37 = vpop.eup %3626 }
 0x212   :  { %v3629_v39 = vpop.eup %3628  ;;  %v954_v40 = vadd.f32 1.0, %v3627_v37  ;;  %v6156_v37 = vld [vmem:[%s10233_s2 + $0x110] sm:$0xff] }
 0x213   :  { %v3631_v41 = vpop.eup %3630  ;;  %v792_v42 = vmul.f32 %v3629_v39, %v3625_v36  ;;  %v6150_v36 = vld [vmem:[%s10233_s2 + $0x100] sm:$0xff]  ;;  %v6168_v39 = vld [vmem:[%s10233_s2 + $0xf8] sm:$0xff] }
 0x214   :  { %3634 = vrcp.f32 %v954_v40  ;;  %v960_v43 = vadd.f32 1.0, %v3631_v41  ;;  %v3633_v50 = vpop.eup %3632  ;;  %v6174_v40 = vld [vmem:[%s10233_s2 + $0xe0] sm:$0xff]  ;;  %v6180_v41 = vld [vmem:[%s10233_s2 + $0xf0] sm:$0xff] }
 0x215   :  { %3636 = vtanh.f32 %v949_v38  ;;  %v979_v44 = vrot.slane %v792_v42, 6  ;;  %v967_v63 = vadd.f32 1.0, %v3633_v50  ;;  %v6162_v38 = vld [vmem:[%s10233_s2 + $0xe8] sm:$0xff] }
 0x216   :  { %3638 = vrcp.f32 %v960_v43  ;;  %v6186_v42 = vld [vmem:[%s10233_s2 + $0xc8] sm:$0xff]  ;;  %v6192_v43 = vld [vmem:[%s10233_s2 + $0xd8] sm:$0xff] }
 0x217   :  { %v982_v49 = vrot.slane %v979_v44, 2  ;;  %3640 = vrcp.f32 %v967_v63  ;;  %v6198_v44 = vld [vmem:[%s10233_s2 + $0xc0] sm:$0xff]  ;;  %v6210_v50 = vld [vmem:[%s10233_s2 + $0xa8] sm:$0xff]  ;;  %v6240_v63 = vld [vmem:[%s10233_s2 + $0x98] sm:$0xff] }
 0x218   :  { %11191 = vst [vmem:[#allocation16_spill] sm:$0xff] %v6240_v63 }
 0x219   :  { %1049 = vmatprep.mubr.f32.mxu0 %v982_v49  ;;  %1120 = vmatprep.mubr.f32.mxu1 %v982_v49  ;;  %v6204_v49 = vld [vmem:[%s10233_s2 + $0xd0] sm:$0xff] }
 0x221   :  { %v3635_v53 = vpop.eup %3634 }
 0x222   :  { %v3637_v57 = vpop.eup %3636 }
 0x223   :  { %v3639_v61 = vpop.eup %3638  ;;  %v974_v0 = vmul.f32 %v3637_v57, %v3635_v53  ;;  %v6216_v53 = vld [vmem:[%s10233_s2 + $0xb8] sm:$0xff]  ;;  %v6222_v57 = vld [vmem:[%s10233_s2 + $0xa0] sm:$0xff] }
 0x224   :  { %v973_v16 = vmul.f32 %v3639_v61, %v971_v59  ;;  %v3641_v60 = vpop.eup %3640  ;;  %11187 = vst [vmem:[#allocation14_spill] sm:$0xff] %v6216_v53  ;;  %11188 = vst [vmem:[#allocation5_spill] sm:$0xff] %v6222_v57  ;;  %v6228_v59 = vld [vmem:[%s10233_s2 + $0xb0] sm:$0xff]  ;;  %v6234_v61 = vld [vmem:[%s10233_s2 + $0x88] sm:$0xff] }
 0x225   :  { %11189 = vst [vmem:[#allocation15_spill] sm:$0xff] %v6228_v59  ;;  %11190 = vst [vmem:[#allocation6_spill] sm:$0xff] %v6234_v61 }
 0x226   :  { %v5972_v5 = vadd.f32 %v974_v0, %v973_v16  ;;  %v6246_v0 = vld [vmem:[%s10233_s2 + $0x80] sm:$0xff]  ;;  %v6252_v16 = vld [vmem:[%s10233_s2 + $0x90] sm:$0xff] }
 0x227   :  { %11192 = vst [vmem:[#allocation7_spill] sm:$0xff] %v6246_v0  ;;  %11193 = vst [vmem:[#allocation17_spill] sm:$0xff] %v6252_v16 }
 0x228   :  { %3642 = vtanh.f32 %v5972_v5 }
 0x235   :  { %v3643_v54 = vpop.eup %3642 }
 0x236   :  { %v977_v23 = vmul.f32 %v3643_v54, %v3641_v60  ;;  %v6258_v60 = vld [vmem:[%s10233_s2 + $0x68] sm:$0xff]  ;;  %v6264_v54 = vld [vmem:[%s10233_s2 + $0x78] sm:$0xff] }
 0x237   :  { %11194 = vst [vmem:[#allocation8_spill] sm:$0xff] %v6258_v60  ;;  %11195 = vst [vmem:[#allocation18_spill] sm:$0xff] %v6264_v54 }
 0x238   :  { %v5975_v46 = vrot.slane %v977_v23, 2  ;;  %v6270_v23 = vld [vmem:[%s10233_s2 + $0x60] sm:$0xff] }
 0x239   :  { %11196 = vst [vmem:[#allocation9_spill] sm:$0xff] %v6270_v23 }
 0x23a   :  { %1050 = vmatmul.mubr.f32.vlgmr.msra.gmra.mxu0 %v5975_v46  ;;  %1121 = vmatmul.mubr.f32.vlgmr.msra.gmra.mxu1 %v5975_v46 }
 0x23b   :  { %1152 = vmatpush1.msra.mxu0 %v5982_v13  ;;  %1223 = vmatpush1.msra.mxu1 %v5988_v15 }
 0x23c   :  { %1153 = vmatprep.subr.mxu0 %v5994_v56  ;;  %1224 = vmatprep.subr.mxu1 %v6000_v18 }
 0x23d   :  { %1154 = vmatpush1.msra.mxu0 %v6006_v52  ;;  %1225 = vmatpush1.msra.mxu1 %v6012_v62 }
 0x23e   :  { %1155 = vmatprep.subr.mxu0 %v6018_v48  ;;  %1226 = vmatprep.subr.mxu1 %v6024_v7 }
 0x23f   :  { %1156 = vmatpush1.msra.mxu0 %v6030_v4  ;;  %1227 = vmatpush1.msra.mxu1 %v6036_v6 }
 0x240   :  { %1157 = vmatprep.subr.mxu0 %v6042_v8  ;;  %1228 = vmatprep.subr.mxu1 %v6048_v10 }
 0x241   :  { %1158 = vmatpush1.msra.mxu0 %v6054_v11  ;;  %1229 = vmatpush1.msra.mxu1 %v6060_v20 }
 0x242   :  { %1159 = vmatprep.subr.mxu0 %v6066_v12  ;;  %1230 = vmatprep.subr.mxu1 %v6072_v17 }
 0x243   :  { %1160 = vmatpush1.msra.mxu0 %v6078_v19  ;;  %1231 = vmatpush1.msra.mxu1 %v6084_v21 }
 0x244   :  { %1161 = vmatprep.subr.mxu0 %v6090_v22  ;;  %1232 = vmatprep.subr.mxu1 %v6096_v24 }
 0x245   :  { %1162 = vmatpush1.msra.mxu0 %v6102_v25  ;;  %1233 = vmatpush1.msra.mxu1 %v6108_v27 }
 0x246   :  { %1163 = vmatprep.subr.mxu0 %v6114_v29  ;;  %1234 = vmatprep.subr.mxu1 %v6120_v30 }
 0x247   :  { %1164 = vmatpush1.msra.mxu0 %v6126_v32  ;;  %1235 = vmatpush1.msra.mxu1 %v6132_v33 }
 0x248   :  { %1165 = vmatprep.subr.mxu0 %v6138_v34  ;;  %1236 = vmatprep.subr.mxu1 %v6144_v35 }
 0x249   :  { %1166 = vmatpush1.msra.mxu0 %v6150_v36  ;;  %1237 = vmatpush1.msra.mxu1 %v6156_v37 }
 0x24a   :  { %1167 = vmatprep.subr.mxu0 %v6162_v38  ;;  %1238 = vmatprep.subr.mxu1 %v6168_v39 }
 0x24b   :  { %1168 = vmatpush1.msra.mxu0 %v6174_v40  ;;  %1239 = vmatpush1.msra.mxu1 %v6180_v41 }
 0x24c   :  { %1169 = vmatprep.subr.mxu0 %v6186_v42  ;;  %1240 = vmatprep.subr.mxu1 %v6192_v43 }
 0x24d   :  { %1170 = vmatpush1.msra.mxu0 %v6198_v44  ;;  %1241 = vmatpush1.msra.mxu1 %v6204_v49 }
 0x24e   :  { %1171 = vmatprep.subr.mxu0 %v6210_v50  ;;  %1242 = vmatprep.subr.mxu1 %v6216_v53 }
 0x24f   :  { %1172 = vmatpush1.msra.mxu0 %v6222_v57  ;;  %1243 = vmatpush1.msra.mxu1 %v6228_v59 }
 0x250   :  { %1173 = vmatprep.subr.mxu0 %v6234_v61  ;;  %1244 = vmatprep.subr.mxu1 %v6240_v63 }
 0x251   :  { %1174 = vmatpush1.msra.mxu0 %v6246_v0  ;;  %1245 = vmatpush1.msra.mxu1 %v6252_v16 }
 0x252   :  { %1175 = vmatprep.subr.mxu0 %v6258_v60  ;;  %1246 = vmatprep.subr.mxu1 %v6264_v54  ;;  %v6282_v60 = vld [vmem:[%s10233_s2 + $0x48] sm:$0xff]  ;;  %v6288_v54 = vld [vmem:[%s10233_s2 + $0x58] sm:$0xff] }
 0x253   :  { %1176 = vmatpush1.msra.mxu0 %v6270_v23  ;;  %1247 = vmatpush1.msra.mxu1 %v6276_v1  ;;  %11198 = vst [vmem:[#allocation10_spill] sm:$0xff] %v6282_v60  ;;  %11199 = vst [vmem:[#allocation20_spill] sm:$0xff] %v6288_v54  ;;  %v6294_v23 = vld [vmem:[%s10233_s2 + $0x40] sm:$0xff]  ;;  %v6300_v1 = vld [vmem:[%s10233_s2 + $0x50] sm:$0xff] }
 0x254   :  { %1177 = vmatprep.subr.mxu0 %v6282_v60  ;;  %1248 = vmatprep.subr.mxu1 %v6288_v54  ;;  %11200 = vst [vmem:[#allocation11_spill] sm:$0xff] %v6294_v23  ;;  %11201 = vst [vmem:[#allocation21_spill] sm:$0xff] %v6300_v1  ;;  %v6306_v60 = vld [vmem:[%s10233_s2 + $0x28] sm:$0xff]  ;;  %v6312_v54 = vld [vmem:[%s10233_s2 + $0x38] sm:$0xff] }
 0x255   :  { %1178 = vmatpush1.msra.mxu0 %v6294_v23  ;;  %1249 = vmatpush1.msra.mxu1 %v6300_v1  ;;  %11202 = vst [vmem:[#allocation22_spill] sm:$0xff] %v6306_v60  ;;  %11203 = vst [vmem:[#allocation23_spill] sm:$0xff] %v6312_v54  ;;  %v6318_v23 = vld [vmem:[%s10233_s2 + $0x20] sm:$0xff]  ;;  %v6324_v1 = vld [vmem:[%s10233_s2 + $0x30] sm:$0xff] }
 0x256   :  { %1179 = vmatprep.subr.mxu0 %v6306_v60  ;;  %1250 = vmatprep.subr.mxu1 %v6312_v54  ;;  %11204 = vst [vmem:[#allocation24_spill] sm:$0xff] %v6318_v23  ;;  %11205 = vst [vmem:[#allocation25_spill] sm:$0xff] %v6324_v1  ;;  %v6330_v60 = vld [vmem:[%s10233_s2 + $0x8] sm:$0xff]  ;;  %v6336_v54 = vld [vmem:[%s10233_s2 + $0x18] sm:$0xff] }
 0x257   :  { %1180 = vmatpush1.msra.mxu0 %v6318_v23  ;;  %1251 = vmatpush1.msra.mxu1 %v6324_v1  ;;  %11206 = vst [vmem:[#allocation26_spill] sm:$0xff] %v6330_v60  ;;  %11207 = vst [vmem:[#allocation27_spill] sm:$0xff] %v6336_v54  ;;  %v6342_v23 = vld [vmem:[%s10233_s2] sm:$0xff] }
 0x258   :  { %1181 = vmatprep.subr.mxu0 %v6330_v60  ;;  %1252 = vmatprep.subr.mxu1 %v6336_v54  ;;  %11208 = vst [vmem:[#allocation28_spill] sm:$0xff] %v6342_v23  ;;  %v6349_v60 = vld [vmem:[%s10233_s2 + $0x10] sm:$0xff]  ;;  %v6358_v54 = vld [vmem:[%s10235_s4 + $0x1e8] sm:$0xff] }
 0x259   :  { %1182 = vmatpush1.msra.mxu0 %v6342_v23  ;;  %1215 = vmatprep.mubr.f32.mxu0 %v11047_v31  ;;  %11209 = vst [vmem:[#allocation29_spill] sm:$0xff] %v6349_v60  ;;  %11210 = vst [vmem:[#allocation30_spill] sm:$0xff] %v6358_v54  ;;  %v6364_v23 = vld [vmem:[%s10235_s4 + $0x1f8] sm:$0xff] }
 0x25a   :  { %1253 = vmatpush1.msra.mxu1 %v6349_v60  ;;  %1286 = vmatprep.mubr.f32.mxu1 %v11047_v31  ;;  %11211 = vst [vmem:[#allocation31_spill] sm:$0xff] %v6364_v23  ;;  %v6370_v60 = vld [vmem:[%s10235_s4 + $0x1e0] sm:$0xff] }
 0x25b   :  { %1216 = vmatmul.mubr.f32.vlgmr.msra.gmra.mxu0 %v5975_v46  ;;  %1287 = vmatmul.mubr.f32.vlgmr.msra.gmra.mxu1 %v5975_v46  ;;  %11212 = vst [vmem:[#allocation32_spill] sm:$0xff] %v6370_v60  ;;  %v6376_v46 = vld [vmem:[%s10235_s4 + $0x1f0] sm:$0xff] }
 0x25c   :  { %1343 = vmatprep.subr.mxu0 %v6358_v54  ;;  %1414 = vmatprep.subr.mxu1 %v6364_v23  ;;  %11213 = vst [vmem:[#allocation33_spill] sm:$0xff] %v6376_v46  ;;  %v6382_v54 = vld [vmem:[%s10235_s4 + $0x1c8] sm:$0xff]  ;;  %v6388_v23 = vld [vmem:[%s10235_s4 + $0x1d8] sm:$0xff] }
 0x25d   :  { %1344 = vmatpush1.msra.mxu0 %v6370_v60  ;;  %1415 = vmatpush1.msra.mxu1 %v6376_v46  ;;  %11214 = vst [vmem:[#allocation34_spill] sm:$0xff] %v6382_v54  ;;  %11215 = vst [vmem:[#allocation35_spill] sm:$0xff] %v6388_v23  ;;  %v6394_v60 = vld [vmem:[%s10235_s4 + $0x1c0] sm:$0xff]  ;;  %v6400_v46 = vld [vmem:[%s10235_s4 + $0x1d0] sm:$0xff] }
 0x25e   :  { %1345 = vmatprep.subr.mxu0 %v6382_v54  ;;  %1416 = vmatprep.subr.mxu1 %v6388_v23  ;;  %11216 = vst [vmem:[#allocation36_spill] sm:$0xff] %v6394_v60  ;;  %11217 = vst [vmem:[#allocation37_spill] sm:$0xff] %v6400_v46  ;;  %v6406_v54 = vld [vmem:[%s10235_s4 + $0x1a8] sm:$0xff]  ;;  %v6412_v23 = vld [vmem:[%s10235_s4 + $0x1b8] sm:$0xff] }
 0x25f   :  { %1346 = vmatpush1.msra.mxu0 %v6394_v60  ;;  %1417 = vmatpush1.msra.mxu1 %v6400_v46  ;;  %11218 = vst [vmem:[#allocation38_spill] sm:$0xff] %v6406_v54  ;;  %11219 = vst [vmem:[#allocation39_spill] sm:$0xff] %v6412_v23  ;;  %v6418_v60 = vld [vmem:[%s10235_s4 + $0x1a0] sm:$0xff]  ;;  %v6424_v46 = vld [vmem:[%s10235_s4 + $0x1b0] sm:$0xff] }
 0x260   :  { %1347 = vmatprep.subr.mxu0 %v6406_v54  ;;  %1418 = vmatprep.subr.mxu1 %v6412_v23  ;;  %11220 = vst [vmem:[#allocation40_spill] sm:$0xff] %v6418_v60  ;;  %11221 = vst [vmem:[#allocation41_spill] sm:$0xff] %v6424_v46  ;;  %v6430_v54 = vld [vmem:[%s10235_s4 + $0x188] sm:$0xff]  ;;  %v6436_v23 = vld [vmem:[%s10235_s4 + $0x198] sm:$0xff] }
 0x261   :  { %1348 = vmatpush1.msra.mxu0 %v6418_v60  ;;  %1419 = vmatpush1.msra.mxu1 %v6424_v46  ;;  %11222 = vst [vmem:[#allocation42_spill] sm:$0xff] %v6430_v54  ;;  %11223 = vst [vmem:[#allocation43_spill] sm:$0xff] %v6436_v23  ;;  %v6442_v60 = vld [vmem:[%s10235_s4 + $0x180] sm:$0xff]  ;;  %v6448_v46 = vld [vmem:[%s10235_s4 + $0x190] sm:$0xff] }
 0x262   :  { %1349 = vmatprep.subr.mxu0 %v6430_v54  ;;  %1420 = vmatprep.subr.mxu1 %v6436_v23  ;;  %11224 = vst [vmem:[#allocation44_spill] sm:$0xff] %v6442_v60  ;;  %11225 = vst [vmem:[#allocation45_spill] sm:$0xff] %v6448_v46  ;;  %v6454_v54 = vld [vmem:[%s10235_s4 + $0x168] sm:$0xff]  ;;  %v6460_v23 = vld [vmem:[%s10235_s4 + $0x178] sm:$0xff] }
 0x263   :  { %1350 = vmatpush1.msra.mxu0 %v6442_v60  ;;  %1421 = vmatpush1.msra.mxu1 %v6448_v46  ;;  %11226 = vst [vmem:[#allocation46_spill] sm:$0xff] %v6454_v54  ;;  %11227 = vst [vmem:[#allocation47_spill] sm:$0xff] %v6460_v23  ;;  %v6466_v60 = vld [vmem:[%s10235_s4 + $0x160] sm:$0xff]  ;;  %v6472_v46 = vld [vmem:[%s10235_s4 + $0x170] sm:$0xff] }
 0x264   :  { %1351 = vmatprep.subr.mxu0 %v6454_v54  ;;  %1422 = vmatprep.subr.mxu1 %v6460_v23  ;;  %11228 = vst [vmem:[#allocation48_spill] sm:$0xff] %v6466_v60  ;;  %11229 = vst [vmem:[#allocation49_spill] sm:$0xff] %v6472_v46  ;;  %v6478_v54 = vld [vmem:[%s10235_s4 + $0x148] sm:$0xff]  ;;  %v6484_v23 = vld [vmem:[%s10235_s4 + $0x158] sm:$0xff] }
 0x265   :  { %1352 = vmatpush1.msra.mxu0 %v6466_v60  ;;  %1423 = vmatpush1.msra.mxu1 %v6472_v46  ;;  %11230 = vst [vmem:[#allocation50_spill] sm:$0xff] %v6478_v54  ;;  %11231 = vst [vmem:[#allocation51_spill] sm:$0xff] %v6484_v23  ;;  %v6490_v60 = vld [vmem:[%s10235_s4 + $0x140] sm:$0xff]  ;;  %v6496_v46 = vld [vmem:[%s10235_s4 + $0x150] sm:$0xff] }
 0x266   :  { %1353 = vmatprep.subr.mxu0 %v6478_v54  ;;  %1424 = vmatprep.subr.mxu1 %v6484_v23  ;;  %11232 = vst [vmem:[#allocation52_spill] sm:$0xff] %v6490_v60  ;;  %11233 = vst [vmem:[#allocation53_spill] sm:$0xff] %v6496_v46  ;;  %v6502_v54 = vld [vmem:[%s10235_s4 + $0x128] sm:$0xff]  ;;  %v6508_v23 = vld [vmem:[%s10235_s4 + $0x138] sm:$0xff] }
 0x267   :  { %1354 = vmatpush1.msra.mxu0 %v6490_v60  ;;  %1425 = vmatpush1.msra.mxu1 %v6496_v46  ;;  %11234 = vst [vmem:[#allocation54_spill] sm:$0xff] %v6502_v54  ;;  %11235 = vst [vmem:[#allocation55_spill] sm:$0xff] %v6508_v23  ;;  %v6514_v60 = vld [vmem:[%s10235_s4 + $0x120] sm:$0xff]  ;;  %v6520_v46 = vld [vmem:[%s10235_s4 + $0x130] sm:$0xff] }
 0x268   :  { %1355 = vmatprep.subr.mxu0 %v6502_v54  ;;  %1426 = vmatprep.subr.mxu1 %v6508_v23  ;;  %11236 = vst [vmem:[#allocation56_spill] sm:$0xff] %v6514_v60  ;;  %11237 = vst [vmem:[#allocation57_spill] sm:$0xff] %v6520_v46  ;;  %v6526_v54 = vld [vmem:[%s10235_s4 + $0x108] sm:$0xff]  ;;  %v6532_v23 = vld [vmem:[%s10235_s4 + $0x118] sm:$0xff] }
 0x269   :  { %1356 = vmatpush1.msra.mxu0 %v6514_v60  ;;  %1427 = vmatpush1.msra.mxu1 %v6520_v46  ;;  %11238 = vst [vmem:[#allocation58_spill] sm:$0xff] %v6526_v54  ;;  %11239 = vst [vmem:[#allocation59_spill] sm:$0xff] %v6532_v23  ;;  %v6538_v60 = vld [vmem:[%s10235_s4 + $0x100] sm:$0xff]  ;;  %v6544_v46 = vld [vmem:[%s10235_s4 + $0x110] sm:$0xff] }
 0x26a   :  { %1357 = vmatprep.subr.mxu0 %v6526_v54  ;;  %1428 = vmatprep.subr.mxu1 %v6532_v23  ;;  %11240 = vst [vmem:[#allocation60_spill] sm:$0xff] %v6538_v60  ;;  %11241 = vst [vmem:[#allocation61_spill] sm:$0xff] %v6544_v46  ;;  %v6550_v54 = vld [vmem:[%s10235_s4 + $0xe8] sm:$0xff]  ;;  %v6556_v23 = vld [vmem:[%s10235_s4 + $0xf8] sm:$0xff] }
 0x26b   :  { %1358 = vmatpush1.msra.mxu0 %v6538_v60  ;;  %1429 = vmatpush1.msra.mxu1 %v6544_v46  ;;  %11242 = vst [vmem:[#allocation62_spill] sm:$0xff] %v6550_v54  ;;  %11243 = vst [vmem:[#allocation63_spill] sm:$0xff] %v6556_v23  ;;  %v6562_v60 = vld [vmem:[%s10235_s4 + $0xe0] sm:$0xff]  ;;  %v6568_v46 = vld [vmem:[%s10235_s4 + $0xf0] sm:$0xff] }
 0x26c   :  { %1359 = vmatprep.subr.mxu0 %v6550_v54  ;;  %1430 = vmatprep.subr.mxu1 %v6556_v23  ;;  %11244 = vst [vmem:[#allocation64_spill] sm:$0xff] %v6562_v60  ;;  %11245 = vst [vmem:[#allocation65_spill] sm:$0xff] %v6568_v46  ;;  %v6574_v54 = vld [vmem:[%s10235_s4 + $0xc8] sm:$0xff]  ;;  %v6580_v23 = vld [vmem:[%s10235_s4 + $0xd8] sm:$0xff] }
 0x26d   :  { %1360 = vmatpush1.msra.mxu0 %v6562_v60  ;;  %1431 = vmatpush1.msra.mxu1 %v6568_v46  ;;  %11246 = vst [vmem:[#allocation66_spill] sm:$0xff] %v6574_v54  ;;  %11247 = vst [vmem:[#allocation67_spill] sm:$0xff] %v6580_v23  ;;  %v6586_v60 = vld [vmem:[%s10235_s4 + $0xc0] sm:$0xff]  ;;  %v6592_v46 = vld [vmem:[%s10235_s4 + $0xd0] sm:$0xff] }
 0x26e   :  { %1361 = vmatprep.subr.mxu0 %v6574_v54  ;;  %1432 = vmatprep.subr.mxu1 %v6580_v23  ;;  %11248 = vst [vmem:[#allocation68_spill] sm:$0xff] %v6586_v60  ;;  %11249 = vst [vmem:[#allocation69_spill] sm:$0xff] %v6592_v46  ;;  %v6598_v54 = vld [vmem:[%s10235_s4 + $0xa8] sm:$0xff]  ;;  %v6604_v23 = vld [vmem:[%s10235_s4 + $0xb8] sm:$0xff] }
 0x26f   :  { %1362 = vmatpush1.msra.mxu0 %v6586_v60  ;;  %1433 = vmatpush1.msra.mxu1 %v6592_v46  ;;  %11250 = vst [vmem:[#allocation70_spill] sm:$0xff] %v6598_v54  ;;  %11251 = vst [vmem:[#allocation71_spill] sm:$0xff] %v6604_v23  ;;  %v6610_v60 = vld [vmem:[%s10235_s4 + $0xa0] sm:$0xff]  ;;  %v6616_v46 = vld [vmem:[%s10235_s4 + $0xb0] sm:$0xff] }
 0x270   :  { %1363 = vmatprep.subr.mxu0 %v6598_v54  ;;  %1434 = vmatprep.subr.mxu1 %v6604_v23  ;;  %11252 = vst [vmem:[#allocation72_spill] sm:$0xff] %v6610_v60  ;;  %11253 = vst [vmem:[#allocation73_spill] sm:$0xff] %v6616_v46  ;;  %v6622_v54 = vld [vmem:[%s10235_s4 + $0x88] sm:$0xff]  ;;  %v6628_v23 = vld [vmem:[%s10235_s4 + $0x98] sm:$0xff] }
 0x271   :  { %1364 = vmatpush1.msra.mxu0 %v6610_v60  ;;  %1435 = vmatpush1.msra.mxu1 %v6616_v46  ;;  %11254 = vst [vmem:[#allocation74_spill] sm:$0xff] %v6622_v54  ;;  %11255 = vst [vmem:[#allocation75_spill] sm:$0xff] %v6628_v23  ;;  %v6634_v60 = vld [vmem:[%s10235_s4 + $0x80] sm:$0xff]  ;;  %v6640_v46 = vld [vmem:[%s10235_s4 + $0x90] sm:$0xff] }
 0x272   :  { %1365 = vmatprep.subr.mxu0 %v6622_v54  ;;  %1436 = vmatprep.subr.mxu1 %v6628_v23  ;;  %11256 = vst [vmem:[#allocation76_spill] sm:$0xff] %v6634_v60  ;;  %11257 = vst [vmem:[#allocation77_spill] sm:$0xff] %v6640_v46  ;;  %v6646_v54 = vld [vmem:[%s10235_s4 + $0x68] sm:$0xff]  ;;  %v6652_v23 = vld [vmem:[%s10235_s4 + $0x78] sm:$0xff] }
 0x273   :  { %1366 = vmatpush1.msra.mxu0 %v6634_v60  ;;  %1437 = vmatpush1.msra.mxu1 %v6640_v46  ;;  %11258 = vst [vmem:[#allocation78_spill] sm:$0xff] %v6646_v54  ;;  %11259 = vst [vmem:[#allocation79_spill] sm:$0xff] %v6652_v23  ;;  %v6658_v60 = vld [vmem:[%s10235_s4 + $0x60] sm:$0xff]  ;;  %v6664_v46 = vld [vmem:[%s10235_s4 + $0x70] sm:$0xff] }
 0x274   :  { %1367 = vmatprep.subr.mxu0 %v6646_v54  ;;  %1438 = vmatprep.subr.mxu1 %v6652_v23  ;;  %11260 = vst [vmem:[#allocation80_spill] sm:$0xff] %v6658_v60  ;;  %11261 = vst [vmem:[#allocation81_spill] sm:$0xff] %v6664_v46  ;;  %v6670_v54 = vld [vmem:[%s10235_s4 + $0x48] sm:$0xff]  ;;  %v6676_v23 = vld [vmem:[%s10235_s4 + $0x58] sm:$0xff] }
 0x275   :  { %1368 = vmatpush1.msra.mxu0 %v6658_v60  ;;  %1439 = vmatpush1.msra.mxu1 %v6664_v46  ;;  %11262 = vst [vmem:[#allocation82_spill] sm:$0xff] %v6670_v54  ;;  %11263 = vst [vmem:[#allocation83_spill] sm:$0xff] %v6676_v23  ;;  %v6682_v60 = vld [vmem:[%s10235_s4 + $0x40] sm:$0xff]  ;;  %v6688_v46 = vld [vmem:[%s10235_s4 + $0x50] sm:$0xff] }
 0x276   :  { %1369 = vmatprep.subr.mxu0 %v6670_v54  ;;  %1440 = vmatprep.subr.mxu1 %v6676_v23  ;;  %11264 = vst [vmem:[#allocation84_spill] sm:$0xff] %v6682_v60  ;;  %11265 = vst [vmem:[#allocation85_spill] sm:$0xff] %v6688_v46  ;;  %v6694_v54 = vld [vmem:[%s10235_s4 + $0x28] sm:$0xff]  ;;  %v6700_v23 = vld [vmem:[%s10235_s4 + $0x38] sm:$0xff] }
 0x277   :  { %1370 = vmatpush1.msra.mxu0 %v6682_v60  ;;  %1441 = vmatpush1.msra.mxu1 %v6688_v46  ;;  %11266 = vst [vmem:[#allocation86_spill] sm:$0xff] %v6694_v54  ;;  %11267 = vst [vmem:[#allocation87_spill] sm:$0xff] %v6700_v23  ;;  %v6706_v60 = vld [vmem:[%s10235_s4 + $0x20] sm:$0xff]  ;;  %v6712_v46 = vld [vmem:[%s10235_s4 + $0x30] sm:$0xff] }
 0x278   :  { %1371 = vmatprep.subr.mxu0 %v6694_v54  ;;  %1442 = vmatprep.subr.mxu1 %v6700_v23  ;;  %11268 = vst [vmem:[#allocation88_spill] sm:$0xff] %v6706_v60  ;;  %11269 = vst [vmem:[#allocation89_spill] sm:$0xff] %v6712_v46  ;;  %v6718_v54 = vld [vmem:[%s10235_s4 + $0x8] sm:$0xff]  ;;  %v6724_v23 = vld [vmem:[%s10235_s4 + $0x18] sm:$0xff] }
 0x279   :  { %1372 = vmatpush1.msra.mxu0 %v6706_v60  ;;  %1443 = vmatpush1.msra.mxu1 %v6712_v46  ;;  %11270 = vst [vmem:[#allocation90_spill] sm:$0xff] %v6718_v54  ;;  %11271 = vst [vmem:[#allocation91_spill] sm:$0xff] %v6724_v23  ;;  %v6730_v60 = vld [vmem:[%s10235_s4] sm:$0xff]  ;;  %v6736_v46 = vld [vmem:[%s10235_s4 + $0x10] sm:$0xff] }
 0x27a   :  { %1373 = vmatprep.subr.mxu0 %v6718_v54  ;;  %1444 = vmatprep.subr.mxu1 %v6724_v23  ;;  %11272 = vst [vmem:[#allocation92_spill] sm:$0xff] %v6730_v60  ;;  %11273 = vst [vmem:[#allocation93_spill] sm:$0xff] %v6736_v46  ;;  %v6742_v54 = vld [vmem:[%s10235_s4 + $0x3e8] sm:$0xff]  ;;  %v6748_v23 = vld [vmem:[%s10235_s4 + $0x3f8] sm:$0xff] }
 0x27b   :  { %1374 = vmatpush1.msra.mxu0 %v6730_v60  ;;  %1445 = vmatpush1.msra.mxu1 %v6736_v46  ;;  %11274 = vst [vmem:[#allocation94_spill] sm:$0xff] %v6742_v54  ;;  %11275 = vst [vmem:[#allocation95_spill] sm:$0xff] %v6748_v23  ;;  %v6754_v60 = vld [vmem:[%s10235_s4 + $0x3e0] sm:$0xff]  ;;  %v6760_v46 = vld [vmem:[%s10235_s4 + $0x3f0] sm:$0xff] }
 0x27c   :  { %1375 = vmatprep.subr.mxu0 %v6742_v54  ;;  %1446 = vmatprep.subr.mxu1 %v6748_v23  ;;  %11276 = vst [vmem:[#allocation96_spill] sm:$0xff] %v6754_v60  ;;  %11277 = vst [vmem:[#allocation97_spill] sm:$0xff] %v6760_v46  ;;  %v6766_v54 = vld [vmem:[%s10235_s4 + $0x3c8] sm:$0xff]  ;;  %v6772_v23 = vld [vmem:[%s10235_s4 + $0x3d8] sm:$0xff] }
 0x27d   :  { %1376 = vmatpush2.msra.mxu0 %v6754_v60  ;;  %1447 = vmatpush2.msra.mxu1 %v6760_v46  ;;  %11278 = vst [vmem:[#allocation98_spill] sm:$0xff] %v6766_v54  ;;  %11279 = vst [vmem:[#allocation99_spill] sm:$0xff] %v6772_v23  ;;  %v6778_v60 = vld [vmem:[%s10235_s4 + $0x3c0] sm:$0xff]  ;;  %v6784_v46 = vld [vmem:[%s10235_s4 + $0x3d0] sm:$0xff] }
 0x27e   :  { %1377 = vmatprep.subr.mxu0 %v6766_v54  ;;  %1448 = vmatprep.subr.mxu1 %v6772_v23  ;;  %11280 = vst [vmem:[#allocation100_spill] sm:$0xff] %v6778_v60  ;;  %11281 = vst [vmem:[#allocation101_spill] sm:$0xff] %v6784_v46  ;;  %v6790_v54 = vld [vmem:[%s10235_s4 + $0x3a8] sm:$0xff]  ;;  %v6796_v23 = vld [vmem:[%s10235_s4 + $0x3b8] sm:$0xff] }
 0x27f   :  { %1378 = vmatpush2.msra.mxu0 %v6778_v60  ;;  %1449 = vmatpush2.msra.mxu1 %v6784_v46  ;;  %11282 = vst [vmem:[#allocation102_spill] sm:$0xff] %v6790_v54  ;;  %11283 = vst [vmem:[#allocation103_spill] sm:$0xff] %v6796_v23  ;;  %v6802_v60 = vld [vmem:[%s10235_s4 + $0x3a0] sm:$0xff]  ;;  %v6808_v46 = vld [vmem:[%s10235_s4 + $0x3b0] sm:$0xff] }
 0x280   :  { %1379 = vmatprep.subr.mxu0 %v6790_v54  ;;  %1450 = vmatprep.subr.mxu1 %v6796_v23  ;;  %11284 = vst [vmem:[#allocation104_spill] sm:$0xff] %v6802_v60  ;;  %11285 = vst [vmem:[#allocation105_spill] sm:$0xff] %v6808_v46  ;;  %v6814_v54 = vld [vmem:[%s10235_s4 + $0x388] sm:$0xff]  ;;  %v6820_v23 = vld [vmem:[%s10235_s4 + $0x398] sm:$0xff] }
 0x281   :  { %1380 = vmatpush2.msra.mxu0 %v6802_v60  ;;  %1451 = vmatpush2.msra.mxu1 %v6808_v46  ;;  %11286 = vst [vmem:[#allocation106_spill] sm:$0xff] %v6814_v54  ;;  %11287 = vst [vmem:[#allocation107_spill] sm:$0xff] %v6820_v23  ;;  %v6826_v60 = vld [vmem:[%s10235_s4 + $0x380] sm:$0xff]  ;;  %v6832_v46 = vld [vmem:[%s10235_s4 + $0x390] sm:$0xff] }
 0x282   :  { %1381 = vmatprep.subr.mxu0 %v6814_v54  ;;  %1452 = vmatprep.subr.mxu1 %v6820_v23  ;;  %11288 = vst [vmem:[#allocation108_spill] sm:$0xff] %v6826_v60  ;;  %11289 = vst [vmem:[#allocation109_spill] sm:$0xff] %v6832_v46  ;;  %v6838_v54 = vld [vmem:[%s10235_s4 + $0x368] sm:$0xff]  ;;  %v6844_v23 = vld [vmem:[%s10235_s4 + $0x378] sm:$0xff] }
 0x283   :  { %1382 = vmatpush2.msra.mxu0 %v6826_v60  ;;  %1453 = vmatpush2.msra.mxu1 %v6832_v46  ;;  %11290 = vst [vmem:[#allocation110_spill] sm:$0xff] %v6838_v54  ;;  %11291 = vst [vmem:[#allocation111_spill] sm:$0xff] %v6844_v23  ;;  %v6850_v60 = vld [vmem:[%s10235_s4 + $0x360] sm:$0xff]  ;;  %v6856_v46 = vld [vmem:[%s10235_s4 + $0x370] sm:$0xff] }
 0x284   :  { %1383 = vmatprep.subr.mxu0 %v6838_v54  ;;  %1454 = vmatprep.subr.mxu1 %v6844_v23  ;;  %11292 = vst [vmem:[#allocation112_spill] sm:$0xff] %v6850_v60  ;;  %11293 = vst [vmem:[#allocation113_spill] sm:$0xff] %v6856_v46  ;;  %v6862_v54 = vld [vmem:[%s10235_s4 + $0x348] sm:$0xff]  ;;  %v6868_v23 = vld [vmem:[%s10235_s4 + $0x358] sm:$0xff] }
 0x285   :  { %1384 = vmatpush2.msra.mxu0 %v6850_v60  ;;  %1455 = vmatpush2.msra.mxu1 %v6856_v46  ;;  %11294 = vst [vmem:[#allocation114_spill] sm:$0xff] %v6862_v54  ;;  %11295 = vst [vmem:[#allocation115_spill] sm:$0xff] %v6868_v23  ;;  %v6874_v60 = vld [vmem:[%s10235_s4 + $0x340] sm:$0xff]  ;;  %v6880_v46 = vld [vmem:[%s10235_s4 + $0x350] sm:$0xff] }
 0x286   :  { %1385 = vmatprep.subr.mxu0 %v6862_v54  ;;  %1456 = vmatprep.subr.mxu1 %v6868_v23  ;;  %11296 = vst [vmem:[#allocation116_spill] sm:$0xff] %v6874_v60  ;;  %11297 = vst [vmem:[#allocation117_spill] sm:$0xff] %v6880_v46  ;;  %v6886_v54 = vld [vmem:[%s10235_s4 + $0x328] sm:$0xff]  ;;  %v6892_v23 = vld [vmem:[%s10235_s4 + $0x338] sm:$0xff] }
 0x287   :  { %1386 = vmatpush2.msra.mxu0 %v6874_v60  ;;  %1457 = vmatpush2.msra.mxu1 %v6880_v46  ;;  %11298 = vst [vmem:[#allocation118_spill] sm:$0xff] %v6886_v54  ;;  %11299 = vst [vmem:[#allocation119_spill] sm:$0xff] %v6892_v23  ;;  %v6898_v60 = vld [vmem:[%s10235_s4 + $0x320] sm:$0xff]  ;;  %v6904_v46 = vld [vmem:[%s10235_s4 + $0x330] sm:$0xff] }
 0x288   :  { %1387 = vmatprep.subr.mxu0 %v6886_v54  ;;  %1458 = vmatprep.subr.mxu1 %v6892_v23  ;;  %11300 = vst [vmem:[#allocation120_spill] sm:$0xff] %v6898_v60  ;;  %11301 = vst [vmem:[#allocation121_spill] sm:$0xff] %v6904_v46  ;;  %v6910_v54 = vld [vmem:[%s10235_s4 + $0x308] sm:$0xff]  ;;  %v6916_v23 = vld [vmem:[%s10235_s4 + $0x318] sm:$0xff] }
 0x289   :  { %1388 = vmatpush2.msra.mxu0 %v6898_v60  ;;  %1459 = vmatpush2.msra.mxu1 %v6904_v46  ;;  %11302 = vst [vmem:[#allocation122_spill] sm:$0xff] %v6910_v54  ;;  %11303 = vst [vmem:[#allocation123_spill] sm:$0xff] %v6916_v23  ;;  %v6922_v60 = vld [vmem:[%s10235_s4 + $0x300] sm:$0xff]  ;;  %v6928_v46 = vld [vmem:[%s10235_s4 + $0x310] sm:$0xff] }
 0x28a   :  { %1389 = vmatprep.subr.mxu0 %v6910_v54  ;;  %1460 = vmatprep.subr.mxu1 %v6916_v23  ;;  %11304 = vst [vmem:[#allocation124_spill] sm:$0xff] %v6922_v60  ;;  %11305 = vst [vmem:[#allocation125_spill] sm:$0xff] %v6928_v46  ;;  %v6934_v54 = vld [vmem:[%s10235_s4 + $0x2e8] sm:$0xff]  ;;  %v6940_v23 = vld [vmem:[%s10235_s4 + $0x2f8] sm:$0xff] }
 0x28b   :  { %1390 = vmatpush2.msra.mxu0 %v6922_v60  ;;  %1461 = vmatpush2.msra.mxu1 %v6928_v46  ;;  %11306 = vst [vmem:[#allocation126_spill] sm:$0xff] %v6934_v54  ;;  %11307 = vst [vmem:[#allocation127_spill] sm:$0xff] %v6940_v23  ;;  %v6946_v60 = vld [vmem:[%s10235_s4 + $0x2e0] sm:$0xff]  ;;  %v6952_v46 = vld [vmem:[%s10235_s4 + $0x2f0] sm:$0xff] }
 0x28c   :  { %1391 = vmatprep.subr.mxu0 %v6934_v54  ;;  %1462 = vmatprep.subr.mxu1 %v6940_v23  ;;  %11308 = vst [vmem:[#allocation128_spill] sm:$0xff] %v6946_v60  ;;  %11309 = vst [vmem:[#allocation129_spill] sm:$0xff] %v6952_v46  ;;  %v6958_v54 = vld [vmem:[%s10235_s4 + $0x2c8] sm:$0xff]  ;;  %v6964_v23 = vld [vmem:[%s10235_s4 + $0x2d8] sm:$0xff] }
 0x28d   :  { %1392 = vmatpush2.msra.mxu0 %v6946_v60  ;;  %1463 = vmatpush2.msra.mxu1 %v6952_v46  ;;  %11310 = vst [vmem:[#allocation130_spill] sm:$0xff] %v6958_v54  ;;  %11311 = vst [vmem:[#allocation131_spill] sm:$0xff] %v6964_v23  ;;  %v6970_v60 = vld [vmem:[%s10235_s4 + $0x2c0] sm:$0xff]  ;;  %v6976_v46 = vld [vmem:[%s10235_s4 + $0x2d0] sm:$0xff] }
 0x28e   :  { %1393 = vmatprep.subr.mxu0 %v6958_v54  ;;  %1464 = vmatprep.subr.mxu1 %v6964_v23  ;;  %11312 = vst [vmem:[#allocation132_spill] sm:$0xff] %v6970_v60  ;;  %11313 = vst [vmem:[#allocation133_spill] sm:$0xff] %v6976_v46  ;;  %v6982_v54 = vld [vmem:[%s10235_s4 + $0x2a8] sm:$0xff]  ;;  %v6988_v23 = vld [vmem:[%s10235_s4 + $0x2b8] sm:$0xff] }
 0x28f   :  { %1394 = vmatpush2.msra.mxu0 %v6970_v60  ;;  %1465 = vmatpush2.msra.mxu1 %v6976_v46  ;;  %11314 = vst [vmem:[#allocation134_spill] sm:$0xff] %v6982_v54  ;;  %11315 = vst [vmem:[#allocation135_spill] sm:$0xff] %v6988_v23  ;;  %v6994_v60 = vld [vmem:[%s10235_s4 + $0x2a0] sm:$0xff]  ;;  %v7000_v46 = vld [vmem:[%s10235_s4 + $0x2b0] sm:$0xff] }
 0x290   :  { %1395 = vmatprep.subr.mxu0 %v6982_v54  ;;  %1466 = vmatprep.subr.mxu1 %v6988_v23  ;;  %11316 = vst [vmem:[#allocation136_spill] sm:$0xff] %v6994_v60  ;;  %11317 = vst [vmem:[#allocation137_spill] sm:$0xff] %v7000_v46  ;;  %v7006_v54 = vld [vmem:[%s10235_s4 + $0x288] sm:$0xff]  ;;  %v7012_v23 = vld [vmem:[%s10235_s4 + $0x298] sm:$0xff] }
 0x291   :  { %1396 = vmatpush2.msra.mxu0 %v6994_v60  ;;  %1467 = vmatpush2.msra.mxu1 %v7000_v46  ;;  %11318 = vst [vmem:[#allocation138_spill] sm:$0xff] %v7006_v54  ;;  %11319 = vst [vmem:[#allocation139_spill] sm:$0xff] %v7012_v23  ;;  %v7018_v60 = vld [vmem:[%s10235_s4 + $0x280] sm:$0xff]  ;;  %v7024_v46 = vld [vmem:[%s10235_s4 + $0x290] sm:$0xff] }
 0x292   :  { %1397 = vmatprep.subr.mxu0 %v7006_v54  ;;  %1468 = vmatprep.subr.mxu1 %v7012_v23  ;;  %11320 = vst [vmem:[#allocation140_spill] sm:$0xff] %v7018_v60  ;;  %11321 = vst [vmem:[#allocation141_spill] sm:$0xff] %v7024_v46  ;;  %v7030_v54 = vld [vmem:[%s10235_s4 + $0x268] sm:$0xff]  ;;  %v7036_v23 = vld [vmem:[%s10235_s4 + $0x278] sm:$0xff] }
 0x293   :  { %1398 = vmatpush2.msra.mxu0 %v7018_v60  ;;  %1469 = vmatpush2.msra.mxu1 %v7024_v46  ;;  %11322 = vst [vmem:[#allocation142_spill] sm:$0xff] %v7030_v54  ;;  %11323 = vst [vmem:[#allocation143_spill] sm:$0xff] %v7036_v23  ;;  %v7042_v60 = vld [vmem:[%s10235_s4 + $0x260] sm:$0xff]  ;;  %v7048_v46 = vld [vmem:[%s10235_s4 + $0x270] sm:$0xff] }
 0x294   :  { %1399 = vmatprep.subr.mxu0 %v7030_v54  ;;  %1470 = vmatprep.subr.mxu1 %v7036_v23  ;;  %11324 = vst [vmem:[#allocation144_spill] sm:$0xff] %v7042_v60  ;;  %11325 = vst [vmem:[#allocation145_spill] sm:$0xff] %v7048_v46  ;;  %v7054_v54 = vld [vmem:[%s10235_s4 + $0x248] sm:$0xff]  ;;  %v7060_v23 = vld [vmem:[%s10235_s4 + $0x258] sm:$0xff] }
 0x295   :  { %1400 = vmatpush2.msra.mxu0 %v7042_v60  ;;  %1471 = vmatpush2.msra.mxu1 %v7048_v46  ;;  %11326 = vst [vmem:[#allocation146_spill] sm:$0xff] %v7054_v54  ;;  %11327 = vst [vmem:[#allocation147_spill] sm:$0xff] %v7060_v23  ;;  %v7066_v60 = vld [vmem:[%s10235_s4 + $0x240] sm:$0xff]  ;;  %v7072_v46 = vld [vmem:[%s10235_s4 + $0x250] sm:$0xff] }
 0x296   :  { %1401 = vmatprep.subr.mxu0 %v7054_v54  ;;  %1472 = vmatprep.subr.mxu1 %v7060_v23  ;;  %11328 = vst [vmem:[#allocation148_spill] sm:$0xff] %v7066_v60  ;;  %11329 = vst [vmem:[#allocation149_spill] sm:$0xff] %v7072_v46  ;;  %v7078_v54 = vld [vmem:[%s10235_s4 + $0x228] sm:$0xff]  ;;  %v7084_v23 = vld [vmem:[%s10235_s4 + $0x238] sm:$0xff] }
 0x297   :  { %1402 = vmatpush2.msra.mxu0 %v7066_v60  ;;  %1473 = vmatpush2.msra.mxu1 %v7072_v46  ;;  %11330 = vst [vmem:[#allocation152_spill] sm:$0xff] %v7078_v54  ;;  %11331 = vst [vmem:[#allocation153_spill] sm:$0xff] %v7084_v23  ;;  %v7090_v60 = vld [vmem:[%s10235_s4 + $0x220] sm:$0xff]  ;;  %v7096_v46 = vld [vmem:[%s10235_s4 + $0x230] sm:$0xff] }
 0x298   :  { %1403 = vmatprep.subr.mxu0 %v7078_v54  ;;  %1474 = vmatprep.subr.mxu1 %v7084_v23  ;;  %11332 = vst [vmem:[#allocation157_spill] sm:$0xff] %v7090_v60  ;;  %11333 = vst [vmem:[#allocation158_spill] sm:$0xff] %v7096_v46  ;;  %v7102_v54 = vld [vmem:[%s10235_s4 + $0x208] sm:$0xff]  ;;  %v7108_v23 = vld [vmem:[%s10235_s4 + $0x218] sm:$0xff] }
 0x299   :  { %1404 = vmatpush2.msra.mxu0 %v7090_v60  ;;  %1475 = vmatpush2.msra.mxu1 %v7096_v46  ;;  %11334 = vst [vmem:[#allocation159_spill] sm:$0xff] %v7102_v54  ;;  %11335 = vst [vmem:[#allocation160_spill] sm:$0xff] %v7108_v23  ;;  %v7114_v60 = vld [vmem:[%s10235_s4 + $0x200] sm:$0xff]  ;;  %v7120_v46 = vld [vmem:[%s10235_s4 + $0x210] sm:$0xff] }
 0x29a   :  { %1405 = vmatprep.subr.mxu0 %v7102_v54  ;;  %1476 = vmatprep.subr.mxu1 %v7108_v23  ;;  %11336 = vst [vmem:[#allocation161_spill] sm:$0xff] %v7114_v60  ;;  %11337 = vst [vmem:[#allocation162_spill] sm:$0xff] %v7120_v46 }
 0x29b   :  { %1406 = vmatpush2.msra.mxu0 %v7114_v60  ;;  %1477 = vmatpush2.msra.mxu1 %v7120_v46 }
 0x29c   :  { %1509 = vmatprep.subr.mxu0 %v5932_v45  ;;  %1580 = vmatprep.subr.mxu1 %v5938_v47 }
 0x2fa   :  { %v1051_v54 = vpop.f32.mrf.mxu0  ;;  %v1122_v0 = vpop.f32.mrf.mxu1 }
 0x2fb   :  { %v1052_v23 = vadd.f32 %v1051_v54, %v5946_v51  ;;  %v1123_v45 = vadd.f32 %v1122_v0, %v5961_v58 }
 0x2fc   :  { %v1053_v31 = vpop.f32.mrf.mxu0  ;;  %v1124_v63 = vpop.f32.mrf.mxu1 }
 0x2fd   :  { %v3484_v1 = vmul.f32 -1.442695, %v1052_v23  ;;  %v1054_v16 = vadd.f32 %v1053_v31, %v5950_v55  ;;  %v1125_v61 = vadd.f32 %v1124_v63, %v5956_v3 }
 0x2ff   :  { %3644 = vpow2.f32 %v3484_v1  ;;  %v3485_v60 = vmul.f32 -1.442695, %v1054_v16  ;;  %v3486_v59 = vmul.f32 -1.442695, %v1125_v61 }
 0x301   :  { %3646 = vpow2.f32 %v3485_v60 }
 0x302   :  { %3648 = vpow2.f32 %v3486_v59 }
 0x30c   :  { %v3645_v46 = vpop.eup %3644 }
 0x30d   :  { %v1130_v57 = vadd.f32 1.0, %v3645_v46 }
 0x30e   :  { %v3647_v47 = vpop.eup %3646 }
 0x30f   :  { %3650 = vrcp.f32 %v1130_v57  ;;  %v1136_v54 = vadd.f32 1.0, %v3647_v47  ;;  %v3649_v23 = vpop.eup %3648 }
 0x310   :  { %3652 = vtanh.f32 %v1123_v45  ;;  %v1143_v60 = vadd.f32 1.0, %v3649_v23 }
 0x311   :  { %3654 = vrcp.f32 %v1136_v54 }
 0x312   :  { %3656 = vrcp.f32 %v1143_v60 }
 0x31b   :  { %v1217_v31 = vpop.f32.mrf.mxu0  ;;  %v1288_v63 = vpop.f32.mrf.mxu1 }
 0x31c   :  { %v3651_v55 = vpop.eup %3650  ;;  %v1297_v1 = vrot.slane %v1217_v31, 4 }
 0x31d   :  { %v3653_v16 = vpop.eup %3652  ;;  %v1219_v51 = vpop.f32.mrf.mxu0 }
 0x31e   :  { %v3655_v53 = vpop.eup %3654  ;;  %v1305_v61 = vadd.f32 %v1297_v1, %v11185_v14  ;;  %v1298_v3 = vrot.slane %v1219_v51, 4  ;;  %v1147_v0 = vmul.f32 %v3653_v16, %v3651_v55  ;;  %v1290_v54 = vpop.f32.mrf.mxu1  ;;  %v1299_v1 = vrot.slane %v1288_v63, 4 }
 0x31f   :  { %v1146_v59 = vmul.f32 %v3655_v53, %v5966_v28  ;;  %v1300_v23 = vrot.slane %v1290_v54, 4  ;;  %v3657_v55 = vpop.eup %3656  ;;  %v1329_v54 = vrot.slane %v5972_v5, 6  ;;  %v11338_v5 = vld [vmem:[#allocation14_spill] sm:$0xff] }
 0x320   :  { %v3487_v46 = vmul.f32 -1.442695, %v1305_v61  ;;  %v1306_v57 = vadd.f32 %v1298_v3, %v11186_v26  ;;  %v1307_v28 = vadd.f32 %v1299_v1, %v5725_v2 }
 0x321   :  { %v7132_v45 = vadd.f32 %v1147_v0, %v1146_v59  ;;  %v1308_v31 = vadd.f32 %v1300_v23, %v5722_v9 }
 0x322   :  { %3658 = vpow2.f32 %v3487_v46  ;;  %v3488_v47 = vmul.f32 -1.442695, %v1306_v57 }
 0x323   :  { %3660 = vtanh.f32 %v7132_v45  ;;  %v3489_v51 = vmul.f32 -1.442695, %v1308_v31 }
 0x324   :  { %3662 = vpow2.f32 %v3488_v47 }
 0x325   :  { %3664 = vpow2.f32 %v3489_v51 }
 0x32f   :  { %v3659_v16 = vpop.eup %3658 }
 0x330   :  { %v3661_v53 = vpop.eup %3660  ;;  %v1312_v3 = vadd.f32 1.0, %v3659_v16 }
 0x331   :  { %v3663_v60 = vpop.eup %3662  ;;  %v1150_v61 = vmul.f32 %v3661_v53, %v3657_v55 }
 0x332   :  { %3666 = vrcp.f32 %v1312_v3  ;;  %v1318_v0 = vadd.f32 1.0, %v3663_v60  ;;  %v3665_v57 = vpop.eup %3664  ;;  %v11378_v3 = vld [vmem:[#allocation46_spill] sm:$0xff]  ;;  %v11379_v60 = vld [vmem:[#allocation47_spill] sm:$0xff] }
 0x333   :  { %3668 = vtanh.f32 %v1307_v28  ;;  %v1337_v59 = vrot.slane %v1150_v61, 4  ;;  %v1325_v31 = vadd.f32 1.0, %v3665_v57  ;;  %v11380_v61 = vld [vmem:[#allocation48_spill] sm:$0xff] }
 0x334   :  { %3670 = vrcp.f32 %v1318_v0  ;;  %v11381_v0 = vld [vmem:[#allocation49_spill] sm:$0xff]  ;;  %v11384_v57 = vld [vmem:[#allocation52_spill] sm:$0xff] }
 0x335   :  { %v1340_v46 = vrot.slane %v1337_v59, 4  ;;  %3672 = vrcp.f32 %v1325_v31  ;;  %v11382_v59 = vld [vmem:[#allocation50_spill] sm:$0xff]  ;;  %v11389_v31 = vld [vmem:[#allocation57_spill] sm:$0xff] }
 0x337   :  { %1407 = vmatprep.mubr.f32.mxu0 %v1340_v46  ;;  %1478 = vmatprep.mubr.f32.mxu1 %v1340_v46  ;;  %v11383_v46 = vld [vmem:[#allocation51_spill] sm:$0xff] }
 0x33f   :  { %v3667_v63 = vpop.eup %3666 }
 0x340   :  { %v3669_v47 = vpop.eup %3668 }
 0x341   :  { %v3671_v23 = vpop.eup %3670  ;;  %v1332_v1 = vmul.f32 %v3669_v47, %v3667_v63  ;;  %v11385_v63 = vld [vmem:[#allocation53_spill] sm:$0xff]  ;;  %v11386_v47 = vld [vmem:[#allocation54_spill] sm:$0xff] }
 0x342   :  { %v1331_v16 = vmul.f32 %v3671_v23, %v1329_v54  ;;  %v3673_v51 = vpop.eup %3672  ;;  %v11387_v54 = vld [vmem:[#allocation55_spill] sm:$0xff]  ;;  %v11388_v23 = vld [vmem:[#allocation56_spill] sm:$0xff] }
 0x344   :  { %v7138_v2 = vadd.f32 %v1332_v1, %v1331_v16  ;;  %v11390_v1 = vld [vmem:[#allocation58_spill] sm:$0xff]  ;;  %v11391_v16 = vld [vmem:[#allocation59_spill] sm:$0xff] }
 0x346   :  { %3674 = vtanh.f32 %v7138_v2 }
 0x353   :  { %v3675_v55 = vpop.eup %3674 }
 0x354   :  { %v1335_v28 = vmul.f32 %v3675_v55, %v3673_v51  ;;  %v11392_v51 = vld [vmem:[#allocation60_spill] sm:$0xff]  ;;  %v11393_v55 = vld [vmem:[#allocation61_spill] sm:$0xff] }
 0x356   :  { %v7141_v53 = vrot.slane %v1335_v28, 4  ;;  %v11394_v28 = vld [vmem:[#allocation62_spill] sm:$0xff] }
 0x358   :  { %1408 = vmatmul.mubr.f32.vlgmr.msra.gmra.mxu0 %v7141_v53  ;;  %1479 = vmatmul.mubr.f32.vlgmr.msra.gmra.mxu1 %v7141_v53 }
 0x359   :  { %1510 = vmatpush1.msra.mxu0 %v5982_v13  ;;  %1581 = vmatpush1.msra.mxu1 %v5988_v15  ;;  %v11339_v13 = vld [vmem:[#allocation5_spill] sm:$0xff]  ;;  %v11340_v15 = vld [vmem:[#allocation15_spill] sm:$0xff] }
 0x35a   :  { %1511 = vmatprep.subr.mxu0 %v5994_v56  ;;  %1582 = vmatprep.subr.mxu1 %v6000_v18  ;;  %v11341_v56 = vld [vmem:[#allocation6_spill] sm:$0xff]  ;;  %v11342_v18 = vld [vmem:[#allocation16_spill] sm:$0xff] }
 0x35b   :  { %1512 = vmatpush1.msra.mxu0 %v6006_v52  ;;  %1583 = vmatpush1.msra.mxu1 %v6012_v62  ;;  %v11343_v52 = vld [vmem:[#allocation7_spill] sm:$0xff]  ;;  %v11344_v62 = vld [vmem:[#allocation17_spill] sm:$0xff] }
 0x35c   :  { %1513 = vmatprep.subr.mxu0 %v6018_v48  ;;  %1584 = vmatprep.subr.mxu1 %v6024_v7  ;;  %v11345_v48 = vld [vmem:[#allocation8_spill] sm:$0xff]  ;;  %v11346_v7 = vld [vmem:[#allocation18_spill] sm:$0xff] }
 0x35d   :  { %1514 = vmatpush1.msra.mxu0 %v6030_v4  ;;  %1585 = vmatpush1.msra.mxu1 %v6036_v6  ;;  %v11347_v4 = vld [vmem:[#allocation9_spill] sm:$0xff]  ;;  %v11348_v6 = vld [vmem:[#allocation19_spill] sm:$0xff] }
 0x35e   :  { %1515 = vmatprep.subr.mxu0 %v6042_v8  ;;  %1586 = vmatprep.subr.mxu1 %v6048_v10  ;;  %v11349_v8 = vld [vmem:[#allocation10_spill] sm:$0xff]  ;;  %v11350_v10 = vld [vmem:[#allocation20_spill] sm:$0xff] }
 0x35f   :  { %1516 = vmatpush1.msra.mxu0 %v6054_v11  ;;  %1587 = vmatpush1.msra.mxu1 %v6060_v20  ;;  %v11351_v11 = vld [vmem:[#allocation11_spill] sm:$0xff]  ;;  %v11352_v20 = vld [vmem:[#allocation21_spill] sm:$0xff] }
 0x360   :  { %1517 = vmatprep.subr.mxu0 %v6066_v12  ;;  %1588 = vmatprep.subr.mxu1 %v6072_v17  ;;  %v11353_v12 = vld [vmem:[#allocation22_spill] sm:$0xff]  ;;  %v11354_v17 = vld [vmem:[#allocation23_spill] sm:$0xff] }
 0x361   :  { %1518 = vmatpush1.msra.mxu0 %v6078_v19  ;;  %1589 = vmatpush1.msra.mxu1 %v6084_v21  ;;  %v11355_v19 = vld [vmem:[#allocation24_spill] sm:$0xff]  ;;  %v11356_v21 = vld [vmem:[#allocation25_spill] sm:$0xff] }
 0x362   :  { %1519 = vmatprep.subr.mxu0 %v6090_v22  ;;  %1590 = vmatprep.subr.mxu1 %v6096_v24  ;;  %v11357_v22 = vld [vmem:[#allocation26_spill] sm:$0xff]  ;;  %v11358_v24 = vld [vmem:[#allocation27_spill] sm:$0xff] }
 0x363   :  { %1520 = vmatpush1.msra.mxu0 %v6102_v25  ;;  %1591 = vmatpush1.msra.mxu1 %v6108_v27  ;;  %v11359_v25 = vld [vmem:[#allocation28_spill] sm:$0xff]  ;;  %v11360_v27 = vmov 0.0  }
 0x364   :  { %1521 = vmatprep.subr.mxu0 %v6114_v29  ;;  %1592 = vmatprep.subr.mxu1 %v6120_v30  ;;  %v11361_v29 = vld [vmem:[#allocation29_spill] sm:$0xff]  ;;  %v11362_v30 = vld [vmem:[#allocation30_spill] sm:$0xff] }
 0x365   :  { %1522 = vmatpush1.msra.mxu0 %v6126_v32  ;;  %1593 = vmatpush1.msra.mxu1 %v6132_v33  ;;  %v11363_v32 = vld [vmem:[#allocation31_spill] sm:$0xff]  ;;  %v11364_v33 = vld [vmem:[#allocation32_spill] sm:$0xff] }
 0x366   :  { %1523 = vmatprep.subr.mxu0 %v6138_v34  ;;  %1594 = vmatprep.subr.mxu1 %v6144_v35  ;;  %v11365_v34 = vld [vmem:[#allocation33_spill] sm:$0xff]  ;;  %v11366_v35 = vld [vmem:[#allocation34_spill] sm:$0xff] }
 0x367   :  { %1524 = vmatpush1.msra.mxu0 %v6150_v36  ;;  %1595 = vmatpush1.msra.mxu1 %v6156_v37  ;;  %v11367_v36 = vld [vmem:[#allocation35_spill] sm:$0xff]  ;;  %v11368_v37 = vld [vmem:[#allocation36_spill] sm:$0xff] }
 0x368   :  { %1525 = vmatprep.subr.mxu0 %v6162_v38  ;;  %1596 = vmatprep.subr.mxu1 %v6168_v39  ;;  %v11369_v38 = vld [vmem:[#allocation37_spill] sm:$0xff]  ;;  %v11370_v39 = vld [vmem:[#allocation38_spill] sm:$0xff] }
 0x369   :  { %1526 = vmatpush1.msra.mxu0 %v6174_v40  ;;  %1597 = vmatpush1.msra.mxu1 %v6180_v41  ;;  %v11371_v40 = vld [vmem:[#allocation39_spill] sm:$0xff]  ;;  %v11372_v41 = vld [vmem:[#allocation40_spill] sm:$0xff] }
 0x36a   :  { %1527 = vmatprep.subr.mxu0 %v6186_v42  ;;  %1598 = vmatprep.subr.mxu1 %v6192_v43  ;;  %v11373_v42 = vld [vmem:[#allocation41_spill] sm:$0xff]  ;;  %v11374_v43 = vld [vmem:[#allocation42_spill] sm:$0xff] }
 0x36b   :  { %1528 = vmatpush1.msra.mxu0 %v6198_v44  ;;  %1599 = vmatpush1.msra.mxu1 %v6204_v49  ;;  %v11375_v44 = vld [vmem:[#allocation43_spill] sm:$0xff]  ;;  %v11376_v49 = vld [vmem:[#allocation44_spill] sm:$0xff] }
 0x36c   :  { %1529 = vmatprep.subr.mxu0 %v6210_v50  ;;  %1600 = vmatprep.subr.mxu1 %v11338_v5  ;;  %v11377_v50 = vld [vmem:[#allocation45_spill] sm:$0xff]  ;;  %v11396_v5 = vld [vmem:[#allocation64_spill] sm:$0xff] }
 0x36d   :  { %1530 = vmatpush1.msra.mxu0 %v11339_v13  ;;  %1601 = vmatpush1.msra.mxu1 %v11340_v15  ;;  %v11397_v13 = vld [vmem:[#allocation65_spill] sm:$0xff]  ;;  %v11398_v15 = vld [vmem:[#allocation66_spill] sm:$0xff] }
 0x36e   :  { %1531 = vmatprep.subr.mxu0 %v11341_v56  ;;  %1602 = vmatprep.subr.mxu1 %v11342_v18  ;;  %v11399_v56 = vld [vmem:[#allocation67_spill] sm:$0xff]  ;;  %v11400_v18 = vld [vmem:[#allocation68_spill] sm:$0xff] }
 0x36f   :  { %1532 = vmatpush1.msra.mxu0 %v11343_v52  ;;  %1603 = vmatpush1.msra.mxu1 %v11344_v62  ;;  %v11401_v52 = vld [vmem:[#allocation69_spill] sm:$0xff]  ;;  %v11402_v62 = vld [vmem:[#allocation70_spill] sm:$0xff] }
 0x370   :  { %1533 = vmatprep.subr.mxu0 %v11345_v48  ;;  %1604 = vmatprep.subr.mxu1 %v11346_v7  ;;  %v11403_v48 = vld [vmem:[#allocation71_spill] sm:$0xff]  ;;  %v11404_v7 = vld [vmem:[#allocation72_spill] sm:$0xff] }
 0x371   :  { %1534 = vmatpush1.msra.mxu0 %v11347_v4  ;;  %1605 = vmatpush1.msra.mxu1 %v11348_v6  ;;  %v11405_v4 = vld [vmem:[#allocation73_spill] sm:$0xff]  ;;  %v11406_v6 = vld [vmem:[#allocation74_spill] sm:$0xff] }
 0x372   :  { %1535 = vmatprep.subr.mxu0 %v11349_v8  ;;  %1606 = vmatprep.subr.mxu1 %v11350_v10  ;;  %v11407_v8 = vld [vmem:[#allocation75_spill] sm:$0xff]  ;;  %v11408_v10 = vld [vmem:[#allocation76_spill] sm:$0xff] }
 0x373   :  { %1536 = vmatpush1.msra.mxu0 %v11351_v11  ;;  %1607 = vmatpush1.msra.mxu1 %v11352_v20  ;;  %v11409_v11 = vld [vmem:[#allocation77_spill] sm:$0xff]  ;;  %v11410_v20 = vld [vmem:[#allocation78_spill] sm:$0xff] }
 0x374   :  { %1537 = vmatprep.subr.mxu0 %v11353_v12  ;;  %1608 = vmatprep.subr.mxu1 %v11354_v17  ;;  %v11411_v12 = vld [vmem:[#allocation79_spill] sm:$0xff]  ;;  %v11412_v17 = vld [vmem:[#allocation80_spill] sm:$0xff] }
 0x375   :  { %1538 = vmatpush1.msra.mxu0 %v11355_v19  ;;  %1609 = vmatpush1.msra.mxu1 %v11356_v21  ;;  %v11413_v19 = vld [vmem:[#allocation81_spill] sm:$0xff]  ;;  %v11414_v21 = vld [vmem:[#allocation82_spill] sm:$0xff] }
 0x376   :  { %1539 = vmatprep.subr.mxu0 %v11357_v22  ;;  %1610 = vmatprep.subr.mxu1 %v11358_v24  ;;  %v11415_v22 = vld [vmem:[#allocation83_spill] sm:$0xff]  ;;  %v11416_v24 = vld [vmem:[#allocation84_spill] sm:$0xff] }
 0x377   :  { %1540 = vmatpush1.msra.mxu0 %v11359_v25  ;;  %1573 = vmatprep.mubr.f32.mxu0 %v11360_v27  ;;  %v11417_v25 = vld [vmem:[#allocation85_spill] sm:$0xff] }
 0x378   :  { %1611 = vmatpush1.msra.mxu1 %v11361_v29  ;;  %1644 = vmatprep.mubr.f32.mxu1 %v11360_v27  ;;  %v11418_v29 = vld [vmem:[#allocation86_spill] sm:$0xff] }
 0x379   :  { %1574 = vmatmul.mubr.f32.vlgmr.msra.gmra.mxu0 %v7141_v53  ;;  %1645 = vmatmul.mubr.f32.vlgmr.msra.gmra.mxu1 %v7141_v53  ;;  %v11395_v53 = vld [vmem:[#allocation63_spill] sm:$0xff] }
 0x37a   :  { %1701 = vmatprep.subr.mxu0 %v11362_v30  ;;  %1772 = vmatprep.subr.mxu1 %v11363_v32  ;;  %v11419_v30 = vld [vmem:[#allocation87_spill] sm:$0xff]  ;;  %v11420_v32 = vld [vmem:[#allocation88_spill] sm:$0xff] }
 0x37b   :  { %1702 = vmatpush1.msra.mxu0 %v11364_v33  ;;  %1773 = vmatpush1.msra.mxu1 %v11365_v34  ;;  %v11421_v33 = vld [vmem:[#allocation89_spill] sm:$0xff]  ;;  %v11422_v34 = vld [vmem:[#allocation90_spill] sm:$0xff] }
 0x37c   :  { %1703 = vmatprep.subr.mxu0 %v11366_v35  ;;  %1774 = vmatprep.subr.mxu1 %v11367_v36  ;;  %v11423_v35 = vld [vmem:[#allocation91_spill] sm:$0xff]  ;;  %v11424_v36 = vld [vmem:[#allocation92_spill] sm:$0xff] }
 0x37d   :  { %1704 = vmatpush1.msra.mxu0 %v11368_v37  ;;  %1775 = vmatpush1.msra.mxu1 %v11369_v38  ;;  %v11425_v37 = vld [vmem:[#allocation93_spill] sm:$0xff]  ;;  %v11426_v38 = vld [vmem:[#allocation94_spill] sm:$0xff] }
 0x37e   :  { %1705 = vmatprep.subr.mxu0 %v11370_v39  ;;  %1776 = vmatprep.subr.mxu1 %v11371_v40  ;;  %v11427_v39 = vld [vmem:[#allocation95_spill] sm:$0xff]  ;;  %v11428_v40 = vld [vmem:[#allocation96_spill] sm:$0xff] }
 0x37f   :  { %1706 = vmatpush1.msra.mxu0 %v11372_v41  ;;  %1777 = vmatpush1.msra.mxu1 %v11373_v42  ;;  %v11429_v41 = vld [vmem:[#allocation97_spill] sm:$0xff]  ;;  %v11430_v42 = vld [vmem:[#allocation98_spill] sm:$0xff] }
 0x380   :  { %1707 = vmatprep.subr.mxu0 %v11374_v43  ;;  %1778 = vmatprep.subr.mxu1 %v11375_v44  ;;  %v11431_v43 = vld [vmem:[#allocation99_spill] sm:$0xff]  ;;  %v11432_v44 = vld [vmem:[#allocation100_spill] sm:$0xff] }
 0x381   :  { %1708 = vmatpush1.msra.mxu0 %v11376_v49  ;;  %1779 = vmatpush1.msra.mxu1 %v11377_v50  ;;  %v11433_v49 = vld [vmem:[#allocation101_spill] sm:$0xff]  ;;  %v11434_v50 = vld [vmem:[#allocation102_spill] sm:$0xff] }
 0x382   :  { %1709 = vmatprep.subr.mxu0 %v11378_v3  ;;  %1780 = vmatprep.subr.mxu1 %v11379_v60  ;;  %v11435_v3 = vld [vmem:[#allocation103_spill] sm:$0xff]  ;;  %v11436_v60 = vld [vmem:[#allocation104_spill] sm:$0xff] }
 0x383   :  { %1710 = vmatpush1.msra.mxu0 %v11380_v61  ;;  %1781 = vmatpush1.msra.mxu1 %v11381_v0  ;;  %v11437_v61 = vld [vmem:[#allocation105_spill] sm:$0xff]  ;;  %v11438_v0 = vld [vmem:[#allocation106_spill] sm:$0xff] }
 0x384   :  { %1711 = vmatprep.subr.mxu0 %v11382_v59  ;;  %1782 = vmatprep.subr.mxu1 %v11383_v46  ;;  %v11439_v59 = vld [vmem:[#allocation107_spill] sm:$0xff]  ;;  %v11440_v46 = vld [vmem:[#allocation108_spill] sm:$0xff] }
 0x385   :  { %1712 = vmatpush1.msra.mxu0 %v11384_v57  ;;  %1783 = vmatpush1.msra.mxu1 %v11385_v63  ;;  %v11441_v57 = vld [vmem:[#allocation109_spill] sm:$0xff]  ;;  %v11442_v63 = vld [vmem:[#allocation110_spill] sm:$0xff] }
 0x386   :  { %1713 = vmatprep.subr.mxu0 %v11386_v47  ;;  %1784 = vmatprep.subr.mxu1 %v11387_v54  ;;  %v11443_v47 = vld [vmem:[#allocation111_spill] sm:$0xff]  ;;  %v11444_v54 = vld [vmem:[#allocation112_spill] sm:$0xff] }
 0x387   :  { %1714 = vmatpush1.msra.mxu0 %v11388_v23  ;;  %1785 = vmatpush1.msra.mxu1 %v11389_v31  ;;  %v11445_v23 = vld [vmem:[#allocation113_spill] sm:$0xff]  ;;  %v11446_v31 = vld [vmem:[#allocation114_spill] sm:$0xff] }
 0x388   :  { %1715 = vmatprep.subr.mxu0 %v11390_v1  ;;  %1786 = vmatprep.subr.mxu1 %v11391_v16  ;;  %v11447_v1 = vld [vmem:[#allocation115_spill] sm:$0xff]  ;;  %v11448_v16 = vld [vmem:[#allocation116_spill] sm:$0xff] }
 0x389   :  { %1716 = vmatpush1.msra.mxu0 %v11392_v51  ;;  %1787 = vmatpush1.msra.mxu1 %v11393_v55  ;;  %v11449_v51 = vld [vmem:[#allocation117_spill] sm:$0xff]  ;;  %v11450_v55 = vld [vmem:[#allocation118_spill] sm:$0xff] }
 0x38a   :  { %1717 = vmatprep.subr.mxu0 %v11394_v28  ;;  %1788 = vmatprep.subr.mxu1 %v11395_v53  ;;  %v11451_v28 = vld [vmem:[#allocation119_spill] sm:$0xff]  ;;  %v11452_v53 = vld [vmem:[#allocation120_spill] sm:$0xff] }
 0x38b   :  { %1718 = vmatpush1.msra.mxu0 %v11396_v5  ;;  %1789 = vmatpush1.msra.mxu1 %v11397_v13  ;;  %v11453_v5 = vld [vmem:[#allocation121_spill] sm:$0xff]  ;;  %v11454_v13 = vld [vmem:[#allocation122_spill] sm:$0xff] }
 0x38c   :  { %1719 = vmatprep.subr.mxu0 %v11398_v15  ;;  %1790 = vmatprep.subr.mxu1 %v11399_v56  ;;  %v11455_v15 = vld [vmem:[#allocation123_spill] sm:$0xff]  ;;  %v11456_v56 = vld [vmem:[#allocation124_spill] sm:$0xff] }
 0x38d   :  { %1720 = vmatpush1.msra.mxu0 %v11400_v18  ;;  %1791 = vmatpush1.msra.mxu1 %v11401_v52  ;;  %v11457_v18 = vld [vmem:[#allocation125_spill] sm:$0xff]  ;;  %v11458_v52 = vld [vmem:[#allocation126_spill] sm:$0xff] }
 0x38e   :  { %1721 = vmatprep.subr.mxu0 %v11402_v62  ;;  %1792 = vmatprep.subr.mxu1 %v11403_v48  ;;  %v11459_v62 = vld [vmem:[#allocation127_spill] sm:$0xff]  ;;  %v11460_v48 = vld [vmem:[#allocation128_spill] sm:$0xff] }
 0x38f   :  { %1722 = vmatpush1.msra.mxu0 %v11404_v7  ;;  %1793 = vmatpush1.msra.mxu1 %v11405_v4  ;;  %v11461_v7 = vld [vmem:[#allocation129_spill] sm:$0xff]  ;;  %v11462_v4 = vld [vmem:[#allocation130_spill] sm:$0xff] }
 0x390   :  { %1723 = vmatprep.subr.mxu0 %v11406_v6  ;;  %1794 = vmatprep.subr.mxu1 %v11407_v8  ;;  %v11463_v6 = vld [vmem:[#allocation131_spill] sm:$0xff]  ;;  %v11464_v8 = vld [vmem:[#allocation132_spill] sm:$0xff] }
 0x391   :  { %1724 = vmatpush1.msra.mxu0 %v11408_v10  ;;  %1795 = vmatpush1.msra.mxu1 %v11409_v11  ;;  %v11465_v10 = vld [vmem:[#allocation133_spill] sm:$0xff]  ;;  %v11466_v11 = vld [vmem:[#allocation134_spill] sm:$0xff] }
 0x392   :  { %1725 = vmatprep.subr.mxu0 %v11410_v20  ;;  %1796 = vmatprep.subr.mxu1 %v11411_v12  ;;  %v11467_v20 = vld [vmem:[#allocation135_spill] sm:$0xff]  ;;  %v11468_v12 = vld [vmem:[#allocation136_spill] sm:$0xff] }
 0x393   :  { %1726 = vmatpush1.msra.mxu0 %v11412_v17  ;;  %1797 = vmatpush1.msra.mxu1 %v11413_v19  ;;  %v11469_v17 = vld [vmem:[#allocation137_spill] sm:$0xff]  ;;  %v11470_v19 = vld [vmem:[#allocation138_spill] sm:$0xff] }
 0x394   :  { %1727 = vmatprep.subr.mxu0 %v11414_v21  ;;  %1798 = vmatprep.subr.mxu1 %v11415_v22  ;;  %v11471_v21 = vld [vmem:[#allocation139_spill] sm:$0xff]  ;;  %v11472_v22 = vld [vmem:[#allocation140_spill] sm:$0xff] }
 0x395   :  { %1728 = vmatpush1.msra.mxu0 %v11416_v24  ;;  %1799 = vmatpush1.msra.mxu1 %v11417_v25  ;;  %v11473_v24 = vld [vmem:[#allocation141_spill] sm:$0xff]  ;;  %v11474_v25 = vld [vmem:[#allocation142_spill] sm:$0xff] }
 0x396   :  { %1729 = vmatprep.subr.mxu0 %v11418_v29  ;;  %1800 = vmatprep.subr.mxu1 %v11419_v30  ;;  %v11475_v29 = vld [vmem:[#allocation143_spill] sm:$0xff]  ;;  %v11476_v30 = vld [vmem:[#allocation144_spill] sm:$0xff] }
 0x397   :  { %1730 = vmatpush1.msra.mxu0 %v11420_v32  ;;  %1801 = vmatpush1.msra.mxu1 %v11421_v33  ;;  %v11477_v32 = vld [vmem:[#allocation145_spill] sm:$0xff]  ;;  %v11478_v33 = vld [vmem:[#allocation146_spill] sm:$0xff] }
 0x398   :  { %1731 = vmatprep.subr.mxu0 %v11422_v34  ;;  %1802 = vmatprep.subr.mxu1 %v11423_v35  ;;  %v11479_v34 = vld [vmem:[#allocation147_spill] sm:$0xff]  ;;  %v11480_v35 = vld [vmem:[#allocation148_spill] sm:$0xff] }
 0x399   :  { %1732 = vmatpush1.msra.mxu0 %v11424_v36  ;;  %1803 = vmatpush1.msra.mxu1 %v11425_v37  ;;  %v11481_v36 = vld [vmem:[#allocation149_spill] sm:$0xff]  ;;  %v11482_v37 = vld [vmem:[#allocation152_spill] sm:$0xff] }
 0x39a   :  { %1733 = vmatprep.subr.mxu0 %v11426_v38  ;;  %1804 = vmatprep.subr.mxu1 %v11427_v39  ;;  %v11483_v38 = vld [vmem:[#allocation153_spill] sm:$0xff] }
 0x39b   :  { %1734 = vmatpush2.msra.mxu0 %v11428_v40  ;;  %1805 = vmatpush2.msra.mxu1 %v11429_v41  ;;  %v11484_v39 = vld [vmem:[#allocation157_spill] sm:$0xff]  ;;  %v11485_v40 = vld [vmem:[#allocation158_spill] sm:$0xff]  ;;  %v11486_v41 = vld [vmem:[#allocation159_spill] sm:$0xff] }
 0x39c   :  { %1735 = vmatprep.subr.mxu0 %v11430_v42  ;;  %1806 = vmatprep.subr.mxu1 %v11431_v43  ;;  %v11487_v42 = vld [vmem:[#allocation160_spill] sm:$0xff]  ;;  %v11488_v43 = vld [vmem:[#allocation161_spill] sm:$0xff] }
 0x39d   :  { %1736 = vmatpush2.msra.mxu0 %v11432_v44  ;;  %1807 = vmatpush2.msra.mxu1 %v11433_v49  ;;  %v11489_v44 = vld [vmem:[#allocation162_spill] sm:$0xff]  ;;  %v7342_v49 = vld [vmem:[%s10233_s2 + $0x1e8] sm:$0xff] }
 0x39e   :  { %1737 = vmatprep.subr.mxu0 %v11434_v50  ;;  %1808 = vmatprep.subr.mxu1 %v11435_v3  ;;  %v7348_v50 = vld [vmem:[%s10233_s2 + $0x1f8] sm:$0xff] }
 0x39f   :  { %1738 = vmatpush2.msra.mxu0 %v11436_v60  ;;  %1809 = vmatpush2.msra.mxu1 %v11437_v61  ;;  %v11490_v60 = vld [vmem:[#allocation12_spill] sm:$0xff] }
 0x3a0   :  { %1739 = vmatprep.subr.mxu0 %v11438_v0  ;;  %1810 = vmatprep.subr.mxu1 %v11439_v59 }
 0x3a1   :  { %1740 = vmatpush2.msra.mxu0 %v11440_v46  ;;  %1811 = vmatpush2.msra.mxu1 %v11441_v57  ;;  %v11491_v46 = vld [vmem:[#allocation3_spill] sm:$0xff] }
 0x3a2   :  { %1741 = vmatprep.subr.mxu0 %v11442_v63  ;;  %1812 = vmatprep.subr.mxu1 %v11443_v47 }
 0x3a3   :  { %1742 = vmatpush2.msra.mxu0 %v11444_v54  ;;  %1813 = vmatpush2.msra.mxu1 %v11445_v23  ;;  %v11492_v23 = vld [vmem:[#allocation13_spill] sm:$0xff] }
 0x3a4   :  { %1743 = vmatprep.subr.mxu0 %v11446_v31  ;;  %1814 = vmatprep.subr.mxu1 %v11447_v1 }
 0x3a5   :  { %1744 = vmatpush2.msra.mxu0 %v11448_v16  ;;  %1815 = vmatpush2.msra.mxu1 %v11449_v51 }
 0x3a6   :  { %1745 = vmatprep.subr.mxu0 %v11450_v55  ;;  %1816 = vmatprep.subr.mxu1 %v11451_v28 }
 0x3a7   :  { %1746 = vmatpush2.msra.mxu0 %v11452_v53  ;;  %1817 = vmatpush2.msra.mxu1 %v11453_v5 }
 0x3a8   :  { %1747 = vmatprep.subr.mxu0 %v11454_v13  ;;  %1818 = vmatprep.subr.mxu1 %v11455_v15 }
 0x3a9   :  { %1748 = vmatpush2.msra.mxu0 %v11456_v56  ;;  %1819 = vmatpush2.msra.mxu1 %v11457_v18 }
 0x3aa   :  { %1749 = vmatprep.subr.mxu0 %v11458_v52  ;;  %1820 = vmatprep.subr.mxu1 %v11459_v62 }
 0x3ab   :  { %1750 = vmatpush2.msra.mxu0 %v11460_v48  ;;  %1821 = vmatpush2.msra.mxu1 %v11461_v7 }
 0x3ac   :  { %1751 = vmatprep.subr.mxu0 %v11462_v4  ;;  %1822 = vmatprep.subr.mxu1 %v11463_v6 }
 0x3ad   :  { %1752 = vmatpush2.msra.mxu0 %v11464_v8  ;;  %1823 = vmatpush2.msra.mxu1 %v11465_v10 }
 0x3ae   :  { %1753 = vmatprep.subr.mxu0 %v11466_v11  ;;  %1824 = vmatprep.subr.mxu1 %v11467_v20 }
 0x3af   :  { %1754 = vmatpush2.msra.mxu0 %v11468_v12  ;;  %1825 = vmatpush2.msra.mxu1 %v11469_v17 }
 0x3b0   :  { %1755 = vmatprep.subr.mxu0 %v11470_v19  ;;  %1826 = vmatprep.subr.mxu1 %v11471_v21 }
 0x3b1   :  { %1756 = vmatpush2.msra.mxu0 %v11472_v22  ;;  %1827 = vmatpush2.msra.mxu1 %v11473_v24 }
 0x3b2   :  { %1757 = vmatprep.subr.mxu0 %v11474_v25  ;;  %1828 = vmatprep.subr.mxu1 %v11475_v29 }
 0x3b3   :  { %1758 = vmatpush2.msra.mxu0 %v11476_v30  ;;  %1829 = vmatpush2.msra.mxu1 %v11477_v32 }
 0x3b4   :  { %1759 = vmatprep.subr.mxu0 %v11478_v33  ;;  %1830 = vmatprep.subr.mxu1 %v11479_v34 }
 0x3b5   :  { %1760 = vmatpush2.msra.mxu0 %v11480_v35  ;;  %1831 = vmatpush2.msra.mxu1 %v11481_v36 }
 0x3b6   :  { %1761 = vmatprep.subr.mxu0 %v11482_v37  ;;  %1832 = vmatprep.subr.mxu1 %v11483_v38 }
 0x3b7   :  { %1762 = vmatpush2.msra.mxu0 %v11484_v39  ;;  %1833 = vmatpush2.msra.mxu1 %v11485_v40  ;;  %v1687_v40 = vrot.slane %v7138_v2, 6  ;;  %v7374_v2 = vld [vmem:[%s10233_s2 + $0x1e0] sm:$0xff] }
 0x3b8   :  { %1763 = vmatprep.subr.mxu0 %v11486_v41  ;;  %1834 = vmatprep.subr.mxu1 %v11487_v42 }
 0x3b9   :  { %1764 = vmatpush2.msra.mxu0 %v11488_v43  ;;  %1835 = vmatpush2.msra.mxu1 %v11489_v44 }
 0x3ba   :  { %1867 = vmatprep.subr.mxu0 %v7342_v49  ;;  %1938 = vmatprep.subr.mxu1 %v7348_v50 }
 0x418   :  { %v1409_v3 = vpop.f32.mrf.mxu0  ;;  %v1480_v63 = vpop.f32.mrf.mxu1 }
 0x419   :  { %v1410_v61 = vadd.f32 %v1409_v3, %v11490_v60  ;;  %v1481_v51 = vadd.f32 %v1480_v63, %v5961_v58  ;;  %v7380_v63 = vld [vmem:[%s10233_s2 + $0x1f0] sm:$0xff] }
 0x41a   :  { %v1411_v0 = vpop.f32.mrf.mxu0  ;;  %v1482_v54 = vpop.f32.mrf.mxu1 }
 0x41b   :  { %v3490_v59 = vmul.f32 -1.442695, %v1410_v61  ;;  %v1412_v57 = vadd.f32 %v1411_v0, %v11491_v46  ;;  %v1483_v31 = vadd.f32 %v1482_v54, %v11492_v23  ;;  %v7392_v54 = vld [vmem:[%s10233_s2 + $0x1d8] sm:$0xff] }
 0x41d   :  { %3676 = vpow2.f32 %v3490_v59  ;;  %v3491_v47 = vmul.f32 -1.442695, %v1412_v57  ;;  %v3492_v1 = vmul.f32 -1.442695, %v1483_v31  ;;  %v7398_v31 = vld [vmem:[%s10233_s2 + $0x1c0] sm:$0xff] }
 0x41f   :  { %3678 = vpow2.f32 %v3491_v47  ;;  %v7386_v47 = vld [vmem:[%s10233_s2 + $0x1c8] sm:$0xff] }
 0x420   :  { %3680 = vpow2.f32 %v3492_v1  ;;  %v7404_v1 = vld [vmem:[%s10233_s2 + $0x1d0] sm:$0xff] }
 0x42a   :  { %v3677_v16 = vpop.eup %3676 }
 0x42b   :  { %v1488_v55 = vadd.f32 1.0, %v3677_v16  ;;  %v7410_v16 = vld [vmem:[%s10233_s2 + $0x1a8] sm:$0xff] }
 0x42c   :  { %v3679_v28 = vpop.eup %3678 }
 0x42d   :  { %3682 = vrcp.f32 %v1488_v55  ;;  %v1494_v53 = vadd.f32 1.0, %v3679_v28  ;;  %v3681_v5 = vpop.eup %3680  ;;  %v7422_v55 = vld [vmem:[%s10233_s2 + $0x1a0] sm:$0xff]  ;;  %v7428_v28 = vld [vmem:[%s10233_s2 + $0x1b0] sm:$0xff] }
 0x42e   :  { %3684 = vtanh.f32 %v1481_v51  ;;  %v1501_v52 = vadd.f32 1.0, %v3681_v5  ;;  %v7416_v51 = vld [vmem:[%s10233_s2 + $0x1b8] sm:$0xff] }
 0x42f   :  { %3686 = vrcp.f32 %v1494_v53  ;;  %v7434_v53 = vld [vmem:[%s10233_s2 + $0x188] sm:$0xff]  ;;  %v7440_v5 = vld [vmem:[%s10233_s2 + $0x198] sm:$0xff] }
 0x430   :  { %3688 = vrcp.f32 %v1501_v52  ;;  %v7470_v52 = vld [vmem:[%s10233_s2 + $0x160] sm:$0xff] }
 0x439   :  { %v1575_v13 = vpop.f32.mrf.mxu0  ;;  %v1646_v4 = vpop.f32.mrf.mxu1 }
 0x43a   :  { %v3683_v15 = vpop.eup %3682  ;;  %v1655_v56 = vrot.slane %v1575_v13, 2  ;;  %v1657_v22 = vrot.slane %v1646_v4, 2  ;;  %v7446_v13 = vld [vmem:[%s10233_s2 + $0x180] sm:$0xff] }
 0x43b   :  { %v3685_v18 = vpop.eup %3684  ;;  %v1577_v62 = vpop.f32.mrf.mxu0  ;;  %v7494_v4 = vld [vmem:[%s10233_s2 + $0x140] sm:$0xff] }
 0x43c   :  { %v3687_v48 = vpop.eup %3686  ;;  %v1663_v7 = vadd.f32 %v1655_v56, %v11185_v14  ;;  %v1656_v6 = vrot.slane %v1577_v62, 2  ;;  %v1505_v8 = vmul.f32 %v3685_v18, %v3683_v15  ;;  %v1648_v19 = vpop.f32.mrf.mxu1  ;;  %v7452_v15 = vld [vmem:[%s10233_s2 + $0x190] sm:$0xff]  ;;  %v7458_v56 = vld [vmem:[%s10233_s2 + $0x168] sm:$0xff]  ;;  %v7464_v18 = vld [vmem:[%s10233_s2 + $0x178] sm:$0xff] }
 0x43d   :  { %v1504_v10 = vmul.f32 %v3687_v48, %v7132_v45  ;;  %v1658_v21 = vrot.slane %v1648_v19, 2  ;;  %v3689_v25 = vpop.eup %3688  ;;  %v11493_v45 = vld [vmem:[#allocation156_spill] sm:$0xff]  ;;  %v7536_v19 = vld [vmem:[%s10233_s2 + $0x118] sm:$0xff] }
 0x43e   :  { %v3493_v11 = vmul.f32 -1.442695, %v1663_v7  ;;  %v1664_v20 = vadd.f32 %v1656_v6, %v11186_v26  ;;  %v1665_v30 = vadd.f32 %v1657_v22, %v11493_v45  ;;  %v7476_v62 = vld [vmem:[%s10233_s2 + $0x170] sm:$0xff]  ;;  %v7482_v48 = vld [vmem:[%s10233_s2 + $0x148] sm:$0xff]  ;;  %v7488_v7 = vld [vmem:[%s10233_s2 + $0x158] sm:$0xff] }
 0x43f   :  { %v7358_v12 = vadd.f32 %v1505_v8, %v1504_v10  ;;  %v1666_v14 = vadd.f32 %v1658_v21, %v5722_v9  ;;  %v7500_v6 = vld [vmem:[%s10233_s2 + $0x150] sm:$0xff]  ;;  %v7506_v8 = vld [vmem:[%s10233_s2 + $0x128] sm:$0xff]  ;;  %v7512_v10 = vld [vmem:[%s10233_s2 + $0x138] sm:$0xff] }
 0x440   :  { %3690 = vpow2.f32 %v3493_v11  ;;  %v3494_v17 = vmul.f32 -1.442695, %v1664_v20  ;;  %v7518_v11 = vld [vmem:[%s10233_s2 + $0x120] sm:$0xff]  ;;  %v7524_v20 = vld [vmem:[%s10233_s2 + $0x130] sm:$0xff]  ;;  %v7554_v22 = vld [vmem:[%s10233_s2 + $0xe8] sm:$0xff] }
 0x441   :  { %3692 = vtanh.f32 %v7358_v12  ;;  %v3495_v24 = vmul.f32 -1.442695, %v1666_v14  ;;  %v7542_v21 = vld [vmem:[%s10233_s2 + $0x100] sm:$0xff]  ;;  %v7548_v14 = vld [vmem:[%s10233_s2 + $0x110] sm:$0xff]  ;;  %v7578_v45 = vld [vmem:[%s10233_s2 + $0xc8] sm:$0xff] }
 0x442   :  { %3694 = vpow2.f32 %v3494_v17  ;;  %v7530_v17 = vld [vmem:[%s10233_s2 + $0x108] sm:$0xff] }
 0x443   :  { %3696 = vpow2.f32 %v3495_v24  ;;  %v7560_v24 = vld [vmem:[%s10233_s2 + $0xf8] sm:$0xff] }
 0x44d   :  { %v3691_v29 = vpop.eup %3690 }
 0x44e   :  { %v3693_v32 = vpop.eup %3692  ;;  %v1670_v26 = vadd.f32 1.0, %v3691_v29  ;;  %v7572_v29 = vld [vmem:[%s10233_s2 + $0xf0] sm:$0xff] }
 0x44f   :  { %v3695_v33 = vpop.eup %3694  ;;  %v1508_v34 = vmul.f32 %v3693_v32, %v3689_v25  ;;  %v7566_v25 = vld [vmem:[%s10233_s2 + $0xe0] sm:$0xff] }
 0x450   :  { %3698 = vrcp.f32 %v1670_v26  ;;  %v1676_v35 = vadd.f32 1.0, %v3695_v33  ;;  %v3697_v9 = vpop.eup %3696  ;;  %v7590_v32 = vld [vmem:[%s10233_s2 + $0xc0] sm:$0xff]  ;;  %v7596_v26 = vld [vmem:[%s10233_s2 + $0xd0] sm:$0xff]  ;;  %v7602_v33 = vld [vmem:[%s10233_s2 + $0xa8] sm:$0xff] }
 0x451   :  { %3700 = vtanh.f32 %v1665_v30  ;;  %v1695_v36 = vrot.slane %v1508_v34, 2  ;;  %v1683_v42 = vadd.f32 1.0, %v3697_v9  ;;  %v7584_v30 = vld [vmem:[%s10233_s2 + $0xd8] sm:$0xff] }
 0x452   :  { %3702 = vrcp.f32 %v1676_v35  ;;  %v7608_v34 = vld [vmem:[%s10233_s2 + $0xb8] sm:$0xff]  ;;  %v7614_v35 = vld [vmem:[%s10233_s2 + $0xa0] sm:$0xff] }
 0x453   :  { %v1698_v37 = vrot.slane %v1695_v36, 6  ;;  %3704 = vrcp.f32 %v1683_v42  ;;  %v7620_v36 = vld [vmem:[%s10233_s2 + $0xb0] sm:$0xff]  ;;  %v7632_v9 = vld [vmem:[%s10233_s2 + $0x98] sm:$0xff]  ;;  %v7662_v42 = vld [vmem:[%s10233_s2 + $0x60] sm:$0xff] }
 0x454   :  { %11495 = vst [vmem:[#allocation5_spill] sm:$0xff] %v7632_v9  ;;  %11500 = vst [vmem:[#allocation17_spill] sm:$0xff] %v7662_v42 }
 0x455   :  { %1765 = vmatprep.mubr.f32.mxu0 %v1698_v37  ;;  %1836 = vmatprep.mubr.f32.mxu1 %v1698_v37  ;;  %v7626_v37 = vld [vmem:[%s10233_s2 + $0x88] sm:$0xff] }
 0x456   :  { %11494 = vst [vmem:[#allocation14_spill] sm:$0xff] %v7626_v37 }
 0x45d   :  { %v3699_v38 = vpop.eup %3698 }
 0x45e   :  { %v3701_v39 = vpop.eup %3700 }
 0x45f   :  { %v3703_v41 = vpop.eup %3702  ;;  %v1690_v43 = vmul.f32 %v3701_v39, %v3699_v38  ;;  %v7638_v38 = vld [vmem:[%s10233_s2 + $0x80] sm:$0xff]  ;;  %v7644_v39 = vld [vmem:[%s10233_s2 + $0x90] sm:$0xff] }
 0x460   :  { %v1689_v44 = vmul.f32 %v3703_v41, %v1687_v40  ;;  %v3705_v61 = vpop.eup %3704  ;;  %11496 = vst [vmem:[#allocation15_spill] sm:$0xff] %v7638_v38  ;;  %11497 = vst [vmem:[#allocation6_spill] sm:$0xff] %v7644_v39  ;;  %v7650_v40 = vld [vmem:[%s10233_s2 + $0x68] sm:$0xff]  ;;  %v7656_v41 = vld [vmem:[%s10233_s2 + $0x78] sm:$0xff] }
 0x461   :  { %11498 = vst [vmem:[#allocation16_spill] sm:$0xff] %v7650_v40  ;;  %11499 = vst [vmem:[#allocation7_spill] sm:$0xff] %v7656_v41 }
 0x462   :  { %v7364_v3 = vadd.f32 %v1690_v43, %v1689_v44  ;;  %v7668_v43 = vld [vmem:[%s10233_s2 + $0x70] sm:$0xff]  ;;  %v7674_v44 = vld [vmem:[%s10233_s2 + $0x48] sm:$0xff] }
 0x463   :  { %11501 = vst [vmem:[#allocation8_spill] sm:$0xff] %v7668_v43  ;;  %11502 = vst [vmem:[#allocation18_spill] sm:$0xff] %v7674_v44 }
 0x464   :  { %3706 = vtanh.f32 %v7364_v3 }
 0x471   :  { %v3707_v0 = vpop.eup %3706 }
 0x472   :  { %v1693_v59 = vmul.f32 %v3707_v0, %v3705_v61  ;;  %v7680_v61 = vld [vmem:[%s10233_s2 + $0x58] sm:$0xff]  ;;  %v7686_v0 = vld [vmem:[%s10233_s2 + $0x40] sm:$0xff] }
 0x473   :  { %11503 = vst [vmem:[#allocation9_spill] sm:$0xff] %v7680_v61  ;;  %11504 = vst [vmem:[#allocation19_spill] sm:$0xff] %v7686_v0 }
 0x474   :  { %v7367_v57 = vrot.slane %v1693_v59, 6  ;;  %v7692_v59 = vld [vmem:[%s10233_s2 + $0x50] sm:$0xff] }
 0x475   :  { %11505 = vst [vmem:[#allocation10_spill] sm:$0xff] %v7692_v59 }
 0x476   :  { %1766 = vmatmul.mubr.f32.vlgmr.msra.gmra.mxu0 %v7367_v57  ;;  %1837 = vmatmul.mubr.f32.vlgmr.msra.gmra.mxu1 %v7367_v57 }
 0x477   :  { %1868 = vmatpush1.msra.mxu0 %v7374_v2  ;;  %1939 = vmatpush1.msra.mxu1 %v7380_v63 }
 0x478   :  { %1869 = vmatprep.subr.mxu0 %v7386_v47  ;;  %1940 = vmatprep.subr.mxu1 %v7392_v54 }
 0x479   :  { %1870 = vmatpush1.msra.mxu0 %v7398_v31  ;;  %1941 = vmatpush1.msra.mxu1 %v7404_v1 }
 0x47a   :  { %1871 = vmatprep.subr.mxu0 %v7410_v16  ;;  %1942 = vmatprep.subr.mxu1 %v7416_v51 }
 0x47b   :  { %1872 = vmatpush1.msra.mxu0 %v7422_v55  ;;  %1943 = vmatpush1.msra.mxu1 %v7428_v28 }
 0x47c   :  { %1873 = vmatprep.subr.mxu0 %v7434_v53  ;;  %1944 = vmatprep.subr.mxu1 %v7440_v5 }
 0x47d   :  { %1874 = vmatpush1.msra.mxu0 %v7446_v13  ;;  %1945 = vmatpush1.msra.mxu1 %v7452_v15 }
 0x47e   :  { %1875 = vmatprep.subr.mxu0 %v7458_v56  ;;  %1946 = vmatprep.subr.mxu1 %v7464_v18 }
 0x47f   :  { %1876 = vmatpush1.msra.mxu0 %v7470_v52  ;;  %1947 = vmatpush1.msra.mxu1 %v7476_v62 }
 0x480   :  { %1877 = vmatprep.subr.mxu0 %v7482_v48  ;;  %1948 = vmatprep.subr.mxu1 %v7488_v7 }
 0x481   :  { %1878 = vmatpush1.msra.mxu0 %v7494_v4  ;;  %1949 = vmatpush1.msra.mxu1 %v7500_v6 }
 0x482   :  { %1879 = vmatprep.subr.mxu0 %v7506_v8  ;;  %1950 = vmatprep.subr.mxu1 %v7512_v10 }
 0x483   :  { %1880 = vmatpush1.msra.mxu0 %v7518_v11  ;;  %1951 = vmatpush1.msra.mxu1 %v7524_v20 }
 0x484   :  { %1881 = vmatprep.subr.mxu0 %v7530_v17  ;;  %1952 = vmatprep.subr.mxu1 %v7536_v19 }
 0x485   :  { %1882 = vmatpush1.msra.mxu0 %v7542_v21  ;;  %1953 = vmatpush1.msra.mxu1 %v7548_v14 }
 0x486   :  { %1883 = vmatprep.subr.mxu0 %v7554_v22  ;;  %1954 = vmatprep.subr.mxu1 %v7560_v24 }
 0x487   :  { %1884 = vmatpush1.msra.mxu0 %v7566_v25  ;;  %1955 = vmatpush1.msra.mxu1 %v7572_v29 }
 0x488   :  { %1885 = vmatprep.subr.mxu0 %v7578_v45  ;;  %1956 = vmatprep.subr.mxu1 %v7584_v30 }
 0x489   :  { %1886 = vmatpush1.msra.mxu0 %v7590_v32  ;;  %1957 = vmatpush1.msra.mxu1 %v7596_v26 }
 0x48a   :  { %1887 = vmatprep.subr.mxu0 %v7602_v33  ;;  %1958 = vmatprep.subr.mxu1 %v7608_v34 }
 0x48b   :  { %1888 = vmatpush1.msra.mxu0 %v7614_v35  ;;  %1959 = vmatpush1.msra.mxu1 %v7620_v36 }
 0x48c   :  { %1889 = vmatprep.subr.mxu0 %v7626_v37  ;;  %1960 = vmatprep.subr.mxu1 %v7632_v9 }
 0x48d   :  { %1890 = vmatpush1.msra.mxu0 %v7638_v38  ;;  %1961 = vmatpush1.msra.mxu1 %v7644_v39 }
 0x48e   :  { %1891 = vmatprep.subr.mxu0 %v7650_v40  ;;  %1962 = vmatprep.subr.mxu1 %v7656_v41 }
 0x48f   :  { %1892 = vmatpush1.msra.mxu0 %v7662_v42  ;;  %1963 = vmatpush1.msra.mxu1 %v7668_v43 }
 0x490   :  { %1893 = vmatprep.subr.mxu0 %v7674_v44  ;;  %1964 = vmatprep.subr.mxu1 %v7680_v61  ;;  %v7698_v44 = vld [vmem:[%s10233_s2 + $0x28] sm:$0xff]  ;;  %v7704_v61 = vld [vmem:[%s10233_s2 + $0x38] sm:$0xff] }
 0x491   :  { %1894 = vmatpush1.msra.mxu0 %v7686_v0  ;;  %1965 = vmatpush1.msra.mxu1 %v7692_v59  ;;  %11506 = vst [vmem:[#allocation20_spill] sm:$0xff] %v7698_v44  ;;  %11507 = vst [vmem:[#allocation11_spill] sm:$0xff] %v7704_v61  ;;  %v7710_v0 = vld [vmem:[%s10233_s2 + $0x20] sm:$0xff]  ;;  %v7716_v59 = vld [vmem:[%s10233_s2 + $0x30] sm:$0xff] }
 0x492   :  { %1895 = vmatprep.subr.mxu0 %v7698_v44  ;;  %1966 = vmatprep.subr.mxu1 %v7704_v61  ;;  %11508 = vst [vmem:[#allocation21_spill] sm:$0xff] %v7710_v0  ;;  %11509 = vst [vmem:[#allocation22_spill] sm:$0xff] %v7716_v59  ;;  %v7722_v44 = vld [vmem:[%s10233_s2 + $0x8] sm:$0xff]  ;;  %v7728_v61 = vld [vmem:[%s10233_s2 + $0x18] sm:$0xff] }
 0x493   :  { %1896 = vmatpush1.msra.mxu0 %v7710_v0  ;;  %1967 = vmatpush1.msra.mxu1 %v7716_v59  ;;  %11510 = vst [vmem:[#allocation23_spill] sm:$0xff] %v7722_v44  ;;  %11511 = vst [vmem:[#allocation24_spill] sm:$0xff] %v7728_v61  ;;  %v7734_v0 = vld [vmem:[%s10233_s2] sm:$0xff] }
 0x494   :  { %1897 = vmatprep.subr.mxu0 %v7722_v44  ;;  %1968 = vmatprep.subr.mxu1 %v7728_v61  ;;  %11512 = vst [vmem:[#allocation25_spill] sm:$0xff] %v7734_v0  ;;  %v7741_v44 = vld [vmem:[%s10233_s2 + $0x10] sm:$0xff]  ;;  %v7750_v61 = vld [vmem:[%s10235_s4 + $0x1e8] sm:$0xff] }
 0x495   :  { %1898 = vmatpush1.msra.mxu0 %v7734_v0  ;;  %1931 = vmatprep.mubr.f32.mxu0 %v11360_v27  ;;  %11513 = vst [vmem:[#allocation26_spill] sm:$0xff] %v7741_v44  ;;  %11514 = vst [vmem:[#allocation27_spill] sm:$0xff] %v7750_v61  ;;  %v7756_v0 = vld [vmem:[%s10235_s4 + $0x1f8] sm:$0xff] }
 0x496   :  { %1969 = vmatpush1.msra.mxu1 %v7741_v44  ;;  %2002 = vmatprep.mubr.f32.mxu1 %v11360_v27  ;;  %11515 = vst [vmem:[#allocation28_spill] sm:$0xff] %v7756_v0  ;;  %v7762_v44 = vld [vmem:[%s10235_s4 + $0x1e0] sm:$0xff] }
 0x497   :  { %1932 = vmatmul.mubr.f32.vlgmr.msra.gmra.mxu0 %v7367_v57  ;;  %2003 = vmatmul.mubr.f32.vlgmr.msra.gmra.mxu1 %v7367_v57  ;;  %11516 = vst [vmem:[#allocation29_spill] sm:$0xff] %v7762_v44  ;;  %v7768_v57 = vld [vmem:[%s10235_s4 + $0x1f0] sm:$0xff] }
 0x498   :  { %2040 = vmatprep.subr.mxu0 %v7750_v61  ;;  %2111 = vmatprep.subr.mxu1 %v7756_v0  ;;  %11517 = vst [vmem:[#allocation30_spill] sm:$0xff] %v7768_v57  ;;  %v7774_v61 = vld [vmem:[%s10235_s4 + $0x1c8] sm:$0xff]  ;;  %v7780_v0 = vld [vmem:[%s10235_s4 + $0x1d8] sm:$0xff] }
 0x499   :  { %2041 = vmatpush1.msra.mxu0 %v7762_v44  ;;  %2112 = vmatpush1.msra.mxu1 %v7768_v57  ;;  %11518 = vst [vmem:[#allocation31_spill] sm:$0xff] %v7774_v61  ;;  %11519 = vst [vmem:[#allocation32_spill] sm:$0xff] %v7780_v0  ;;  %v7786_v44 = vld [vmem:[%s10235_s4 + $0x1c0] sm:$0xff]  ;;  %v7792_v57 = vld [vmem:[%s10235_s4 + $0x1d0] sm:$0xff] }
 0x49a   :  { %2042 = vmatprep.subr.mxu0 %v7774_v61  ;;  %2113 = vmatprep.subr.mxu1 %v7780_v0  ;;  %11520 = vst [vmem:[#allocation33_spill] sm:$0xff] %v7786_v44  ;;  %11521 = vst [vmem:[#allocation34_spill] sm:$0xff] %v7792_v57  ;;  %v7798_v61 = vld [vmem:[%s10235_s4 + $0x1a8] sm:$0xff]  ;;  %v7804_v0 = vld [vmem:[%s10235_s4 + $0x1b8] sm:$0xff] }
 0x49b   :  { %2043 = vmatpush1.msra.mxu0 %v7786_v44  ;;  %2114 = vmatpush1.msra.mxu1 %v7792_v57  ;;  %11522 = vst [vmem:[#allocation35_spill] sm:$0xff] %v7798_v61  ;;  %11523 = vst [vmem:[#allocation36_spill] sm:$0xff] %v7804_v0  ;;  %v7810_v44 = vld [vmem:[%s10235_s4 + $0x1a0] sm:$0xff]  ;;  %v7816_v57 = vld [vmem:[%s10235_s4 + $0x1b0] sm:$0xff] }
 0x49c   :  { %2044 = vmatprep.subr.mxu0 %v7798_v61  ;;  %2115 = vmatprep.subr.mxu1 %v7804_v0  ;;  %11524 = vst [vmem:[#allocation37_spill] sm:$0xff] %v7810_v44  ;;  %11525 = vst [vmem:[#allocation38_spill] sm:$0xff] %v7816_v57  ;;  %v7822_v61 = vld [vmem:[%s10235_s4 + $0x188] sm:$0xff]  ;;  %v7828_v0 = vld [vmem:[%s10235_s4 + $0x198] sm:$0xff] }
 0x49d   :  { %2045 = vmatpush1.msra.mxu0 %v7810_v44  ;;  %2116 = vmatpush1.msra.mxu1 %v7816_v57  ;;  %11526 = vst [vmem:[#allocation39_spill] sm:$0xff] %v7822_v61  ;;  %11527 = vst [vmem:[#allocation40_spill] sm:$0xff] %v7828_v0  ;;  %v7834_v44 = vld [vmem:[%s10235_s4 + $0x180] sm:$0xff]  ;;  %v7840_v57 = vld [vmem:[%s10235_s4 + $0x190] sm:$0xff] }
 0x49e   :  { %2046 = vmatprep.subr.mxu0 %v7822_v61  ;;  %2117 = vmatprep.subr.mxu1 %v7828_v0  ;;  %11528 = vst [vmem:[#allocation41_spill] sm:$0xff] %v7834_v44  ;;  %11529 = vst [vmem:[#allocation42_spill] sm:$0xff] %v7840_v57  ;;  %v7846_v61 = vld [vmem:[%s10235_s4 + $0x168] sm:$0xff]  ;;  %v7852_v0 = vld [vmem:[%s10235_s4 + $0x178] sm:$0xff] }
 0x49f   :  { %2047 = vmatpush1.msra.mxu0 %v7834_v44  ;;  %2118 = vmatpush1.msra.mxu1 %v7840_v57  ;;  %11530 = vst [vmem:[#allocation43_spill] sm:$0xff] %v7846_v61  ;;  %11531 = vst [vmem:[#allocation44_spill] sm:$0xff] %v7852_v0  ;;  %v7858_v44 = vld [vmem:[%s10235_s4 + $0x160] sm:$0xff]  ;;  %v7864_v57 = vld [vmem:[%s10235_s4 + $0x170] sm:$0xff] }
 0x4a0   :  { %2048 = vmatprep.subr.mxu0 %v7846_v61  ;;  %2119 = vmatprep.subr.mxu1 %v7852_v0  ;;  %11532 = vst [vmem:[#allocation45_spill] sm:$0xff] %v7858_v44  ;;  %11533 = vst [vmem:[#allocation46_spill] sm:$0xff] %v7864_v57  ;;  %v7870_v61 = vld [vmem:[%s10235_s4 + $0x148] sm:$0xff]  ;;  %v7876_v0 = vld [vmem:[%s10235_s4 + $0x158] sm:$0xff] }
 0x4a1   :  { %2049 = vmatpush1.msra.mxu0 %v7858_v44  ;;  %2120 = vmatpush1.msra.mxu1 %v7864_v57  ;;  %11534 = vst [vmem:[#allocation47_spill] sm:$0xff] %v7870_v61  ;;  %11535 = vst [vmem:[#allocation48_spill] sm:$0xff] %v7876_v0  ;;  %v7882_v44 = vld [vmem:[%s10235_s4 + $0x140] sm:$0xff]  ;;  %v7888_v57 = vld [vmem:[%s10235_s4 + $0x150] sm:$0xff] }
 0x4a2   :  { %2050 = vmatprep.subr.mxu0 %v7870_v61  ;;  %2121 = vmatprep.subr.mxu1 %v7876_v0  ;;  %11536 = vst [vmem:[#allocation49_spill] sm:$0xff] %v7882_v44  ;;  %11537 = vst [vmem:[#allocation50_spill] sm:$0xff] %v7888_v57  ;;  %v7894_v61 = vld [vmem:[%s10235_s4 + $0x128] sm:$0xff]  ;;  %v7900_v0 = vld [vmem:[%s10235_s4 + $0x138] sm:$0xff] }
 0x4a3   :  { %2051 = vmatpush1.msra.mxu0 %v7882_v44  ;;  %2122 = vmatpush1.msra.mxu1 %v7888_v57  ;;  %11538 = vst [vmem:[#allocation51_spill] sm:$0xff] %v7894_v61  ;;  %11539 = vst [vmem:[#allocation52_spill] sm:$0xff] %v7900_v0  ;;  %v7906_v44 = vld [vmem:[%s10235_s4 + $0x120] sm:$0xff]  ;;  %v7912_v57 = vld [vmem:[%s10235_s4 + $0x130] sm:$0xff] }
 0x4a4   :  { %2052 = vmatprep.subr.mxu0 %v7894_v61  ;;  %2123 = vmatprep.subr.mxu1 %v7900_v0  ;;  %11540 = vst [vmem:[#allocation53_spill] sm:$0xff] %v7906_v44  ;;  %11541 = vst [vmem:[#allocation54_spill] sm:$0xff] %v7912_v57  ;;  %v7918_v61 = vld [vmem:[%s10235_s4 + $0x108] sm:$0xff]  ;;  %v7924_v0 = vld [vmem:[%s10235_s4 + $0x118] sm:$0xff] }
 0x4a5   :  { %2053 = vmatpush1.msra.mxu0 %v7906_v44  ;;  %2124 = vmatpush1.msra.mxu1 %v7912_v57  ;;  %11542 = vst [vmem:[#allocation55_spill] sm:$0xff] %v7918_v61  ;;  %11543 = vst [vmem:[#allocation56_spill] sm:$0xff] %v7924_v0  ;;  %v7930_v44 = vld [vmem:[%s10235_s4 + $0x100] sm:$0xff]  ;;  %v7936_v57 = vld [vmem:[%s10235_s4 + $0x110] sm:$0xff] }
 0x4a6   :  { %2054 = vmatprep.subr.mxu0 %v7918_v61  ;;  %2125 = vmatprep.subr.mxu1 %v7924_v0  ;;  %11544 = vst [vmem:[#allocation57_spill] sm:$0xff] %v7930_v44  ;;  %11545 = vst [vmem:[#allocation58_spill] sm:$0xff] %v7936_v57  ;;  %v7942_v61 = vld [vmem:[%s10235_s4 + $0xe8] sm:$0xff]  ;;  %v7948_v0 = vld [vmem:[%s10235_s4 + $0xf8] sm:$0xff] }
 0x4a7   :  { %2055 = vmatpush1.msra.mxu0 %v7930_v44  ;;  %2126 = vmatpush1.msra.mxu1 %v7936_v57  ;;  %11546 = vst [vmem:[#allocation59_spill] sm:$0xff] %v7942_v61  ;;  %11547 = vst [vmem:[#allocation60_spill] sm:$0xff] %v7948_v0  ;;  %v7954_v44 = vld [vmem:[%s10235_s4 + $0xe0] sm:$0xff]  ;;  %v7960_v57 = vld [vmem:[%s10235_s4 + $0xf0] sm:$0xff] }
 0x4a8   :  { %2056 = vmatprep.subr.mxu0 %v7942_v61  ;;  %2127 = vmatprep.subr.mxu1 %v7948_v0  ;;  %11548 = vst [vmem:[#allocation61_spill] sm:$0xff] %v7954_v44  ;;  %11549 = vst [vmem:[#allocation62_spill] sm:$0xff] %v7960_v57  ;;  %v7966_v61 = vld [vmem:[%s10235_s4 + $0xc8] sm:$0xff]  ;;  %v7972_v0 = vld [vmem:[%s10235_s4 + $0xd8] sm:$0xff] }
 0x4a9   :  { %2057 = vmatpush1.msra.mxu0 %v7954_v44  ;;  %2128 = vmatpush1.msra.mxu1 %v7960_v57  ;;  %11550 = vst [vmem:[#allocation63_spill] sm:$0xff] %v7966_v61  ;;  %11551 = vst [vmem:[#allocation64_spill] sm:$0xff] %v7972_v0  ;;  %v7978_v44 = vld [vmem:[%s10235_s4 + $0xc0] sm:$0xff]  ;;  %v7984_v57 = vld [vmem:[%s10235_s4 + $0xd0] sm:$0xff] }
 0x4aa   :  { %2058 = vmatprep.subr.mxu0 %v7966_v61  ;;  %2129 = vmatprep.subr.mxu1 %v7972_v0  ;;  %11552 = vst [vmem:[#allocation65_spill] sm:$0xff] %v7978_v44  ;;  %11553 = vst [vmem:[#allocation66_spill] sm:$0xff] %v7984_v57  ;;  %v7990_v61 = vld [vmem:[%s10235_s4 + $0xa8] sm:$0xff]  ;;  %v7996_v0 = vld [vmem:[%s10235_s4 + $0xb8] sm:$0xff] }
 0x4ab   :  { %2059 = vmatpush1.msra.mxu0 %v7978_v44  ;;  %2130 = vmatpush1.msra.mxu1 %v7984_v57  ;;  %11554 = vst [vmem:[#allocation67_spill] sm:$0xff] %v7990_v61  ;;  %11555 = vst [vmem:[#allocation68_spill] sm:$0xff] %v7996_v0  ;;  %v8002_v44 = vld [vmem:[%s10235_s4 + $0xa0] sm:$0xff]  ;;  %v8008_v57 = vld [vmem:[%s10235_s4 + $0xb0] sm:$0xff] }
 0x4ac   :  { %2060 = vmatprep.subr.mxu0 %v7990_v61  ;;  %2131 = vmatprep.subr.mxu1 %v7996_v0  ;;  %11556 = vst [vmem:[#allocation69_spill] sm:$0xff] %v8002_v44  ;;  %11557 = vst [vmem:[#allocation70_spill] sm:$0xff] %v8008_v57  ;;  %v8014_v61 = vld [vmem:[%s10235_s4 + $0x88] sm:$0xff]  ;;  %v8020_v0 = vld [vmem:[%s10235_s4 + $0x98] sm:$0xff] }
 0x4ad   :  { %2061 = vmatpush1.msra.mxu0 %v8002_v44  ;;  %2132 = vmatpush1.msra.mxu1 %v8008_v57  ;;  %11558 = vst [vmem:[#allocation71_spill] sm:$0xff] %v8014_v61  ;;  %11559 = vst [vmem:[#allocation72_spill] sm:$0xff] %v8020_v0  ;;  %v8026_v44 = vld [vmem:[%s10235_s4 + $0x80] sm:$0xff]  ;;  %v8032_v57 = vld [vmem:[%s10235_s4 + $0x90] sm:$0xff] }
 0x4ae   :  { %2062 = vmatprep.subr.mxu0 %v8014_v61  ;;  %2133 = vmatprep.subr.mxu1 %v8020_v0  ;;  %11560 = vst [vmem:[#allocation73_spill] sm:$0xff] %v8026_v44  ;;  %11561 = vst [vmem:[#allocation74_spill] sm:$0xff] %v8032_v57  ;;  %v8038_v61 = vld [vmem:[%s10235_s4 + $0x68] sm:$0xff]  ;;  %v8044_v0 = vld [vmem:[%s10235_s4 + $0x78] sm:$0xff] }
 0x4af   :  { %2063 = vmatpush1.msra.mxu0 %v8026_v44  ;;  %2134 = vmatpush1.msra.mxu1 %v8032_v57  ;;  %11562 = vst [vmem:[#allocation75_spill] sm:$0xff] %v8038_v61  ;;  %11563 = vst [vmem:[#allocation76_spill] sm:$0xff] %v8044_v0  ;;  %v8050_v44 = vld [vmem:[%s10235_s4 + $0x60] sm:$0xff]  ;;  %v8056_v57 = vld [vmem:[%s10235_s4 + $0x70] sm:$0xff] }
 0x4b0   :  { %2064 = vmatprep.subr.mxu0 %v8038_v61  ;;  %2135 = vmatprep.subr.mxu1 %v8044_v0  ;;  %11564 = vst [vmem:[#allocation77_spill] sm:$0xff] %v8050_v44  ;;  %11565 = vst [vmem:[#allocation78_spill] sm:$0xff] %v8056_v57  ;;  %v8062_v61 = vld [vmem:[%s10235_s4 + $0x48] sm:$0xff]  ;;  %v8068_v0 = vld [vmem:[%s10235_s4 + $0x58] sm:$0xff] }
 0x4b1   :  { %2065 = vmatpush1.msra.mxu0 %v8050_v44  ;;  %2136 = vmatpush1.msra.mxu1 %v8056_v57  ;;  %11566 = vst [vmem:[#allocation79_spill] sm:$0xff] %v8062_v61  ;;  %11567 = vst [vmem:[#allocation80_spill] sm:$0xff] %v8068_v0  ;;  %v8074_v44 = vld [vmem:[%s10235_s4 + $0x40] sm:$0xff]  ;;  %v8080_v57 = vld [vmem:[%s10235_s4 + $0x50] sm:$0xff] }
 0x4b2   :  { %2066 = vmatprep.subr.mxu0 %v8062_v61  ;;  %2137 = vmatprep.subr.mxu1 %v8068_v0  ;;  %11568 = vst [vmem:[#allocation81_spill] sm:$0xff] %v8074_v44  ;;  %11569 = vst [vmem:[#allocation82_spill] sm:$0xff] %v8080_v57  ;;  %v8086_v61 = vld [vmem:[%s10235_s4 + $0x28] sm:$0xff]  ;;  %v8092_v0 = vld [vmem:[%s10235_s4 + $0x38] sm:$0xff] }
 0x4b3   :  { %2067 = vmatpush1.msra.mxu0 %v8074_v44  ;;  %2138 = vmatpush1.msra.mxu1 %v8080_v57  ;;  %11570 = vst [vmem:[#allocation83_spill] sm:$0xff] %v8086_v61  ;;  %11571 = vst [vmem:[#allocation84_spill] sm:$0xff] %v8092_v0  ;;  %v8098_v44 = vld [vmem:[%s10235_s4 + $0x20] sm:$0xff]  ;;  %v8104_v57 = vld [vmem:[%s10235_s4 + $0x30] sm:$0xff] }
 0x4b4   :  { %2068 = vmatprep.subr.mxu0 %v8086_v61  ;;  %2139 = vmatprep.subr.mxu1 %v8092_v0  ;;  %11572 = vst [vmem:[#allocation85_spill] sm:$0xff] %v8098_v44  ;;  %11573 = vst [vmem:[#allocation86_spill] sm:$0xff] %v8104_v57  ;;  %v8110_v61 = vld [vmem:[%s10235_s4 + $0x8] sm:$0xff]  ;;  %v8116_v0 = vld [vmem:[%s10235_s4 + $0x18] sm:$0xff] }
 0x4b5   :  { %2069 = vmatpush1.msra.mxu0 %v8098_v44  ;;  %2140 = vmatpush1.msra.mxu1 %v8104_v57  ;;  %11574 = vst [vmem:[#allocation87_spill] sm:$0xff] %v8110_v61  ;;  %11575 = vst [vmem:[#allocation88_spill] sm:$0xff] %v8116_v0  ;;  %v8122_v44 = vld [vmem:[%s10235_s4] sm:$0xff]  ;;  %v8128_v57 = vld [vmem:[%s10235_s4 + $0x10] sm:$0xff] }
 0x4b6   :  { %2070 = vmatprep.subr.mxu0 %v8110_v61  ;;  %2141 = vmatprep.subr.mxu1 %v8116_v0  ;;  %11576 = vst [vmem:[#allocation89_spill] sm:$0xff] %v8122_v44  ;;  %11577 = vst [vmem:[#allocation90_spill] sm:$0xff] %v8128_v57  ;;  %v8134_v61 = vld [vmem:[%s10235_s4 + $0x3e8] sm:$0xff]  ;;  %v8140_v0 = vld [vmem:[%s10235_s4 + $0x3f8] sm:$0xff] }
 0x4b7   :  { %2071 = vmatpush1.msra.mxu0 %v8122_v44  ;;  %2142 = vmatpush1.msra.mxu1 %v8128_v57  ;;  %11578 = vst [vmem:[#allocation91_spill] sm:$0xff] %v8134_v61  ;;  %11579 = vst [vmem:[#allocation92_spill] sm:$0xff] %v8140_v0  ;;  %v8146_v44 = vld [vmem:[%s10235_s4 + $0x3e0] sm:$0xff]  ;;  %v8152_v57 = vld [vmem:[%s10235_s4 + $0x3f0] sm:$0xff] }
 0x4b8   :  { %2072 = vmatprep.subr.mxu0 %v8134_v61  ;;  %2143 = vmatprep.subr.mxu1 %v8140_v0  ;;  %11580 = vst [vmem:[#allocation93_spill] sm:$0xff] %v8146_v44  ;;  %11581 = vst [vmem:[#allocation94_spill] sm:$0xff] %v8152_v57  ;;  %v8158_v61 = vld [vmem:[%s10235_s4 + $0x3c8] sm:$0xff]  ;;  %v8164_v0 = vld [vmem:[%s10235_s4 + $0x3d8] sm:$0xff] }
 0x4b9   :  { %2073 = vmatpush2.msra.mxu0 %v8146_v44  ;;  %2144 = vmatpush2.msra.mxu1 %v8152_v57  ;;  %11582 = vst [vmem:[#allocation95_spill] sm:$0xff] %v8158_v61  ;;  %11583 = vst [vmem:[#allocation96_spill] sm:$0xff] %v8164_v0  ;;  %v8170_v44 = vld [vmem:[%s10235_s4 + $0x3c0] sm:$0xff]  ;;  %v8176_v57 = vld [vmem:[%s10235_s4 + $0x3d0] sm:$0xff] }
 0x4ba   :  { %2074 = vmatprep.subr.mxu0 %v8158_v61  ;;  %2145 = vmatprep.subr.mxu1 %v8164_v0  ;;  %11584 = vst [vmem:[#allocation97_spill] sm:$0xff] %v8170_v44  ;;  %11585 = vst [vmem:[#allocation98_spill] sm:$0xff] %v8176_v57  ;;  %v8182_v61 = vld [vmem:[%s10235_s4 + $0x3a8] sm:$0xff]  ;;  %v8188_v0 = vld [vmem:[%s10235_s4 + $0x3b8] sm:$0xff] }
 0x4bb   :  { %2075 = vmatpush2.msra.mxu0 %v8170_v44  ;;  %2146 = vmatpush2.msra.mxu1 %v8176_v57  ;;  %11586 = vst [vmem:[#allocation99_spill] sm:$0xff] %v8182_v61  ;;  %11587 = vst [vmem:[#allocation100_spill] sm:$0xff] %v8188_v0  ;;  %v8194_v44 = vld [vmem:[%s10235_s4 + $0x3a0] sm:$0xff]  ;;  %v8200_v57 = vld [vmem:[%s10235_s4 + $0x3b0] sm:$0xff] }
 0x4bc   :  { %2076 = vmatprep.subr.mxu0 %v8182_v61  ;;  %2147 = vmatprep.subr.mxu1 %v8188_v0  ;;  %11588 = vst [vmem:[#allocation101_spill] sm:$0xff] %v8194_v44  ;;  %11589 = vst [vmem:[#allocation102_spill] sm:$0xff] %v8200_v57  ;;  %v8206_v61 = vld [vmem:[%s10235_s4 + $0x388] sm:$0xff]  ;;  %v8212_v0 = vld [vmem:[%s10235_s4 + $0x398] sm:$0xff] }
 0x4bd   :  { %2077 = vmatpush2.msra.mxu0 %v8194_v44  ;;  %2148 = vmatpush2.msra.mxu1 %v8200_v57  ;;  %11590 = vst [vmem:[#allocation103_spill] sm:$0xff] %v8206_v61  ;;  %11591 = vst [vmem:[#allocation104_spill] sm:$0xff] %v8212_v0  ;;  %v8218_v44 = vld [vmem:[%s10235_s4 + $0x380] sm:$0xff]  ;;  %v8224_v57 = vld [vmem:[%s10235_s4 + $0x390] sm:$0xff] }
 0x4be   :  { %2078 = vmatprep.subr.mxu0 %v8206_v61  ;;  %2149 = vmatprep.subr.mxu1 %v8212_v0  ;;  %11592 = vst [vmem:[#allocation105_spill] sm:$0xff] %v8218_v44  ;;  %11593 = vst [vmem:[#allocation106_spill] sm:$0xff] %v8224_v57  ;;  %v8230_v61 = vld [vmem:[%s10235_s4 + $0x368] sm:$0xff]  ;;  %v8236_v0 = vld [vmem:[%s10235_s4 + $0x378] sm:$0xff] }
 0x4bf   :  { %2079 = vmatpush2.msra.mxu0 %v8218_v44  ;;  %2150 = vmatpush2.msra.mxu1 %v8224_v57  ;;  %11594 = vst [vmem:[#allocation107_spill] sm:$0xff] %v8230_v61  ;;  %11595 = vst [vmem:[#allocation108_spill] sm:$0xff] %v8236_v0  ;;  %v8242_v44 = vld [vmem:[%s10235_s4 + $0x360] sm:$0xff]  ;;  %v8248_v57 = vld [vmem:[%s10235_s4 + $0x370] sm:$0xff] }
 0x4c0   :  { %2080 = vmatprep.subr.mxu0 %v8230_v61  ;;  %2151 = vmatprep.subr.mxu1 %v8236_v0  ;;  %11596 = vst [vmem:[#allocation109_spill] sm:$0xff] %v8242_v44  ;;  %11597 = vst [vmem:[#allocation110_spill] sm:$0xff] %v8248_v57  ;;  %v8254_v61 = vld [vmem:[%s10235_s4 + $0x348] sm:$0xff]  ;;  %v8260_v0 = vld [vmem:[%s10235_s4 + $0x358] sm:$0xff] }
 0x4c1   :  { %2081 = vmatpush2.msra.mxu0 %v8242_v44  ;;  %2152 = vmatpush2.msra.mxu1 %v8248_v57  ;;  %11598 = vst [vmem:[#allocation111_spill] sm:$0xff] %v8254_v61  ;;  %11599 = vst [vmem:[#allocation112_spill] sm:$0xff] %v8260_v0  ;;  %v8266_v44 = vld [vmem:[%s10235_s4 + $0x340] sm:$0xff]  ;;  %v8272_v57 = vld [vmem:[%s10235_s4 + $0x350] sm:$0xff] }
 0x4c2   :  { %2082 = vmatprep.subr.mxu0 %v8254_v61  ;;  %2153 = vmatprep.subr.mxu1 %v8260_v0  ;;  %11600 = vst [vmem:[#allocation113_spill] sm:$0xff] %v8266_v44  ;;  %11601 = vst [vmem:[#allocation114_spill] sm:$0xff] %v8272_v57  ;;  %v8278_v61 = vld [vmem:[%s10235_s4 + $0x328] sm:$0xff]  ;;  %v8284_v0 = vld [vmem:[%s10235_s4 + $0x338] sm:$0xff] }
 0x4c3   :  { %2083 = vmatpush2.msra.mxu0 %v8266_v44  ;;  %2154 = vmatpush2.msra.mxu1 %v8272_v57  ;;  %11602 = vst [vmem:[#allocation115_spill] sm:$0xff] %v8278_v61  ;;  %11603 = vst [vmem:[#allocation116_spill] sm:$0xff] %v8284_v0  ;;  %v8290_v44 = vld [vmem:[%s10235_s4 + $0x320] sm:$0xff]  ;;  %v8296_v57 = vld [vmem:[%s10235_s4 + $0x330] sm:$0xff] }
 0x4c4   :  { %2084 = vmatprep.subr.mxu0 %v8278_v61  ;;  %2155 = vmatprep.subr.mxu1 %v8284_v0  ;;  %11604 = vst [vmem:[#allocation117_spill] sm:$0xff] %v8290_v44  ;;  %11605 = vst [vmem:[#allocation118_spill] sm:$0xff] %v8296_v57  ;;  %v8302_v61 = vld [vmem:[%s10235_s4 + $0x308] sm:$0xff]  ;;  %v8308_v0 = vld [vmem:[%s10235_s4 + $0x318] sm:$0xff] }
 0x4c5   :  { %2085 = vmatpush2.msra.mxu0 %v8290_v44  ;;  %2156 = vmatpush2.msra.mxu1 %v8296_v57  ;;  %11606 = vst [vmem:[#allocation119_spill] sm:$0xff] %v8302_v61  ;;  %11607 = vst [vmem:[#allocation120_spill] sm:$0xff] %v8308_v0  ;;  %v8314_v44 = vld [vmem:[%s10235_s4 + $0x300] sm:$0xff]  ;;  %v8320_v57 = vld [vmem:[%s10235_s4 + $0x310] sm:$0xff] }
 0x4c6   :  { %2086 = vmatprep.subr.mxu0 %v8302_v61  ;;  %2157 = vmatprep.subr.mxu1 %v8308_v0  ;;  %11608 = vst [vmem:[#allocation121_spill] sm:$0xff] %v8314_v44  ;;  %11609 = vst [vmem:[#allocation122_spill] sm:$0xff] %v8320_v57  ;;  %v8326_v61 = vld [vmem:[%s10235_s4 + $0x2e8] sm:$0xff]  ;;  %v8332_v0 = vld [vmem:[%s10235_s4 + $0x2f8] sm:$0xff] }
 0x4c7   :  { %2087 = vmatpush2.msra.mxu0 %v8314_v44  ;;  %2158 = vmatpush2.msra.mxu1 %v8320_v57  ;;  %11610 = vst [vmem:[#allocation123_spill] sm:$0xff] %v8326_v61  ;;  %11611 = vst [vmem:[#allocation124_spill] sm:$0xff] %v8332_v0  ;;  %v8338_v44 = vld [vmem:[%s10235_s4 + $0x2e0] sm:$0xff]  ;;  %v8344_v57 = vld [vmem:[%s10235_s4 + $0x2f0] sm:$0xff] }
 0x4c8   :  { %2088 = vmatprep.subr.mxu0 %v8326_v61  ;;  %2159 = vmatprep.subr.mxu1 %v8332_v0  ;;  %11612 = vst [vmem:[#allocation125_spill] sm:$0xff] %v8338_v44  ;;  %11613 = vst [vmem:[#allocation126_spill] sm:$0xff] %v8344_v57  ;;  %v8350_v61 = vld [vmem:[%s10235_s4 + $0x2c8] sm:$0xff]  ;;  %v8356_v0 = vld [vmem:[%s10235_s4 + $0x2d8] sm:$0xff] }
 0x4c9   :  { %2089 = vmatpush2.msra.mxu0 %v8338_v44  ;;  %2160 = vmatpush2.msra.mxu1 %v8344_v57  ;;  %11614 = vst [vmem:[#allocation127_spill] sm:$0xff] %v8350_v61  ;;  %11615 = vst [vmem:[#allocation128_spill] sm:$0xff] %v8356_v0  ;;  %v8362_v44 = vld [vmem:[%s10235_s4 + $0x2c0] sm:$0xff]  ;;  %v8368_v57 = vld [vmem:[%s10235_s4 + $0x2d0] sm:$0xff] }
 0x4ca   :  { %2090 = vmatprep.subr.mxu0 %v8350_v61  ;;  %2161 = vmatprep.subr.mxu1 %v8356_v0  ;;  %11616 = vst [vmem:[#allocation129_spill] sm:$0xff] %v8362_v44  ;;  %11617 = vst [vmem:[#allocation130_spill] sm:$0xff] %v8368_v57  ;;  %v8374_v61 = vld [vmem:[%s10235_s4 + $0x2a8] sm:$0xff]  ;;  %v8380_v0 = vld [vmem:[%s10235_s4 + $0x2b8] sm:$0xff] }
 0x4cb   :  { %2091 = vmatpush2.msra.mxu0 %v8362_v44  ;;  %2162 = vmatpush2.msra.mxu1 %v8368_v57  ;;  %11618 = vst [vmem:[#allocation131_spill] sm:$0xff] %v8374_v61  ;;  %11619 = vst [vmem:[#allocation132_spill] sm:$0xff] %v8380_v0  ;;  %v8386_v44 = vld [vmem:[%s10235_s4 + $0x2a0] sm:$0xff]  ;;  %v8392_v57 = vld [vmem:[%s10235_s4 + $0x2b0] sm:$0xff] }
 0x4cc   :  { %2092 = vmatprep.subr.mxu0 %v8374_v61  ;;  %2163 = vmatprep.subr.mxu1 %v8380_v0  ;;  %11620 = vst [vmem:[#allocation133_spill] sm:$0xff] %v8386_v44  ;;  %11621 = vst [vmem:[#allocation134_spill] sm:$0xff] %v8392_v57  ;;  %v8398_v61 = vld [vmem:[%s10235_s4 + $0x288] sm:$0xff]  ;;  %v8404_v0 = vld [vmem:[%s10235_s4 + $0x298] sm:$0xff] }
 0x4cd   :  { %2093 = vmatpush2.msra.mxu0 %v8386_v44  ;;  %2164 = vmatpush2.msra.mxu1 %v8392_v57  ;;  %11622 = vst [vmem:[#allocation135_spill] sm:$0xff] %v8398_v61  ;;  %11623 = vst [vmem:[#allocation136_spill] sm:$0xff] %v8404_v0  ;;  %v8410_v44 = vld [vmem:[%s10235_s4 + $0x280] sm:$0xff]  ;;  %v8416_v57 = vld [vmem:[%s10235_s4 + $0x290] sm:$0xff] }
 0x4ce   :  { %2094 = vmatprep.subr.mxu0 %v8398_v61  ;;  %2165 = vmatprep.subr.mxu1 %v8404_v0  ;;  %11624 = vst [vmem:[#allocation137_spill] sm:$0xff] %v8410_v44  ;;  %11625 = vst [vmem:[#allocation138_spill] sm:$0xff] %v8416_v57  ;;  %v8422_v61 = vld [vmem:[%s10235_s4 + $0x268] sm:$0xff]  ;;  %v8428_v0 = vld [vmem:[%s10235_s4 + $0x278] sm:$0xff] }
 0x4cf   :  { %2095 = vmatpush2.msra.mxu0 %v8410_v44  ;;  %2166 = vmatpush2.msra.mxu1 %v8416_v57  ;;  %11626 = vst [vmem:[#allocation139_spill] sm:$0xff] %v8422_v61  ;;  %11627 = vst [vmem:[#allocation140_spill] sm:$0xff] %v8428_v0  ;;  %v8434_v44 = vld [vmem:[%s10235_s4 + $0x260] sm:$0xff]  ;;  %v8440_v57 = vld [vmem:[%s10235_s4 + $0x270] sm:$0xff] }
 0x4d0   :  { %2096 = vmatprep.subr.mxu0 %v8422_v61  ;;  %2167 = vmatprep.subr.mxu1 %v8428_v0  ;;  %11628 = vst [vmem:[#allocation141_spill] sm:$0xff] %v8434_v44  ;;  %11629 = vst [vmem:[#allocation142_spill] sm:$0xff] %v8440_v57  ;;  %v8446_v61 = vld [vmem:[%s10235_s4 + $0x248] sm:$0xff]  ;;  %v8452_v0 = vld [vmem:[%s10235_s4 + $0x258] sm:$0xff] }
 0x4d1   :  { %2097 = vmatpush2.msra.mxu0 %v8434_v44  ;;  %2168 = vmatpush2.msra.mxu1 %v8440_v57  ;;  %11630 = vst [vmem:[#allocation143_spill] sm:$0xff] %v8446_v61  ;;  %11631 = vst [vmem:[#allocation144_spill] sm:$0xff] %v8452_v0  ;;  %v8458_v44 = vld [vmem:[%s10235_s4 + $0x240] sm:$0xff]  ;;  %v8464_v57 = vld [vmem:[%s10235_s4 + $0x250] sm:$0xff] }
 0x4d2   :  { %2098 = vmatprep.subr.mxu0 %v8446_v61  ;;  %2169 = vmatprep.subr.mxu1 %v8452_v0  ;;  %11632 = vst [vmem:[#allocation145_spill] sm:$0xff] %v8458_v44  ;;  %11633 = vst [vmem:[#allocation146_spill] sm:$0xff] %v8464_v57  ;;  %v8470_v61 = vld [vmem:[%s10235_s4 + $0x228] sm:$0xff]  ;;  %v8476_v0 = vld [vmem:[%s10235_s4 + $0x238] sm:$0xff] }
 0x4d3   :  { %2099 = vmatpush2.msra.mxu0 %v8458_v44  ;;  %2170 = vmatpush2.msra.mxu1 %v8464_v57  ;;  %11634 = vst [vmem:[#allocation147_spill] sm:$0xff] %v8470_v61  ;;  %11635 = vst [vmem:[#allocation148_spill] sm:$0xff] %v8476_v0  ;;  %v8482_v44 = vld [vmem:[%s10235_s4 + $0x220] sm:$0xff]  ;;  %v8488_v57 = vld [vmem:[%s10235_s4 + $0x230] sm:$0xff] }
 0x4d4   :  { %2100 = vmatprep.subr.mxu0 %v8470_v61  ;;  %2171 = vmatprep.subr.mxu1 %v8476_v0  ;;  %11636 = vst [vmem:[#allocation149_spill] sm:$0xff] %v8482_v44  ;;  %11637 = vst [vmem:[#allocation152_spill] sm:$0xff] %v8488_v57  ;;  %v8494_v61 = vld [vmem:[%s10235_s4 + $0x208] sm:$0xff]  ;;  %v8500_v0 = vld [vmem:[%s10235_s4 + $0x218] sm:$0xff] }
 0x4d5   :  { %2101 = vmatpush2.msra.mxu0 %v8482_v44  ;;  %2172 = vmatpush2.msra.mxu1 %v8488_v57  ;;  %11638 = vst [vmem:[#allocation153_spill] sm:$0xff] %v8494_v61  ;;  %11639 = vst [vmem:[#allocation157_spill] sm:$0xff] %v8500_v0  ;;  %v8506_v44 = vld [vmem:[%s10235_s4 + $0x200] sm:$0xff]  ;;  %v8512_v57 = vld [vmem:[%s10235_s4 + $0x210] sm:$0xff] }
 0x4d6   :  { %2102 = vmatprep.subr.mxu0 %v8494_v61  ;;  %2173 = vmatprep.subr.mxu1 %v8500_v0  ;;  %11640 = vst [vmem:[#allocation158_spill] sm:$0xff] %v8506_v44  ;;  %11641 = vst [vmem:[#allocation159_spill] sm:$0xff] %v8512_v57 }
 0x4d7   :  { %2103 = vmatpush2.msra.mxu0 %v8506_v44  ;;  %2174 = vmatpush2.msra.mxu1 %v8512_v57 }
 0x4d8   :  { %2206 = vmatprep.subr.mxu0 %v7342_v49  ;;  %2277 = vmatprep.subr.mxu1 %v7348_v50 }
 0x536   :  { %v1767_v61 = vpop.f32.mrf.mxu0  ;;  %v1838_v44 = vpop.f32.mrf.mxu1 }
 0x537   :  { %v1768_v0 = vadd.f32 %v1767_v61, %v11490_v60  ;;  %v1839_v49 = vadd.f32 %v1838_v44, %v5961_v58  ;;  %v11645_v58 = vld [vmem:[#allocation154_spill] sm:$0xff] }
 0x538   :  { %v1769_v27 = vpop.f32.mrf.mxu0  ;;  %v1840_v41 = vpop.f32.mrf.mxu1 }
 0x539   :  { %v3496_v59 = vmul.f32 -1.442695, %v1768_v0  ;;  %v1770_v43 = vadd.f32 %v1769_v27, %v11491_v46  ;;  %v1841_v40 = vadd.f32 %v1840_v41, %v11492_v23  ;;  %v11642_v46 = vld [vmem:[#allocation150_spill] sm:$0xff] }
 0x53b   :  { %3708 = vpow2.f32 %v3496_v59  ;;  %v3497_v42 = vmul.f32 -1.442695, %v1770_v43  ;;  %v3498_v39 = vmul.f32 -1.442695, %v1841_v40  ;;  %v11643_v40 = vld [vmem:[#allocation151_spill] sm:$0xff] }
 0x53d   :  { %3710 = vpow2.f32 %v3497_v42 }
 0x53e   :  { %3712 = vpow2.f32 %v3498_v39 }
 0x548   :  { %v3709_v57 = vpop.eup %3708 }
 0x549   :  { %v1846_v38 = vadd.f32 1.0, %v3709_v57 }
 0x54a   :  { %v3711_v50 = vpop.eup %3710 }
 0x54b   :  { %3714 = vrcp.f32 %v1846_v38  ;;  %v1852_v61 = vadd.f32 1.0, %v3711_v50  ;;  %v3713_v0 = vpop.eup %3712 }
 0x54c   :  { %3716 = vtanh.f32 %v1839_v49  ;;  %v1859_v57 = vadd.f32 1.0, %v3713_v0 }
 0x54d   :  { %3718 = vrcp.f32 %v1852_v61  ;;  %v11644_v61 = vld [vmem:[#allocation155_spill] sm:$0xff] }
 0x557   :  { %v1933_v27 = vpop.f32.mrf.mxu0  ;;  %v2004_v38 = vpop.f32.mrf.mxu1 }
 0x558   :  { %v3715_v59 = vpop.eup %3714  ;;  %v2009_v43 = vadd.f32 %v1933_v27, %v11642_v46 }
 0x559   :  { %v3717_v42 = vpop.eup %3716  ;;  %v1935_v60 = vpop.f32.mrf.mxu0 }
 0x55a   :  { %v3719_v9 = vpop.eup %3718  ;;  %v3499_v41 = vmul.f32 -1.442695, %v2009_v43  ;;  %v2010_v23 = vadd.f32 %v1935_v60, %v11643_v40  ;;  %v1863_v37 = vmul.f32 %v3717_v42, %v3715_v59  ;;  %v2006_v50 = vpop.f32.mrf.mxu1  ;;  %v2011_v60 = vadd.f32 %v2004_v38, %v11645_v58 }
 0x55b   :  { %v1862_v44 = vmul.f32 %v3719_v9, %v7358_v12  ;;  %v2012_v27 = vadd.f32 %v2006_v50, %v11644_v61 }
 0x55c   :  { %3720 = vpow2.f32 %v3499_v41  ;;  %v3500_v39 = vmul.f32 -1.442695, %v2010_v23 }
 0x55d   :  { %v8524_v49 = vadd.f32 %v1863_v37, %v1862_v44  ;;  %v3501_v46 = vmul.f32 -1.442695, %v2012_v27 }
 0x55e   :  { %3722 = vpow2.f32 %v3500_v39 }
 0x55f   :  { %3724 = vrcp.f32 %v1859_v57  ;;  %v2033_v57 = vrot.slane %v7364_v3, 6  ;;  %v11646_v3 = vld [vmem:[#allocation14_spill] sm:$0xff] }
 0x560   :  { %3726 = vtanh.f32 %v8524_v49 }
 0x561   :  { %3728 = vpow2.f32 %v3501_v46 }
 0x569   :  { %v3721_v43 = vpop.eup %3720 }
 0x56a   :  { %v2016_v59 = vadd.f32 1.0, %v3721_v43 }
 0x56b   :  { %v3723_v42 = vpop.eup %3722 }
 0x56c   :  { %v3725_v12 = vpop.eup %3724  ;;  %3730 = vrcp.f32 %v2016_v59  ;;  %v2022_v9 = vadd.f32 1.0, %v3723_v42  ;;  %v11689_v42 = vld [vmem:[#allocation49_spill] sm:$0xff] }
 0x56d   :  { %v3727_v23 = vpop.eup %3726  ;;  %3732 = vtanh.f32 %v2011_v60 }
 0x56e   :  { %3734 = vrcp.f32 %v2022_v9  ;;  %v1866_v37 = vmul.f32 %v3727_v23, %v3725_v12  ;;  %v3729_v0 = vpop.eup %3728  ;;  %v11690_v12 = vld [vmem:[#allocation50_spill] sm:$0xff]  ;;  %v11691_v9 = vld [vmem:[#allocation51_spill] sm:$0xff]  ;;  %v11692_v23 = vld [vmem:[#allocation52_spill] sm:$0xff] }
 0x56f   :  { %v2029_v50 = vadd.f32 1.0, %v3729_v0  ;;  %v11694_v0 = vld [vmem:[#allocation54_spill] sm:$0xff] }
 0x570   :  { %2104 = vmatprep.mubr.f32.mxu0 %v1866_v37  ;;  %2175 = vmatprep.mubr.f32.mxu1 %v1866_v37  ;;  %v11693_v37 = vld [vmem:[#allocation53_spill] sm:$0xff] }
 0x571   :  { %3736 = vrcp.f32 %v2029_v50  ;;  %v11699_v50 = vld [vmem:[#allocation59_spill] sm:$0xff] }
 0x579   :  { %v3731_v41 = vpop.eup %3730 }
 0x57a   :  { %v3733_v44 = vpop.eup %3732 }
 0x57b   :  { %v3735_v39 = vpop.eup %3734  ;;  %v2036_v38 = vmul.f32 %v3733_v44, %v3731_v41  ;;  %v11695_v41 = vld [vmem:[#allocation55_spill] sm:$0xff]  ;;  %v11696_v44 = vld [vmem:[#allocation56_spill] sm:$0xff] }
 0x57c   :  { %v2035_v27 = vmul.f32 %v3735_v39, %v2033_v57  ;;  %v11697_v57 = vld [vmem:[#allocation57_spill] sm:$0xff]  ;;  %v11698_v39 = vld [vmem:[#allocation58_spill] sm:$0xff] }
 0x57e   :  { %v8530_v43 = vadd.f32 %v2036_v38, %v2035_v27  ;;  %v3737_v46 = vpop.eup %3736  ;;  %v11700_v38 = vld [vmem:[#allocation60_spill] sm:$0xff]  ;;  %v11701_v27 = vld [vmem:[#allocation61_spill] sm:$0xff] }
 0x580   :  { %3738 = vtanh.f32 %v8530_v43 }
 0x58d   :  { %v3739_v60 = vpop.eup %3738 }
 0x58e   :  { %v8533_v59 = vmul.f32 %v3739_v60, %v3737_v46  ;;  %v11702_v46 = vld [vmem:[#allocation62_spill] sm:$0xff]  ;;  %v11703_v60 = vld [vmem:[#allocation63_spill] sm:$0xff] }
 0x590   :  { %2105 = vmatmul.mubr.f32.vlgmr.msra.gmra.mxu0 %v8533_v59  ;;  %2176 = vmatmul.mubr.f32.vlgmr.msra.gmra.mxu1 %v8533_v59 }
 0x591   :  { %2207 = vmatpush1.msra.mxu0 %v7374_v2  ;;  %2278 = vmatpush1.msra.mxu1 %v7380_v63  ;;  %v11647_v2 = vld [vmem:[#allocation5_spill] sm:$0xff]  ;;  %v11648_v63 = vld [vmem:[#allocation15_spill] sm:$0xff] }
 0x592   :  { %2208 = vmatprep.subr.mxu0 %v7386_v47  ;;  %2279 = vmatprep.subr.mxu1 %v7392_v54  ;;  %v11649_v47 = vld [vmem:[#allocation6_spill] sm:$0xff]  ;;  %v11650_v54 = vld [vmem:[#allocation16_spill] sm:$0xff] }
 0x593   :  { %2209 = vmatpush1.msra.mxu0 %v7398_v31  ;;  %2280 = vmatpush1.msra.mxu1 %v7404_v1  ;;  %v11651_v31 = vld [vmem:[#allocation7_spill] sm:$0xff]  ;;  %v11652_v1 = vld [vmem:[#allocation17_spill] sm:$0xff] }
 0x594   :  { %2210 = vmatprep.subr.mxu0 %v7410_v16  ;;  %2281 = vmatprep.subr.mxu1 %v7416_v51  ;;  %v11653_v16 = vld [vmem:[#allocation8_spill] sm:$0xff]  ;;  %v11654_v51 = vld [vmem:[#allocation18_spill] sm:$0xff] }
 0x595   :  { %2211 = vmatpush1.msra.mxu0 %v7422_v55  ;;  %2282 = vmatpush1.msra.mxu1 %v7428_v28  ;;  %v11655_v55 = vld [vmem:[#allocation9_spill] sm:$0xff]  ;;  %v11656_v28 = vld [vmem:[#allocation19_spill] sm:$0xff] }
 0x596   :  { %2212 = vmatprep.subr.mxu0 %v7434_v53  ;;  %2283 = vmatprep.subr.mxu1 %v7440_v5  ;;  %v11657_v53 = vld [vmem:[#allocation10_spill] sm:$0xff]  ;;  %v11658_v5 = vld [vmem:[#allocation20_spill] sm:$0xff] }
 0x597   :  { %2213 = vmatpush1.msra.mxu0 %v7446_v13  ;;  %2284 = vmatpush1.msra.mxu1 %v7452_v15  ;;  %v11659_v13 = vld [vmem:[#allocation11_spill] sm:$0xff]  ;;  %v11660_v15 = vld [vmem:[#allocation21_spill] sm:$0xff] }
 0x598   :  { %2214 = vmatprep.subr.mxu0 %v7458_v56  ;;  %2285 = vmatprep.subr.mxu1 %v7464_v18  ;;  %v11661_v56 = vld [vmem:[#allocation22_spill] sm:$0xff]  ;;  %v11662_v18 = vld [vmem:[#allocation23_spill] sm:$0xff] }
 0x599   :  { %2215 = vmatpush1.msra.mxu0 %v7470_v52  ;;  %2286 = vmatpush1.msra.mxu1 %v7476_v62  ;;  %v11663_v52 = vld [vmem:[#allocation24_spill] sm:$0xff]  ;;  %v11664_v62 = vld [vmem:[#allocation25_spill] sm:$0xff] }
 0x59a   :  { %2216 = vmatprep.subr.mxu0 %v7482_v48  ;;  %2287 = vmatprep.subr.mxu1 %v7488_v7  ;;  %v11665_v48 = vmov 0.0   ;;  %v11666_v7 = vld [vmem:[#allocation26_spill] sm:$0xff] }
 0x59b   :  { %2217 = vmatpush1.msra.mxu0 %v7494_v4  ;;  %2288 = vmatpush1.msra.mxu1 %v7500_v6  ;;  %v11667_v4 = vld [vmem:[#allocation27_spill] sm:$0xff]  ;;  %v11668_v6 = vld [vmem:[#allocation28_spill] sm:$0xff] }
 0x59c   :  { %2218 = vmatprep.subr.mxu0 %v7506_v8  ;;  %2289 = vmatprep.subr.mxu1 %v7512_v10  ;;  %v11669_v8 = vld [vmem:[#allocation29_spill] sm:$0xff]  ;;  %v11670_v10 = vld [vmem:[#allocation30_spill] sm:$0xff] }
 0x59d   :  { %2219 = vmatpush1.msra.mxu0 %v7518_v11  ;;  %2290 = vmatpush1.msra.mxu1 %v7524_v20  ;;  %v11671_v11 = vld [vmem:[#allocation31_spill] sm:$0xff]  ;;  %v11672_v20 = vld [vmem:[#allocation32_spill] sm:$0xff] }
 0x59e   :  { %2220 = vmatprep.subr.mxu0 %v7530_v17  ;;  %2291 = vmatprep.subr.mxu1 %v7536_v19  ;;  %v11673_v17 = vld [vmem:[#allocation33_spill] sm:$0xff]  ;;  %v11674_v19 = vld [vmem:[#allocation34_spill] sm:$0xff] }
 0x59f   :  { %2221 = vmatpush1.msra.mxu0 %v7542_v21  ;;  %2292 = vmatpush1.msra.mxu1 %v7548_v14  ;;  %v11675_v21 = vld [vmem:[#allocation35_spill] sm:$0xff]  ;;  %v11676_v14 = vld [vmem:[#allocation36_spill] sm:$0xff] }
 0x5a0   :  { %2222 = vmatprep.subr.mxu0 %v7554_v22  ;;  %2293 = vmatprep.subr.mxu1 %v7560_v24  ;;  %v11677_v22 = vld [vmem:[#allocation37_spill] sm:$0xff]  ;;  %v11678_v24 = vld [vmem:[#allocation38_spill] sm:$0xff] }
 0x5a1   :  { %2223 = vmatpush1.msra.mxu0 %v7566_v25  ;;  %2294 = vmatpush1.msra.mxu1 %v7572_v29  ;;  %v11679_v25 = vld [vmem:[#allocation39_spill] sm:$0xff]  ;;  %v11680_v29 = vld [vmem:[#allocation40_spill] sm:$0xff] }
 0x5a2   :  { %2224 = vmatprep.subr.mxu0 %v7578_v45  ;;  %2295 = vmatprep.subr.mxu1 %v7584_v30  ;;  %v11681_v45 = vld [vmem:[#allocation41_spill] sm:$0xff]  ;;  %v11682_v30 = vld [vmem:[#allocation42_spill] sm:$0xff] }
 0x5a3   :  { %2225 = vmatpush1.msra.mxu0 %v7590_v32  ;;  %2296 = vmatpush1.msra.mxu1 %v7596_v26  ;;  %v11683_v32 = vld [vmem:[#allocation43_spill] sm:$0xff]  ;;  %v11684_v26 = vld [vmem:[#allocation44_spill] sm:$0xff] }
 0x5a4   :  { %2226 = vmatprep.subr.mxu0 %v7602_v33  ;;  %2297 = vmatprep.subr.mxu1 %v7608_v34  ;;  %v11685_v33 = vld [vmem:[#allocation45_spill] sm:$0xff]  ;;  %v11686_v34 = vld [vmem:[#allocation46_spill] sm:$0xff] }
 0x5a5   :  { %2227 = vmatpush1.msra.mxu0 %v7614_v35  ;;  %2298 = vmatpush1.msra.mxu1 %v7620_v36  ;;  %v11687_v35 = vld [vmem:[#allocation47_spill] sm:$0xff]  ;;  %v11688_v36 = vld [vmem:[#allocation48_spill] sm:$0xff] }
 0x5a6   :  { %2228 = vmatprep.subr.mxu0 %v11646_v3  ;;  %2299 = vmatprep.subr.mxu1 %v11647_v2  ;;  %v11705_v3 = vld [vmem:[#allocation65_spill] sm:$0xff]  ;;  %v11706_v2 = vld [vmem:[#allocation66_spill] sm:$0xff] }
 0x5a7   :  { %2229 = vmatpush1.msra.mxu0 %v11648_v63  ;;  %2300 = vmatpush1.msra.mxu1 %v11649_v47  ;;  %v11707_v63 = vld [vmem:[#allocation67_spill] sm:$0xff]  ;;  %v11708_v47 = vld [vmem:[#allocation68_spill] sm:$0xff] }
 0x5a8   :  { %2230 = vmatprep.subr.mxu0 %v11650_v54  ;;  %2301 = vmatprep.subr.mxu1 %v11651_v31  ;;  %v11709_v54 = vld [vmem:[#allocation69_spill] sm:$0xff]  ;;  %v11710_v31 = vld [vmem:[#allocation70_spill] sm:$0xff] }
 0x5a9   :  { %2231 = vmatpush1.msra.mxu0 %v11652_v1  ;;  %2302 = vmatpush1.msra.mxu1 %v11653_v16  ;;  %v11711_v1 = vld [vmem:[#allocation71_spill] sm:$0xff]  ;;  %v11712_v16 = vld [vmem:[#allocation72_spill] sm:$0xff] }
 0x5aa   :  { %2232 = vmatprep.subr.mxu0 %v11654_v51  ;;  %2303 = vmatprep.subr.mxu1 %v11655_v55  ;;  %v11713_v51 = vld [vmem:[#allocation73_spill] sm:$0xff]  ;;  %v11714_v55 = vld [vmem:[#allocation74_spill] sm:$0xff] }
 0x5ab   :  { %2233 = vmatpush1.msra.mxu0 %v11656_v28  ;;  %2304 = vmatpush1.msra.mxu1 %v11657_v53  ;;  %v11715_v28 = vld [vmem:[#allocation75_spill] sm:$0xff]  ;;  %v11716_v53 = vld [vmem:[#allocation76_spill] sm:$0xff] }
 0x5ac   :  { %2234 = vmatprep.subr.mxu0 %v11658_v5  ;;  %2305 = vmatprep.subr.mxu1 %v11659_v13  ;;  %v11717_v5 = vld [vmem:[#allocation77_spill] sm:$0xff]  ;;  %v11718_v13 = vld [vmem:[#allocation78_spill] sm:$0xff] }
 0x5ad   :  { %2235 = vmatpush1.msra.mxu0 %v11660_v15  ;;  %2306 = vmatpush1.msra.mxu1 %v11661_v56  ;;  %v11719_v15 = vld [vmem:[#allocation79_spill] sm:$0xff]  ;;  %v11720_v56 = vld [vmem:[#allocation80_spill] sm:$0xff] }
 0x5ae   :  { %2236 = vmatprep.subr.mxu0 %v11662_v18  ;;  %2307 = vmatprep.subr.mxu1 %v11663_v52  ;;  %v11721_v18 = vld [vmem:[#allocation81_spill] sm:$0xff]  ;;  %v11722_v52 = vld [vmem:[#allocation82_spill] sm:$0xff] }
 0x5af   :  { %2237 = vmatpush1.msra.mxu0 %v11664_v62  ;;  %2270 = vmatprep.mubr.f32.mxu0 %v11665_v48  ;;  %v11723_v62 = vld [vmem:[#allocation83_spill] sm:$0xff] }
 0x5b0   :  { %2308 = vmatpush1.msra.mxu1 %v11666_v7  ;;  %2341 = vmatprep.mubr.f32.mxu1 %v11665_v48  ;;  %v11724_v7 = vld [vmem:[#allocation84_spill] sm:$0xff] }
 0x5b1   :  { %2271 = vmatmul.mubr.f32.vlgmr.msra.gmra.mxu0 %v8533_v59  ;;  %2342 = vmatmul.mubr.f32.vlgmr.msra.gmra.mxu1 %v8533_v59  ;;  %v11704_v59 = vld [vmem:[#allocation64_spill] sm:$0xff] }
 0x5b2   :  { %2398 = vmatprep.subr.mxu0 %v11667_v4  ;;  %2469 = vmatprep.subr.mxu1 %v11668_v6  ;;  %v11725_v4 = vld [vmem:[#allocation85_spill] sm:$0xff]  ;;  %v11726_v6 = vld [vmem:[#allocation86_spill] sm:$0xff] }
 0x5b3   :  { %2399 = vmatpush1.msra.mxu0 %v11669_v8  ;;  %2470 = vmatpush1.msra.mxu1 %v11670_v10  ;;  %v11727_v8 = vld [vmem:[#allocation87_spill] sm:$0xff]  ;;  %v11728_v10 = vld [vmem:[#allocation88_spill] sm:$0xff] }
 0x5b4   :  { %2400 = vmatprep.subr.mxu0 %v11671_v11  ;;  %2471 = vmatprep.subr.mxu1 %v11672_v20  ;;  %v11729_v11 = vld [vmem:[#allocation89_spill] sm:$0xff]  ;;  %v11730_v20 = vld [vmem:[#allocation90_spill] sm:$0xff] }
 0x5b5   :  { %2401 = vmatpush1.msra.mxu0 %v11673_v17  ;;  %2472 = vmatpush1.msra.mxu1 %v11674_v19  ;;  %v11731_v17 = vld [vmem:[#allocation91_spill] sm:$0xff]  ;;  %v11732_v19 = vld [vmem:[#allocation92_spill] sm:$0xff] }
 0x5b6   :  { %2402 = vmatprep.subr.mxu0 %v11675_v21  ;;  %2473 = vmatprep.subr.mxu1 %v11676_v14  ;;  %v11733_v21 = vld [vmem:[#allocation93_spill] sm:$0xff]  ;;  %v11734_v14 = vld [vmem:[#allocation94_spill] sm:$0xff] }
 0x5b7   :  { %2403 = vmatpush1.msra.mxu0 %v11677_v22  ;;  %2474 = vmatpush1.msra.mxu1 %v11678_v24  ;;  %v11735_v22 = vld [vmem:[#allocation95_spill] sm:$0xff]  ;;  %v11736_v24 = vld [vmem:[#allocation96_spill] sm:$0xff] }
 0x5b8   :  { %2404 = vmatprep.subr.mxu0 %v11679_v25  ;;  %2475 = vmatprep.subr.mxu1 %v11680_v29  ;;  %v11737_v25 = vld [vmem:[#allocation97_spill] sm:$0xff]  ;;  %v11738_v29 = vld [vmem:[#allocation98_spill] sm:$0xff] }
 0x5b9   :  { %2405 = vmatpush1.msra.mxu0 %v11681_v45  ;;  %2476 = vmatpush1.msra.mxu1 %v11682_v30  ;;  %v11739_v45 = vld [vmem:[#allocation99_spill] sm:$0xff]  ;;  %v11740_v30 = vld [vmem:[#allocation100_spill] sm:$0xff] }
 0x5ba   :  { %2406 = vmatprep.subr.mxu0 %v11683_v32  ;;  %2477 = vmatprep.subr.mxu1 %v11684_v26  ;;  %v11741_v32 = vld [vmem:[#allocation101_spill] sm:$0xff]  ;;  %v11742_v26 = vld [vmem:[#allocation102_spill] sm:$0xff] }
 0x5bb   :  { %2407 = vmatpush1.msra.mxu0 %v11685_v33  ;;  %2478 = vmatpush1.msra.mxu1 %v11686_v34  ;;  %v11743_v33 = vld [vmem:[#allocation103_spill] sm:$0xff]  ;;  %v11744_v34 = vld [vmem:[#allocation104_spill] sm:$0xff] }
 0x5bc   :  { %2408 = vmatprep.subr.mxu0 %v11687_v35  ;;  %2479 = vmatprep.subr.mxu1 %v11688_v36  ;;  %v11745_v35 = vld [vmem:[#allocation105_spill] sm:$0xff]  ;;  %v11746_v36 = vld [vmem:[#allocation106_spill] sm:$0xff] }
 0x5bd   :  { %2409 = vmatpush1.msra.mxu0 %v11689_v42  ;;  %2480 = vmatpush1.msra.mxu1 %v11690_v12  ;;  %v11747_v42 = vld [vmem:[#allocation107_spill] sm:$0xff]  ;;  %v11748_v12 = vld [vmem:[#allocation108_spill] sm:$0xff] }
 0x5be   :  { %2410 = vmatprep.subr.mxu0 %v11691_v9  ;;  %2481 = vmatprep.subr.mxu1 %v11692_v23  ;;  %v11749_v9 = vld [vmem:[#allocation109_spill] sm:$0xff]  ;;  %v11750_v23 = vld [vmem:[#allocation110_spill] sm:$0xff] }
 0x5bf   :  { %2411 = vmatpush1.msra.mxu0 %v11693_v37  ;;  %2482 = vmatpush1.msra.mxu1 %v11694_v0  ;;  %v11751_v37 = vld [vmem:[#allocation111_spill] sm:$0xff]  ;;  %v11752_v0 = vld [vmem:[#allocation112_spill] sm:$0xff] }
 0x5c0   :  { %2412 = vmatprep.subr.mxu0 %v11695_v41  ;;  %2483 = vmatprep.subr.mxu1 %v11696_v44  ;;  %v11753_v41 = vld [vmem:[#allocation113_spill] sm:$0xff]  ;;  %v11754_v44 = vld [vmem:[#allocation114_spill] sm:$0xff] }
 0x5c1   :  { %2413 = vmatpush1.msra.mxu0 %v11697_v57  ;;  %2484 = vmatpush1.msra.mxu1 %v11698_v39  ;;  %v11755_v57 = vld [vmem:[#allocation115_spill] sm:$0xff]  ;;  %v11756_v39 = vld [vmem:[#allocation116_spill] sm:$0xff] }
 0x5c2   :  { %2414 = vmatprep.subr.mxu0 %v11699_v50  ;;  %2485 = vmatprep.subr.mxu1 %v11700_v38  ;;  %v11757_v50 = vld [vmem:[#allocation117_spill] sm:$0xff]  ;;  %v11758_v38 = vld [vmem:[#allocation118_spill] sm:$0xff] }
 0x5c3   :  { %2415 = vmatpush1.msra.mxu0 %v11701_v27  ;;  %2486 = vmatpush1.msra.mxu1 %v11702_v46  ;;  %v11759_v27 = vld [vmem:[#allocation119_spill] sm:$0xff]  ;;  %v11760_v46 = vld [vmem:[#allocation120_spill] sm:$0xff] }
 0x5c4   :  { %2416 = vmatprep.subr.mxu0 %v11703_v60  ;;  %2487 = vmatprep.subr.mxu1 %v11704_v59  ;;  %v11761_v60 = vld [vmem:[#allocation121_spill] sm:$0xff]  ;;  %v11762_v59 = vld [vmem:[#allocation122_spill] sm:$0xff] }
 0x5c5   :  { %2417 = vmatpush1.msra.mxu0 %v11705_v3  ;;  %2488 = vmatpush1.msra.mxu1 %v11706_v2  ;;  %v11763_v3 = vld [vmem:[#allocation123_spill] sm:$0xff]  ;;  %v11764_v2 = vld [vmem:[#allocation124_spill] sm:$0xff] }
 0x5c6   :  { %2418 = vmatprep.subr.mxu0 %v11707_v63  ;;  %2489 = vmatprep.subr.mxu1 %v11708_v47  ;;  %v11765_v63 = vld [vmem:[#allocation125_spill] sm:$0xff]  ;;  %v11766_v47 = vld [vmem:[#allocation126_spill] sm:$0xff] }
 0x5c7   :  { %2419 = vmatpush1.msra.mxu0 %v11709_v54  ;;  %2490 = vmatpush1.msra.mxu1 %v11710_v31  ;;  %v11767_v54 = vld [vmem:[#allocation127_spill] sm:$0xff]  ;;  %v11768_v31 = vld [vmem:[#allocation128_spill] sm:$0xff] }
 0x5c8   :  { %2420 = vmatprep.subr.mxu0 %v11711_v1  ;;  %2491 = vmatprep.subr.mxu1 %v11712_v16  ;;  %v11769_v1 = vld [vmem:[#allocation129_spill] sm:$0xff]  ;;  %v11770_v16 = vld [vmem:[#allocation130_spill] sm:$0xff] }
 0x5c9   :  { %2421 = vmatpush1.msra.mxu0 %v11713_v51  ;;  %2492 = vmatpush1.msra.mxu1 %v11714_v55  ;;  %v11771_v51 = vld [vmem:[#allocation131_spill] sm:$0xff]  ;;  %v11772_v55 = vld [vmem:[#allocation132_spill] sm:$0xff] }
 0x5ca   :  { %2422 = vmatprep.subr.mxu0 %v11715_v28  ;;  %2493 = vmatprep.subr.mxu1 %v11716_v53  ;;  %v11773_v28 = vld [vmem:[#allocation133_spill] sm:$0xff]  ;;  %v11774_v53 = vld [vmem:[#allocation134_spill] sm:$0xff] }
 0x5cb   :  { %2423 = vmatpush1.msra.mxu0 %v11717_v5  ;;  %2494 = vmatpush1.msra.mxu1 %v11718_v13  ;;  %v11775_v5 = vld [vmem:[#allocation135_spill] sm:$0xff]  ;;  %v11776_v13 = vld [vmem:[#allocation136_spill] sm:$0xff] }
 0x5cc   :  { %2424 = vmatprep.subr.mxu0 %v11719_v15  ;;  %2495 = vmatprep.subr.mxu1 %v11720_v56  ;;  %v11777_v15 = vld [vmem:[#allocation137_spill] sm:$0xff]  ;;  %v11778_v56 = vld [vmem:[#allocation138_spill] sm:$0xff] }
 0x5cd   :  { %2425 = vmatpush1.msra.mxu0 %v11721_v18  ;;  %2496 = vmatpush1.msra.mxu1 %v11722_v52  ;;  %v11779_v18 = vld [vmem:[#allocation139_spill] sm:$0xff]  ;;  %v11780_v52 = vld [vmem:[#allocation140_spill] sm:$0xff] }
 0x5ce   :  { %2426 = vmatprep.subr.mxu0 %v11723_v62  ;;  %2497 = vmatprep.subr.mxu1 %v11724_v7  ;;  %v11781_v62 = vld [vmem:[#allocation141_spill] sm:$0xff]  ;;  %v11782_v7 = vld [vmem:[#allocation142_spill] sm:$0xff] }
 0x5cf   :  { %2427 = vmatpush1.msra.mxu0 %v11725_v4  ;;  %2498 = vmatpush1.msra.mxu1 %v11726_v6  ;;  %v11783_v4 = vld [vmem:[#allocation143_spill] sm:$0xff]  ;;  %v11784_v6 = vld [vmem:[#allocation144_spill] sm:$0xff] }
 0x5d0   :  { %2428 = vmatprep.subr.mxu0 %v11727_v8  ;;  %2499 = vmatprep.subr.mxu1 %v11728_v10  ;;  %v11785_v8 = vld [vmem:[#allocation145_spill] sm:$0xff]  ;;  %v11786_v10 = vld [vmem:[#allocation146_spill] sm:$0xff] }
 0x5d1   :  { %2429 = vmatpush1.msra.mxu0 %v11729_v11  ;;  %2500 = vmatpush1.msra.mxu1 %v11730_v20  ;;  %v11787_v11 = vld [vmem:[#allocation147_spill] sm:$0xff]  ;;  %v11788_v20 = vld [vmem:[#allocation148_spill] sm:$0xff] }
 0x5d2   :  { %2430 = vmatprep.subr.mxu0 %v11731_v17  ;;  %2501 = vmatprep.subr.mxu1 %v11732_v19  ;;  %v11789_v17 = vld [vmem:[#allocation149_spill] sm:$0xff]  ;;  %v11790_v19 = vld [vmem:[#allocation152_spill] sm:$0xff] }
 0x5d3   :  { %2431 = vmatpush2.msra.mxu0 %v11733_v21  ;;  %2502 = vmatpush2.msra.mxu1 %v11734_v14  ;;  %v11791_v21 = vld [vmem:[#allocation153_spill] sm:$0xff] }
 0x5d4   :  { %2432 = vmatprep.subr.mxu0 %v11735_v22  ;;  %2503 = vmatprep.subr.mxu1 %v11736_v24  ;;  %v11792_v14 = vld [vmem:[#allocation157_spill] sm:$0xff]  ;;  %v11793_v22 = vld [vmem:[#allocation158_spill] sm:$0xff]  ;;  %v11794_v24 = vld [vmem:[#allocation159_spill] sm:$0xff] }
 0x5d5   :  { %2433 = vmatpush2.msra.mxu0 %v11737_v25  ;;  %2504 = vmatpush2.msra.mxu1 %v11738_v29  ;;  %v8734_v25 = vld [vmem:[%s10233_s2 + $0x1e8] sm:$0xff]  ;;  %v8740_v29 = vld [vmem:[%s10233_s2 + $0x1f8] sm:$0xff] }
 0x5d6   :  { %2434 = vmatprep.subr.mxu0 %v11739_v45  ;;  %2505 = vmatprep.subr.mxu1 %v11740_v30  ;;  %v11795_v30 = vld [vmem:[#allocation12_spill] sm:$0xff] }
 0x5d7   :  { %2435 = vmatpush2.msra.mxu0 %v11741_v32  ;;  %2506 = vmatpush2.msra.mxu1 %v11742_v26 }
 0x5d8   :  { %2436 = vmatprep.subr.mxu0 %v11743_v33  ;;  %2507 = vmatprep.subr.mxu1 %v11744_v34  ;;  %v11796_v34 = vld [vmem:[#allocation3_spill] sm:$0xff] }
 0x5d9   :  { %2437 = vmatpush2.msra.mxu0 %v11745_v35  ;;  %2508 = vmatpush2.msra.mxu1 %v11746_v36 }
 0x5da   :  { %2438 = vmatprep.subr.mxu0 %v11747_v42  ;;  %2509 = vmatprep.subr.mxu1 %v11748_v12 }
 0x5db   :  { %2439 = vmatpush2.msra.mxu0 %v11749_v9  ;;  %2510 = vmatpush2.msra.mxu1 %v11750_v23  ;;  %v11797_v9 = vld [vmem:[#allocation13_spill] sm:$0xff] }
 0x5dc   :  { %2440 = vmatprep.subr.mxu0 %v11751_v37  ;;  %2511 = vmatprep.subr.mxu1 %v11752_v0 }
 0x5dd   :  { %2441 = vmatpush2.msra.mxu0 %v11753_v41  ;;  %2512 = vmatpush2.msra.mxu1 %v11754_v44  ;;  %v11798_v41 = vld [vmem:[#allocation4_spill] sm:$0xff] }
 0x5de   :  { %2442 = vmatprep.subr.mxu0 %v11755_v57  ;;  %2513 = vmatprep.subr.mxu1 %v11756_v39 }
 0x5df   :  { %2443 = vmatpush2.msra.mxu0 %v11757_v50  ;;  %2514 = vmatpush2.msra.mxu1 %v11758_v38 }
 0x5e0   :  { %2444 = vmatprep.subr.mxu0 %v11759_v27  ;;  %2515 = vmatprep.subr.mxu1 %v11760_v46 }
 0x5e1   :  { %2445 = vmatpush2.msra.mxu0 %v11761_v60  ;;  %2516 = vmatpush2.msra.mxu1 %v11762_v59 }
 0x5e2   :  { %2446 = vmatprep.subr.mxu0 %v11763_v3  ;;  %2517 = vmatprep.subr.mxu1 %v11764_v2 }
 0x5e3   :  { %2447 = vmatpush2.msra.mxu0 %v11765_v63  ;;  %2518 = vmatpush2.msra.mxu1 %v11766_v47  ;;  %v11799_v47 = vld [vmem:[#allocation150_spill] sm:$0xff] }
 0x5e4   :  { %2448 = vmatprep.subr.mxu0 %v11767_v54  ;;  %2519 = vmatprep.subr.mxu1 %v11768_v31 }
 0x5e5   :  { %2449 = vmatpush2.msra.mxu0 %v11769_v1  ;;  %2520 = vmatpush2.msra.mxu1 %v11770_v16 }
 0x5e6   :  { %2450 = vmatprep.subr.mxu0 %v11771_v51  ;;  %2521 = vmatprep.subr.mxu1 %v11772_v55 }
 0x5e7   :  { %2451 = vmatpush2.msra.mxu0 %v11773_v28  ;;  %2522 = vmatpush2.msra.mxu1 %v11774_v53 }
 0x5e8   :  { %2452 = vmatprep.subr.mxu0 %v11775_v5  ;;  %2523 = vmatprep.subr.mxu1 %v11776_v13 }
 0x5e9   :  { %2453 = vmatpush2.msra.mxu0 %v11777_v15  ;;  %2524 = vmatpush2.msra.mxu1 %v11778_v56 }
 0x5ea   :  { %2454 = vmatprep.subr.mxu0 %v11779_v18  ;;  %2525 = vmatprep.subr.mxu1 %v11780_v52 }
 0x5eb   :  { %2455 = vmatpush2.msra.mxu0 %v11781_v62  ;;  %2526 = vmatpush2.msra.mxu1 %v11782_v7 }
 0x5ec   :  { %2456 = vmatprep.subr.mxu0 %v11783_v4  ;;  %2527 = vmatprep.subr.mxu1 %v11784_v6 }
 0x5ed   :  { %2457 = vmatpush2.msra.mxu0 %v11785_v8  ;;  %2528 = vmatpush2.msra.mxu1 %v11786_v10 }
 0x5ee   :  { %2458 = vmatprep.subr.mxu0 %v11787_v11  ;;  %2529 = vmatprep.subr.mxu1 %v11788_v20 }
 0x5ef   :  { %2459 = vmatpush2.msra.mxu0 %v11789_v17  ;;  %2530 = vmatpush2.msra.mxu1 %v11790_v19 }
 0x5f0   :  { %2460 = vmatprep.subr.mxu0 %v11791_v21  ;;  %2531 = vmatprep.subr.mxu1 %v11792_v14 }
 0x5f1   :  { %2461 = vmatpush2.msra.mxu0 %v11793_v22  ;;  %2532 = vmatpush2.msra.mxu1 %v11794_v24  ;;  %v2384_v22 = vrot.slane %v8530_v43, 6  ;;  %v8766_v43 = vld [vmem:[%s10233_s2 + $0x1e0] sm:$0xff] }
 0x5f2   :  { %2564 = vmatprep.subr.mxu0 %v8734_v25  ;;  %2635 = vmatprep.subr.mxu1 %v8740_v29 }
 0x650   :  { %v2106_v45 = vpop.f32.mrf.mxu0  ;;  %v2177_v36 = vpop.f32.mrf.mxu1 }
 0x651   :  { %v2107_v32 = vadd.f32 %v2106_v45, %v11795_v30  ;;  %v2178_v44 = vadd.f32 %v2177_v36, %v11798_v41 }
 0x652   :  { %v2108_v26 = vpop.f32.mrf.mxu0  ;;  %v2179_v12 = vpop.f32.mrf.mxu1 }
 0x653   :  { %v3502_v33 = vmul.f32 -1.442695, %v2107_v32  ;;  %v2109_v35 = vadd.f32 %v2108_v26, %v11796_v34  ;;  %v2180_v23 = vadd.f32 %v2179_v12, %v11797_v9 }
 0x655   :  { %3740 = vpow2.f32 %v3502_v33  ;;  %v3503_v42 = vmul.f32 -1.442695, %v2109_v35  ;;  %v3504_v37 = vmul.f32 -1.442695, %v2180_v23  ;;  %v8772_v23 = vld [vmem:[%s10233_s2 + $0x1f0] sm:$0xff] }
 0x657   :  { %3742 = vpow2.f32 %v3503_v42 }
 0x658   :  { %3744 = vpow2.f32 %v3504_v37  ;;  %v8778_v37 = vld [vmem:[%s10233_s2 + $0x1c8] sm:$0xff] }
 0x662   :  { %v3741_v0 = vpop.eup %3740 }
 0x663   :  { %v2185_v57 = vadd.f32 1.0, %v3741_v0  ;;  %v8784_v0 = vld [vmem:[%s10233_s2 + $0x1d8] sm:$0xff] }
 0x664   :  { %v3743_v39 = vpop.eup %3742 }
 0x665   :  { %3746 = vrcp.f32 %v2185_v57  ;;  %v2191_v50 = vadd.f32 1.0, %v3743_v39  ;;  %v3745_v38 = vpop.eup %3744  ;;  %v8796_v57 = vld [vmem:[%s10233_s2 + $0x1d0] sm:$0xff]  ;;  %v8802_v39 = vld [vmem:[%s10233_s2 + $0x1a8] sm:$0xff] }
 0x666   :  { %3748 = vtanh.f32 %v2178_v44  ;;  %v2198_v3 = vadd.f32 1.0, %v3745_v38  ;;  %v8790_v44 = vld [vmem:[%s10233_s2 + $0x1c0] sm:$0xff] }
 0x667   :  { %3750 = vrcp.f32 %v2191_v50  ;;  %v8808_v50 = vld [vmem:[%s10233_s2 + $0x1b8] sm:$0xff]  ;;  %v8814_v38 = vld [vmem:[%s10233_s2 + $0x1a0] sm:$0xff] }
 0x668   :  { %3752 = vrcp.f32 %v2198_v3  ;;  %v8844_v3 = vld [vmem:[%s10233_s2 + $0x190] sm:$0xff] }
 0x671   :  { %v2272_v27 = vpop.f32.mrf.mxu0  ;;  %v2343_v31 = vpop.f32.mrf.mxu1 }
 0x672   :  { %v3747_v46 = vpop.eup %3746  ;;  %v2352_v60 = vrot.slane %v2272_v27, 6  ;;  %v2354_v18 = vrot.slane %v2343_v31, 6  ;;  %v8820_v27 = vld [vmem:[%s10233_s2 + $0x1b0] sm:$0xff] }
 0x673   :  { %v3749_v59 = vpop.eup %3748  ;;  %v2274_v2 = vpop.f32.mrf.mxu0  ;;  %v8868_v31 = vld [vmem:[%s10233_s2 + $0x170] sm:$0xff] }
 0x674   :  { %v3751_v63 = vpop.eup %3750  ;;  %v2360_v54 = vadd.f32 %v2352_v60, %v11799_v47  ;;  %v2353_v1 = vrot.slane %v2274_v2, 6  ;;  %v2202_v16 = vmul.f32 %v3749_v59, %v3747_v46  ;;  %v2345_v13 = vpop.f32.mrf.mxu1  ;;  %v8826_v46 = vld [vmem:[%s10233_s2 + $0x188] sm:$0xff]  ;;  %v8832_v60 = vld [vmem:[%s10233_s2 + $0x198] sm:$0xff]  ;;  %v8838_v59 = vld [vmem:[%s10233_s2 + $0x180] sm:$0xff] }
 0x675   :  { %v2201_v51 = vmul.f32 %v3751_v63, %v8524_v49  ;;  %v2355_v15 = vrot.slane %v2345_v13, 6  ;;  %v3753_v62 = vpop.eup %3752  ;;  %v2362_v49 = vadd.f32 %v2354_v18, %v11645_v58  ;;  %v8850_v2 = vld [vmem:[%s10233_s2 + $0x168] sm:$0xff]  ;;  %v8856_v63 = vld [vmem:[%s10233_s2 + $0x178] sm:$0xff]  ;;  %v8910_v13 = vld [vmem:[%s10233_s2 + $0x120] sm:$0xff] }
 0x676   :  { %v3505_v55 = vmul.f32 -1.442695, %v2360_v54  ;;  %v2361_v28 = vadd.f32 %v2353_v1, %v11643_v40  ;;  %v8862_v54 = vld [vmem:[%s10233_s2 + $0x160] sm:$0xff]  ;;  %v8874_v1 = vld [vmem:[%s10233_s2 + $0x148] sm:$0xff]  ;;  %v8928_v18 = vld [vmem:[%s10233_s2 + $0x118] sm:$0xff] }
 0x677   :  { %v8750_v53 = vadd.f32 %v2202_v16, %v2201_v51  ;;  %v2363_v56 = vadd.f32 %v2355_v15, %v11644_v61  ;;  %v8880_v16 = vld [vmem:[%s10233_s2 + $0x158] sm:$0xff]  ;;  %v8886_v51 = vld [vmem:[%s10233_s2 + $0x140] sm:$0xff]  ;;  %v8916_v15 = vld [vmem:[%s10233_s2 + $0x130] sm:$0xff] }
 0x678   :  { %3754 = vpow2.f32 %v3505_v55  ;;  %v3506_v5 = vmul.f32 -1.442695, %v2361_v28  ;;  %v8892_v55 = vld [vmem:[%s10233_s2 + $0x150] sm:$0xff]  ;;  %v8898_v28 = vld [vmem:[%s10233_s2 + $0x128] sm:$0xff] }
 0x679   :  { %3756 = vtanh.f32 %v8750_v53  ;;  %v3507_v52 = vmul.f32 -1.442695, %v2363_v56  ;;  %v8922_v56 = vld [vmem:[%s10233_s2 + $0x108] sm:$0xff] }
 0x67a   :  { %3758 = vpow2.f32 %v3506_v5  ;;  %v8904_v5 = vld [vmem:[%s10233_s2 + $0x138] sm:$0xff] }
 0x67b   :  { %3760 = vpow2.f32 %v3507_v52  ;;  %v8934_v52 = vld [vmem:[%s10233_s2 + $0x100] sm:$0xff] }
 0x685   :  { %v3755_v7 = vpop.eup %3754 }
 0x686   :  { %v3757_v4 = vpop.eup %3756  ;;  %v2367_v6 = vadd.f32 1.0, %v3755_v7  ;;  %v8946_v7 = vld [vmem:[%s10233_s2 + $0xe8] sm:$0xff] }
 0x687   :  { %v3759_v8 = vpop.eup %3758  ;;  %v2205_v10 = vmul.f32 %v3757_v4, %v3753_v62  ;;  %v8940_v62 = vld [vmem:[%s10233_s2 + $0x110] sm:$0xff]  ;;  %v8958_v4 = vld [vmem:[%s10233_s2 + $0xe0] sm:$0xff] }
 0x688   :  { %3762 = vrcp.f32 %v2367_v6  ;;  %v2373_v11 = vadd.f32 1.0, %v3759_v8  ;;  %v3761_v19 = vpop.eup %3760  ;;  %v8964_v6 = vld [vmem:[%s10233_s2 + $0xf0] sm:$0xff]  ;;  %v8970_v8 = vld [vmem:[%s10233_s2 + $0xc8] sm:$0xff] }
 0x689   :  { %3764 = vtanh.f32 %v2362_v49  ;;  %v2392_v20 = vrot.slane %v2205_v10, 6  ;;  %v2380_v45 = vadd.f32 1.0, %v3761_v19  ;;  %v8952_v49 = vld [vmem:[%s10233_s2 + $0xf8] sm:$0xff] }
 0x68a   :  { %3766 = vrcp.f32 %v2373_v11  ;;  %v8976_v10 = vld [vmem:[%s10233_s2 + $0xd8] sm:$0xff]  ;;  %v8982_v11 = vld [vmem:[%s10233_s2 + $0xc0] sm:$0xff] }
 0x68b   :  { %v2395_v17 = vrot.slane %v2392_v20, 2  ;;  %3768 = vrcp.f32 %v2380_v45  ;;  %v8988_v20 = vld [vmem:[%s10233_s2 + $0xd0] sm:$0xff]  ;;  %v9000_v19 = vld [vmem:[%s10233_s2 + $0xb8] sm:$0xff]  ;;  %v9030_v45 = vld [vmem:[%s10233_s2 + $0x80] sm:$0xff] }
 0x68c   :  { %11800 = vst [vmem:[#allocation160_spill] sm:$0xff] %v9000_v19  ;;  %11805 = vst [vmem:[#allocation155_spill] sm:$0xff] %v9030_v45 }
 0x68d   :  { %2462 = vmatprep.mubr.f32.mxu0 %v2395_v17  ;;  %2533 = vmatprep.mubr.f32.mxu1 %v2395_v17  ;;  %v8994_v17 = vld [vmem:[%s10233_s2 + $0xa8] sm:$0xff] }
 0x695   :  { %v3763_v21 = vpop.eup %3762 }
 0x696   :  { %v3765_v14 = vpop.eup %3764 }
 0x697   :  { %v3767_v24 = vpop.eup %3766  ;;  %v2387_v32 = vmul.f32 %v3765_v14, %v3763_v21  ;;  %v9006_v21 = vld [vmem:[%s10233_s2 + $0xa0] sm:$0xff]  ;;  %v9012_v14 = vld [vmem:[%s10233_s2 + $0xb0] sm:$0xff] }
 0x698   :  { %v2386_v26 = vmul.f32 %v3767_v24, %v2384_v22  ;;  %v3769_v35 = vpop.eup %3768  ;;  %11801 = vst [vmem:[#allocation161_spill] sm:$0xff] %v9006_v21  ;;  %11802 = vst [vmem:[#allocation162_spill] sm:$0xff] %v9012_v14  ;;  %v9018_v22 = vld [vmem:[%s10233_s2 + $0x88] sm:$0xff]  ;;  %v9024_v24 = vld [vmem:[%s10233_s2 + $0x98] sm:$0xff] }
 0x699   :  { %11803 = vst [vmem:[#allocation156_spill] sm:$0xff] %v9018_v22  ;;  %11804 = vst [vmem:[#allocation151_spill] sm:$0xff] %v9024_v24 }
 0x69a   :  { %v8756_v33 = vadd.f32 %v2387_v32, %v2386_v26  ;;  %v9036_v32 = vld [vmem:[%s10233_s2 + $0x90] sm:$0xff]  ;;  %v9042_v26 = vld [vmem:[%s10233_s2 + $0x68] sm:$0xff] }
 0x69b   :  { %11806 = vst [vmem:[#allocation14_spill] sm:$0xff] %v9036_v32  ;;  %11807 = vst [vmem:[#allocation5_spill] sm:$0xff] %v9042_v26 }
 0x69c   :  { %3770 = vtanh.f32 %v8756_v33 }
 0x6a9   :  { %v3771_v36 = vpop.eup %3770 }
 0x6aa   :  { %v2390_v42 = vmul.f32 %v3771_v36, %v3769_v35  ;;  %v9048_v35 = vld [vmem:[%s10233_s2 + $0x78] sm:$0xff]  ;;  %v9054_v36 = vld [vmem:[%s10233_s2 + $0x60] sm:$0xff] }
 0x6ab   :  { %11808 = vst [vmem:[#allocation15_spill] sm:$0xff] %v9048_v35  ;;  %11809 = vst [vmem:[#allocation6_spill] sm:$0xff] %v9054_v36 }
 0x6ac   :  { %v8759_v12 = vrot.slane %v2390_v42, 2  ;;  %v9060_v42 = vld [vmem:[%s10233_s2 + $0x70] sm:$0xff] }
 0x6ad   :  { %11810 = vst [vmem:[#allocation16_spill] sm:$0xff] %v9060_v42 }
 0x6ae   :  { %2463 = vmatmul.mubr.f32.vlgmr.msra.gmra.mxu0 %v8759_v12  ;;  %2534 = vmatmul.mubr.f32.vlgmr.msra.gmra.mxu1 %v8759_v12 }
 0x6af   :  { %2565 = vmatpush1.msra.mxu0 %v8766_v43  ;;  %2636 = vmatpush1.msra.mxu1 %v8772_v23 }
 0x6b0   :  { %2566 = vmatprep.subr.mxu0 %v8778_v37  ;;  %2637 = vmatprep.subr.mxu1 %v8784_v0 }
 0x6b1   :  { %2567 = vmatpush1.msra.mxu0 %v8790_v44  ;;  %2638 = vmatpush1.msra.mxu1 %v8796_v57 }
 0x6b2   :  { %2568 = vmatprep.subr.mxu0 %v8802_v39  ;;  %2639 = vmatprep.subr.mxu1 %v8808_v50 }
 0x6b3   :  { %2569 = vmatpush1.msra.mxu0 %v8814_v38  ;;  %2640 = vmatpush1.msra.mxu1 %v8820_v27 }
 0x6b4   :  { %2570 = vmatprep.subr.mxu0 %v8826_v46  ;;  %2641 = vmatprep.subr.mxu1 %v8832_v60 }
 0x6b5   :  { %2571 = vmatpush1.msra.mxu0 %v8838_v59  ;;  %2642 = vmatpush1.msra.mxu1 %v8844_v3 }
 0x6b6   :  { %2572 = vmatprep.subr.mxu0 %v8850_v2  ;;  %2643 = vmatprep.subr.mxu1 %v8856_v63 }
 0x6b7   :  { %2573 = vmatpush1.msra.mxu0 %v8862_v54  ;;  %2644 = vmatpush1.msra.mxu1 %v8868_v31 }
 0x6b8   :  { %2574 = vmatprep.subr.mxu0 %v8874_v1  ;;  %2645 = vmatprep.subr.mxu1 %v8880_v16 }
 0x6b9   :  { %2575 = vmatpush1.msra.mxu0 %v8886_v51  ;;  %2646 = vmatpush1.msra.mxu1 %v8892_v55 }
 0x6ba   :  { %2576 = vmatprep.subr.mxu0 %v8898_v28  ;;  %2647 = vmatprep.subr.mxu1 %v8904_v5 }
 0x6bb   :  { %2577 = vmatpush1.msra.mxu0 %v8910_v13  ;;  %2648 = vmatpush1.msra.mxu1 %v8916_v15 }
 0x6bc   :  { %2578 = vmatprep.subr.mxu0 %v8922_v56  ;;  %2649 = vmatprep.subr.mxu1 %v8928_v18 }
 0x6bd   :  { %2579 = vmatpush1.msra.mxu0 %v8934_v52  ;;  %2650 = vmatpush1.msra.mxu1 %v8940_v62 }
 0x6be   :  { %2580 = vmatprep.subr.mxu0 %v8946_v7  ;;  %2651 = vmatprep.subr.mxu1 %v8952_v49 }
 0x6bf   :  { %2581 = vmatpush1.msra.mxu0 %v8958_v4  ;;  %2652 = vmatpush1.msra.mxu1 %v8964_v6 }
 0x6c0   :  { %2582 = vmatprep.subr.mxu0 %v8970_v8  ;;  %2653 = vmatprep.subr.mxu1 %v8976_v10 }
 0x6c1   :  { %2583 = vmatpush1.msra.mxu0 %v8982_v11  ;;  %2654 = vmatpush1.msra.mxu1 %v8988_v20 }
 0x6c2   :  { %2584 = vmatprep.subr.mxu0 %v8994_v17  ;;  %2655 = vmatprep.subr.mxu1 %v9000_v19 }
 0x6c3   :  { %2585 = vmatpush1.msra.mxu0 %v9006_v21  ;;  %2656 = vmatpush1.msra.mxu1 %v9012_v14 }
 0x6c4   :  { %2586 = vmatprep.subr.mxu0 %v9018_v22  ;;  %2657 = vmatprep.subr.mxu1 %v9024_v24 }
 0x6c5   :  { %2587 = vmatpush1.msra.mxu0 %v9030_v45  ;;  %2658 = vmatpush1.msra.mxu1 %v9036_v32 }
 0x6c6   :  { %2588 = vmatprep.subr.mxu0 %v9042_v26  ;;  %2659 = vmatprep.subr.mxu1 %v9048_v35  ;;  %v9066_v26 = vld [vmem:[%s10233_s2 + $0x48] sm:$0xff]  ;;  %v9072_v35 = vld [vmem:[%s10233_s2 + $0x58] sm:$0xff] }
 0x6c7   :  { %2589 = vmatpush1.msra.mxu0 %v9054_v36  ;;  %2660 = vmatpush1.msra.mxu1 %v9060_v42  ;;  %11811 = vst [vmem:[#allocation7_spill] sm:$0xff] %v9066_v26  ;;  %11812 = vst [vmem:[#allocation17_spill] sm:$0xff] %v9072_v35  ;;  %v9078_v36 = vld [vmem:[%s10233_s2 + $0x40] sm:$0xff]  ;;  %v9084_v42 = vld [vmem:[%s10233_s2 + $0x50] sm:$0xff] }
 0x6c8   :  { %2590 = vmatprep.subr.mxu0 %v9066_v26  ;;  %2661 = vmatprep.subr.mxu1 %v9072_v35  ;;  %11813 = vst [vmem:[#allocation8_spill] sm:$0xff] %v9078_v36  ;;  %11814 = vst [vmem:[#allocation18_spill] sm:$0xff] %v9084_v42  ;;  %v9090_v26 = vld [vmem:[%s10233_s2 + $0x28] sm:$0xff]  ;;  %v9096_v35 = vld [vmem:[%s10233_s2 + $0x38] sm:$0xff] }
 0x6c9   :  { %2591 = vmatpush1.msra.mxu0 %v9078_v36  ;;  %2662 = vmatpush1.msra.mxu1 %v9084_v42  ;;  %11815 = vst [vmem:[#allocation9_spill] sm:$0xff] %v9090_v26  ;;  %11816 = vst [vmem:[#allocation19_spill] sm:$0xff] %v9096_v35  ;;  %v9102_v36 = vld [vmem:[%s10233_s2 + $0x20] sm:$0xff]  ;;  %v9108_v42 = vld [vmem:[%s10233_s2 + $0x30] sm:$0xff] }
 0x6ca   :  { %2592 = vmatprep.subr.mxu0 %v9090_v26  ;;  %2663 = vmatprep.subr.mxu1 %v9096_v35  ;;  %11817 = vst [vmem:[#allocation10_spill] sm:$0xff] %v9102_v36  ;;  %11818 = vst [vmem:[#allocation20_spill] sm:$0xff] %v9108_v42  ;;  %v9114_v26 = vld [vmem:[%s10233_s2 + $0x8] sm:$0xff]  ;;  %v9120_v35 = vld [vmem:[%s10233_s2 + $0x18] sm:$0xff] }
 0x6cb   :  { %2593 = vmatpush1.msra.mxu0 %v9102_v36  ;;  %2664 = vmatpush1.msra.mxu1 %v9108_v42  ;;  %11819 = vst [vmem:[#allocation11_spill] sm:$0xff] %v9114_v26  ;;  %11820 = vst [vmem:[#allocation21_spill] sm:$0xff] %v9120_v35  ;;  %v9126_v36 = vld [vmem:[%s10233_s2] sm:$0xff] }
 0x6cc   :  { %2594 = vmatprep.subr.mxu0 %v9114_v26  ;;  %2665 = vmatprep.subr.mxu1 %v9120_v35  ;;  %11821 = vst [vmem:[#allocation22_spill] sm:$0xff] %v9126_v36  ;;  %v9133_v26 = vld [vmem:[%s10233_s2 + $0x10] sm:$0xff]  ;;  %v9142_v35 = vld [vmem:[%s10235_s4 + $0x1e8] sm:$0xff] }
 0x6cd   :  { %2595 = vmatpush1.msra.mxu0 %v9126_v36  ;;  %2628 = vmatprep.mubr.f32.mxu0 %v11665_v48  ;;  %11822 = vst [vmem:[#allocation23_spill] sm:$0xff] %v9133_v26  ;;  %11823 = vst [vmem:[#allocation24_spill] sm:$0xff] %v9142_v35  ;;  %v9148_v36 = vld [vmem:[%s10235_s4 + $0x1f8] sm:$0xff] }
 0x6ce   :  { %2666 = vmatpush1.msra.mxu1 %v9133_v26  ;;  %2699 = vmatprep.mubr.f32.mxu1 %v11665_v48  ;;  %11824 = vst [vmem:[#allocation25_spill] sm:$0xff] %v9148_v36  ;;  %v9154_v26 = vld [vmem:[%s10235_s4 + $0x1e0] sm:$0xff] }
 0x6cf   :  { %2629 = vmatmul.mubr.f32.vlgmr.msra.gmra.mxu0 %v8759_v12  ;;  %2700 = vmatmul.mubr.f32.vlgmr.msra.gmra.mxu1 %v8759_v12  ;;  %11825 = vst [vmem:[#allocation26_spill] sm:$0xff] %v9154_v26  ;;  %v9160_v12 = vld [vmem:[%s10235_s4 + $0x1f0] sm:$0xff] }
 0x6d0   :  { %2756 = vmatprep.subr.mxu0 %v9142_v35  ;;  %2827 = vmatprep.subr.mxu1 %v9148_v36  ;;  %11826 = vst [vmem:[#allocation27_spill] sm:$0xff] %v9160_v12  ;;  %v9166_v35 = vld [vmem:[%s10235_s4 + $0x1c8] sm:$0xff]  ;;  %v9172_v36 = vld [vmem:[%s10235_s4 + $0x1d8] sm:$0xff] }
 0x6d1   :  { %2757 = vmatpush1.msra.mxu0 %v9154_v26  ;;  %2828 = vmatpush1.msra.mxu1 %v9160_v12  ;;  %11827 = vst [vmem:[#allocation28_spill] sm:$0xff] %v9166_v35  ;;  %11828 = vst [vmem:[#allocation29_spill] sm:$0xff] %v9172_v36  ;;  %v9178_v26 = vld [vmem:[%s10235_s4 + $0x1c0] sm:$0xff]  ;;  %v9184_v12 = vld [vmem:[%s10235_s4 + $0x1d0] sm:$0xff] }
 0x6d2   :  { %2758 = vmatprep.subr.mxu0 %v9166_v35  ;;  %2829 = vmatprep.subr.mxu1 %v9172_v36  ;;  %11829 = vst [vmem:[#allocation30_spill] sm:$0xff] %v9178_v26  ;;  %11830 = vst [vmem:[#allocation31_spill] sm:$0xff] %v9184_v12  ;;  %v9190_v35 = vld [vmem:[%s10235_s4 + $0x1a8] sm:$0xff]  ;;  %v9196_v36 = vld [vmem:[%s10235_s4 + $0x1b8] sm:$0xff] }
 0x6d3   :  { %2759 = vmatpush1.msra.mxu0 %v9178_v26  ;;  %2830 = vmatpush1.msra.mxu1 %v9184_v12  ;;  %11831 = vst [vmem:[#allocation32_spill] sm:$0xff] %v9190_v35  ;;  %11832 = vst [vmem:[#allocation33_spill] sm:$0xff] %v9196_v36  ;;  %v9202_v26 = vld [vmem:[%s10235_s4 + $0x1a0] sm:$0xff]  ;;  %v9208_v12 = vld [vmem:[%s10235_s4 + $0x1b0] sm:$0xff] }
 0x6d4   :  { %2760 = vmatprep.subr.mxu0 %v9190_v35  ;;  %2831 = vmatprep.subr.mxu1 %v9196_v36  ;;  %11833 = vst [vmem:[#allocation34_spill] sm:$0xff] %v9202_v26  ;;  %11834 = vst [vmem:[#allocation35_spill] sm:$0xff] %v9208_v12  ;;  %v9214_v35 = vld [vmem:[%s10235_s4 + $0x188] sm:$0xff]  ;;  %v9220_v36 = vld [vmem:[%s10235_s4 + $0x198] sm:$0xff] }
 0x6d5   :  { %2761 = vmatpush1.msra.mxu0 %v9202_v26  ;;  %2832 = vmatpush1.msra.mxu1 %v9208_v12  ;;  %11835 = vst [vmem:[#allocation36_spill] sm:$0xff] %v9214_v35  ;;  %11836 = vst [vmem:[#allocation37_spill] sm:$0xff] %v9220_v36  ;;  %v9226_v26 = vld [vmem:[%s10235_s4 + $0x180] sm:$0xff]  ;;  %v9232_v12 = vld [vmem:[%s10235_s4 + $0x190] sm:$0xff] }
 0x6d6   :  { %2762 = vmatprep.subr.mxu0 %v9214_v35  ;;  %2833 = vmatprep.subr.mxu1 %v9220_v36  ;;  %11837 = vst [vmem:[#allocation38_spill] sm:$0xff] %v9226_v26  ;;  %11838 = vst [vmem:[#allocation39_spill] sm:$0xff] %v9232_v12  ;;  %v9238_v35 = vld [vmem:[%s10235_s4 + $0x168] sm:$0xff]  ;;  %v9244_v36 = vld [vmem:[%s10235_s4 + $0x178] sm:$0xff] }
 0x6d7   :  { %2763 = vmatpush1.msra.mxu0 %v9226_v26  ;;  %2834 = vmatpush1.msra.mxu1 %v9232_v12  ;;  %11839 = vst [vmem:[#allocation40_spill] sm:$0xff] %v9238_v35  ;;  %11840 = vst [vmem:[#allocation41_spill] sm:$0xff] %v9244_v36  ;;  %v9250_v26 = vld [vmem:[%s10235_s4 + $0x160] sm:$0xff]  ;;  %v9256_v12 = vld [vmem:[%s10235_s4 + $0x170] sm:$0xff] }
 0x6d8   :  { %2764 = vmatprep.subr.mxu0 %v9238_v35  ;;  %2835 = vmatprep.subr.mxu1 %v9244_v36  ;;  %11841 = vst [vmem:[#allocation42_spill] sm:$0xff] %v9250_v26  ;;  %11842 = vst [vmem:[#allocation43_spill] sm:$0xff] %v9256_v12  ;;  %v9262_v35 = vld [vmem:[%s10235_s4 + $0x148] sm:$0xff]  ;;  %v9268_v36 = vld [vmem:[%s10235_s4 + $0x158] sm:$0xff] }
 0x6d9   :  { %2765 = vmatpush1.msra.mxu0 %v9250_v26  ;;  %2836 = vmatpush1.msra.mxu1 %v9256_v12  ;;  %11843 = vst [vmem:[#allocation44_spill] sm:$0xff] %v9262_v35  ;;  %11844 = vst [vmem:[#allocation45_spill] sm:$0xff] %v9268_v36  ;;  %v9274_v26 = vld [vmem:[%s10235_s4 + $0x140] sm:$0xff]  ;;  %v9280_v12 = vld [vmem:[%s10235_s4 + $0x150] sm:$0xff] }
 0x6da   :  { %2766 = vmatprep.subr.mxu0 %v9262_v35  ;;  %2837 = vmatprep.subr.mxu1 %v9268_v36  ;;  %11845 = vst [vmem:[#allocation46_spill] sm:$0xff] %v9274_v26  ;;  %11846 = vst [vmem:[#allocation47_spill] sm:$0xff] %v9280_v12  ;;  %v9286_v35 = vld [vmem:[%s10235_s4 + $0x128] sm:$0xff]  ;;  %v9292_v36 = vld [vmem:[%s10235_s4 + $0x138] sm:$0xff] }
 0x6db   :  { %2767 = vmatpush1.msra.mxu0 %v9274_v26  ;;  %2838 = vmatpush1.msra.mxu1 %v9280_v12  ;;  %11847 = vst [vmem:[#allocation48_spill] sm:$0xff] %v9286_v35  ;;  %11848 = vst [vmem:[#allocation49_spill] sm:$0xff] %v9292_v36  ;;  %v9298_v26 = vld [vmem:[%s10235_s4 + $0x120] sm:$0xff]  ;;  %v9304_v12 = vld [vmem:[%s10235_s4 + $0x130] sm:$0xff] }
 0x6dc   :  { %2768 = vmatprep.subr.mxu0 %v9286_v35  ;;  %2839 = vmatprep.subr.mxu1 %v9292_v36  ;;  %11849 = vst [vmem:[#allocation50_spill] sm:$0xff] %v9298_v26  ;;  %11850 = vst [vmem:[#allocation51_spill] sm:$0xff] %v9304_v12  ;;  %v9310_v35 = vld [vmem:[%s10235_s4 + $0x108] sm:$0xff]  ;;  %v9316_v36 = vld [vmem:[%s10235_s4 + $0x118] sm:$0xff] }
 0x6dd   :  { %2769 = vmatpush1.msra.mxu0 %v9298_v26  ;;  %2840 = vmatpush1.msra.mxu1 %v9304_v12  ;;  %11851 = vst [vmem:[#allocation52_spill] sm:$0xff] %v9310_v35  ;;  %11852 = vst [vmem:[#allocation53_spill] sm:$0xff] %v9316_v36  ;;  %v9322_v26 = vld [vmem:[%s10235_s4 + $0x100] sm:$0xff]  ;;  %v9328_v12 = vld [vmem:[%s10235_s4 + $0x110] sm:$0xff] }
 0x6de   :  { %2770 = vmatprep.subr.mxu0 %v9310_v35  ;;  %2841 = vmatprep.subr.mxu1 %v9316_v36  ;;  %11853 = vst [vmem:[#allocation54_spill] sm:$0xff] %v9322_v26  ;;  %11854 = vst [vmem:[#allocation55_spill] sm:$0xff] %v9328_v12  ;;  %v9334_v35 = vld [vmem:[%s10235_s4 + $0xe8] sm:$0xff]  ;;  %v9340_v36 = vld [vmem:[%s10235_s4 + $0xf8] sm:$0xff] }
 0x6df   :  { %2771 = vmatpush1.msra.mxu0 %v9322_v26  ;;  %2842 = vmatpush1.msra.mxu1 %v9328_v12  ;;  %11855 = vst [vmem:[#allocation56_spill] sm:$0xff] %v9334_v35  ;;  %11856 = vst [vmem:[#allocation57_spill] sm:$0xff] %v9340_v36  ;;  %v9346_v26 = vld [vmem:[%s10235_s4 + $0xe0] sm:$0xff]  ;;  %v9352_v12 = vld [vmem:[%s10235_s4 + $0xf0] sm:$0xff] }
 0x6e0   :  { %2772 = vmatprep.subr.mxu0 %v9334_v35  ;;  %2843 = vmatprep.subr.mxu1 %v9340_v36  ;;  %11857 = vst [vmem:[#allocation58_spill] sm:$0xff] %v9346_v26  ;;  %11858 = vst [vmem:[#allocation59_spill] sm:$0xff] %v9352_v12  ;;  %v9358_v35 = vld [vmem:[%s10235_s4 + $0xc8] sm:$0xff]  ;;  %v9364_v36 = vld [vmem:[%s10235_s4 + $0xd8] sm:$0xff] }
 0x6e1   :  { %2773 = vmatpush1.msra.mxu0 %v9346_v26  ;;  %2844 = vmatpush1.msra.mxu1 %v9352_v12  ;;  %11859 = vst [vmem:[#allocation60_spill] sm:$0xff] %v9358_v35  ;;  %11860 = vst [vmem:[#allocation61_spill] sm:$0xff] %v9364_v36  ;;  %v9370_v26 = vld [vmem:[%s10235_s4 + $0xc0] sm:$0xff]  ;;  %v9376_v12 = vld [vmem:[%s10235_s4 + $0xd0] sm:$0xff] }
 0x6e2   :  { %2774 = vmatprep.subr.mxu0 %v9358_v35  ;;  %2845 = vmatprep.subr.mxu1 %v9364_v36  ;;  %11861 = vst [vmem:[#allocation62_spill] sm:$0xff] %v9370_v26  ;;  %11862 = vst [vmem:[#allocation63_spill] sm:$0xff] %v9376_v12  ;;  %v9382_v35 = vld [vmem:[%s10235_s4 + $0xa8] sm:$0xff]  ;;  %v9388_v36 = vld [vmem:[%s10235_s4 + $0xb8] sm:$0xff] }
 0x6e3   :  { %2775 = vmatpush1.msra.mxu0 %v9370_v26  ;;  %2846 = vmatpush1.msra.mxu1 %v9376_v12  ;;  %11863 = vst [vmem:[#allocation64_spill] sm:$0xff] %v9382_v35  ;;  %11864 = vst [vmem:[#allocation65_spill] sm:$0xff] %v9388_v36  ;;  %v9394_v26 = vld [vmem:[%s10235_s4 + $0xa0] sm:$0xff]  ;;  %v9400_v12 = vld [vmem:[%s10235_s4 + $0xb0] sm:$0xff] }
 0x6e4   :  { %2776 = vmatprep.subr.mxu0 %v9382_v35  ;;  %2847 = vmatprep.subr.mxu1 %v9388_v36  ;;  %11865 = vst [vmem:[#allocation66_spill] sm:$0xff] %v9394_v26  ;;  %11866 = vst [vmem:[#allocation67_spill] sm:$0xff] %v9400_v12  ;;  %v9406_v35 = vld [vmem:[%s10235_s4 + $0x88] sm:$0xff]  ;;  %v9412_v36 = vld [vmem:[%s10235_s4 + $0x98] sm:$0xff] }
 0x6e5   :  { %2777 = vmatpush1.msra.mxu0 %v9394_v26  ;;  %2848 = vmatpush1.msra.mxu1 %v9400_v12  ;;  %11867 = vst [vmem:[#allocation68_spill] sm:$0xff] %v9406_v35  ;;  %11868 = vst [vmem:[#allocation69_spill] sm:$0xff] %v9412_v36  ;;  %v9418_v26 = vld [vmem:[%s10235_s4 + $0x80] sm:$0xff]  ;;  %v9424_v12 = vld [vmem:[%s10235_s4 + $0x90] sm:$0xff] }
 0x6e6   :  { %2778 = vmatprep.subr.mxu0 %v9406_v35  ;;  %2849 = vmatprep.subr.mxu1 %v9412_v36  ;;  %11869 = vst [vmem:[#allocation70_spill] sm:$0xff] %v9418_v26  ;;  %11870 = vst [vmem:[#allocation71_spill] sm:$0xff] %v9424_v12  ;;  %v9430_v35 = vld [vmem:[%s10235_s4 + $0x68] sm:$0xff]  ;;  %v9436_v36 = vld [vmem:[%s10235_s4 + $0x78] sm:$0xff] }
 0x6e7   :  { %2779 = vmatpush1.msra.mxu0 %v9418_v26  ;;  %2850 = vmatpush1.msra.mxu1 %v9424_v12  ;;  %11871 = vst [vmem:[#allocation72_spill] sm:$0xff] %v9430_v35  ;;  %11872 = vst [vmem:[#allocation73_spill] sm:$0xff] %v9436_v36  ;;  %v9442_v26 = vld [vmem:[%s10235_s4 + $0x60] sm:$0xff]  ;;  %v9448_v12 = vld [vmem:[%s10235_s4 + $0x70] sm:$0xff] }
 0x6e8   :  { %2780 = vmatprep.subr.mxu0 %v9430_v35  ;;  %2851 = vmatprep.subr.mxu1 %v9436_v36  ;;  %11873 = vst [vmem:[#allocation74_spill] sm:$0xff] %v9442_v26  ;;  %11874 = vst [vmem:[#allocation75_spill] sm:$0xff] %v9448_v12  ;;  %v9454_v35 = vld [vmem:[%s10235_s4 + $0x48] sm:$0xff]  ;;  %v9460_v36 = vld [vmem:[%s10235_s4 + $0x58] sm:$0xff] }
 0x6e9   :  { %2781 = vmatpush1.msra.mxu0 %v9442_v26  ;;  %2852 = vmatpush1.msra.mxu1 %v9448_v12  ;;  %11875 = vst [vmem:[#allocation76_spill] sm:$0xff] %v9454_v35  ;;  %11876 = vst [vmem:[#allocation77_spill] sm:$0xff] %v9460_v36  ;;  %v9466_v26 = vld [vmem:[%s10235_s4 + $0x40] sm:$0xff]  ;;  %v9472_v12 = vld [vmem:[%s10235_s4 + $0x50] sm:$0xff] }
 0x6ea   :  { %2782 = vmatprep.subr.mxu0 %v9454_v35  ;;  %2853 = vmatprep.subr.mxu1 %v9460_v36  ;;  %11877 = vst [vmem:[#allocation78_spill] sm:$0xff] %v9466_v26  ;;  %11878 = vst [vmem:[#allocation79_spill] sm:$0xff] %v9472_v12  ;;  %v9478_v35 = vld [vmem:[%s10235_s4 + $0x28] sm:$0xff]  ;;  %v9484_v36 = vld [vmem:[%s10235_s4 + $0x38] sm:$0xff] }
 0x6eb   :  { %2783 = vmatpush1.msra.mxu0 %v9466_v26  ;;  %2854 = vmatpush1.msra.mxu1 %v9472_v12  ;;  %11879 = vst [vmem:[#allocation80_spill] sm:$0xff] %v9478_v35  ;;  %11880 = vst [vmem:[#allocation81_spill] sm:$0xff] %v9484_v36  ;;  %v9490_v26 = vld [vmem:[%s10235_s4 + $0x20] sm:$0xff]  ;;  %v9496_v12 = vld [vmem:[%s10235_s4 + $0x30] sm:$0xff] }
 0x6ec   :  { %2784 = vmatprep.subr.mxu0 %v9478_v35  ;;  %2855 = vmatprep.subr.mxu1 %v9484_v36  ;;  %11881 = vst [vmem:[#allocation82_spill] sm:$0xff] %v9490_v26  ;;  %11882 = vst [vmem:[#allocation83_spill] sm:$0xff] %v9496_v12  ;;  %v9502_v35 = vld [vmem:[%s10235_s4 + $0x8] sm:$0xff]  ;;  %v9508_v36 = vld [vmem:[%s10235_s4 + $0x18] sm:$0xff] }
 0x6ed   :  { %2785 = vmatpush1.msra.mxu0 %v9490_v26  ;;  %2856 = vmatpush1.msra.mxu1 %v9496_v12  ;;  %11883 = vst [vmem:[#allocation84_spill] sm:$0xff] %v9502_v35  ;;  %11884 = vst [vmem:[#allocation85_spill] sm:$0xff] %v9508_v36  ;;  %v9514_v26 = vld [vmem:[%s10235_s4] sm:$0xff]  ;;  %v9520_v12 = vld [vmem:[%s10235_s4 + $0x10] sm:$0xff] }
 0x6ee   :  { %2786 = vmatprep.subr.mxu0 %v9502_v35  ;;  %2857 = vmatprep.subr.mxu1 %v9508_v36  ;;  %11885 = vst [vmem:[#allocation86_spill] sm:$0xff] %v9514_v26  ;;  %11886 = vst [vmem:[#allocation87_spill] sm:$0xff] %v9520_v12  ;;  %v9526_v35 = vld [vmem:[%s10235_s4 + $0x3e8] sm:$0xff]  ;;  %v9532_v36 = vld [vmem:[%s10235_s4 + $0x3f8] sm:$0xff] }
 0x6ef   :  { %2787 = vmatpush1.msra.mxu0 %v9514_v26  ;;  %2858 = vmatpush1.msra.mxu1 %v9520_v12  ;;  %11887 = vst [vmem:[#allocation88_spill] sm:$0xff] %v9526_v35  ;;  %11888 = vst [vmem:[#allocation89_spill] sm:$0xff] %v9532_v36  ;;  %v9538_v26 = vld [vmem:[%s10235_s4 + $0x3e0] sm:$0xff]  ;;  %v9544_v12 = vld [vmem:[%s10235_s4 + $0x3f0] sm:$0xff] }
 0x6f0   :  { %2788 = vmatprep.subr.mxu0 %v9526_v35  ;;  %2859 = vmatprep.subr.mxu1 %v9532_v36  ;;  %11889 = vst [vmem:[#allocation90_spill] sm:$0xff] %v9538_v26  ;;  %11890 = vst [vmem:[#allocation91_spill] sm:$0xff] %v9544_v12  ;;  %v9550_v35 = vld [vmem:[%s10235_s4 + $0x3c8] sm:$0xff]  ;;  %v9556_v36 = vld [vmem:[%s10235_s4 + $0x3d8] sm:$0xff] }
 0x6f1   :  { %2789 = vmatpush2.msra.mxu0 %v9538_v26  ;;  %2860 = vmatpush2.msra.mxu1 %v9544_v12  ;;  %11891 = vst [vmem:[#allocation92_spill] sm:$0xff] %v9550_v35  ;;  %11892 = vst [vmem:[#allocation93_spill] sm:$0xff] %v9556_v36  ;;  %v9562_v26 = vld [vmem:[%s10235_s4 + $0x3c0] sm:$0xff]  ;;  %v9568_v12 = vld [vmem:[%s10235_s4 + $0x3d0] sm:$0xff] }
 0x6f2   :  { %2790 = vmatprep.subr.mxu0 %v9550_v35  ;;  %2861 = vmatprep.subr.mxu1 %v9556_v36  ;;  %11893 = vst [vmem:[#allocation94_spill] sm:$0xff] %v9562_v26  ;;  %11894 = vst [vmem:[#allocation95_spill] sm:$0xff] %v9568_v12  ;;  %v9574_v35 = vld [vmem:[%s10235_s4 + $0x3a8] sm:$0xff]  ;;  %v9580_v36 = vld [vmem:[%s10235_s4 + $0x3b8] sm:$0xff] }
 0x6f3   :  { %2791 = vmatpush2.msra.mxu0 %v9562_v26  ;;  %2862 = vmatpush2.msra.mxu1 %v9568_v12  ;;  %11895 = vst [vmem:[#allocation96_spill] sm:$0xff] %v9574_v35  ;;  %11896 = vst [vmem:[#allocation97_spill] sm:$0xff] %v9580_v36  ;;  %v9586_v26 = vld [vmem:[%s10235_s4 + $0x3a0] sm:$0xff]  ;;  %v9592_v12 = vld [vmem:[%s10235_s4 + $0x3b0] sm:$0xff] }
 0x6f4   :  { %2792 = vmatprep.subr.mxu0 %v9574_v35  ;;  %2863 = vmatprep.subr.mxu1 %v9580_v36  ;;  %11897 = vst [vmem:[#allocation98_spill] sm:$0xff] %v9586_v26  ;;  %11898 = vst [vmem:[#allocation99_spill] sm:$0xff] %v9592_v12  ;;  %v9598_v35 = vld [vmem:[%s10235_s4 + $0x388] sm:$0xff]  ;;  %v9604_v36 = vld [vmem:[%s10235_s4 + $0x398] sm:$0xff] }
 0x6f5   :  { %2793 = vmatpush2.msra.mxu0 %v9586_v26  ;;  %2864 = vmatpush2.msra.mxu1 %v9592_v12  ;;  %11899 = vst [vmem:[#allocation100_spill] sm:$0xff] %v9598_v35  ;;  %11900 = vst [vmem:[#allocation101_spill] sm:$0xff] %v9604_v36  ;;  %v9610_v26 = vld [vmem:[%s10235_s4 + $0x380] sm:$0xff]  ;;  %v9616_v12 = vld [vmem:[%s10235_s4 + $0x390] sm:$0xff] }
 0x6f6   :  { %2794 = vmatprep.subr.mxu0 %v9598_v35  ;;  %2865 = vmatprep.subr.mxu1 %v9604_v36  ;;  %11901 = vst [vmem:[#allocation102_spill] sm:$0xff] %v9610_v26  ;;  %11902 = vst [vmem:[#allocation103_spill] sm:$0xff] %v9616_v12  ;;  %v9622_v35 = vld [vmem:[%s10235_s4 + $0x368] sm:$0xff]  ;;  %v9628_v36 = vld [vmem:[%s10235_s4 + $0x378] sm:$0xff] }
 0x6f7   :  { %2795 = vmatpush2.msra.mxu0 %v9610_v26  ;;  %2866 = vmatpush2.msra.mxu1 %v9616_v12  ;;  %11903 = vst [vmem:[#allocation104_spill] sm:$0xff] %v9622_v35  ;;  %11904 = vst [vmem:[#allocation105_spill] sm:$0xff] %v9628_v36  ;;  %v9634_v26 = vld [vmem:[%s10235_s4 + $0x360] sm:$0xff]  ;;  %v9640_v12 = vld [vmem:[%s10235_s4 + $0x370] sm:$0xff] }
 0x6f8   :  { %2796 = vmatprep.subr.mxu0 %v9622_v35  ;;  %2867 = vmatprep.subr.mxu1 %v9628_v36  ;;  %11905 = vst [vmem:[#allocation106_spill] sm:$0xff] %v9634_v26  ;;  %11906 = vst [vmem:[#allocation107_spill] sm:$0xff] %v9640_v12  ;;  %v9646_v35 = vld [vmem:[%s10235_s4 + $0x348] sm:$0xff]  ;;  %v9652_v36 = vld [vmem:[%s10235_s4 + $0x358] sm:$0xff] }
 0x6f9   :  { %2797 = vmatpush2.msra.mxu0 %v9634_v26  ;;  %2868 = vmatpush2.msra.mxu1 %v9640_v12  ;;  %11907 = vst [vmem:[#allocation108_spill] sm:$0xff] %v9646_v35  ;;  %11908 = vst [vmem:[#allocation109_spill] sm:$0xff] %v9652_v36  ;;  %v9658_v26 = vld [vmem:[%s10235_s4 + $0x340] sm:$0xff]  ;;  %v9664_v12 = vld [vmem:[%s10235_s4 + $0x350] sm:$0xff] }
 0x6fa   :  { %2798 = vmatprep.subr.mxu0 %v9646_v35  ;;  %2869 = vmatprep.subr.mxu1 %v9652_v36  ;;  %11909 = vst [vmem:[#allocation110_spill] sm:$0xff] %v9658_v26  ;;  %11910 = vst [vmem:[#allocation111_spill] sm:$0xff] %v9664_v12  ;;  %v9670_v35 = vld [vmem:[%s10235_s4 + $0x328] sm:$0xff]  ;;  %v9676_v36 = vld [vmem:[%s10235_s4 + $0x338] sm:$0xff] }
 0x6fb   :  { %2799 = vmatpush2.msra.mxu0 %v9658_v26  ;;  %2870 = vmatpush2.msra.mxu1 %v9664_v12  ;;  %11911 = vst [vmem:[#allocation112_spill] sm:$0xff] %v9670_v35  ;;  %11912 = vst [vmem:[#allocation113_spill] sm:$0xff] %v9676_v36  ;;  %v9682_v26 = vld [vmem:[%s10235_s4 + $0x320] sm:$0xff]  ;;  %v9688_v12 = vld [vmem:[%s10235_s4 + $0x330] sm:$0xff] }
 0x6fc   :  { %2800 = vmatprep.subr.mxu0 %v9670_v35  ;;  %2871 = vmatprep.subr.mxu1 %v9676_v36  ;;  %11913 = vst [vmem:[#allocation114_spill] sm:$0xff] %v9682_v26  ;;  %11914 = vst [vmem:[#allocation115_spill] sm:$0xff] %v9688_v12  ;;  %v9694_v35 = vld [vmem:[%s10235_s4 + $0x308] sm:$0xff]  ;;  %v9700_v36 = vld [vmem:[%s10235_s4 + $0x318] sm:$0xff] }
 0x6fd   :  { %2801 = vmatpush2.msra.mxu0 %v9682_v26  ;;  %2872 = vmatpush2.msra.mxu1 %v9688_v12  ;;  %11915 = vst [vmem:[#allocation116_spill] sm:$0xff] %v9694_v35  ;;  %11916 = vst [vmem:[#allocation117_spill] sm:$0xff] %v9700_v36  ;;  %v9706_v26 = vld [vmem:[%s10235_s4 + $0x300] sm:$0xff]  ;;  %v9712_v12 = vld [vmem:[%s10235_s4 + $0x310] sm:$0xff] }
 0x6fe   :  { %2802 = vmatprep.subr.mxu0 %v9694_v35  ;;  %2873 = vmatprep.subr.mxu1 %v9700_v36  ;;  %11917 = vst [vmem:[#allocation118_spill] sm:$0xff] %v9706_v26  ;;  %11918 = vst [vmem:[#allocation119_spill] sm:$0xff] %v9712_v12  ;;  %v9718_v35 = vld [vmem:[%s10235_s4 + $0x2e8] sm:$0xff]  ;;  %v9724_v36 = vld [vmem:[%s10235_s4 + $0x2f8] sm:$0xff] }
 0x6ff   :  { %2803 = vmatpush2.msra.mxu0 %v9706_v26  ;;  %2874 = vmatpush2.msra.mxu1 %v9712_v12  ;;  %11919 = vst [vmem:[#allocation120_spill] sm:$0xff] %v9718_v35  ;;  %11920 = vst [vmem:[#allocation121_spill] sm:$0xff] %v9724_v36  ;;  %v9730_v26 = vld [vmem:[%s10235_s4 + $0x2e0] sm:$0xff]  ;;  %v9736_v12 = vld [vmem:[%s10235_s4 + $0x2f0] sm:$0xff] }
 0x700   :  { %2804 = vmatprep.subr.mxu0 %v9718_v35  ;;  %2875 = vmatprep.subr.mxu1 %v9724_v36  ;;  %11921 = vst [vmem:[#allocation122_spill] sm:$0xff] %v9730_v26  ;;  %11922 = vst [vmem:[#allocation123_spill] sm:$0xff] %v9736_v12  ;;  %v9742_v35 = vld [vmem:[%s10235_s4 + $0x2c8] sm:$0xff]  ;;  %v9748_v36 = vld [vmem:[%s10235_s4 + $0x2d8] sm:$0xff] }
 0x701   :  { %2805 = vmatpush2.msra.mxu0 %v9730_v26  ;;  %2876 = vmatpush2.msra.mxu1 %v9736_v12  ;;  %11923 = vst [vmem:[#allocation124_spill] sm:$0xff] %v9742_v35  ;;  %11924 = vst [vmem:[#allocation125_spill] sm:$0xff] %v9748_v36  ;;  %v9754_v26 = vld [vmem:[%s10235_s4 + $0x2c0] sm:$0xff]  ;;  %v9760_v12 = vld [vmem:[%s10235_s4 + $0x2d0] sm:$0xff] }
 0x702   :  { %2806 = vmatprep.subr.mxu0 %v9742_v35  ;;  %2877 = vmatprep.subr.mxu1 %v9748_v36  ;;  %11925 = vst [vmem:[#allocation126_spill] sm:$0xff] %v9754_v26  ;;  %11926 = vst [vmem:[#allocation127_spill] sm:$0xff] %v9760_v12  ;;  %v9766_v35 = vld [vmem:[%s10235_s4 + $0x2a8] sm:$0xff]  ;;  %v9772_v36 = vld [vmem:[%s10235_s4 + $0x2b8] sm:$0xff] }
 0x703   :  { %2807 = vmatpush2.msra.mxu0 %v9754_v26  ;;  %2878 = vmatpush2.msra.mxu1 %v9760_v12  ;;  %11927 = vst [vmem:[#allocation128_spill] sm:$0xff] %v9766_v35  ;;  %11928 = vst [vmem:[#allocation129_spill] sm:$0xff] %v9772_v36  ;;  %v9778_v26 = vld [vmem:[%s10235_s4 + $0x2a0] sm:$0xff]  ;;  %v9784_v12 = vld [vmem:[%s10235_s4 + $0x2b0] sm:$0xff] }
 0x704   :  { %2808 = vmatprep.subr.mxu0 %v9766_v35  ;;  %2879 = vmatprep.subr.mxu1 %v9772_v36  ;;  %11929 = vst [vmem:[#allocation130_spill] sm:$0xff] %v9778_v26  ;;  %11930 = vst [vmem:[#allocation131_spill] sm:$0xff] %v9784_v12  ;;  %v9790_v35 = vld [vmem:[%s10235_s4 + $0x288] sm:$0xff]  ;;  %v9796_v36 = vld [vmem:[%s10235_s4 + $0x298] sm:$0xff] }
 0x705   :  { %2809 = vmatpush2.msra.mxu0 %v9778_v26  ;;  %2880 = vmatpush2.msra.mxu1 %v9784_v12  ;;  %11931 = vst [vmem:[#allocation132_spill] sm:$0xff] %v9790_v35  ;;  %11932 = vst [vmem:[#allocation133_spill] sm:$0xff] %v9796_v36  ;;  %v9802_v26 = vld [vmem:[%s10235_s4 + $0x280] sm:$0xff]  ;;  %v9808_v12 = vld [vmem:[%s10235_s4 + $0x290] sm:$0xff] }
 0x706   :  { %2810 = vmatprep.subr.mxu0 %v9790_v35  ;;  %2881 = vmatprep.subr.mxu1 %v9796_v36  ;;  %11933 = vst [vmem:[#allocation134_spill] sm:$0xff] %v9802_v26  ;;  %11934 = vst [vmem:[#allocation135_spill] sm:$0xff] %v9808_v12  ;;  %v9814_v35 = vld [vmem:[%s10235_s4 + $0x268] sm:$0xff]  ;;  %v9820_v36 = vld [vmem:[%s10235_s4 + $0x278] sm:$0xff] }
 0x707   :  { %2811 = vmatpush2.msra.mxu0 %v9802_v26  ;;  %2882 = vmatpush2.msra.mxu1 %v9808_v12  ;;  %11935 = vst [vmem:[#allocation136_spill] sm:$0xff] %v9814_v35  ;;  %11936 = vst [vmem:[#allocation137_spill] sm:$0xff] %v9820_v36  ;;  %v9826_v26 = vld [vmem:[%s10235_s4 + $0x260] sm:$0xff]  ;;  %v9832_v12 = vld [vmem:[%s10235_s4 + $0x270] sm:$0xff] }
 0x708   :  { %2812 = vmatprep.subr.mxu0 %v9814_v35  ;;  %2883 = vmatprep.subr.mxu1 %v9820_v36  ;;  %11937 = vst [vmem:[#allocation138_spill] sm:$0xff] %v9826_v26  ;;  %11938 = vst [vmem:[#allocation139_spill] sm:$0xff] %v9832_v12  ;;  %v9838_v35 = vld [vmem:[%s10235_s4 + $0x248] sm:$0xff]  ;;  %v9844_v36 = vld [vmem:[%s10235_s4 + $0x258] sm:$0xff] }
 0x709   :  { %2813 = vmatpush2.msra.mxu0 %v9826_v26  ;;  %2884 = vmatpush2.msra.mxu1 %v9832_v12  ;;  %11939 = vst [vmem:[#allocation140_spill] sm:$0xff] %v9838_v35  ;;  %11940 = vst [vmem:[#allocation141_spill] sm:$0xff] %v9844_v36  ;;  %v9850_v26 = vld [vmem:[%s10235_s4 + $0x240] sm:$0xff]  ;;  %v9856_v12 = vld [vmem:[%s10235_s4 + $0x250] sm:$0xff] }
 0x70a   :  { %2814 = vmatprep.subr.mxu0 %v9838_v35  ;;  %2885 = vmatprep.subr.mxu1 %v9844_v36  ;;  %11941 = vst [vmem:[#allocation142_spill] sm:$0xff] %v9850_v26  ;;  %11942 = vst [vmem:[#allocation143_spill] sm:$0xff] %v9856_v12  ;;  %v9862_v35 = vld [vmem:[%s10235_s4 + $0x228] sm:$0xff]  ;;  %v9868_v36 = vld [vmem:[%s10235_s4 + $0x238] sm:$0xff] }
 0x70b   :  { %2815 = vmatpush2.msra.mxu0 %v9850_v26  ;;  %2886 = vmatpush2.msra.mxu1 %v9856_v12  ;;  %11943 = vst [vmem:[#allocation144_spill] sm:$0xff] %v9862_v35  ;;  %11944 = vst [vmem:[#allocation145_spill] sm:$0xff] %v9868_v36  ;;  %v9874_v26 = vld [vmem:[%s10235_s4 + $0x220] sm:$0xff]  ;;  %v9880_v12 = vld [vmem:[%s10235_s4 + $0x230] sm:$0xff] }
 0x70c   :  { %2816 = vmatprep.subr.mxu0 %v9862_v35  ;;  %2887 = vmatprep.subr.mxu1 %v9868_v36  ;;  %11945 = vst [vmem:[#allocation146_spill] sm:$0xff] %v9874_v26  ;;  %11946 = vst [vmem:[#allocation147_spill] sm:$0xff] %v9880_v12  ;;  %v9886_v35 = vld [vmem:[%s10235_s4 + $0x208] sm:$0xff]  ;;  %v9892_v36 = vld [vmem:[%s10235_s4 + $0x218] sm:$0xff] }
 0x70d   :  { %2817 = vmatpush2.msra.mxu0 %v9874_v26  ;;  %2888 = vmatpush2.msra.mxu1 %v9880_v12  ;;  %11947 = vst [vmem:[#allocation148_spill] sm:$0xff] %v9886_v35  ;;  %11948 = vst [vmem:[#allocation149_spill] sm:$0xff] %v9892_v36  ;;  %v9898_v26 = vld [vmem:[%s10235_s4 + $0x200] sm:$0xff]  ;;  %v9904_v12 = vld [vmem:[%s10235_s4 + $0x210] sm:$0xff] }
 0x70e   :  { %2818 = vmatprep.subr.mxu0 %v9886_v35  ;;  %2889 = vmatprep.subr.mxu1 %v9892_v36  ;;  %11949 = vst [vmem:[#allocation152_spill] sm:$0xff] %v9898_v26  ;;  %11950 = vst [vmem:[#allocation153_spill] sm:$0xff] %v9904_v12 }
 0x70f   :  { %2819 = vmatpush2.msra.mxu0 %v9898_v26  ;;  %2890 = vmatpush2.msra.mxu1 %v9904_v12 }
 0x710   :  { %2922 = vmatprep.subr.mxu0 %v8734_v25  ;;  %2993 = vmatprep.subr.mxu1 %v8740_v29 }
 0x76e   :  { %v2464_v35 = vpop.f32.mrf.mxu0  ;;  %v2535_v45 = vpop.f32.mrf.mxu1 }
 0x76f   :  { %v2465_v36 = vadd.f32 %v2464_v35, %v11795_v30  ;;  %v2536_v25 = vadd.f32 %v2535_v45, %v11798_v41 }
 0x770   :  { %v2466_v48 = vpop.f32.mrf.mxu0  ;;  %v2537_v24 = vpop.f32.mrf.mxu1 }
 0x771   :  { %v3508_v42 = vmul.f32 -1.442695, %v2465_v36  ;;  %v2467_v32 = vadd.f32 %v2466_v48, %v11796_v34  ;;  %v2538_v22 = vadd.f32 %v2537_v24, %v11797_v9 }
 0x773   :  { %3772 = vpow2.f32 %v3508_v42  ;;  %v3509_v26 = vmul.f32 -1.442695, %v2467_v32  ;;  %v3510_v14 = vmul.f32 -1.442695, %v2538_v22 }
 0x775   :  { %3774 = vpow2.f32 %v3509_v26 }
 0x776   :  { %3776 = vpow2.f32 %v3510_v14 }
 0x780   :  { %v3773_v12 = vpop.eup %3772 }
 0x781   :  { %v2543_v21 = vadd.f32 1.0, %v3773_v12 }
 0x782   :  { %v3775_v29 = vpop.eup %3774 }
 0x783   :  { %3778 = vrcp.f32 %v2543_v21  ;;  %v2549_v35 = vadd.f32 1.0, %v3775_v29  ;;  %v3777_v36 = vpop.eup %3776 }
 0x784   :  { %3780 = vtanh.f32 %v2536_v25  ;;  %v2556_v26 = vadd.f32 1.0, %v3777_v36 }
 0x785   :  { %3782 = vrcp.f32 %v2549_v35 }
 0x786   :  { %3784 = vrcp.f32 %v2556_v26 }
 0x78f   :  { %v2630_v48 = vpop.f32.mrf.mxu0  ;;  %v2701_v24 = vpop.f32.mrf.mxu1 }
 0x790   :  { %v3779_v34 = vpop.eup %3778  ;;  %v2710_v42 = vrot.slane %v2630_v48, 4 }
 0x791   :  { %v3781_v32 = vpop.eup %3780  ;;  %v2632_v30 = vpop.f32.mrf.mxu0 }
 0x792   :  { %v3783_v19 = vpop.eup %3782  ;;  %v2718_v22 = vadd.f32 %v2710_v42, %v11799_v47  ;;  %v2711_v9 = vrot.slane %v2632_v30, 4  ;;  %v2560_v45 = vmul.f32 %v3781_v32, %v3779_v34  ;;  %v2703_v35 = vpop.f32.mrf.mxu1  ;;  %v2712_v42 = vrot.slane %v2701_v24, 4 }
 0x793   :  { %v2559_v14 = vmul.f32 %v3783_v19, %v8750_v53  ;;  %v2713_v36 = vrot.slane %v2703_v35, 4  ;;  %v3785_v34 = vpop.eup %3784  ;;  %v2742_v35 = vrot.slane %v8756_v33, 6  ;;  %v11951_v33 = vld [vmem:[#allocation160_spill] sm:$0xff] }
 0x794   :  { %v3511_v12 = vmul.f32 -1.442695, %v2718_v22  ;;  %v2719_v21 = vadd.f32 %v2711_v9, %v11643_v40  ;;  %v2720_v53 = vadd.f32 %v2712_v42, %v11645_v58 }
 0x795   :  { %v9916_v25 = vadd.f32 %v2560_v45, %v2559_v14  ;;  %v2721_v48 = vadd.f32 %v2713_v36, %v11644_v61 }
 0x796   :  { %3786 = vpow2.f32 %v3511_v12  ;;  %v3512_v29 = vmul.f32 -1.442695, %v2719_v21 }
 0x797   :  { %3788 = vtanh.f32 %v9916_v25  ;;  %v3513_v30 = vmul.f32 -1.442695, %v2721_v48 }
 0x798   :  { %3790 = vpow2.f32 %v3512_v29 }
 0x799   :  { %3792 = vpow2.f32 %v3513_v30 }
 0x7a3   :  { %v3787_v32 = vpop.eup %3786 }
 0x7a4   :  { %v3789_v19 = vpop.eup %3788  ;;  %v2725_v9 = vadd.f32 1.0, %v3787_v32 }
 0x7a5   :  { %v3791_v26 = vpop.eup %3790  ;;  %v2563_v22 = vmul.f32 %v3789_v19, %v3785_v34 }
 0x7a6   :  { %3794 = vrcp.f32 %v2725_v9  ;;  %v2731_v45 = vadd.f32 1.0, %v3791_v26  ;;  %v3793_v21 = vpop.eup %3792  ;;  %v11991_v9 = vld [vmem:[#allocation40_spill] sm:$0xff]  ;;  %v11992_v26 = vld [vmem:[#allocation41_spill] sm:$0xff] }
 0x7a7   :  { %3796 = vtanh.f32 %v2720_v53  ;;  %v2750_v14 = vrot.slane %v2563_v22, 4  ;;  %v2738_v48 = vadd.f32 1.0, %v3793_v21  ;;  %v11993_v22 = vld [vmem:[#allocation42_spill] sm:$0xff] }
 0x7a8   :  { %3798 = vrcp.f32 %v2731_v45  ;;  %v11994_v45 = vld [vmem:[#allocation43_spill] sm:$0xff]  ;;  %v11997_v21 = vld [vmem:[#allocation46_spill] sm:$0xff] }
 0x7a9   :  { %v2753_v12 = vrot.slane %v2750_v14, 4  ;;  %3800 = vrcp.f32 %v2738_v48  ;;  %v11995_v14 = vld [vmem:[#allocation44_spill] sm:$0xff]  ;;  %v12002_v48 = vld [vmem:[#allocation51_spill] sm:$0xff] }
 0x7ab   :  { %2820 = vmatprep.mubr.f32.mxu0 %v2753_v12  ;;  %2891 = vmatprep.mubr.f32.mxu1 %v2753_v12  ;;  %v11996_v12 = vld [vmem:[#allocation45_spill] sm:$0xff] }
 0x7b3   :  { %v3795_v24 = vpop.eup %3794 }
 0x7b4   :  { %v3797_v29 = vpop.eup %3796 }
 0x7b5   :  { %v3799_v36 = vpop.eup %3798  ;;  %v2745_v42 = vmul.f32 %v3797_v29, %v3795_v24  ;;  %v11998_v24 = vld [vmem:[#allocation47_spill] sm:$0xff]  ;;  %v11999_v29 = vld [vmem:[#allocation48_spill] sm:$0xff] }
 0x7b6   :  { %v2744_v32 = vmul.f32 %v3799_v36, %v2742_v35  ;;  %v3801_v30 = vpop.eup %3800  ;;  %v12000_v35 = vld [vmem:[#allocation49_spill] sm:$0xff]  ;;  %v12001_v36 = vld [vmem:[#allocation50_spill] sm:$0xff] }
 0x7b8   :  { %v9922_v58 = vadd.f32 %v2745_v42, %v2744_v32  ;;  %v12003_v42 = vld [vmem:[#allocation52_spill] sm:$0xff]  ;;  %v12004_v32 = vld [vmem:[#allocation53_spill] sm:$0xff] }
 0x7ba   :  { %3802 = vtanh.f32 %v9922_v58 }
 0x7c7   :  { %v3803_v34 = vpop.eup %3802 }
 0x7c8   :  { %v2748_v53 = vmul.f32 %v3803_v34, %v3801_v30  ;;  %v12005_v30 = vld [vmem:[#allocation54_spill] sm:$0xff]  ;;  %v12006_v34 = vld [vmem:[#allocation55_spill] sm:$0xff] }
 0x7ca   :  { %v9925_v19 = vrot.slane %v2748_v53, 4  ;;  %v12007_v53 = vld [vmem:[#allocation56_spill] sm:$0xff] }
 0x7cc   :  { %2821 = vmatmul.mubr.f32.vlgmr.msra.gmra.mxu0 %v9925_v19  ;;  %2892 = vmatmul.mubr.f32.vlgmr.msra.gmra.mxu1 %v9925_v19 }
 0x7cd   :  { %2923 = vmatpush1.msra.mxu0 %v8766_v43  ;;  %2994 = vmatpush1.msra.mxu1 %v8772_v23  ;;  %v11952_v43 = vld [vmem:[#allocation161_spill] sm:$0xff]  ;;  %v11953_v23 = vld [vmem:[#allocation162_spill] sm:$0xff] }
 0x7ce   :  { %2924 = vmatprep.subr.mxu0 %v8778_v37  ;;  %2995 = vmatprep.subr.mxu1 %v8784_v0  ;;  %v11954_v37 = vld [vmem:[#allocation156_spill] sm:$0xff]  ;;  %v11955_v0 = vld [vmem:[#allocation151_spill] sm:$0xff] }
 0x7cf   :  { %2925 = vmatpush1.msra.mxu0 %v8790_v44  ;;  %2996 = vmatpush1.msra.mxu1 %v8796_v57  ;;  %v11956_v44 = vld [vmem:[#allocation155_spill] sm:$0xff]  ;;  %v11957_v57 = vld [vmem:[#allocation14_spill] sm:$0xff] }
 0x7d0   :  { %2926 = vmatprep.subr.mxu0 %v8802_v39  ;;  %2997 = vmatprep.subr.mxu1 %v8808_v50  ;;  %v11958_v39 = vld [vmem:[#allocation5_spill] sm:$0xff]  ;;  %v11959_v50 = vld [vmem:[#allocation15_spill] sm:$0xff] }
 0x7d1   :  { %2927 = vmatpush1.msra.mxu0 %v8814_v38  ;;  %2998 = vmatpush1.msra.mxu1 %v8820_v27  ;;  %v11960_v38 = vld [vmem:[#allocation6_spill] sm:$0xff]  ;;  %v11961_v27 = vld [vmem:[#allocation16_spill] sm:$0xff] }
 0x7d2   :  { %2928 = vmatprep.subr.mxu0 %v8826_v46  ;;  %2999 = vmatprep.subr.mxu1 %v8832_v60  ;;  %v11962_v46 = vld [vmem:[#allocation7_spill] sm:$0xff]  ;;  %v11963_v60 = vld [vmem:[#allocation17_spill] sm:$0xff] }
 0x7d3   :  { %2929 = vmatpush1.msra.mxu0 %v8838_v59  ;;  %3000 = vmatpush1.msra.mxu1 %v8844_v3  ;;  %v11964_v59 = vld [vmem:[#allocation8_spill] sm:$0xff]  ;;  %v11965_v3 = vld [vmem:[#allocation18_spill] sm:$0xff] }
 0x7d4   :  { %2930 = vmatprep.subr.mxu0 %v8850_v2  ;;  %3001 = vmatprep.subr.mxu1 %v8856_v63  ;;  %v11966_v2 = vld [vmem:[#allocation9_spill] sm:$0xff]  ;;  %v11967_v63 = vld [vmem:[#allocation19_spill] sm:$0xff] }
 0x7d5   :  { %2931 = vmatpush1.msra.mxu0 %v8862_v54  ;;  %3002 = vmatpush1.msra.mxu1 %v8868_v31  ;;  %v11968_v54 = vld [vmem:[#allocation10_spill] sm:$0xff]  ;;  %v11969_v31 = vld [vmem:[#allocation20_spill] sm:$0xff] }
 0x7d6   :  { %2932 = vmatprep.subr.mxu0 %v8874_v1  ;;  %3003 = vmatprep.subr.mxu1 %v8880_v16  ;;  %v11970_v1 = vld [vmem:[#allocation11_spill] sm:$0xff]  ;;  %v11971_v16 = vld [vmem:[#allocation21_spill] sm:$0xff] }
 0x7d7   :  { %2933 = vmatpush1.msra.mxu0 %v8886_v51  ;;  %3004 = vmatpush1.msra.mxu1 %v8892_v55  ;;  %v11972_v51 = vld [vmem:[#allocation22_spill] sm:$0xff]  ;;  %v11973_v55 = vmov 0.0  }
 0x7d8   :  { %2934 = vmatprep.subr.mxu0 %v8898_v28  ;;  %3005 = vmatprep.subr.mxu1 %v8904_v5  ;;  %v11974_v28 = vld [vmem:[#allocation23_spill] sm:$0xff]  ;;  %v11975_v5 = vld [vmem:[#allocation24_spill] sm:$0xff] }
 0x7d9   :  { %2935 = vmatpush1.msra.mxu0 %v8910_v13  ;;  %3006 = vmatpush1.msra.mxu1 %v8916_v15  ;;  %v11976_v13 = vld [vmem:[#allocation25_spill] sm:$0xff]  ;;  %v11977_v15 = vld [vmem:[#allocation26_spill] sm:$0xff] }
 0x7da   :  { %2936 = vmatprep.subr.mxu0 %v8922_v56  ;;  %3007 = vmatprep.subr.mxu1 %v8928_v18  ;;  %v11978_v56 = vld [vmem:[#allocation27_spill] sm:$0xff]  ;;  %v11979_v18 = vld [vmem:[#allocation28_spill] sm:$0xff] }
 0x7db   :  { %2937 = vmatpush1.msra.mxu0 %v8934_v52  ;;  %3008 = vmatpush1.msra.mxu1 %v8940_v62  ;;  %v11980_v52 = vld [vmem:[#allocation29_spill] sm:$0xff]  ;;  %v11981_v62 = vld [vmem:[#allocation30_spill] sm:$0xff] }
 0x7dc   :  { %2938 = vmatprep.subr.mxu0 %v8946_v7  ;;  %3009 = vmatprep.subr.mxu1 %v8952_v49  ;;  %v11982_v7 = vld [vmem:[#allocation31_spill] sm:$0xff]  ;;  %v11983_v49 = vld [vmem:[#allocation32_spill] sm:$0xff] }
 0x7dd   :  { %2939 = vmatpush1.msra.mxu0 %v8958_v4  ;;  %3010 = vmatpush1.msra.mxu1 %v8964_v6  ;;  %v11984_v4 = vld [vmem:[#allocation33_spill] sm:$0xff]  ;;  %v11985_v6 = vld [vmem:[#allocation34_spill] sm:$0xff] }
 0x7de   :  { %2940 = vmatprep.subr.mxu0 %v8970_v8  ;;  %3011 = vmatprep.subr.mxu1 %v8976_v10  ;;  %v11986_v8 = vld [vmem:[#allocation35_spill] sm:$0xff]  ;;  %v11987_v10 = vld [vmem:[#allocation36_spill] sm:$0xff] }
 0x7df   :  { %2941 = vmatpush1.msra.mxu0 %v8982_v11  ;;  %3012 = vmatpush1.msra.mxu1 %v8988_v20  ;;  %v11988_v11 = vld [vmem:[#allocation37_spill] sm:$0xff]  ;;  %v11989_v20 = vld [vmem:[#allocation38_spill] sm:$0xff] }
 0x7e0   :  { %2942 = vmatprep.subr.mxu0 %v8994_v17  ;;  %3013 = vmatprep.subr.mxu1 %v11951_v33  ;;  %v11990_v17 = vld [vmem:[#allocation39_spill] sm:$0xff]  ;;  %v12009_v33 = vld [vmem:[#allocation58_spill] sm:$0xff] }
 0x7e1   :  { %2943 = vmatpush1.msra.mxu0 %v11952_v43  ;;  %3014 = vmatpush1.msra.mxu1 %v11953_v23  ;;  %v12010_v43 = vld [vmem:[#allocation59_spill] sm:$0xff]  ;;  %v12011_v23 = vld [vmem:[#allocation60_spill] sm:$0xff] }
 0x7e2   :  { %2944 = vmatprep.subr.mxu0 %v11954_v37  ;;  %3015 = vmatprep.subr.mxu1 %v11955_v0  ;;  %v12012_v37 = vld [vmem:[#allocation61_spill] sm:$0xff]  ;;  %v12013_v0 = vld [vmem:[#allocation62_spill] sm:$0xff] }
 0x7e3   :  { %2945 = vmatpush1.msra.mxu0 %v11956_v44  ;;  %3016 = vmatpush1.msra.mxu1 %v11957_v57  ;;  %v12014_v44 = vld [vmem:[#allocation63_spill] sm:$0xff]  ;;  %v12015_v57 = vld [vmem:[#allocation64_spill] sm:$0xff] }
 0x7e4   :  { %2946 = vmatprep.subr.mxu0 %v11958_v39  ;;  %3017 = vmatprep.subr.mxu1 %v11959_v50  ;;  %v12016_v39 = vld [vmem:[#allocation65_spill] sm:$0xff]  ;;  %v12017_v50 = vld [vmem:[#allocation66_spill] sm:$0xff] }
 0x7e5   :  { %2947 = vmatpush1.msra.mxu0 %v11960_v38  ;;  %3018 = vmatpush1.msra.mxu1 %v11961_v27  ;;  %v12018_v38 = vld [vmem:[#allocation67_spill] sm:$0xff]  ;;  %v12019_v27 = vld [vmem:[#allocation68_spill] sm:$0xff] }
 0x7e6   :  { %2948 = vmatprep.subr.mxu0 %v11962_v46  ;;  %3019 = vmatprep.subr.mxu1 %v11963_v60  ;;  %v12020_v46 = vld [vmem:[#allocation69_spill] sm:$0xff]  ;;  %v12021_v60 = vld [vmem:[#allocation70_spill] sm:$0xff] }
 0x7e7   :  { %2949 = vmatpush1.msra.mxu0 %v11964_v59  ;;  %3020 = vmatpush1.msra.mxu1 %v11965_v3  ;;  %v12022_v59 = vld [vmem:[#allocation71_spill] sm:$0xff]  ;;  %v12023_v3 = vld [vmem:[#allocation72_spill] sm:$0xff] }
 0x7e8   :  { %2950 = vmatprep.subr.mxu0 %v11966_v2  ;;  %3021 = vmatprep.subr.mxu1 %v11967_v63  ;;  %v12024_v2 = vld [vmem:[#allocation73_spill] sm:$0xff]  ;;  %v12025_v63 = vld [vmem:[#allocation74_spill] sm:$0xff] }
 0x7e9   :  { %2951 = vmatpush1.msra.mxu0 %v11968_v54  ;;  %3022 = vmatpush1.msra.mxu1 %v11969_v31  ;;  %v12026_v54 = vld [vmem:[#allocation75_spill] sm:$0xff]  ;;  %v12027_v31 = vld [vmem:[#allocation76_spill] sm:$0xff] }
 0x7ea   :  { %2952 = vmatprep.subr.mxu0 %v11970_v1  ;;  %3023 = vmatprep.subr.mxu1 %v11971_v16  ;;  %v12028_v1 = vld [vmem:[#allocation77_spill] sm:$0xff]  ;;  %v12029_v16 = vld [vmem:[#allocation78_spill] sm:$0xff] }
 0x7eb   :  { %2953 = vmatpush1.msra.mxu0 %v11972_v51  ;;  %2986 = vmatprep.mubr.f32.mxu0 %v11973_v55  ;;  %v12030_v51 = vld [vmem:[#allocation79_spill] sm:$0xff] }
 0x7ec   :  { %3024 = vmatpush1.msra.mxu1 %v11974_v28  ;;  %3057 = vmatprep.mubr.f32.mxu1 %v11973_v55  ;;  %v12031_v28 = vld [vmem:[#allocation80_spill] sm:$0xff] }
 0x7ed   :  { %2987 = vmatmul.mubr.f32.vlgmr.msra.gmra.mxu0 %v9925_v19  ;;  %3058 = vmatmul.mubr.f32.vlgmr.msra.gmra.mxu1 %v9925_v19  ;;  %v12008_v19 = vld [vmem:[#allocation57_spill] sm:$0xff] }
 0x7ee   :  { %3114 = vmatprep.subr.mxu0 %v11975_v5  ;;  %3185 = vmatprep.subr.mxu1 %v11976_v13  ;;  %v12032_v5 = vld [vmem:[#allocation81_spill] sm:$0xff]  ;;  %v12033_v13 = vld [vmem:[#allocation82_spill] sm:$0xff] }
 0x7ef   :  { %3115 = vmatpush1.msra.mxu0 %v11977_v15  ;;  %3186 = vmatpush1.msra.mxu1 %v11978_v56  ;;  %v12034_v15 = vld [vmem:[#allocation83_spill] sm:$0xff]  ;;  %v12035_v56 = vld [vmem:[#allocation84_spill] sm:$0xff] }
 0x7f0   :  { %3116 = vmatprep.subr.mxu0 %v11979_v18  ;;  %3187 = vmatprep.subr.mxu1 %v11980_v52  ;;  %v12036_v18 = vld [vmem:[#allocation85_spill] sm:$0xff]  ;;  %v12037_v52 = vld [vmem:[#allocation86_spill] sm:$0xff] }
 0x7f1   :  { %3117 = vmatpush1.msra.mxu0 %v11981_v62  ;;  %3188 = vmatpush1.msra.mxu1 %v11982_v7  ;;  %v12038_v62 = vld [vmem:[#allocation87_spill] sm:$0xff]  ;;  %v12039_v7 = vld [vmem:[#allocation88_spill] sm:$0xff] }
 0x7f2   :  { %3118 = vmatprep.subr.mxu0 %v11983_v49  ;;  %3189 = vmatprep.subr.mxu1 %v11984_v4  ;;  %v12040_v49 = vld [vmem:[#allocation89_spill] sm:$0xff]  ;;  %v12041_v4 = vld [vmem:[#allocation90_spill] sm:$0xff] }
 0x7f3   :  { %3119 = vmatpush1.msra.mxu0 %v11985_v6  ;;  %3190 = vmatpush1.msra.mxu1 %v11986_v8  ;;  %v12042_v6 = vld [vmem:[#allocation91_spill] sm:$0xff]  ;;  %v12043_v8 = vld [vmem:[#allocation92_spill] sm:$0xff] }
 0x7f4   :  { %3120 = vmatprep.subr.mxu0 %v11987_v10  ;;  %3191 = vmatprep.subr.mxu1 %v11988_v11  ;;  %v12044_v10 = vld [vmem:[#allocation93_spill] sm:$0xff]  ;;  %v12045_v11 = vld [vmem:[#allocation94_spill] sm:$0xff] }
 0x7f5   :  { %3121 = vmatpush1.msra.mxu0 %v11989_v20  ;;  %3192 = vmatpush1.msra.mxu1 %v11990_v17  ;;  %v12046_v20 = vld [vmem:[#allocation95_spill] sm:$0xff]  ;;  %v12047_v17 = vld [vmem:[#allocation96_spill] sm:$0xff] }
 0x7f6   :  { %3122 = vmatprep.subr.mxu0 %v11991_v9  ;;  %3193 = vmatprep.subr.mxu1 %v11992_v26  ;;  %v12048_v9 = vld [vmem:[#allocation97_spill] sm:$0xff]  ;;  %v12049_v26 = vld [vmem:[#allocation98_spill] sm:$0xff] }
 0x7f7   :  { %3123 = vmatpush1.msra.mxu0 %v11993_v22  ;;  %3194 = vmatpush1.msra.mxu1 %v11994_v45  ;;  %v12050_v22 = vld [vmem:[#allocation99_spill] sm:$0xff]  ;;  %v12051_v45 = vld [vmem:[#allocation100_spill] sm:$0xff] }
 0x7f8   :  { %3124 = vmatprep.subr.mxu0 %v11995_v14  ;;  %3195 = vmatprep.subr.mxu1 %v11996_v12  ;;  %v12052_v14 = vld [vmem:[#allocation101_spill] sm:$0xff]  ;;  %v12053_v12 = vld [vmem:[#allocation102_spill] sm:$0xff] }
 0x7f9   :  { %3125 = vmatpush1.msra.mxu0 %v11997_v21  ;;  %3196 = vmatpush1.msra.mxu1 %v11998_v24  ;;  %v12054_v21 = vld [vmem:[#allocation103_spill] sm:$0xff]  ;;  %v12055_v24 = vld [vmem:[#allocation104_spill] sm:$0xff] }
 0x7fa   :  { %3126 = vmatprep.subr.mxu0 %v11999_v29  ;;  %3197 = vmatprep.subr.mxu1 %v12000_v35  ;;  %v12056_v29 = vld [vmem:[#allocation105_spill] sm:$0xff]  ;;  %v12057_v35 = vld [vmem:[#allocation106_spill] sm:$0xff] }
 0x7fb   :  { %3127 = vmatpush1.msra.mxu0 %v12001_v36  ;;  %3198 = vmatpush1.msra.mxu1 %v12002_v48  ;;  %v12058_v36 = vld [vmem:[#allocation107_spill] sm:$0xff]  ;;  %v12059_v48 = vld [vmem:[#allocation108_spill] sm:$0xff] }
 0x7fc   :  { %3128 = vmatprep.subr.mxu0 %v12003_v42  ;;  %3199 = vmatprep.subr.mxu1 %v12004_v32  ;;  %v12060_v42 = vld [vmem:[#allocation109_spill] sm:$0xff]  ;;  %v12061_v32 = vld [vmem:[#allocation110_spill] sm:$0xff] }
 0x7fd   :  { %3129 = vmatpush1.msra.mxu0 %v12005_v30  ;;  %3200 = vmatpush1.msra.mxu1 %v12006_v34  ;;  %v12062_v30 = vld [vmem:[#allocation111_spill] sm:$0xff]  ;;  %v12063_v34 = vld [vmem:[#allocation112_spill] sm:$0xff] }
 0x7fe   :  { %3130 = vmatprep.subr.mxu0 %v12007_v53  ;;  %3201 = vmatprep.subr.mxu1 %v12008_v19  ;;  %v12064_v53 = vld [vmem:[#allocation113_spill] sm:$0xff]  ;;  %v12065_v19 = vld [vmem:[#allocation114_spill] sm:$0xff] }
 0x7ff   :  { %3131 = vmatpush1.msra.mxu0 %v12009_v33  ;;  %3202 = vmatpush1.msra.mxu1 %v12010_v43  ;;  %v12066_v33 = vld [vmem:[#allocation115_spill] sm:$0xff]  ;;  %v12067_v43 = vld [vmem:[#allocation116_spill] sm:$0xff] }
 0x800   :  { %3132 = vmatprep.subr.mxu0 %v12011_v23  ;;  %3203 = vmatprep.subr.mxu1 %v12012_v37  ;;  %v12068_v23 = vld [vmem:[#allocation117_spill] sm:$0xff]  ;;  %v12069_v37 = vld [vmem:[#allocation118_spill] sm:$0xff] }
 0x801   :  { %3133 = vmatpush1.msra.mxu0 %v12013_v0  ;;  %3204 = vmatpush1.msra.mxu1 %v12014_v44  ;;  %v12070_v0 = vld [vmem:[#allocation119_spill] sm:$0xff]  ;;  %v12071_v44 = vld [vmem:[#allocation120_spill] sm:$0xff] }
 0x802   :  { %3134 = vmatprep.subr.mxu0 %v12015_v57  ;;  %3205 = vmatprep.subr.mxu1 %v12016_v39  ;;  %v12072_v57 = vld [vmem:[#allocation121_spill] sm:$0xff]  ;;  %v12073_v39 = vld [vmem:[#allocation122_spill] sm:$0xff] }
 0x803   :  { %3135 = vmatpush1.msra.mxu0 %v12017_v50  ;;  %3206 = vmatpush1.msra.mxu1 %v12018_v38  ;;  %v12074_v50 = vld [vmem:[#allocation123_spill] sm:$0xff]  ;;  %v12075_v38 = vld [vmem:[#allocation124_spill] sm:$0xff] }
 0x804   :  { %3136 = vmatprep.subr.mxu0 %v12019_v27  ;;  %3207 = vmatprep.subr.mxu1 %v12020_v46  ;;  %v12076_v27 = vld [vmem:[#allocation125_spill] sm:$0xff]  ;;  %v12077_v46 = vld [vmem:[#allocation126_spill] sm:$0xff] }
 0x805   :  { %3137 = vmatpush1.msra.mxu0 %v12021_v60  ;;  %3208 = vmatpush1.msra.mxu1 %v12022_v59  ;;  %v12078_v60 = vld [vmem:[#allocation127_spill] sm:$0xff]  ;;  %v12079_v59 = vld [vmem:[#allocation128_spill] sm:$0xff] }
 0x806   :  { %3138 = vmatprep.subr.mxu0 %v12023_v3  ;;  %3209 = vmatprep.subr.mxu1 %v12024_v2  ;;  %v12080_v3 = vld [vmem:[#allocation129_spill] sm:$0xff]  ;;  %v12081_v2 = vld [vmem:[#allocation130_spill] sm:$0xff] }
 0x807   :  { %3139 = vmatpush1.msra.mxu0 %v12025_v63  ;;  %3210 = vmatpush1.msra.mxu1 %v12026_v54  ;;  %v12082_v63 = vld [vmem:[#allocation131_spill] sm:$0xff]  ;;  %v12083_v54 = vld [vmem:[#allocation132_spill] sm:$0xff] }
 0x808   :  { %3140 = vmatprep.subr.mxu0 %v12027_v31  ;;  %3211 = vmatprep.subr.mxu1 %v12028_v1  ;;  %v12084_v31 = vld [vmem:[#allocation133_spill] sm:$0xff]  ;;  %v12085_v1 = vld [vmem:[#allocation134_spill] sm:$0xff] }
 0x809   :  { %3141 = vmatpush1.msra.mxu0 %v12029_v16  ;;  %3212 = vmatpush1.msra.mxu1 %v12030_v51  ;;  %v12086_v16 = vld [vmem:[#allocation135_spill] sm:$0xff]  ;;  %v12087_v51 = vld [vmem:[#allocation136_spill] sm:$0xff] }
 0x80a   :  { %3142 = vmatprep.subr.mxu0 %v12031_v28  ;;  %3213 = vmatprep.subr.mxu1 %v12032_v5  ;;  %v12088_v28 = vld [vmem:[#allocation137_spill] sm:$0xff]  ;;  %v12089_v5 = vld [vmem:[#allocation138_spill] sm:$0xff] }
 0x80b   :  { %3143 = vmatpush1.msra.mxu0 %v12033_v13  ;;  %3214 = vmatpush1.msra.mxu1 %v12034_v15  ;;  %v12090_v13 = vld [vmem:[#allocation139_spill] sm:$0xff]  ;;  %v12091_v15 = vld [vmem:[#allocation140_spill] sm:$0xff] }
 0x80c   :  { %3144 = vmatprep.subr.mxu0 %v12035_v56  ;;  %3215 = vmatprep.subr.mxu1 %v12036_v18  ;;  %v12092_v56 = vld [vmem:[#allocation141_spill] sm:$0xff]  ;;  %v12093_v18 = vld [vmem:[#allocation142_spill] sm:$0xff] }
 0x80d   :  { %3145 = vmatpush1.msra.mxu0 %v12037_v52  ;;  %3216 = vmatpush1.msra.mxu1 %v12038_v62  ;;  %v12094_v52 = vld [vmem:[#allocation143_spill] sm:$0xff]  ;;  %v12095_v62 = vld [vmem:[#allocation144_spill] sm:$0xff] }
 0x80e   :  { %3146 = vmatprep.subr.mxu0 %v12039_v7  ;;  %3217 = vmatprep.subr.mxu1 %v12040_v49  ;;  %v12096_v7 = vld [vmem:[#allocation145_spill] sm:$0xff]  ;;  %v12097_v49 = vld [vmem:[#allocation146_spill] sm:$0xff] }
 0x80f   :  { %3147 = vmatpush2.msra.mxu0 %v12041_v4  ;;  %3218 = vmatpush2.msra.mxu1 %v12042_v6  ;;  %v12098_v4 = vld [vmem:[#allocation147_spill] sm:$0xff]  ;;  %v12099_v6 = vld [vmem:[#allocation148_spill] sm:$0xff] }
 0x810   :  { %3148 = vmatprep.subr.mxu0 %v12043_v8  ;;  %3219 = vmatprep.subr.mxu1 %v12044_v10  ;;  %v12100_v8 = vld [vmem:[#allocation149_spill] sm:$0xff]  ;;  %v12101_v10 = vld [vmem:[#allocation152_spill] sm:$0xff] }
 0x811   :  { %3149 = vmatpush2.msra.mxu0 %v12045_v11  ;;  %3220 = vmatpush2.msra.mxu1 %v12046_v20  ;;  %v12102_v11 = vld [vmem:[#allocation153_spill] sm:$0xff] }
 0x812   :  { %3150 = vmatprep.subr.mxu0 %v12047_v17  ;;  %3221 = vmatprep.subr.mxu1 %v12048_v9  ;;  %v12103_v17 = vld [vmem:[#allocation12_spill] sm:$0xff] }
 0x813   :  { %3151 = vmatpush2.msra.mxu0 %v12049_v26  ;;  %3222 = vmatpush2.msra.mxu1 %v12050_v22 }
 0x814   :  { %3152 = vmatprep.subr.mxu0 %v12051_v45  ;;  %3223 = vmatprep.subr.mxu1 %v12052_v14  ;;  %v12104_v45 = vld [vmem:[#allocation3_spill] sm:$0xff] }
 0x815   :  { %3153 = vmatpush2.msra.mxu0 %v12053_v12  ;;  %3224 = vmatpush2.msra.mxu1 %v12054_v21 }
 0x816   :  { %3154 = vmatprep.subr.mxu0 %v12055_v24  ;;  %3225 = vmatprep.subr.mxu1 %v12056_v29  ;;  %v12105_v29 = vld [vmem:[#allocation13_spill] sm:$0xff] }
 0x817   :  { %3155 = vmatpush2.msra.mxu0 %v12057_v35  ;;  %3226 = vmatpush2.msra.mxu1 %v12058_v36 }
 0x818   :  { %3156 = vmatprep.subr.mxu0 %v12059_v48  ;;  %3227 = vmatprep.subr.mxu1 %v12060_v42 }
 0x819   :  { %3157 = vmatpush2.msra.mxu0 %v12061_v32  ;;  %3228 = vmatpush2.msra.mxu1 %v12062_v30 }
 0x81a   :  { %3158 = vmatprep.subr.mxu0 %v12063_v34  ;;  %3229 = vmatprep.subr.mxu1 %v12064_v53 }
 0x81b   :  { %3159 = vmatpush2.msra.mxu0 %v12065_v19  ;;  %3230 = vmatpush2.msra.mxu1 %v12066_v33 }
 0x81c   :  { %3160 = vmatprep.subr.mxu0 %v12067_v43  ;;  %3231 = vmatprep.subr.mxu1 %v12068_v23 }
 0x81d   :  { %3161 = vmatpush2.msra.mxu0 %v12069_v37  ;;  %3232 = vmatpush2.msra.mxu1 %v12070_v0 }
 0x81e   :  { %3162 = vmatprep.subr.mxu0 %v12071_v44  ;;  %3233 = vmatprep.subr.mxu1 %v12072_v57 }
 0x81f   :  { %3163 = vmatpush2.msra.mxu0 %v12073_v39  ;;  %3234 = vmatpush2.msra.mxu1 %v12074_v50 }
 0x820   :  { %3164 = vmatprep.subr.mxu0 %v12075_v38  ;;  %3235 = vmatprep.subr.mxu1 %v12076_v27 }
 0x821   :  { %3165 = vmatpush2.msra.mxu0 %v12077_v46  ;;  %3236 = vmatpush2.msra.mxu1 %v12078_v60 }
 0x822   :  { %3166 = vmatprep.subr.mxu0 %v12079_v59  ;;  %3237 = vmatprep.subr.mxu1 %v12080_v3 }
 0x823   :  { %3167 = vmatpush2.msra.mxu0 %v12081_v2  ;;  %3238 = vmatpush2.msra.mxu1 %v12082_v63 }
 0x824   :  { %3168 = vmatprep.subr.mxu0 %v12083_v54  ;;  %3239 = vmatprep.subr.mxu1 %v12084_v31 }
 0x825   :  { %3169 = vmatpush2.msra.mxu0 %v12085_v1  ;;  %3240 = vmatpush2.msra.mxu1 %v12086_v16 }
 0x826   :  { %3170 = vmatprep.subr.mxu0 %v12087_v51  ;;  %3241 = vmatprep.subr.mxu1 %v12088_v28 }
 0x827   :  { %3171 = vmatpush2.msra.mxu0 %v12089_v5  ;;  %3242 = vmatpush2.msra.mxu1 %v12090_v13 }
 0x828   :  { %3172 = vmatprep.subr.mxu0 %v12091_v15  ;;  %3243 = vmatprep.subr.mxu1 %v12092_v56 }
 0x829   :  { %3173 = vmatpush2.msra.mxu0 %v12093_v18  ;;  %3244 = vmatpush2.msra.mxu1 %v12094_v52 }
 0x82a   :  { %3174 = vmatprep.subr.mxu0 %v12095_v62  ;;  %3245 = vmatprep.subr.mxu1 %v12096_v7  ;;  %v3100_v7 = vrot.slane %v9922_v58, 6  ;;  %v3294_v58 = vld [vmem:[%s10238_s6 + $0x70] sm:$0xff] }
 0x82b   :  { %3175 = vmatpush2.msra.mxu0 %v12097_v49  ;;  %3246 = vmatpush2.msra.mxu1 %v12098_v4 }
 0x82c   :  { %3176 = vmatprep.subr.mxu0 %v12099_v6  ;;  %3247 = vmatprep.subr.mxu1 %v12100_v8 }
 0x82d   :  { %3177 = vmatpush2.msra.mxu0 %v12101_v10  ;;  %3248 = vmatpush2.msra.mxu1 %v12102_v11 }
 0x82e   :  { %3548 = vmatprep.subr.mxu0 %v11973_v55  ;;  %3583 = vmatprep.subr.mxu1 %v11973_v55 }
 0x88c   :  { %v2822_v20 = vpop.f32.mrf.mxu0  ;;  %v2893_v12 = vpop.f32.mrf.mxu1 }
 0x88d   :  { %v2823_v9 = vadd.f32 %v2822_v20, %v12103_v17  ;;  %v2894_v42 = vadd.f32 %v2893_v12, %v11798_v41  ;;  %v3292_v12 = vld [vmem:[%s10238_s6 + $0x60] sm:$0xff] }
 0x88e   :  { %v2824_v26 = vpop.f32.mrf.mxu0  ;;  %v2895_v24 = vpop.f32.mrf.mxu1 }
 0x88f   :  { %v3514_v22 = vmul.f32 -1.442695, %v2823_v9  ;;  %v2825_v14 = vadd.f32 %v2824_v26, %v12104_v45  ;;  %v2896_v35 = vadd.f32 %v2895_v24, %v12105_v29  ;;  %v3290_v24 = vld [vmem:[%s10238_s6 + $0x50] sm:$0xff] }
 0x891   :  { %3804 = vpow2.f32 %v3514_v22  ;;  %v3515_v21 = vmul.f32 -1.442695, %v2825_v14  ;;  %v3516_v36 = vmul.f32 -1.442695, %v2896_v35  ;;  %v3295_v22 = vld [vmem:[%s10238_s6 + $0x78] sm:$0xff]  ;;  %v3293_v14 = vld [vmem:[%s10238_s6 + $0x68] sm:$0xff] }
 0x892   :  { %v3289_v35 = vld [vmem:[%s10238_s6 + $0x48] sm:$0xff] }
 0x893   :  { %3806 = vpow2.f32 %v3515_v21  ;;  %v3291_v21 = vld [vmem:[%s10238_s6 + $0x58] sm:$0xff] }
 0x894   :  { %3808 = vpow2.f32 %v3516_v36  ;;  %v3288_v36 = vld [vmem:[%s10238_s6 + $0x40] sm:$0xff] }
 0x89e   :  { %v3805_v48 = vpop.eup %3804 }
 0x89f   :  { %v2901_v32 = vadd.f32 1.0, %v3805_v48  ;;  %v3287_v48 = vld [vmem:[%s10238_s6 + $0x38] sm:$0xff] }
 0x8a0   :  { %v3807_v30 = vpop.eup %3806 }
 0x8a1   :  { %3810 = vrcp.f32 %v2901_v32  ;;  %v2907_v34 = vadd.f32 1.0, %v3807_v30  ;;  %v3809_v53 = vpop.eup %3808  ;;  %v3285_v32 = vld [vmem:[%s10238_s6 + $0x28] sm:$0xff]  ;;  %v3284_v30 = vld [vmem:[%s10238_s6 + $0x20] sm:$0xff] }
 0x8a2   :  { %3812 = vtanh.f32 %v2894_v42  ;;  %v2914_v37 = vadd.f32 1.0, %v3809_v53  ;;  %v3286_v42 = vld [vmem:[%s10238_s6 + $0x30] sm:$0xff] }
 0x8a3   :  { %3814 = vrcp.f32 %v2907_v34  ;;  %v3283_v34 = vld [vmem:[%s10238_s6 + $0x18] sm:$0xff]  ;;  %v3282_v53 = vld [vmem:[%s10238_s6 + $0x10] sm:$0xff] }
 0x8a4   :  { %3816 = vrcp.f32 %v2914_v37 }
 0x8ad   :  { %v2988_v19 = vpop.f32.mrf.mxu0  ;;  %v3059_v39 = vpop.f32.mrf.mxu1 }
 0x8ae   :  { %v3811_v33 = vpop.eup %3810  ;;  %v3068_v43 = vrot.slane %v2988_v19, 2  ;;  %v3070_v54 = vrot.slane %v3059_v39, 2  ;;  %v3281_v19 = vld [vmem:[%s10238_s6 + $0x8] sm:$0xff] }
 0x8af   :  { %v3813_v23 = vpop.eup %3812  ;;  %v2990_v0 = vpop.f32.mrf.mxu0 }
 0x8b0   :  { %v3815_v44 = vpop.eup %3814  ;;  %v3076_v57 = vadd.f32 %v3068_v43, %v11799_v47  ;;  %v3069_v50 = vrot.slane %v2990_v0, 2  ;;  %v2918_v38 = vmul.f32 %v3813_v23, %v3811_v33  ;;  %v3061_v2 = vpop.f32.mrf.mxu1  ;;  %v3280_v33 = vld [vmem:[%s10238_s6] sm:$0xff]  ;;  %v3379_v43 = vld [vmem:[%s10239_s8 + $0x18] sm:$0xff] }
 0x8b1   :  { %v2917_v27 = vmul.f32 %v3815_v44, %v9916_v25  ;;  %v3071_v63 = vrot.slane %v3061_v2, 2  ;;  %v3817_v1 = vpop.eup %3816  ;;  %v12106_v25 = vld [vmem:[#allocation154_spill] sm:$0xff] }
 0x8b2   :  { %v3517_v46 = vmul.f32 -1.442695, %v3076_v57  ;;  %v3077_v60 = vadd.f32 %v3069_v50, %v11643_v40  ;;  %v3078_v51 = vadd.f32 %v3070_v54, %v12106_v25 }
 0x8b3   :  { %v10132_v59 = vadd.f32 %v2918_v38, %v2917_v27  ;;  %v3079_v47 = vadd.f32 %v3071_v63, %v11644_v61 }
 0x8b4   :  { %3818 = vpow2.f32 %v3517_v46  ;;  %v3518_v3 = vmul.f32 -1.442695, %v3077_v60 }
 0x8b5   :  { %3820 = vtanh.f32 %v10132_v59  ;;  %v3519_v31 = vmul.f32 -1.442695, %v3079_v47 }
 0x8b6   :  { %3822 = vpow2.f32 %v3518_v3 }
 0x8b7   :  { %3824 = vpow2.f32 %v3519_v31 }
 0x8c1   :  { %v3819_v16 = vpop.eup %3818 }
 0x8c2   :  { %v3821_v28 = vpop.eup %3820  ;;  %v3083_v40 = vadd.f32 1.0, %v3819_v16 }
 0x8c3   :  { %v3823_v5 = vpop.eup %3822  ;;  %v2921_v13 = vmul.f32 %v3821_v28, %v3817_v1 }
 0x8c4   :  { %3826 = vrcp.f32 %v3083_v40  ;;  %v3089_v15 = vadd.f32 1.0, %v3823_v5  ;;  %v3825_v61 = vpop.eup %3824  ;;  %v3378_v40 = vld [vmem:[%s10239_s8 + $0x10] sm:$0xff]  ;;  %v3377_v5 = vld [vmem:[%s10239_s8 + $0x8] sm:$0xff] }
 0x8c5   :  { %3828 = vtanh.f32 %v3078_v51  ;;  %v3108_v56 = vrot.slane %v2921_v13, 2  ;;  %v3096_v4 = vadd.f32 1.0, %v3825_v61  ;;  %v15_v13 = vstv %s10240_s9 }
 0x8c6   :  { %3830 = vrcp.f32 %v3089_v15  ;;  %16 = vst [vmem:[#allocation2] sm:$0x1] %v15_v13  ;;  %v3523_v15 = vld [vmem:[%s10241_s7] ss:$0 sm:$0xff] }
 0x8c7   :  { %v3111_v18 = vrot.slane %v3108_v56, 6  ;;  %3832 = vrcp.f32 %v3096_v4 }
 0x8c9   :  { %3178 = vmatprep.mubr.f32.mxu0 %v3111_v18  ;;  %3249 = vmatprep.mubr.f32.mxu1 %v3111_v18 }
 0x8d1   :  { %v3827_v52 = vpop.eup %3826 }
 0x8d2   :  { %v3829_v62 = vpop.eup %3828 }
 0x8d3   :  { %v3831_v49 = vpop.eup %3830  ;;  %v3103_v6 = vmul.f32 %v3829_v62, %v3827_v52  ;;  %v3524_v62 = vld [vmem:[#allocation2] ss:$0 sm:$0xff] }
 0x8d4   :  { %v3102_v8 = vmul.f32 %v3831_v49, %v3100_v7  ;;  %v3833_v11 = vpop.eup %3832 }
 0x8d6   :  { %v3104_v10 = vadd.f32 %v3103_v6, %v3102_v8 }
 0x8d8   :  { %3834 = vtanh.f32 %v3104_v10 }
 0x8e5   :  { %v3835_v20 = vpop.eup %3834 }
 0x8e6   :  { %v3106_v9 = vmul.f32 %v3835_v20, %v3833_v11 }
 0x8e8   :  { %v3110_v26 = vrot.slane %v3106_v9, 6 }
 0x8ea   :  { %3179 = vmatmul.mubr.f32.vlgmr.msra.gmra.mxu0 %v3110_v26  ;;  %3250 = vmatmul.mubr.f32.vlgmr.msra.gmra.mxu1 %v3110_v26 }
 0x8eb   :  { %3549 = vmatpush3.msra.mxu0 %v3295_v22  ;;  %3580 = vmatprep.mubr.msk.f32.mxu0 %vm4429_vm2, %v11973_v55 }
 0x8ec   :  { %3550 = vmatprep.subr.mxu0 %v11973_v55  ;;  %3591 = vmatprep.mubr.msk.f32.mxu1 %vm4429_vm2, %v11973_v55 }
 0x8ed   :  { %3551 = vmatpush3.msra.mxu0 %v3294_v58  ;;  %3584 = vmatpush3.msra.mxu1 %v3379_v43 }
 0x8ee   :  { %3552 = vmatprep.subr.mxu0 %v11973_v55  ;;  %3585 = vmatprep.subr.mxu1 %v11973_v55 }
 0x8ef   :  { %3553 = vmatpush3.msra.mxu0 %v3293_v14  ;;  %3586 = vmatpush3.msra.mxu1 %v3378_v40 }
 0x8f0   :  { %3554 = vmatprep.subr.mxu0 %v11973_v55  ;;  %3587 = vmatprep.subr.mxu1 %v11973_v55 }
 0x8f1   :  { %3555 = vmatpush3.msra.mxu0 %v3292_v12  ;;  %3588 = vmatpush3.msra.mxu1 %v3377_v5 }
 0x8f2   :  { %3556 = vmatprep.subr.mxu0 %v11973_v55  ;;  %3589 = vmatprep.subr.mxu1 %v11973_v55 }
 0x8f3   :  { %3557 = vmatpush3.msra.mxu0 %v3291_v21 }
 0x8f4   :  { %3558 = vmatprep.subr.mxu0 %v11973_v55 }
 0x8f5   :  { %3559 = vmatpush3.msra.mxu0 %v3290_v24 }
 0x8f6   :  { %3560 = vmatprep.subr.mxu0 %v11973_v55 }
 0x8f7   :  { %3561 = vmatpush3.msra.mxu0 %v3289_v35 }
 0x8f8   :  { %3562 = vmatprep.subr.mxu0 %v11973_v55 }
 0x8f9   :  { %3563 = vmatpush3.msra.mxu0 %v3288_v36 }
 0x8fa   :  { %3564 = vmatprep.subr.mxu0 %v11973_v55 }
 0x8fb   :  { %3565 = vmatpush3.msra.mxu0 %v3287_v48 }
 0x8fc   :  { %3566 = vmatprep.subr.mxu0 %v11973_v55 }
 0x8fd   :  { %3567 = vmatpush3.msra.mxu0 %v3286_v42 }
 0x8fe   :  { %3568 = vmatprep.subr.mxu0 %v11973_v55 }
 0x8ff   :  { %3569 = vmatpush3.msra.mxu0 %v3285_v32 }
 0x900   :  { %3570 = vmatprep.subr.mxu0 %v11973_v55 }
 0x901   :  { %3571 = vmatpush3.msra.mxu0 %v3284_v30 }
 0x902   :  { %3572 = vmatprep.subr.mxu0 %v11973_v55 }
 0x903   :  { %3573 = vmatpush3.msra.mxu0 %v3283_v34 }
 0x904   :  { %3574 = vmatprep.subr.mxu0 %v11973_v55 }
 0x905   :  { %3575 = vmatpush3.msra.mxu0 %v3282_v53 }
 0x906   :  { %3576 = vmatprep.subr.mxu0 %v11973_v55 }
 0x907   :  { %3577 = vmatpush3.msra.mxu0 %v3281_v19 }
 0x908   :  { %3578 = vmatprep.subr.mxu0 %v11973_v55 }
 0x909   :  { %3579 = vmatpush3.msra.mxu0 %v3280_v33 }
 0x9aa   :  { %v3180_v23 = vpop.f32.mrf.mxu0  ;;  %v3251_v39 = vpop.f32.mrf.mxu1 }
 0x9ab   :  { %v3181_v37 = vadd.f32 %v3180_v23, %v12103_v17  ;;  %v3252_v3 = vadd.f32 %v3251_v39, %v11798_v41 }
 0x9ac   :  { %v3182_v0 = vpop.f32.mrf.mxu0  ;;  %v3253_v38 = vpop.f32.mrf.mxu1 }
 0x9ad   :  { %v3520_v44 = vmul.f32 -1.442695, %v3181_v37  ;;  %v3183_v57 = vadd.f32 %v3182_v0, %v12104_v45  ;;  %v3254_v27 = vadd.f32 %v3253_v38, %v12105_v29 }
 0x9af   :  { %3836 = vpow2.f32 %v3520_v44  ;;  %v3521_v50 = vmul.f32 -1.442695, %v3183_v57  ;;  %v3522_v46 = vmul.f32 -1.442695, %v3254_v27 }
 0x9b1   :  { %3838 = vpow2.f32 %v3521_v50 }
 0x9b2   :  { %3840 = vpow2.f32 %v3522_v46 }
 0x9bc   :  { %v3837_v60 = vpop.eup %3836 }
 0x9bd   :  { %v3259_v2 = vadd.f32 1.0, %v3837_v60 }
 0x9be   :  { %v3839_v63 = vpop.eup %3838 }
 0x9bf   :  { %3842 = vrcp.f32 %v3259_v2  ;;  %v3265_v17 = vadd.f32 1.0, %v3839_v63  ;;  %v3841_v47 = vpop.eup %3840 }
 0x9c0   :  { %3844 = vtanh.f32 %v3252_v3  ;;  %v3272_v1 = vadd.f32 1.0, %v3841_v47 }
 0x9c1   :  { %3846 = vrcp.f32 %v3265_v17 }
 0x9c2   :  { %3848 = vrcp.f32 %v3272_v1 }
 0x9cc   :  { %v3843_v45 = vpop.eup %3842 }
 0x9cd   :  { %v3845_v54 = vpop.eup %3844 }
 0x9ce   :  { %v3847_v31 = vpop.eup %3846  ;;  %v3276_v16 = vmul.f32 %v3845_v54, %v3843_v45 }
 0x9cf   :  { %v3275_v25 = vmul.f32 %v3847_v31, %v10132_v59  ;;  %v3849_v51 = vpop.eup %3848  ;;  %v3376_v59 = vld [vmem:[%s10239_s8] sm:$0xff] }
 0x9d0   :  { %3590 = vmatpush3.msra.mxu1 %v3376_v59 }
 0x9d1   :  { %v3277_v29 = vadd.f32 %v3276_v16, %v3275_v25 }
 0x9d3   :  { %3850 = vtanh.f32 %v3277_v29 }
 0x9e0   :  { %v3851_v41 = vpop.eup %3850 }
 0x9e1   :  { %v3279_v28 = vmul.f32 %v3851_v41, %v3849_v51 }
 0x9e3   :  { %3581 = vmatmul.mubr.f32.vlgmr.msra.gmra.mxu0 %v3279_v28 }
 0xaa3   :  { %v3369_v56 = vpop.f32.mrf.mxu0 }
 0xaa4   :  { %v3370_v18 = vadd.f32 %v3523_v15, %v3369_v56 }
 0xaa5   :  { %v3582_v61 = vpop.f32.mrf.mxu0 }
 0xaa6   :  { %vm3373_vm3 = vcmp.gt.f32.partialorder %v3370_v18, 0.0  ;;  %v3374_v52 = vmul.f32 0.01, %v3370_v18 }
 0xaa8   :  { %v3375_v55 = vsel %vm3373_vm3, %v3370_v18, %v3374_v52 }
 0xaa9   :  { %3592 = vmatmul.mubr.msk.f32.vlgmr.msra.gmra.mxu1 %vm3387_vm4, %v3375_v55 }
 0xb69   :  { %v3457_v7 = vpop.f32.mrf.mxu1 }
 0xb6a   :  { %v3458_v49 = vadd.f32 %v3524_v62, %v3457_v7 }
 0xb6b   :  { %v3593_v4 = vpop.f32.mrf.mxu1 }
 0xb6c   :  { %3462 = vst.msk [vmem:[%s10242_s10] sm:$0x3] %vm3461_vm5, %v3458_v49 }

</bundles_post_ra>
